<compile_context>
chip_gen: v7x
topology: tpu7x:2x2x1
jax: 0.10.0
libtpu: 0.0.40
codegen_flags: <defaults>
</compile_context>

<pallas_src>
import functools

import jax
import jax.numpy as jnp
from jax.experimental import pallas as pl
from jax.experimental.pallas import tpu as pltpu

LATENT_N = 3            # latent_dim (N)
CAT_K = 20              # categorical_dim (K)
W_DIM = 2               # w_dim (torch.split(..., 2, dim=-1) => 2*W_DIM head)
IN_DIM = 784 * 3        # flattened image size
TEMP = 1.0
HARD = False
GUMBEL_EPS = 1e-10      # eps used by gumbel_softmax(..., eps=1e-10)
# TODO(synk): hard=True straight-through Gumbel path not implemented (module is
# run with hard=False).

_LAYERS = [
    ("fc1", IN_DIM, 512), ("fc2", 512, 256), ("fc3", 256, LATENT_N * CAT_K),
    ("fc4", LATENT_N * CAT_K, 256), ("fc5", 256, 512), ("fc6", 512, IN_DIM),
    ("ce1", IN_DIM, 512), ("ce2", 512, 2 * W_DIM),          # contEncoder
    ("cd1", W_DIM, 512), ("cd2", 512, IN_DIM),              # contDecoder
]
_LAYER_NAMES = [n for n, _, _ in _LAYERS]
_LAYER_DOUT = {n: d for n, _, d in _LAYERS}

# Packed-bias layout: each bias padded to a multiple of 128 lanes so every
# in-kernel bias slice starts on a lane boundary (no unaligned lane shuffles).
_BIAS_OFF = {}
_BIAS_TOTAL = 0
for _name, _din, _dout in _LAYERS:
    _BIAS_OFF[_name] = _BIAS_TOTAL
    _BIAS_TOTAL += _dout + ((-_dout) % 128)


def _full_spec(shape):
    """Single block == whole array (everything here fits comfortably in VMEM)."""
    return pl.BlockSpec(shape, lambda: tuple(0 for _ in shape))


# ----------------------------------------------------------------------------
# Fused forward kernel
# ----------------------------------------------------------------------------
def _both_vae_kernel(x_ref, u_ref, eps_ref,
                     fc1_ref, fc2_ref, fc3_ref, fc4_ref, fc5_ref, fc6_ref,
                     ce1_ref, ce2_ref, cd1_ref, cd2_ref, bias_ref,
                     recon_ref, qy_ref, cont_ref, *, temp):
    def lin(h, w_ref, name, act):
        dout = _LAYER_DOUT[name]
        off = _BIAS_OFF[name]
        # bf16 inputs on the MXU, f32 accumulation.
        y = jnp.dot(h.astype(jnp.bfloat16), w_ref[...],
                    preferred_element_type=jnp.float32)
        y = y + bias_ref[0:1, off:off + dout]
        if act == "relu":
            y = jnp.maximum(y, 0.0)
        elif act == "sigmoid":
            y = jax.nn.sigmoid(y)
        return y

    x = x_ref[...]                                    # (B, 2352) f32

    # ---- discrete (categorical) encoder: fc1 -> fc2 -> fc3 (all ReLU) ----
    h1 = lin(x, fc1_ref, "fc1", "relu")
    h2 = lin(h1, fc2_ref, "fc2", "relu")
    q = lin(h2, fc3_ref, "fc3", "relu")               # (B, N*K)

    # ---- gumbel-softmax (soft) + plain softmax, per categorical group of K ----
    u = u_ref[...]                                    # (B, N*K) uniform noise
    z_parts, qy_parts = [], []
    for n in range(LATENT_N):
        lo = n * CAT_K
        qn = q[:, lo:lo + CAT_K]                      # (B, K)
        un = u[:, lo:lo + CAT_K]
        g = -jnp.log(GUMBEL_EPS - jnp.log(un + GUMBEL_EPS))
        yv = (qn + g) / temp
        yv = yv - jnp.max(yv, axis=-1, keepdims=True)
        ez = jnp.exp(yv)
        z_parts.append(ez / jnp.sum(ez, axis=-1, keepdims=True))
        sv = qn - jnp.max(qn, axis=-1, keepdims=True)
        es = jnp.exp(sv)
        qy_parts.append(es / jnp.sum(es, axis=-1, keepdims=True))
    z = jnp.concatenate(z_parts, axis=-1)             # (B, N*K)
    qy_ref[...] = jnp.concatenate(qy_parts, axis=-1)  # softmax(q_y, -1)

    # ---- discrete decoder: fc4 -> fc5 (ReLU) -> fc6 (sigmoid) ----
    h4 = lin(z, fc4_ref, "fc4", "relu")
    h5 = lin(h4, fc5_ref, "fc5", "relu")
    recon_ref[...] = lin(h5, fc6_ref, "fc6", "sigmoid")

    # ---- continuous encoder (contEncoder) + reparametrization ----
    ch = lin(x, ce1_ref, "ce1", "relu")
    mv = lin(ch, ce2_ref, "ce2", "none")              # (B, 2*W_DIM)
    mu = mv[:, :W_DIM]
    log_var = mv[:, W_DIM:2 * W_DIM]
    # TODO(synk): self.kl (KL side-effect of contEncoder) is dead in forward's
    # return values and is intentionally not computed (perf-review request).
    w = mu + jnp.exp(0.5 * log_var) * eps_ref[...]    # (B, W_DIM)

    # ---- continuous decoder (contDecoder) ----
    dh = lin(w, cd1_ref, "cd1", "relu")
    cont_ref[...] = lin(dh, cd2_ref, "cd2", "sigmoid")


# ----------------------------------------------------------------------------
# Parameter init (PyTorch nn.Linear default U(-1/sqrt(fan_in), +)), weights
# cast to bf16 for storage; biases packed (f32) into one lane-aligned buffer.
# ----------------------------------------------------------------------------
def init_params(key):
    keys = jax.random.split(key, len(_LAYERS))
    weights = {}
    bias_chunks = []
    for k, (name, din, dout) in zip(keys, _LAYERS):
        kw, kb = jax.random.split(k)
        bound = 1.0 / (din ** 0.5)
        w = jax.random.uniform(kw, (din, dout), jnp.float32, -bound, bound)
        b = jax.random.uniform(kb, (dout,), jnp.float32, -bound, bound)
        weights[name] = w.astype(jnp.bfloat16)
        bias_chunks.append(jnp.pad(b, (0, (-dout) % 128)))
    bias_packed = jnp.concatenate(bias_chunks).reshape(1, _BIAS_TOTAL)
    return weights, bias_packed


# ----------------------------------------------------------------------------
# bothVAE.forward(x, temp, hard=False)
# returns: (decoder(z) [B, 2352],
#           softmax(q_y, -1).reshape(B*N, K),
#           cont_decoder(w) [B, 3, 28, 28])
# ----------------------------------------------------------------------------
@functools.partial(jax.jit, static_argnames=("temp",))
def both_vae_forward(weights, bias_packed, x, rng_key, *, temp):
    B = x.shape[0]
    xf = x.reshape(B, IN_DIM)
    k_gumbel, k_eps = jax.random.split(rng_key)
    u = jax.random.uniform(k_gumbel, (B, LATENT_N * CAT_K), dtype=jnp.float32)
    eps_noise = jax.random.normal(k_eps, (B, W_DIM), dtype=jnp.float32)

    in_arrays = ([xf, u, eps_noise]
                 + [weights[n] for n in _LAYER_NAMES]
                 + [bias_packed])
    out_shapes = (
        jax.ShapeDtypeStruct((B, IN_DIM), jnp.float32),             # recon
        jax.ShapeDtypeStruct((B, LATENT_N * CAT_K), jnp.float32),   # softmax(q_y)
        jax.ShapeDtypeStruct((B, IN_DIM), jnp.float32),             # cont recon
    )

    recon, qy, cont = pl.pallas_call(
        functools.partial(_both_vae_kernel, temp=float(temp)),
        out_shape=out_shapes,
        in_specs=[_full_spec(a.shape) for a in in_arrays],
        out_specs=tuple(_full_spec(s.shape) for s in out_shapes),
        compiler_params=pltpu.CompilerParams(
            vmem_limit_bytes=48 * 1024 * 1024),
    )(*in_arrays)

    qy_soft = qy.reshape(B * LATENT_N, CAT_K)
    cont_recon = cont.reshape(B, 3, 28, 28)
    return recon, qy_soft, cont_recon


if __name__ == "__main__":
    key = jax.random.PRNGKey(0)
    pkey, xkey, fkey = jax.random.split(key, 3)

    weights, bias_packed = init_params(pkey)
    x = jax.random.uniform(xkey, (2, 3, 28, 28), dtype=jnp.float32)  # NCHW

    recon, qy_soft, cont_recon = both_vae_forward(weights, bias_packed, x, fkey,
                                                  temp=TEMP)
    jax.block_until_ready((recon, qy_soft, cont_recon))

    assert recon.shape == (2, IN_DIM)
    assert qy_soft.shape == (2 * LATENT_N, CAT_K)
    assert cont_recon.shape == (2, 3, 28, 28)
    assert bool(jnp.all(jnp.isfinite(recon)))
    assert bool(jnp.all(jnp.isfinite(qy_soft)))
    assert bool(jnp.all(jnp.isfinite(cont_recon)))
    # sigmoid outputs must be in (0, 1); softmax rows must sum to ~1
    assert bool(jnp.all((recon >= 0.0) & (recon <= 1.0)))
    assert bool(jnp.all((cont_recon >= 0.0) & (cont_recon <= 1.0)))
    assert bool(jnp.allclose(jnp.sum(qy_soft, axis=-1), 1.0, atol=1e-4))

    print("KERNEL_OK")
</pallas_src>

<mosaic_0001>
module attributes {stable_mosaic.version = 11 : i64} {
  func.func @_both_vae_kernel(%arg0: memref<2x2352xf32, #tpu.memory_space<vmem>>, %arg1: memref<2x60xf32, #tpu.memory_space<vmem>>, %arg2: memref<2x2xf32, #tpu.memory_space<vmem>>, %arg3: memref<2352x512xbf16, #tpu.memory_space<vmem>>, %arg4: memref<512x256xbf16, #tpu.memory_space<vmem>>, %arg5: memref<256x60xbf16, #tpu.memory_space<vmem>>, %arg6: memref<60x256xbf16, #tpu.memory_space<vmem>>, %arg7: memref<256x512xbf16, #tpu.memory_space<vmem>>, %arg8: memref<512x2352xbf16, #tpu.memory_space<vmem>>, %arg9: memref<2352x512xbf16, #tpu.memory_space<vmem>>, %arg10: memref<512x4xbf16, #tpu.memory_space<vmem>>, %arg11: memref<2x512xbf16, #tpu.memory_space<vmem>>, %arg12: memref<512x2352xbf16, #tpu.memory_space<vmem>>, %arg13: memref<1x7680xf32, #tpu.memory_space<vmem>>, %arg14: memref<2x2352xf32, #tpu.memory_space<vmem>>, %arg15: memref<2x60xf32, #tpu.memory_space<vmem>>, %arg16: memref<2x2352xf32, #tpu.memory_space<vmem>>) attributes {dimension_semantics = [], scalar_prefetch = 0 : i64, scratch_operands = 0 : i64, tpu.core_type = #tpu.core_type<tc>} {
    %c0 = arith.constant 0 : index
    %c0_0 = arith.constant 0 : index
    %0 = vector.load %arg0[%c0, %c0_0] : memref<2x2352xf32, #tpu.memory_space<vmem>>, vector<2x2352xf32>
    %1 = arith.truncf %0 : vector<2x2352xf32> to vector<2x2352xbf16>
    %c0_1 = arith.constant 0 : index
    %c0_2 = arith.constant 0 : index
    %2 = vector.load %arg3[%c0_1, %c0_2] : memref<2352x512xbf16, #tpu.memory_space<vmem>>, vector<2352x512xbf16>
    %cst = arith.constant dense<0.000000e+00> : vector<2x512xf32>
    %3 = tpu.matmul %1, %2, %cst {dimension_numbers = #tpu.dot_dimension_numbers<[1], [0], [0], [1], [0, 0, 1, 1], [], []>} : vector<2x2352xbf16>, vector<2352x512xbf16>, vector<2x512xf32> -> vector<2x512xf32>
    %c0_3 = arith.constant 0 : index
    %c0_4 = arith.constant 0 : index
    %4 = vector.load %arg13[%c0_3, %c0_4] : memref<1x7680xf32, #tpu.memory_space<vmem>>, vector<1x512xf32>
    %5 = vector.broadcast %4 : vector<1x512xf32> to vector<2x512xf32>
    %6 = arith.addf %3, %5 : vector<2x512xf32>
    %cst_5 = arith.constant 0.000000e+00 : f32
    %7 = vector.broadcast %cst_5 : f32 to vector<2x512xf32>
    %8 = arith.maximumf %6, %7 : vector<2x512xf32>
    %9 = arith.truncf %8 : vector<2x512xf32> to vector<2x512xbf16>
    %c0_6 = arith.constant 0 : index
    %c0_7 = arith.constant 0 : index
    %10 = vector.load %arg4[%c0_6, %c0_7] : memref<512x256xbf16, #tpu.memory_space<vmem>>, vector<512x256xbf16>
    %cst_8 = arith.constant dense<0.000000e+00> : vector<2x256xf32>
    %11 = tpu.matmul %9, %10, %cst_8 {dimension_numbers = #tpu.dot_dimension_numbers<[1], [0], [0], [1], [0, 0, 1, 1], [], []>} : vector<2x512xbf16>, vector<512x256xbf16>, vector<2x256xf32> -> vector<2x256xf32>
    %c0_9 = arith.constant 0 : index
    %c512 = arith.constant 512 : index
    %12 = vector.load %arg13[%c0_9, %c512] : memref<1x7680xf32, #tpu.memory_space<vmem>>, vector<1x256xf32>
    %13 = vector.broadcast %12 : vector<1x256xf32> to vector<2x256xf32>
    %14 = arith.addf %11, %13 : vector<2x256xf32>
    %cst_10 = arith.constant 0.000000e+00 : f32
    %15 = vector.broadcast %cst_10 : f32 to vector<2x256xf32>
    %16 = arith.maximumf %14, %15 : vector<2x256xf32>
    %17 = arith.truncf %16 : vector<2x256xf32> to vector<2x256xbf16>
    %c0_11 = arith.constant 0 : index
    %c0_12 = arith.constant 0 : index
    %18 = vector.load %arg5[%c0_11, %c0_12] : memref<256x60xbf16, #tpu.memory_space<vmem>>, vector<256x60xbf16>
    %cst_13 = arith.constant dense<0.000000e+00> : vector<2x60xf32>
    %19 = tpu.matmul %17, %18, %cst_13 {dimension_numbers = #tpu.dot_dimension_numbers<[1], [0], [0], [1], [0, 0, 1, 1], [], []>} : vector<2x256xbf16>, vector<256x60xbf16>, vector<2x60xf32> -> vector<2x60xf32>
    %c0_14 = arith.constant 0 : index
    %c768 = arith.constant 768 : index
    %20 = vector.load %arg13[%c0_14, %c768] : memref<1x7680xf32, #tpu.memory_space<vmem>>, vector<1x60xf32>
    %21 = vector.broadcast %20 : vector<1x60xf32> to vector<2x60xf32>
    %22 = arith.addf %19, %21 : vector<2x60xf32>
    %cst_15 = arith.constant 0.000000e+00 : f32
    %23 = vector.broadcast %cst_15 : f32 to vector<2x60xf32>
    %24 = arith.maximumf %22, %23 : vector<2x60xf32>
    %c0_16 = arith.constant 0 : index
    %c0_17 = arith.constant 0 : index
    %25 = vector.load %arg1[%c0_16, %c0_17] : memref<2x60xf32, #tpu.memory_space<vmem>>, vector<2x60xf32>
    %26 = vector.extract_strided_slice %24 {offsets = [0, 0], sizes = [2, 20], strides = [1, 1]} : vector<2x60xf32> to vector<2x20xf32>
    %27 = vector.extract_strided_slice %25 {offsets = [0, 0], sizes = [2, 20], strides = [1, 1]} : vector<2x60xf32> to vector<2x20xf32>
    %cst_18 = arith.constant 1.000000e-10 : f32
    %28 = vector.broadcast %cst_18 : f32 to vector<2x20xf32>
    %29 = arith.addf %27, %28 : vector<2x20xf32>
    %30 = math.log %29 : vector<2x20xf32>
    %cst_19 = arith.constant 1.000000e-10 : f32
    %31 = vector.broadcast %cst_19 : f32 to vector<2x20xf32>
    %32 = arith.subf %31, %30 : vector<2x20xf32>
    %33 = math.log %32 : vector<2x20xf32>
    %cst_20 = arith.constant 0.000000e+00 : f32
    %34 = vector.broadcast %cst_20 : f32 to vector<2x20xf32>
    %35 = arith.subf %34, %33 : vector<2x20xf32>
    %36 = arith.addf %26, %35 : vector<2x20xf32>
    %cst_21 = arith.constant 1.000000e+00 : f32
    %37 = vector.broadcast %cst_21 : f32 to vector<2x20xf32>
    %38 = arith.divf %36, %37 : vector<2x20xf32>
    %cst_22 = arith.constant dense<0xFF800000> : vector<2xf32>
    %39 = vector.multi_reduction <maximumf>, %38, %cst_22 [1] : vector<2x20xf32> to vector<2xf32>
    %40 = vector.shape_cast %39 : vector<2xf32> to vector<2x1xf32>
    %41 = vector.broadcast %40 : vector<2x1xf32> to vector<2x20xf32>
    %42 = arith.subf %38, %41 : vector<2x20xf32>
    %43 = math.exp %42 : vector<2x20xf32>
    %cst_23 = arith.constant dense<0.000000e+00> : vector<2xf32>
    %44 = vector.multi_reduction <add>, %43, %cst_23 [1] : vector<2x20xf32> to vector<2xf32>
    %45 = vector.shape_cast %44 : vector<2xf32> to vector<2x1xf32>
    %46 = vector.broadcast %45 : vector<2x1xf32> to vector<2x20xf32>
    %47 = arith.divf %43, %46 : vector<2x20xf32>
    %cst_24 = arith.constant dense<0xFF800000> : vector<2xf32>
    %48 = vector.multi_reduction <maximumf>, %26, %cst_24 [1] : vector<2x20xf32> to vector<2xf32>
    %49 = vector.shape_cast %48 : vector<2xf32> to vector<2x1xf32>
    %50 = vector.broadcast %49 : vector<2x1xf32> to vector<2x20xf32>
    %51 = arith.subf %26, %50 : vector<2x20xf32>
    %52 = math.exp %51 : vector<2x20xf32>
    %cst_25 = arith.constant dense<0.000000e+00> : vector<2xf32>
    %53 = vector.multi_reduction <add>, %52, %cst_25 [1] : vector<2x20xf32> to vector<2xf32>
    %54 = vector.shape_cast %53 : vector<2xf32> to vector<2x1xf32>
    %55 = vector.broadcast %54 : vector<2x1xf32> to vector<2x20xf32>
    %56 = arith.divf %52, %55 : vector<2x20xf32>
    %57 = vector.extract_strided_slice %24 {offsets = [0, 20], sizes = [2, 20], strides = [1, 1]} : vector<2x60xf32> to vector<2x20xf32>
    %58 = vector.extract_strided_slice %25 {offsets = [0, 20], sizes = [2, 20], strides = [1, 1]} : vector<2x60xf32> to vector<2x20xf32>
    %cst_26 = arith.constant 1.000000e-10 : f32
    %59 = vector.broadcast %cst_26 : f32 to vector<2x20xf32>
    %60 = arith.addf %58, %59 : vector<2x20xf32>
    %61 = math.log %60 : vector<2x20xf32>
    %cst_27 = arith.constant 1.000000e-10 : f32
    %62 = vector.broadcast %cst_27 : f32 to vector<2x20xf32>
    %63 = arith.subf %62, %61 : vector<2x20xf32>
    %64 = math.log %63 : vector<2x20xf32>
    %cst_28 = arith.constant 0.000000e+00 : f32
    %65 = vector.broadcast %cst_28 : f32 to vector<2x20xf32>
    %66 = arith.subf %65, %64 : vector<2x20xf32>
    %67 = arith.addf %57, %66 : vector<2x20xf32>
    %cst_29 = arith.constant 1.000000e+00 : f32
    %68 = vector.broadcast %cst_29 : f32 to vector<2x20xf32>
    %69 = arith.divf %67, %68 : vector<2x20xf32>
    %cst_30 = arith.constant dense<0xFF800000> : vector<2xf32>
    %70 = vector.multi_reduction <maximumf>, %69, %cst_30 [1] : vector<2x20xf32> to vector<2xf32>
    %71 = vector.shape_cast %70 : vector<2xf32> to vector<2x1xf32>
    %72 = vector.broadcast %71 : vector<2x1xf32> to vector<2x20xf32>
    %73 = arith.subf %69, %72 : vector<2x20xf32>
    %74 = math.exp %73 : vector<2x20xf32>
    %cst_31 = arith.constant dense<0.000000e+00> : vector<2xf32>
    %75 = vector.multi_reduction <add>, %74, %cst_31 [1] : vector<2x20xf32> to vector<2xf32>
    %76 = vector.shape_cast %75 : vector<2xf32> to vector<2x1xf32>
    %77 = vector.broadcast %76 : vector<2x1xf32> to vector<2x20xf32>
    %78 = arith.divf %74, %77 : vector<2x20xf32>
    %cst_32 = arith.constant dense<0xFF800000> : vector<2xf32>
    %79 = vector.multi_reduction <maximumf>, %57, %cst_32 [1] : vector<2x20xf32> to vector<2xf32>
    %80 = vector.shape_cast %79 : vector<2xf32> to vector<2x1xf32>
    %81 = vector.broadcast %80 : vector<2x1xf32> to vector<2x20xf32>
    %82 = arith.subf %57, %81 : vector<2x20xf32>
    %83 = math.exp %82 : vector<2x20xf32>
    %cst_33 = arith.constant dense<0.000000e+00> : vector<2xf32>
    %84 = vector.multi_reduction <add>, %83, %cst_33 [1] : vector<2x20xf32> to vector<2xf32>
    %85 = vector.shape_cast %84 : vector<2xf32> to vector<2x1xf32>
    %86 = vector.broadcast %85 : vector<2x1xf32> to vector<2x20xf32>
    %87 = arith.divf %83, %86 : vector<2x20xf32>
    %88 = vector.extract_strided_slice %24 {offsets = [0, 40], sizes = [2, 20], strides = [1, 1]} : vector<2x60xf32> to vector<2x20xf32>
    %89 = vector.extract_strided_slice %25 {offsets = [0, 40], sizes = [2, 20], strides = [1, 1]} : vector<2x60xf32> to vector<2x20xf32>
    %cst_34 = arith.constant 1.000000e-10 : f32
    %90 = vector.broadcast %cst_34 : f32 to vector<2x20xf32>
    %91 = arith.addf %89, %90 : vector<2x20xf32>
    %92 = math.log %91 : vector<2x20xf32>
    %cst_35 = arith.constant 1.000000e-10 : f32
    %93 = vector.broadcast %cst_35 : f32 to vector<2x20xf32>
    %94 = arith.subf %93, %92 : vector<2x20xf32>
    %95 = math.log %94 : vector<2x20xf32>
    %cst_36 = arith.constant 0.000000e+00 : f32
    %96 = vector.broadcast %cst_36 : f32 to vector<2x20xf32>
    %97 = arith.subf %96, %95 : vector<2x20xf32>
    %98 = arith.addf %88, %97 : vector<2x20xf32>
    %cst_37 = arith.constant 1.000000e+00 : f32
    %99 = vector.broadcast %cst_37 : f32 to vector<2x20xf32>
    %100 = arith.divf %98, %99 : vector<2x20xf32>
    %cst_38 = arith.constant dense<0xFF800000> : vector<2xf32>
    %101 = vector.multi_reduction <maximumf>, %100, %cst_38 [1] : vector<2x20xf32> to vector<2xf32>
    %102 = vector.shape_cast %101 : vector<2xf32> to vector<2x1xf32>
    %103 = vector.broadcast %102 : vector<2x1xf32> to vector<2x20xf32>
    %104 = arith.subf %100, %103 : vector<2x20xf32>
    %105 = math.exp %104 : vector<2x20xf32>
    %cst_39 = arith.constant dense<0.000000e+00> : vector<2xf32>
    %106 = vector.multi_reduction <add>, %105, %cst_39 [1] : vector<2x20xf32> to vector<2xf32>
    %107 = vector.shape_cast %106 : vector<2xf32> to vector<2x1xf32>
    %108 = vector.broadcast %107 : vector<2x1xf32> to vector<2x20xf32>
    %109 = arith.divf %105, %108 : vector<2x20xf32>
    %cst_40 = arith.constant dense<0xFF800000> : vector<2xf32>
    %110 = vector.multi_reduction <maximumf>, %88, %cst_40 [1] : vector<2x20xf32> to vector<2xf32>
    %111 = vector.shape_cast %110 : vector<2xf32> to vector<2x1xf32>
    %112 = vector.broadcast %111 : vector<2x1xf32> to vector<2x20xf32>
    %113 = arith.subf %88, %112 : vector<2x20xf32>
    %114 = math.exp %113 : vector<2x20xf32>
    %cst_41 = arith.constant dense<0.000000e+00> : vector<2xf32>
    %115 = vector.multi_reduction <add>, %114, %cst_41 [1] : vector<2x20xf32> to vector<2xf32>
    %116 = vector.shape_cast %115 : vector<2xf32> to vector<2x1xf32>
    %117 = vector.broadcast %116 : vector<2x1xf32> to vector<2x20xf32>
    %118 = arith.divf %114, %117 : vector<2x20xf32>
    %119 = tpu.concatenate %47, %78, %109 in 1 : vector<2x20xf32>, vector<2x20xf32>, vector<2x20xf32> -> vector<2x60xf32>
    %120 = tpu.concatenate %56, %87, %118 in 1 : vector<2x20xf32>, vector<2x20xf32>, vector<2x20xf32> -> vector<2x60xf32>
    %c0_42 = arith.constant 0 : index
    %c0_43 = arith.constant 0 : index
    %121 = vector.load %arg15[%c0_42, %c0_43] : memref<2x60xf32, #tpu.memory_space<vmem>>, vector<2x60xf32>
    tpu.vector_store %arg15[%c0_42, %c0_43], %120 {strides = array<i32>} : memref<2x60xf32, #tpu.memory_space<vmem>>, vector<2x60xf32>,
    %122 = arith.truncf %119 : vector<2x60xf32> to vector<2x60xbf16>
    %c0_44 = arith.constant 0 : index
    %c0_45 = arith.constant 0 : index
    %123 = vector.load %arg6[%c0_44, %c0_45] : memref<60x256xbf16, #tpu.memory_space<vmem>>, vector<60x256xbf16>
    %cst_46 = arith.constant dense<0.000000e+00> : vector<2x256xf32>
    %124 = tpu.matmul %122, %123, %cst_46 {dimension_numbers = #tpu.dot_dimension_numbers<[1], [0], [0], [1], [0, 0, 1, 1], [], []>} : vector<2x60xbf16>, vector<60x256xbf16>, vector<2x256xf32> -> vector<2x256xf32>
    %c0_47 = arith.constant 0 : index
    %c896 = arith.constant 896 : index
    %125 = vector.load %arg13[%c0_47, %c896] : memref<1x7680xf32, #tpu.memory_space<vmem>>, vector<1x256xf32>
    %126 = vector.broadcast %125 : vector<1x256xf32> to vector<2x256xf32>
    %127 = arith.addf %124, %126 : vector<2x256xf32>
    %cst_48 = arith.constant 0.000000e+00 : f32
    %128 = vector.broadcast %cst_48 : f32 to vector<2x256xf32>
    %129 = arith.maximumf %127, %128 : vector<2x256xf32>
    %130 = arith.truncf %129 : vector<2x256xf32> to vector<2x256xbf16>
    %c0_49 = arith.constant 0 : index
    %c0_50 = arith.constant 0 : index
    %131 = vector.load %arg7[%c0_49, %c0_50] : memref<256x512xbf16, #tpu.memory_space<vmem>>, vector<256x512xbf16>
    %cst_51 = arith.constant dense<0.000000e+00> : vector<2x512xf32>
    %132 = tpu.matmul %130, %131, %cst_51 {dimension_numbers = #tpu.dot_dimension_numbers<[1], [0], [0], [1], [0, 0, 1, 1], [], []>} : vector<2x256xbf16>, vector<256x512xbf16>, vector<2x512xf32> -> vector<2x512xf32>
    %c0_52 = arith.constant 0 : index
    %c1152 = arith.constant 1152 : index
    %133 = vector.load %arg13[%c0_52, %c1152] : memref<1x7680xf32, #tpu.memory_space<vmem>>, vector<1x512xf32>
    %134 = vector.broadcast %133 : vector<1x512xf32> to vector<2x512xf32>
    %135 = arith.addf %132, %134 : vector<2x512xf32>
    %cst_53 = arith.constant 0.000000e+00 : f32
    %136 = vector.broadcast %cst_53 : f32 to vector<2x512xf32>
    %137 = arith.maximumf %135, %136 : vector<2x512xf32>
    %138 = arith.truncf %137 : vector<2x512xf32> to vector<2x512xbf16>
    %c0_54 = arith.constant 0 : index
    %c0_55 = arith.constant 0 : index
    %139 = vector.load %arg8[%c0_54, %c0_55] : memref<512x2352xbf16, #tpu.memory_space<vmem>>, vector<512x2352xbf16>
    %cst_56 = arith.constant dense<0.000000e+00> : vector<2x2352xf32>
    %140 = tpu.matmul %138, %139, %cst_56 {dimension_numbers = #tpu.dot_dimension_numbers<[1], [0], [0], [1], [0, 0, 1, 1], [], []>} : vector<2x512xbf16>, vector<512x2352xbf16>, vector<2x2352xf32> -> vector<2x2352xf32>
    %c0_57 = arith.constant 0 : index
    %c1664 = arith.constant 1664 : index
    %141 = vector.load %arg13[%c0_57, %c1664] : memref<1x7680xf32, #tpu.memory_space<vmem>>, vector<1x2352xf32>
    %142 = vector.broadcast %141 : vector<1x2352xf32> to vector<2x2352xf32>
    %143 = arith.addf %140, %142 : vector<2x2352xf32>
    %144 = arith.negf %143 : vector<2x2352xf32>
    %145 = math.exp %144 : vector<2x2352xf32>
    %cst_58 = arith.constant 1.000000e+00 : f32
    %146 = vector.broadcast %cst_58 : f32 to vector<2x2352xf32>
    %147 = arith.addf %146, %145 : vector<2x2352xf32>
    %148 = arith.divf %146, %147 : vector<2x2352xf32>
    %c0_59 = arith.constant 0 : index
    %c0_60 = arith.constant 0 : index
    %149 = vector.load %arg14[%c0_59, %c0_60] : memref<2x2352xf32, #tpu.memory_space<vmem>>, vector<2x2352xf32>
    tpu.vector_store %arg14[%c0_59, %c0_60], %148 {strides = array<i32>} : memref<2x2352xf32, #tpu.memory_space<vmem>>, vector<2x2352xf32>,
    %150 = arith.truncf %0 : vector<2x2352xf32> to vector<2x2352xbf16>
    %c0_61 = arith.constant 0 : index
    %c0_62 = arith.constant 0 : index
    %151 = vector.load %arg9[%c0_61, %c0_62] : memref<2352x512xbf16, #tpu.memory_space<vmem>>, vector<2352x512xbf16>
    %cst_63 = arith.constant dense<0.000000e+00> : vector<2x512xf32>
    %152 = tpu.matmul %150, %151, %cst_63 {dimension_numbers = #tpu.dot_dimension_numbers<[1], [0], [0], [1], [0, 0, 1, 1], [], []>} : vector<2x2352xbf16>, vector<2352x512xbf16>, vector<2x512xf32> -> vector<2x512xf32>
    %c0_64 = arith.constant 0 : index
    %c4096 = arith.constant 4096 : index
    %153 = vector.load %arg13[%c0_64, %c4096] : memref<1x7680xf32, #tpu.memory_space<vmem>>, vector<1x512xf32>
    %154 = vector.broadcast %153 : vector<1x512xf32> to vector<2x512xf32>
    %155 = arith.addf %152, %154 : vector<2x512xf32>
    %cst_65 = arith.constant 0.000000e+00 : f32
    %156 = vector.broadcast %cst_65 : f32 to vector<2x512xf32>
    %157 = arith.maximumf %155, %156 : vector<2x512xf32>
    %158 = arith.truncf %157 : vector<2x512xf32> to vector<2x512xbf16>
    %c0_66 = arith.constant 0 : index
    %c0_67 = arith.constant 0 : index
    %159 = vector.load %arg10[%c0_66, %c0_67] : memref<512x4xbf16, #tpu.memory_space<vmem>>, vector<512x4xbf16>
    %cst_68 = arith.constant dense<0.000000e+00> : vector<2x4xf32>
    %160 = tpu.matmul %158, %159, %cst_68 {dimension_numbers = #tpu.dot_dimension_numbers<[1], [0], [0], [1], [0, 0, 1, 1], [], []>} : vector<2x512xbf16>, vector<512x4xbf16>, vector<2x4xf32> -> vector<2x4xf32>
    %c0_69 = arith.constant 0 : index
    %c4608 = arith.constant 4608 : index
    %161 = vector.load %arg13[%c0_69, %c4608] : memref<1x7680xf32, #tpu.memory_space<vmem>>, vector<1x4xf32>
    %162 = vector.broadcast %161 : vector<1x4xf32> to vector<2x4xf32>
    %163 = arith.addf %160, %162 : vector<2x4xf32>
    %164 = vector.extract_strided_slice %163 {offsets = [0, 0], sizes = [2, 2], strides = [1, 1]} : vector<2x4xf32> to vector<2x2xf32>
    %165 = vector.extract_strided_slice %163 {offsets = [0, 2], sizes = [2, 2], strides = [1, 1]} : vector<2x4xf32> to vector<2x2xf32>
    %cst_70 = arith.constant 5.000000e-01 : f32
    %166 = vector.broadcast %cst_70 : f32 to vector<2x2xf32>
    %167 = arith.mulf %166, %165 : vector<2x2xf32>
    %168 = math.exp %167 : vector<2x2xf32>
    %c0_71 = arith.constant 0 : index
    %c0_72 = arith.constant 0 : index
    %169 = vector.load %arg2[%c0_71, %c0_72] : memref<2x2xf32, #tpu.memory_space<vmem>>, vector<2x2xf32>
    %170 = arith.mulf %168, %169 : vector<2x2xf32>
    %171 = arith.addf %164, %170 : vector<2x2xf32>
    %172 = arith.truncf %171 : vector<2x2xf32> to vector<2x2xbf16>
    %c0_73 = arith.constant 0 : index
    %c0_74 = arith.constant 0 : index
    %173 = vector.load %arg11[%c0_73, %c0_74] : memref<2x512xbf16, #tpu.memory_space<vmem>>, vector<2x512xbf16>
    %cst_75 = arith.constant dense<0.000000e+00> : vector<2x512xf32>
    %174 = tpu.matmul %172, %173, %cst_75 {dimension_numbers = #tpu.dot_dimension_numbers<[1], [0], [0], [1], [0, 0, 1, 1], [], []>} : vector<2x2xbf16>, vector<2x512xbf16>, vector<2x512xf32> -> vector<2x512xf32>
    %c0_76 = arith.constant 0 : index
    %c4736 = arith.constant 4736 : index
    %175 = vector.load %arg13[%c0_76, %c4736] : memref<1x7680xf32, #tpu.memory_space<vmem>>, vector<1x512xf32>
    %176 = vector.broadcast %175 : vector<1x512xf32> to vector<2x512xf32>
    %177 = arith.addf %174, %176 : vector<2x512xf32>
    %cst_77 = arith.constant 0.000000e+00 : f32
    %178 = vector.broadcast %cst_77 : f32 to vector<2x512xf32>
    %179 = arith.maximumf %177, %178 : vector<2x512xf32>
    %180 = arith.truncf %179 : vector<2x512xf32> to vector<2x512xbf16>
    %c0_78 = arith.constant 0 : index
    %c0_79 = arith.constant 0 : index
    %181 = vector.load %arg12[%c0_78, %c0_79] : memref<512x2352xbf16, #tpu.memory_space<vmem>>, vector<512x2352xbf16>
    %cst_80 = arith.constant dense<0.000000e+00> : vector<2x2352xf32>
    %182 = tpu.matmul %180, %181, %cst_80 {dimension_numbers = #tpu.dot_dimension_numbers<[1], [0], [0], [1], [0, 0, 1, 1], [], []>} : vector<2x512xbf16>, vector<512x2352xbf16>, vector<2x2352xf32> -> vector<2x2352xf32>
    %c0_81 = arith.constant 0 : index
    %c5248 = arith.constant 5248 : index
    %183 = vector.load %arg13[%c0_81, %c5248] : memref<1x7680xf32, #tpu.memory_space<vmem>>, vector<1x2352xf32>
    %184 = vector.broadcast %183 : vector<1x2352xf32> to vector<2x2352xf32>
    %185 = arith.addf %182, %184 : vector<2x2352xf32>
    %186 = arith.negf %185 : vector<2x2352xf32>
    %187 = math.exp %186 : vector<2x2352xf32>
    %cst_82 = arith.constant 1.000000e+00 : f32
    %188 = vector.broadcast %cst_82 : f32 to vector<2x2352xf32>
    %189 = arith.addf %188, %187 : vector<2x2352xf32>
    %190 = arith.divf %188, %189 : vector<2x2352xf32>
    %c0_83 = arith.constant 0 : index
    %c0_84 = arith.constant 0 : index
    %191 = vector.load %arg16[%c0_83, %c0_84] : memref<2x2352xf32, #tpu.memory_space<vmem>>, vector<2x2352xf32>
    tpu.vector_store %arg16[%c0_83, %c0_84], %190 {strides = array<i32>} : memref<2x2352xf32, #tpu.memory_space<vmem>>, vector<2x2352xf32>,
    return
  }
}

</mosaic_0001>

<bundles_post_ra>
// kernel: both_vae_forward.3
= control target key start
LH: loop header
LB: loop body
LE: loop exit
PB: predicated region body
PF: predicated region fallthrough
CT: control target
= control target key end

     0   :  { %s36100_s0 = inlined_call_operand.vmem [shape: f32[2,2352], index: 0, kind: input, shape index: {}]   ;;  %s36101_s1 = inlined_call_operand.vmem [shape: f32[2,60], index: 1, kind: input, shape index: {}]   ;;  %s36102_s2 = inlined_call_operand.vmem [shape: f32[2,2], index: 2, kind: input, shape index: {}]   ;;  %s36103_s3 = inlined_call_operand.vmem [shape: bf16[2352,512], index: 3, kind: input, shape index: {}]   ;;  %s36104_s4 = inlined_call_operand.vmem [shape: bf16[512,256], index: 4, kind: input, shape index: {}]   ;;  %s36105_s5 = inlined_call_operand.vmem [shape: bf16[256,60], index: 5, kind: input, shape index: {}]   ;;  %s36106_s6 = inlined_call_operand.vmem [shape: bf16[60,256], index: 6, kind: input, shape index: {}]   ;;  %s36107_s7 = inlined_call_operand.vmem [shape: bf16[256,512], index: 7, kind: input, shape index: {}]   ;;  %s36108_s8 = inlined_call_operand.vmem [shape: bf16[512,2352], index: 8, kind: input, shape index: {}]   ;;  %s36109_s9 = inlined_call_operand.vmem [shape: bf16[2352,512], index: 9, kind: input, shape index: {}]   ;;  %s36110_s10 = inlined_call_operand.vmem [shape: bf16[512,4], index: 10, kind: input, shape index: {}]   ;;  %s36111_s11 = inlined_call_operand.vmem [shape: bf16[2,512], index: 11, kind: input, shape index: {}]   ;;  %s36112_s12 = inlined_call_operand.vmem [shape: bf16[512,2352], index: 12, kind: input, shape index: {}]   ;;  %s36113_s13 = inlined_call_operand.vmem [shape: f32[1,7680], index: 13, kind: input, shape index: {}]   ;;  %s36114_s14 = inlined_call_operand.hbm [shape: f32[2,2352], index: 14, kind: output, shape index: {0}]   ;;  %s36115_s15 = inlined_call_operand.vmem [shape: f32[2,60], index: 15, kind: output, shape index: {1}]   ;;  %s36116_s16 = inlined_call_operand.vmem [shape: f32[2,2352], index: 16, kind: output, shape index: {2}]  }
   0x1   :  { %36118 = sst [smem:[#allocation5_spill]] %s36100_s0 }
   0x2   :  { %v23626_v0 = vld [vmem:[%s36103_s3 + $0x4] ss:$16 sps:$4 sm:$0xff]   ;;  %v23628_v1 = vld [vmem:[%s36103_s3 + $0xc] ss:$16 sps:$4 sm:$0xff]   ;;  %v23630_v2 = vld [vmem:[%s36103_s3] ss:$16 sps:$4 sm:$0xff]   ;;  %v66_v38 = vlaneseq }
   0x3   :  { %3738 = vmatprep.subr.bf16.mxu0 %v23626_v0  ;;  %v23631_v3 = vld [vmem:[%s36103_s3 + $0x8] ss:$16 sps:$4 sm:$0xff]   ;;  %4148 = vmatprep.subr.bf16.mxu1 %v23628_v1  ;;  %v23632_v4 = vld [vmem:[%s36103_s3 + $0x24] ss:$16 sps:$4 sm:$0xff]   ;;  %v23634_v5 = vld [vmem:[%s36103_s3 + $0x2c] ss:$16 sps:$4 sm:$0xff]  }
   0x4   :  { %3739 = vmatpush1.bf16.msra.mxu0 %v23630_v2  ;;  %4149 = vmatpush1.bf16.msra.mxu1 %v23631_v3  ;;  %v23636_v6 = vld [vmem:[%s36103_s3 + $0x20] ss:$16 sps:$4 sm:$0xff]   ;;  %v23637_v7 = vld [vmem:[%s36103_s3 + $0x28] ss:$16 sps:$4 sm:$0xff]   ;;  %v23638_v8 = vld [vmem:[%s36103_s3 + $0x44] ss:$16 sps:$4 sm:$0xff]  }
   0x5   :  { %3740 = vmatprep.subr.bf16.mxu0 %v23632_v4  ;;  %4150 = vmatprep.subr.bf16.mxu1 %v23634_v5  ;;  %v23640_v9 = vld [vmem:[%s36103_s3 + $0x4c] ss:$16 sps:$4 sm:$0xff]   ;;  %v23642_v10 = vld [vmem:[%s36103_s3 + $0x40] ss:$16 sps:$4 sm:$0xff]   ;;  %v23643_v11 = vld [vmem:[%s36103_s3 + $0x48] ss:$16 sps:$4 sm:$0xff]  }
   0x6   :  { %v23644_v12 = vld [vmem:[%s36103_s3 + $0x64] ss:$16 sps:$4 sm:$0xff]   ;;  %v23646_v13 = vld [vmem:[%s36103_s3 + $0x6c] ss:$16 sps:$4 sm:$0xff]   ;;  %v23648_v14 = vld [vmem:[%s36103_s3 + $0x60] ss:$16 sps:$4 sm:$0xff]  }
   0x7   :  { %v23649_v15 = vld [vmem:[%s36103_s3 + $0x68] ss:$16 sps:$4 sm:$0xff]   ;;  %v23650_v16 = vld [vmem:[%s36103_s3 + $0x84] ss:$16 sps:$4 sm:$0xff]   ;;  %v23652_v17 = vld [vmem:[%s36103_s3 + $0x8c] ss:$16 sps:$4 sm:$0xff]  }
   0x8   :  { %3741 = vmatpush1.bf16.msra.mxu0 %v23636_v6  ;;  %4151 = vmatpush1.bf16.msra.mxu1 %v23637_v7  ;;  %v23654_v18 = vld [vmem:[%s36103_s3 + $0x80] ss:$16 sps:$4 sm:$0xff]   ;;  %v23655_v19 = vld [vmem:[%s36103_s3 + $0x88] ss:$16 sps:$4 sm:$0xff]   ;;  %v23656_v20 = vld [vmem:[%s36103_s3 + $0xa4] ss:$16 sps:$4 sm:$0xff]  }
   0x9   :  { %3742 = vmatprep.subr.bf16.mxu0 %v23638_v8  ;;  %4152 = vmatprep.subr.bf16.mxu1 %v23640_v9  ;;  %v23658_v21 = vld [vmem:[%s36103_s3 + $0xac] ss:$16 sps:$4 sm:$0xff]   ;;  %v23660_v22 = vld [vmem:[%s36103_s3 + $0xa0] ss:$16 sps:$4 sm:$0xff]   ;;  %v23661_v23 = vld [vmem:[%s36103_s3 + $0xa8] ss:$16 sps:$4 sm:$0xff]  }
   0xa   :  { %v23662_v24 = vld [vmem:[%s36103_s3 + $0xc4] ss:$16 sps:$4 sm:$0xff]   ;;  %v23664_v25 = vld [vmem:[%s36103_s3 + $0xcc] ss:$16 sps:$4 sm:$0xff]   ;;  %v23666_v26 = vld [vmem:[%s36103_s3 + $0xc0] ss:$16 sps:$4 sm:$0xff]  }
   0xb   :  { %v23667_v27 = vld [vmem:[%s36103_s3 + $0xc8] ss:$16 sps:$4 sm:$0xff]   ;;  %v23668_v28 = vld [vmem:[%s36103_s3 + $0xe4] ss:$16 sps:$4 sm:$0xff]   ;;  %v23670_v29 = vld [vmem:[%s36103_s3 + $0xec] ss:$16 sps:$4 sm:$0xff]  }
   0xc   :  { %3743 = vmatpush1.bf16.msra.mxu0 %v23642_v10  ;;  %4153 = vmatpush1.bf16.msra.mxu1 %v23643_v11  ;;  %v23672_v30 = vld [vmem:[%s36103_s3 + $0xe0] ss:$16 sps:$4 sm:$0xff]   ;;  %v23673_v31 = vld [vmem:[%s36103_s3 + $0xe8] ss:$16 sps:$4 sm:$0xff]   ;;  %v23674_v32 = vld [vmem:[%s36103_s3 + $0x104] ss:$16 sps:$4 sm:$0xff]  }
   0xd   :  { %3744 = vmatprep.subr.bf16.mxu0 %v23644_v12  ;;  %4154 = vmatprep.subr.bf16.mxu1 %v23646_v13  ;;  %v23676_v33 = vld [vmem:[%s36103_s3 + $0x10c] ss:$16 sps:$4 sm:$0xff]   ;;  %v23678_v34 = vld [vmem:[%s36103_s3 + $0x100] ss:$16 sps:$4 sm:$0xff]   ;;  %v23679_v35 = vld [vmem:[%s36103_s3 + $0x108] ss:$16 sps:$4 sm:$0xff]  }
   0xe   :  { %v27645_v36 = vmov 1983009808   ;;  %v23680_v39 = vld [vmem:[%s36103_s3 + $0x124] ss:$16 sps:$4 sm:$0xff]   ;;  %v23682_v40 = vld [vmem:[%s36103_s3 + $0x12c] ss:$16 sps:$4 sm:$0xff]  }
   0xf   :  { %v64_v37 = vunpack.c.l.s4 %v27645_v36  ;;  %v23684_v41 = vld [vmem:[%s36103_s3 + $0x120] ss:$16 sps:$4 sm:$0xff]   ;;  %v27855_v43 = vshrl.u32 %v66_v38, 7  ;;  %v23685_v44 = vld [vmem:[%s36103_s3 + $0x128] ss:$16 sps:$4 sm:$0xff]   ;;  %s36119_s25 = sld [smem:[#allocation5_spill]] }
  0x10   :  { %3745 = vmatpush1.bf16.msra.mxu0 %v23648_v14  ;;  %4155 = vmatpush1.bf16.msra.mxu1 %v23649_v15  ;;  %v23686_v45 = vld [vmem:[%s36103_s3 + $0x144] ss:$16 sps:$4 sm:$0xff]   ;;  %v23688_v46 = vld [vmem:[%s36103_s3 + $0x14c] ss:$16 sps:$4 sm:$0xff]   ;;  %v23690_v47 = vld [vmem:[%s36103_s3 + $0x140] ss:$16 sps:$4 sm:$0xff]  }
  0x11   :  { %3746 = vmatprep.subr.bf16.mxu0 %v23650_v16  ;;  %4156 = vmatprep.subr.bf16.mxu1 %v23652_v17  ;;  %v65_v42 = vunpack.c.0.s8 %v64_v37  ;;  %v23691_v48 = vld [vmem:[%s36103_s3 + $0x148] ss:$16 sps:$4 sm:$0xff]   ;;  %v23692_v50 = vld [vmem:[%s36103_s3 + $0x164] ss:$16 sps:$4 sm:$0xff]   ;;  %v23694_v51 = vld [vmem:[%s36103_s3 + $0x16c] ss:$16 sps:$4 sm:$0xff]  }
  0x12   :  { %v23696_v53 = vld [vmem:[%s36103_s3 + $0x160] ss:$16 sps:$4 sm:$0xff]   ;;  %v23697_v55 = vld [vmem:[%s36103_s3 + $0x168] ss:$16 sps:$4 sm:$0xff]   ;;  %v23698_v56 = vld [vmem:[%s36103_s3 + $0x184] ss:$16 sps:$4 sm:$0xff]  }
  0x13   :  { %v27873_v49 = vsub.s32 %v65_v42, %v27855_v43  ;;  %v23700_v57 = vld [vmem:[%s36103_s3 + $0x18c] ss:$16 sps:$4 sm:$0xff]   ;;  %v23702_v59 = vld [vmem:[%s36103_s3 + $0x180] ss:$16 sps:$4 sm:$0xff]   ;;  %v23703_v61 = vld [vmem:[%s36103_s3 + $0x188] ss:$16 sps:$4 sm:$0xff]  }
  0x14   :  { %3747 = vmatpush1.bf16.msra.mxu0 %v23654_v18  ;;  %4157 = vmatpush1.bf16.msra.mxu1 %v23655_v19  ;;  %v23704_v62 = vld [vmem:[%s36103_s3 + $0x1a4] ss:$16 sps:$4 sm:$0xff]   ;;  %v23706_v63 = vld [vmem:[%s36103_s3 + $0x1ac] ss:$16 sps:$4 sm:$0xff]   ;;  %v23708_v0 = vld [vmem:[%s36103_s3 + $0x1a0] ss:$16 sps:$4 sm:$0xff]  }
  0x15   :  { %3748 = vmatprep.subr.bf16.mxu0 %v23656_v20  ;;  %4158 = vmatprep.subr.bf16.mxu1 %v23658_v21  ;;  %v52_v52 = vld [vmem:[%s36119_s25] sm:$0xff]  ;;  %v23709_v1 = vld [vmem:[%s36103_s3 + $0x1a8] ss:$16 sps:$4 sm:$0xff]   ;;  %v23712_v3 = vld [vmem:[%s36103_s3 + $0x1cc] ss:$16 sps:$4 sm:$0xff]   ;;  %vm3734_vm0 = vcmask 392192  }
  0x16   :  { %v69_v54 = vrot.slane %v52_v52, %v27873_v49  ;;  %v23710_v2 = vld [vmem:[%s36103_s3 + $0x1c4] ss:$16 sps:$4 sm:$0xff]   ;;  %v62_v4 = vcombine.high %v52_v52, %v52_v52  ;;  %v23714_v5 = vld [vmem:[%s36103_s3 + $0x1c0] ss:$16 sps:$4 sm:$0xff]   ;;  %v23715_v6 = vld [vmem:[%s36103_s3 + $0x1c8] ss:$16 sps:$4 sm:$0xff]  }
  0x17   :  { %v23716_v7 = vld [vmem:[%s36103_s3 + $0x1e4] ss:$16 sps:$4 sm:$0xff]   ;;  %v23718_v8 = vld [vmem:[%s36103_s3 + $0x1ec] ss:$16 sps:$4 sm:$0xff]   ;;  %v23720_v10 = vld [vmem:[%s36103_s3 + $0x1e0] ss:$16 sps:$4 sm:$0xff]  }
  0x18   :  { %3749 = vmatpush1.bf16.msra.mxu0 %v23660_v22  ;;  %4159 = vmatpush1.bf16.msra.mxu1 %v23661_v23  ;;  %v77_v58 = vcombine.high %v69_v54, %v69_v54  ;;  %v27938_v9 = vrot.slane %v62_v4, %v27873_v49  ;;  %v23721_v11 = vld [vmem:[%s36103_s3 + $0x1e8] ss:$16 sps:$4 sm:$0xff]   ;;  %v23724_v12 = vld [vmem:[%s36103_s3 + $0x204] ss:$16 sps:$4 sm:$0xff]   ;;  %v23727_v13 = vld [vmem:[%s36103_s3 + $0x20c] ss:$16 sps:$4 sm:$0xff]   ;;  %v27957_v16 = vpack.c.bf16 %v69_v54, %v69_v54 }
  0x19   :  { %3750 = vmatprep.subr.bf16.mxu0 %v23662_v24  ;;  %4160 = vmatprep.subr.bf16.mxu1 %v23664_v25  ;;  %v23722_v15 = vld [vmem:[%s36103_s3 + $0x200] ss:$16 sps:$4 sm:$0xff]   ;;  %v23725_v17 = vld [vmem:[%s36103_s3 + $0x208] ss:$16 sps:$4 sm:$0xff]   ;;  %v23730_v18 = vld [vmem:[%s36103_s3 + $0x224] ss:$16 sps:$4 sm:$0xff]  }
  0x1a   :  { %v27900_v60 = vpack.c.bf16 %v77_v58, %v77_v58  ;;  %v78_v14 = vcombine.high %v27938_v9, %v27938_v9  ;;  %v23733_v19 = vld [vmem:[%s36103_s3 + $0x22c] ss:$16 sps:$4 sm:$0xff]   ;;  %v23728_v21 = vld [vmem:[%s36103_s3 + $0x220] ss:$16 sps:$4 sm:$0xff]   ;;  %v23731_v22 = vld [vmem:[%s36103_s3 + $0x228] ss:$16 sps:$4 sm:$0xff]  }
  0x1b   :  { %v23736_v23 = vld [vmem:[%s36103_s3 + $0x244] ss:$16 sps:$4 sm:$0xff]   ;;  %v23739_v24 = vld [vmem:[%s36103_s3 + $0x24c] ss:$16 sps:$4 sm:$0xff]   ;;  %v23734_v25 = vld [vmem:[%s36103_s3 + $0x240] ss:$16 sps:$4 sm:$0xff]  }
  0x1c   :  { %3751 = vmatpush1.bf16.msra.mxu0 %v23666_v26  ;;  %4161 = vmatpush1.bf16.msra.mxu1 %v23667_v27  ;;  %v27968_v20 = vpack.c.bf16 %v78_v14, %v78_v14  ;;  %v23737_v26 = vld [vmem:[%s36103_s3 + $0x248] ss:$16 sps:$4 sm:$0xff]   ;;  %v23742_v27 = vld [vmem:[%s36103_s3 + $0x264] ss:$16 sps:$4 sm:$0xff]   ;;  %v23757_v36 = vld [vmem:[%s36103_s3 + $0x2ac] ss:$16 sps:$4 sm:$0xff]  }
  0x1d   :  { %3752 = vmatprep.subr.bf16.mxu0 %v23668_v28  ;;  %4162 = vmatprep.subr.bf16.mxu1 %v23670_v29  ;;  %v23745_v28 = vld [vmem:[%s36103_s3 + $0x26c] ss:$16 sps:$4 sm:$0xff]   ;;  %v23740_v29 = vld [vmem:[%s36103_s3 + $0x260] ss:$16 sps:$4 sm:$0xff]   ;;  %v23755_v38 = vld [vmem:[%s36103_s3 + $0x2a8] ss:$16 sps:$4 sm:$0xff]  }
  0x1e   :  { %3770 = vmatprep.mubr.bf16.mxu0 %v27900_v60  ;;  %4180 = vmatprep.mubr.bf16.mxu1 %v27900_v60  ;;  %v23752_v37 = vld [vmem:[%s36103_s3 + $0x2a0] ss:$16 sps:$4 sm:$0xff]   ;;  %v23761_v42 = vld [vmem:[%s36103_s3 + $0x2c8] ss:$16 sps:$4 sm:$0xff]   ;;  %v23781_v54 = vld [vmem:[%s36103_s3 + $0x32c] ss:$16 sps:$4 sm:$0xff]  }
  0x1f   :  { %v23773_v52 = vld [vmem:[%s36103_s3 + $0x308] ss:$16 sps:$4 sm:$0xff]   ;;  %v23787_v58 = vld [vmem:[%s36103_s3 + $0x34c] ss:$16 sps:$4 sm:$0xff]   ;;  %v23794_v4 = vld [vmem:[%s36103_s3 + $0x380] ss:$16 sps:$4 sm:$0xff]  }
  0x20   :  { %3753 = vmatpush1.bf16.msra.mxu0 %v23672_v30  ;;  %4163 = vmatpush1.bf16.msra.mxu1 %v23673_v31  ;;  %v23743_v30 = vld [vmem:[%s36103_s3 + $0x268] ss:$16 sps:$4 sm:$0xff]   ;;  %v23748_v31 = vld [vmem:[%s36103_s3 + $0x284] ss:$16 sps:$4 sm:$0xff]  }
  0x21   :  { %3754 = vmatprep.subr.bf16.mxu0 %v23674_v32  ;;  %4164 = vmatprep.subr.bf16.mxu1 %v23676_v33  ;;  %v23751_v32 = vld [vmem:[%s36103_s3 + $0x28c] ss:$16 sps:$4 sm:$0xff]   ;;  %v23746_v33 = vld [vmem:[%s36103_s3 + $0x280] ss:$16 sps:$4 sm:$0xff]   ;;  %v23809_v14 = vld [vmem:[%s36103_s3 + $0x3c8] ss:$16 sps:$4 sm:$0xff]  }
  0x24   :  { %3755 = vmatpush1.bf16.msra.mxu0 %v23678_v34  ;;  %4165 = vmatpush1.bf16.msra.mxu1 %v23679_v35  ;;  %v23749_v34 = vld [vmem:[%s36103_s3 + $0x288] ss:$16 sps:$4 sm:$0xff]   ;;  %v23754_v35 = vld [vmem:[%s36103_s3 + $0x2a4] ss:$16 sps:$4 sm:$0xff]  }
  0x25   :  { %3756 = vmatprep.subr.bf16.mxu0 %v23680_v39  ;;  %4166 = vmatprep.subr.bf16.mxu1 %v23682_v40  ;;  %v23760_v39 = vld [vmem:[%s36103_s3 + $0x2c4] ss:$16 sps:$4 sm:$0xff]   ;;  %v23763_v40 = vld [vmem:[%s36103_s3 + $0x2cc] ss:$16 sps:$4 sm:$0xff]  }
  0x28   :  { %3757 = vmatpush1.bf16.msra.mxu0 %v23684_v41  ;;  %4167 = vmatpush1.bf16.msra.mxu1 %v23685_v44  ;;  %v23758_v41 = vld [vmem:[%s36103_s3 + $0x2c0] ss:$16 sps:$4 sm:$0xff]   ;;  %v23766_v44 = vld [vmem:[%s36103_s3 + $0x2e4] ss:$16 sps:$4 sm:$0xff]  }
  0x29   :  { %3758 = vmatprep.subr.bf16.mxu0 %v23686_v45  ;;  %4168 = vmatprep.subr.bf16.mxu1 %v23688_v46  ;;  %v23769_v45 = vld [vmem:[%s36103_s3 + $0x2ec] ss:$16 sps:$4 sm:$0xff]   ;;  %v23764_v46 = vld [vmem:[%s36103_s3 + $0x2e0] ss:$16 sps:$4 sm:$0xff]  }
  0x2c   :  { %3759 = vmatpush1.bf16.msra.mxu0 %v23690_v47  ;;  %4169 = vmatpush1.bf16.msra.mxu1 %v23691_v48  ;;  %v23767_v47 = vld [vmem:[%s36103_s3 + $0x2e8] ss:$16 sps:$4 sm:$0xff]   ;;  %v23772_v48 = vld [vmem:[%s36103_s3 + $0x304] ss:$16 sps:$4 sm:$0xff]  }
  0x2d   :  { %3760 = vmatprep.subr.bf16.mxu0 %v23692_v50  ;;  %4170 = vmatprep.subr.bf16.mxu1 %v23694_v51  ;;  %v23775_v50 = vld [vmem:[%s36103_s3 + $0x30c] ss:$16 sps:$4 sm:$0xff]   ;;  %v23770_v51 = vld [vmem:[%s36103_s3 + $0x300] ss:$16 sps:$4 sm:$0xff]  }
  0x30   :  { %3761 = vmatpush1.bf16.msra.mxu0 %v23696_v53  ;;  %4171 = vmatpush1.bf16.msra.mxu1 %v23697_v55  ;;  %v23778_v53 = vld [vmem:[%s36103_s3 + $0x324] ss:$16 sps:$4 sm:$0xff]   ;;  %v23776_v55 = vld [vmem:[%s36103_s3 + $0x320] ss:$16 sps:$4 sm:$0xff]  }
  0x31   :  { %3762 = vmatprep.subr.bf16.mxu0 %v23698_v56  ;;  %4172 = vmatprep.subr.bf16.mxu1 %v23700_v57  ;;  %v23779_v56 = vld [vmem:[%s36103_s3 + $0x328] ss:$16 sps:$4 sm:$0xff]   ;;  %v23784_v57 = vld [vmem:[%s36103_s3 + $0x344] ss:$16 sps:$4 sm:$0xff]  }
  0x34   :  { %3763 = vmatpush1.bf16.msra.mxu0 %v23702_v59  ;;  %4173 = vmatpush1.bf16.msra.mxu1 %v23703_v61  ;;  %v23782_v59 = vld [vmem:[%s36103_s3 + $0x340] ss:$16 sps:$4 sm:$0xff]   ;;  %v23785_v61 = vld [vmem:[%s36103_s3 + $0x348] ss:$16 sps:$4 sm:$0xff]  }
  0x35   :  { %3764 = vmatprep.subr.bf16.mxu0 %v23704_v62  ;;  %4174 = vmatprep.subr.bf16.mxu1 %v23706_v63  ;;  %v23790_v62 = vld [vmem:[%s36103_s3 + $0x364] ss:$16 sps:$4 sm:$0xff]   ;;  %v23793_v63 = vld [vmem:[%s36103_s3 + $0x36c] ss:$16 sps:$4 sm:$0xff]  }
  0x38   :  { %3765 = vmatpush1.bf16.msra.mxu0 %v23708_v0  ;;  %4175 = vmatpush1.bf16.msra.mxu1 %v23709_v1  ;;  %v23788_v0 = vld [vmem:[%s36103_s3 + $0x360] ss:$16 sps:$4 sm:$0xff]   ;;  %v23791_v1 = vld [vmem:[%s36103_s3 + $0x368] ss:$16 sps:$4 sm:$0xff]  }
  0x39   :  { %3766 = vmatprep.subr.bf16.mxu0 %v23710_v2  ;;  %4176 = vmatprep.subr.bf16.mxu1 %v23712_v3  ;;  %v23796_v2 = vld [vmem:[%s36103_s3 + $0x384] ss:$16 sps:$4 sm:$0xff]   ;;  %v23799_v3 = vld [vmem:[%s36103_s3 + $0x38c] ss:$16 sps:$4 sm:$0xff]  }
  0x3c   :  { %3767 = vmatpush1.bf16.msra.mxu0 %v23714_v5  ;;  %4177 = vmatpush1.bf16.msra.mxu1 %v23715_v6  ;;  %v23797_v5 = vld [vmem:[%s36103_s3 + $0x388] ss:$16 sps:$4 sm:$0xff]   ;;  %v23802_v6 = vld [vmem:[%s36103_s3 + $0x3a4] ss:$16 sps:$4 sm:$0xff]  }
  0x3d   :  { %3768 = vmatprep.subr.bf16.mxu0 %v23716_v7  ;;  %4178 = vmatprep.subr.bf16.mxu1 %v23718_v8  ;;  %v23805_v7 = vld [vmem:[%s36103_s3 + $0x3ac] ss:$16 sps:$4 sm:$0xff]   ;;  %v23800_v8 = vld [vmem:[%s36103_s3 + $0x3a0] ss:$16 sps:$4 sm:$0xff]  }
  0x40   :  { %3769 = vmatpush1.bf16.msra.mxu0 %v23720_v10  ;;  %4179 = vmatpush1.bf16.msra.mxu1 %v23721_v11  ;;  %v23803_v10 = vld [vmem:[%s36103_s3 + $0x3a8] ss:$16 sps:$4 sm:$0xff]   ;;  %v23808_v11 = vld [vmem:[%s36103_s3 + $0x3c4] ss:$16 sps:$4 sm:$0xff]  }
  0x41   :  { %3779 = vmatprep.subr.bf16.mxu0 %v23724_v12  ;;  %4189 = vmatprep.subr.bf16.mxu1 %v23727_v13  ;;  %v23811_v12 = vld [vmem:[%s36103_s3 + $0x3cc] ss:$16 sps:$4 sm:$0xff]   ;;  %v23806_v13 = vld [vmem:[%s36103_s3 + $0x3c0] ss:$16 sps:$4 sm:$0xff]  }
  0x43   :  { %3771 = vmatmul.mubr.bf16.vlgmr.msra.gmra.mrb[0].mxu0 %v27957_v16  ;;  %4181 = vmatmul.mubr.bf16.vlgmr.msra.gmra.mrb[0].mxu1 %v27957_v16 }
  0x44   :  { %3780 = vmatpush1.bf16.msra.mxu0 %v23722_v15  ;;  %4190 = vmatpush1.bf16.msra.mxu1 %v23725_v17  ;;  %v23814_v15 = vld [vmem:[%s36103_s3 + $0x3e4] ss:$16 sps:$4 sm:$0xff]   ;;  %v23817_v17 = vld [vmem:[%s36103_s3 + $0x3ec] ss:$16 sps:$4 sm:$0xff]  }
  0x45   :  { %3781 = vmatprep.subr.bf16.mxu0 %v23730_v18  ;;  %4191 = vmatprep.subr.bf16.mxu1 %v23733_v19  ;;  %v23812_v18 = vld [vmem:[%s36103_s3 + $0x3e0] ss:$16 sps:$4 sm:$0xff]   ;;  %v23815_v19 = vld [vmem:[%s36103_s3 + $0x3e8] ss:$16 sps:$4 sm:$0xff]  }
  0x46   :  { %3811 = vmatprep.mubr.bf16.mxu0 %v27968_v20  ;;  %4221 = vmatprep.mubr.bf16.mxu1 %v27968_v20 }
  0x48   :  { %3782 = vmatpush1.bf16.msra.mxu0 %v23728_v21  ;;  %4192 = vmatpush1.bf16.msra.mxu1 %v23731_v22  ;;  %v23821_v21 = vld [vmem:[%s36103_s3 + $0x404] ss:$16 sps:$4 sm:$0xff]   ;;  %v23824_v22 = vld [vmem:[%s36103_s3 + $0x40c] ss:$16 sps:$4 sm:$0xff]  }
  0x49   :  { %3783 = vmatprep.subr.bf16.mxu0 %v23736_v23  ;;  %4193 = vmatprep.subr.bf16.mxu1 %v23739_v24  ;;  %v23819_v23 = vld [vmem:[%s36103_s3 + $0x400] ss:$16 sps:$4 sm:$0xff]   ;;  %v28159_v24 = vpack.c.bf16 %v27938_v9, %v27938_v9  ;;  %v23830_v9 = vld [vmem:[%s36103_s3 + $0x42c] ss:$16 sps:$4 sm:$0xff]  }
  0x4c   :  { %3784 = vmatpush1.bf16.msra.mxu0 %v23734_v25  ;;  %4194 = vmatpush1.bf16.msra.mxu1 %v23737_v26  ;;  %v23822_v25 = vld [vmem:[%s36103_s3 + $0x408] ss:$16 sps:$4 sm:$0xff]  }
  0x4d   :  { %3785 = vmatprep.subr.bf16.mxu0 %v23742_v27  ;;  %4195 = vmatprep.subr.bf16.mxu1 %v23745_v28  ;;  %v28167_v26 = vld [vmem:[%s36119_s25 + $0x8] sm:$0xff]  ;;  %v23827_v27 = vld [vmem:[%s36103_s3 + $0x424] ss:$16 sps:$4 sm:$0xff]  }
  0x4e   :  { %v28177_v28 = vrot.slane %v28167_v26, %v27873_v49 }
  0x50   :  { %3786 = vmatpush1.bf16.msra.mxu0 %v23740_v29  ;;  %4196 = vmatpush1.bf16.msra.mxu1 %v23743_v30  ;;  %v94_v29 = vcombine.high %v28177_v28, %v28177_v28  ;;  %v23825_v30 = vld [vmem:[%s36103_s3 + $0x420] ss:$16 sps:$4 sm:$0xff]  }
  0x51   :  { %3787 = vmatprep.subr.bf16.mxu0 %v23748_v31  ;;  %4197 = vmatprep.subr.bf16.mxu1 %v23751_v32  ;;  %v23828_v31 = vld [vmem:[%s36103_s3 + $0x428] ss:$16 sps:$4 sm:$0xff]   ;;  %v23833_v32 = vld [vmem:[%s36103_s3 + $0x444] ss:$16 sps:$4 sm:$0xff]  }
  0x54   :  { %3788 = vmatpush1.bf16.msra.mxu0 %v23746_v33  ;;  %4198 = vmatpush1.bf16.msra.mxu1 %v23749_v34  ;;  %v23836_v33 = vld [vmem:[%s36103_s3 + $0x44c] ss:$16 sps:$4 sm:$0xff]   ;;  %v28195_v34 = vpack.c.bf16 %v94_v29, %v94_v29  ;;  %v23906_v29 = vld [vmem:[%s36103_s3 + $0x5c8] ss:$16 sps:$4 sm:$0xff]  }
  0x55   :  { %3789 = vmatprep.subr.bf16.mxu0 %v23754_v35  ;;  %4199 = vmatprep.subr.bf16.mxu1 %v23757_v36  ;;  %v23831_v35 = vld [vmem:[%s36103_s3 + $0x440] ss:$16 sps:$4 sm:$0xff]   ;;  %v23834_v36 = vld [vmem:[%s36103_s3 + $0x448] ss:$16 sps:$4 sm:$0xff]  }
  0x58   :  { %3790 = vmatpush1.bf16.msra.mxu0 %v23752_v37  ;;  %4200 = vmatpush1.bf16.msra.mxu1 %v23755_v38  ;;  %v23839_v37 = vld [vmem:[%s36103_s3 + $0x464] ss:$16 sps:$4 sm:$0xff]   ;;  %v23842_v38 = vld [vmem:[%s36103_s3 + $0x46c] ss:$16 sps:$4 sm:$0xff]  }
  0x59   :  { %3791 = vmatprep.subr.bf16.mxu0 %v23760_v39  ;;  %4201 = vmatprep.subr.bf16.mxu1 %v23763_v40  ;;  %v23837_v39 = vld [vmem:[%s36103_s3 + $0x460] ss:$16 sps:$4 sm:$0xff]   ;;  %v23840_v40 = vld [vmem:[%s36103_s3 + $0x468] ss:$16 sps:$4 sm:$0xff]  }
  0x5c   :  { %3792 = vmatpush1.bf16.msra.mxu0 %v23758_v41  ;;  %4202 = vmatpush1.bf16.msra.mxu1 %v23761_v42  ;;  %v23845_v41 = vld [vmem:[%s36103_s3 + $0x484] ss:$16 sps:$4 sm:$0xff]   ;;  %v23848_v42 = vld [vmem:[%s36103_s3 + $0x48c] ss:$16 sps:$4 sm:$0xff]  }
  0x5d   :  { %3793 = vmatprep.subr.bf16.mxu0 %v23766_v44  ;;  %4203 = vmatprep.subr.bf16.mxu1 %v23769_v45  ;;  %v23843_v44 = vld [vmem:[%s36103_s3 + $0x480] ss:$16 sps:$4 sm:$0xff]   ;;  %v23846_v45 = vld [vmem:[%s36103_s3 + $0x488] ss:$16 sps:$4 sm:$0xff]  }
  0x60   :  { %3794 = vmatpush1.bf16.msra.mxu0 %v23764_v46  ;;  %4204 = vmatpush1.bf16.msra.mxu1 %v23767_v47  ;;  %v23851_v46 = vld [vmem:[%s36103_s3 + $0x4a4] ss:$16 sps:$4 sm:$0xff]   ;;  %v23854_v47 = vld [vmem:[%s36103_s3 + $0x4ac] ss:$16 sps:$4 sm:$0xff]  }
  0x61   :  { %3795 = vmatprep.subr.bf16.mxu0 %v23772_v48  ;;  %4205 = vmatprep.subr.bf16.mxu1 %v23775_v50  ;;  %v23849_v48 = vld [vmem:[%s36103_s3 + $0x4a0] ss:$16 sps:$4 sm:$0xff]   ;;  %v23852_v50 = vld [vmem:[%s36103_s3 + $0x4a8] ss:$16 sps:$4 sm:$0xff]  }
  0x64   :  { %3796 = vmatpush1.bf16.msra.mxu0 %v23770_v51  ;;  %4206 = vmatpush1.bf16.msra.mxu1 %v23773_v52  ;;  %v23857_v51 = vld [vmem:[%s36103_s3 + $0x4c4] ss:$16 sps:$4 sm:$0xff]   ;;  %v23860_v52 = vld [vmem:[%s36103_s3 + $0x4cc] ss:$16 sps:$4 sm:$0xff]  }
  0x65   :  { %3797 = vmatprep.subr.bf16.mxu0 %v23778_v53  ;;  %4207 = vmatprep.subr.bf16.mxu1 %v23781_v54  ;;  %v23855_v53 = vld [vmem:[%s36103_s3 + $0x4c0] ss:$16 sps:$4 sm:$0xff]   ;;  %v23858_v54 = vld [vmem:[%s36103_s3 + $0x4c8] ss:$16 sps:$4 sm:$0xff]  }
  0x68   :  { %3798 = vmatpush1.bf16.msra.mxu0 %v23776_v55  ;;  %4208 = vmatpush1.bf16.msra.mxu1 %v23779_v56  ;;  %v23863_v55 = vld [vmem:[%s36103_s3 + $0x4e4] ss:$16 sps:$4 sm:$0xff]   ;;  %v23866_v56 = vld [vmem:[%s36103_s3 + $0x4ec] ss:$16 sps:$4 sm:$0xff]  }
  0x69   :  { %3799 = vmatprep.subr.bf16.mxu0 %v23784_v57  ;;  %4209 = vmatprep.subr.bf16.mxu1 %v23787_v58  ;;  %v23861_v57 = vld [vmem:[%s36103_s3 + $0x4e0] ss:$16 sps:$4 sm:$0xff]   ;;  %v23864_v58 = vld [vmem:[%s36103_s3 + $0x4e8] ss:$16 sps:$4 sm:$0xff]  }
  0x6c   :  { %3800 = vmatpush1.bf16.msra.mxu0 %v23782_v59  ;;  %4210 = vmatpush1.bf16.msra.mxu1 %v23785_v61  ;;  %v23869_v59 = vld [vmem:[%s36103_s3 + $0x504] ss:$16 sps:$4 sm:$0xff]   ;;  %v23872_v61 = vld [vmem:[%s36103_s3 + $0x50c] ss:$16 sps:$4 sm:$0xff]  }
  0x6d   :  { %3801 = vmatprep.subr.bf16.mxu0 %v23790_v62  ;;  %4211 = vmatprep.subr.bf16.mxu1 %v23793_v63  ;;  %v23867_v62 = vld [vmem:[%s36103_s3 + $0x500] ss:$16 sps:$4 sm:$0xff]   ;;  %v23870_v63 = vld [vmem:[%s36103_s3 + $0x508] ss:$16 sps:$4 sm:$0xff]  }
  0x70   :  { %3802 = vmatpush1.bf16.msra.mxu0 %v23788_v0  ;;  %4212 = vmatpush1.bf16.msra.mxu1 %v23791_v1  ;;  %v23875_v0 = vld [vmem:[%s36103_s3 + $0x524] ss:$16 sps:$4 sm:$0xff]   ;;  %v23878_v1 = vld [vmem:[%s36103_s3 + $0x52c] ss:$16 sps:$4 sm:$0xff]  }
  0x71   :  { %3803 = vmatprep.subr.bf16.mxu0 %v23796_v2  ;;  %4213 = vmatprep.subr.bf16.mxu1 %v23799_v3  ;;  %v23873_v2 = vld [vmem:[%s36103_s3 + $0x520] ss:$16 sps:$4 sm:$0xff]   ;;  %v23876_v3 = vld [vmem:[%s36103_s3 + $0x528] ss:$16 sps:$4 sm:$0xff]  }
  0x74   :  { %3804 = vmatpush1.bf16.msra.mxu0 %v23794_v4  ;;  %4214 = vmatpush1.bf16.msra.mxu1 %v23797_v5  ;;  %v23881_v4 = vld [vmem:[%s36103_s3 + $0x544] ss:$16 sps:$4 sm:$0xff]   ;;  %v23884_v5 = vld [vmem:[%s36103_s3 + $0x54c] ss:$16 sps:$4 sm:$0xff]  }
  0x75   :  { %3805 = vmatprep.subr.bf16.mxu0 %v23802_v6  ;;  %4215 = vmatprep.subr.bf16.mxu1 %v23805_v7  ;;  %v23879_v6 = vld [vmem:[%s36103_s3 + $0x540] ss:$16 sps:$4 sm:$0xff]   ;;  %v23882_v7 = vld [vmem:[%s36103_s3 + $0x548] ss:$16 sps:$4 sm:$0xff]  }
  0x78   :  { %3806 = vmatpush1.bf16.msra.mxu0 %v23800_v8  ;;  %4216 = vmatpush1.bf16.msra.mxu1 %v23803_v10  ;;  %v23887_v8 = vld [vmem:[%s36103_s3 + $0x564] ss:$16 sps:$4 sm:$0xff]   ;;  %v23890_v10 = vld [vmem:[%s36103_s3 + $0x56c] ss:$16 sps:$4 sm:$0xff]  }
  0x79   :  { %3807 = vmatprep.subr.bf16.mxu0 %v23808_v11  ;;  %4217 = vmatprep.subr.bf16.mxu1 %v23811_v12  ;;  %v23885_v11 = vld [vmem:[%s36103_s3 + $0x560] ss:$16 sps:$4 sm:$0xff]   ;;  %v23888_v12 = vld [vmem:[%s36103_s3 + $0x568] ss:$16 sps:$4 sm:$0xff]  }
  0x7c   :  { %3808 = vmatpush1.bf16.msra.mxu0 %v23806_v13  ;;  %4218 = vmatpush1.bf16.msra.mxu1 %v23809_v14  ;;  %v23893_v13 = vld [vmem:[%s36103_s3 + $0x584] ss:$16 sps:$4 sm:$0xff]   ;;  %v23896_v14 = vld [vmem:[%s36103_s3 + $0x58c] ss:$16 sps:$4 sm:$0xff]  }
  0x7d   :  { %3809 = vmatprep.subr.bf16.mxu0 %v23814_v15  ;;  %4219 = vmatprep.subr.bf16.mxu1 %v23817_v17  ;;  %v23891_v15 = vld [vmem:[%s36103_s3 + $0x580] ss:$16 sps:$4 sm:$0xff]   ;;  %v23894_v17 = vld [vmem:[%s36103_s3 + $0x588] ss:$16 sps:$4 sm:$0xff]  }
  0x80   :  { %3810 = vmatpush1.bf16.msra.mxu0 %v23812_v18  ;;  %4220 = vmatpush1.bf16.msra.mxu1 %v23815_v19  ;;  %v23899_v18 = vld [vmem:[%s36103_s3 + $0x5a4] ss:$16 sps:$4 sm:$0xff]   ;;  %v23902_v19 = vld [vmem:[%s36103_s3 + $0x5ac] ss:$16 sps:$4 sm:$0xff]  }
  0x81   :  { %3820 = vmatprep.subr.bf16.mxu0 %v23821_v21  ;;  %4230 = vmatprep.subr.bf16.mxu1 %v23824_v22  ;;  %v23897_v21 = vld [vmem:[%s36103_s3 + $0x5a0] ss:$16 sps:$4 sm:$0xff]   ;;  %v23900_v22 = vld [vmem:[%s36103_s3 + $0x5a8] ss:$16 sps:$4 sm:$0xff]  }
  0x83   :  { %3812 = vmatmul.mubr.bf16.vlgmr.msra.gmra.mrb[0].mxu0 %v28159_v24  ;;  %4222 = vmatmul.mubr.bf16.vlgmr.msra.gmra.mrb[0].mxu1 %v28159_v24 }
  0x84   :  { %3821 = vmatpush1.bf16.msra.mxu0 %v23819_v23  ;;  %4231 = vmatpush1.bf16.msra.mxu1 %v23822_v25  ;;  %v23905_v23 = vld [vmem:[%s36103_s3 + $0x5c4] ss:$16 sps:$4 sm:$0xff]   ;;  %v23908_v25 = vld [vmem:[%s36103_s3 + $0x5cc] ss:$16 sps:$4 sm:$0xff]  }
  0x85   :  { %3822 = vmatprep.subr.bf16.mxu0 %v23827_v27  ;;  %4232 = vmatprep.subr.bf16.mxu1 %v23830_v9  ;;  %v79_v27 = vcombine.high %v28167_v26, %v28167_v26  ;;  %v23903_v9 = vld [vmem:[%s36103_s3 + $0x5c0] ss:$16 sps:$4 sm:$0xff]   ;;  %v23914_v26 = vld [vmem:[%s36103_s3 + $0x5ec] ss:$16 sps:$4 sm:$0xff]  }
  0x86   :  { %3852 = vmatprep.mubr.bf16.mxu0 %v28195_v34  ;;  %4262 = vmatprep.mubr.bf16.mxu1 %v28195_v34 }
  0x88   :  { %3823 = vmatpush1.bf16.msra.mxu0 %v23825_v30  ;;  %4233 = vmatpush1.bf16.msra.mxu1 %v23828_v31  ;;  %v23911_v30 = vld [vmem:[%s36103_s3 + $0x5e4] ss:$16 sps:$4 sm:$0xff]   ;;  %v28358_v31 = vrot.slane %v79_v27, %v27873_v49  ;;  %v23981_v27 = vld [vmem:[%s36103_s3 + $0x760] ss:$16 sps:$4 sm:$0xff]  }
  0x89   :  { %3824 = vmatprep.subr.bf16.mxu0 %v23833_v32  ;;  %4234 = vmatprep.subr.bf16.mxu1 %v23836_v33  ;;  %v23909_v32 = vld [vmem:[%s36103_s3 + $0x5e0] ss:$16 sps:$4 sm:$0xff]   ;;  %v23912_v33 = vld [vmem:[%s36103_s3 + $0x5e8] ss:$16 sps:$4 sm:$0xff]  }
  0x8c   :  { %3825 = vmatpush1.bf16.msra.mxu0 %v23831_v35  ;;  %4235 = vmatpush1.bf16.msra.mxu1 %v23834_v36  ;;  %v23917_v35 = vld [vmem:[%s36103_s3 + $0x604] ss:$16 sps:$4 sm:$0xff]   ;;  %v23920_v36 = vld [vmem:[%s36103_s3 + $0x60c] ss:$16 sps:$4 sm:$0xff]  }
  0x8d   :  { %3826 = vmatprep.subr.bf16.mxu0 %v23839_v37  ;;  %4236 = vmatprep.subr.bf16.mxu1 %v23842_v38  ;;  %v95_v37 = vcombine.high %v28358_v31, %v28358_v31  ;;  %v28376_v38 = vpack.c.bf16 %v28177_v28, %v28177_v28  ;;  %v23926_v28 = vld [vmem:[%s36103_s3 + $0x62c] ss:$16 sps:$4 sm:$0xff]  }
  0x90   :  { %3827 = vmatpush1.bf16.msra.mxu0 %v23837_v39  ;;  %4237 = vmatpush1.bf16.msra.mxu1 %v23840_v40  ;;  %v23915_v39 = vld [vmem:[%s36103_s3 + $0x600] ss:$16 sps:$4 sm:$0xff]   ;;  %v23918_v40 = vld [vmem:[%s36103_s3 + $0x608] ss:$16 sps:$4 sm:$0xff]  }
  0x91   :  { %3828 = vmatprep.subr.bf16.mxu0 %v23845_v41  ;;  %4238 = vmatprep.subr.bf16.mxu1 %v23848_v42  ;;  %v23923_v41 = vld [vmem:[%s36103_s3 + $0x624] ss:$16 sps:$4 sm:$0xff]   ;;  %v28390_v42 = vpack.c.bf16 %v95_v37, %v95_v37  ;;  %v23996_v37 = vld [vmem:[%s36103_s3 + $0x7a8] ss:$16 sps:$4 sm:$0xff]  }
  0x94   :  { %3829 = vmatpush1.bf16.msra.mxu0 %v23843_v44  ;;  %4239 = vmatpush1.bf16.msra.mxu1 %v23846_v45  ;;  %v23921_v44 = vld [vmem:[%s36103_s3 + $0x620] ss:$16 sps:$4 sm:$0xff]   ;;  %v23924_v45 = vld [vmem:[%s36103_s3 + $0x628] ss:$16 sps:$4 sm:$0xff]  }
  0x95   :  { %3830 = vmatprep.subr.bf16.mxu0 %v23851_v46  ;;  %4240 = vmatprep.subr.bf16.mxu1 %v23854_v47  ;;  %v23929_v46 = vld [vmem:[%s36103_s3 + $0x644] ss:$16 sps:$4 sm:$0xff]   ;;  %v23932_v47 = vld [vmem:[%s36103_s3 + $0x64c] ss:$16 sps:$4 sm:$0xff]  }
  0x98   :  { %3831 = vmatpush1.bf16.msra.mxu0 %v23849_v48  ;;  %4241 = vmatpush1.bf16.msra.mxu1 %v23852_v50  ;;  %v23927_v48 = vld [vmem:[%s36103_s3 + $0x640] ss:$16 sps:$4 sm:$0xff]   ;;  %v23930_v50 = vld [vmem:[%s36103_s3 + $0x648] ss:$16 sps:$4 sm:$0xff]  }
  0x99   :  { %3832 = vmatprep.subr.bf16.mxu0 %v23857_v51  ;;  %4242 = vmatprep.subr.bf16.mxu1 %v23860_v52  ;;  %v23935_v51 = vld [vmem:[%s36103_s3 + $0x664] ss:$16 sps:$4 sm:$0xff]   ;;  %v23938_v52 = vld [vmem:[%s36103_s3 + $0x66c] ss:$16 sps:$4 sm:$0xff]  }
  0x9c   :  { %3833 = vmatpush1.bf16.msra.mxu0 %v23855_v53  ;;  %4243 = vmatpush1.bf16.msra.mxu1 %v23858_v54  ;;  %v23933_v53 = vld [vmem:[%s36103_s3 + $0x660] ss:$16 sps:$4 sm:$0xff]   ;;  %v23936_v54 = vld [vmem:[%s36103_s3 + $0x668] ss:$16 sps:$4 sm:$0xff]  }
  0x9d   :  { %3834 = vmatprep.subr.bf16.mxu0 %v23863_v55  ;;  %4244 = vmatprep.subr.bf16.mxu1 %v23866_v56  ;;  %v23941_v55 = vld [vmem:[%s36103_s3 + $0x684] ss:$16 sps:$4 sm:$0xff]   ;;  %v23944_v56 = vld [vmem:[%s36103_s3 + $0x68c] ss:$16 sps:$4 sm:$0xff]  }
  0xa0   :  { %3835 = vmatpush1.bf16.msra.mxu0 %v23861_v57  ;;  %4245 = vmatpush1.bf16.msra.mxu1 %v23864_v58  ;;  %v23939_v57 = vld [vmem:[%s36103_s3 + $0x680] ss:$16 sps:$4 sm:$0xff]   ;;  %v23942_v58 = vld [vmem:[%s36103_s3 + $0x688] ss:$16 sps:$4 sm:$0xff]  }
  0xa1   :  { %3836 = vmatprep.subr.bf16.mxu0 %v23869_v59  ;;  %4246 = vmatprep.subr.bf16.mxu1 %v23872_v61  ;;  %v23947_v59 = vld [vmem:[%s36103_s3 + $0x6a4] ss:$16 sps:$4 sm:$0xff]   ;;  %v23950_v61 = vld [vmem:[%s36103_s3 + $0x6ac] ss:$16 sps:$4 sm:$0xff]  }
  0xa4   :  { %3837 = vmatpush1.bf16.msra.mxu0 %v23867_v62  ;;  %4247 = vmatpush1.bf16.msra.mxu1 %v23870_v63  ;;  %v23945_v62 = vld [vmem:[%s36103_s3 + $0x6a0] ss:$16 sps:$4 sm:$0xff]   ;;  %v23948_v63 = vld [vmem:[%s36103_s3 + $0x6a8] ss:$16 sps:$4 sm:$0xff]  }
  0xa5   :  { %3838 = vmatprep.subr.bf16.mxu0 %v23875_v0  ;;  %4248 = vmatprep.subr.bf16.mxu1 %v23878_v1  ;;  %v23953_v0 = vld [vmem:[%s36103_s3 + $0x6c4] ss:$16 sps:$4 sm:$0xff]   ;;  %v23956_v1 = vld [vmem:[%s36103_s3 + $0x6cc] ss:$16 sps:$4 sm:$0xff]  }
  0xa8   :  { %3839 = vmatpush1.bf16.msra.mxu0 %v23873_v2  ;;  %4249 = vmatpush1.bf16.msra.mxu1 %v23876_v3  ;;  %v23951_v2 = vld [vmem:[%s36103_s3 + $0x6c0] ss:$16 sps:$4 sm:$0xff]   ;;  %v23954_v3 = vld [vmem:[%s36103_s3 + $0x6c8] ss:$16 sps:$4 sm:$0xff]  }
  0xa9   :  { %3840 = vmatprep.subr.bf16.mxu0 %v23881_v4  ;;  %4250 = vmatprep.subr.bf16.mxu1 %v23884_v5  ;;  %v23959_v4 = vld [vmem:[%s36103_s3 + $0x6e4] ss:$16 sps:$4 sm:$0xff]   ;;  %v23962_v5 = vld [vmem:[%s36103_s3 + $0x6ec] ss:$16 sps:$4 sm:$0xff]  }
  0xac   :  { %3841 = vmatpush1.bf16.msra.mxu0 %v23879_v6  ;;  %4251 = vmatpush1.bf16.msra.mxu1 %v23882_v7  ;;  %v23957_v6 = vld [vmem:[%s36103_s3 + $0x6e0] ss:$16 sps:$4 sm:$0xff]   ;;  %v23960_v7 = vld [vmem:[%s36103_s3 + $0x6e8] ss:$16 sps:$4 sm:$0xff]  }
  0xad   :  { %3842 = vmatprep.subr.bf16.mxu0 %v23887_v8  ;;  %4252 = vmatprep.subr.bf16.mxu1 %v23890_v10  ;;  %v23965_v8 = vld [vmem:[%s36103_s3 + $0x704] ss:$16 sps:$4 sm:$0xff]   ;;  %v23968_v10 = vld [vmem:[%s36103_s3 + $0x70c] ss:$16 sps:$4 sm:$0xff]  }
  0xb0   :  { %3843 = vmatpush1.bf16.msra.mxu0 %v23885_v11  ;;  %4253 = vmatpush1.bf16.msra.mxu1 %v23888_v12  ;;  %v23963_v11 = vld [vmem:[%s36103_s3 + $0x700] ss:$16 sps:$4 sm:$0xff]   ;;  %v23966_v12 = vld [vmem:[%s36103_s3 + $0x708] ss:$16 sps:$4 sm:$0xff]  }
  0xb1   :  { %3844 = vmatprep.subr.bf16.mxu0 %v23893_v13  ;;  %4254 = vmatprep.subr.bf16.mxu1 %v23896_v14  ;;  %v23971_v13 = vld [vmem:[%s36103_s3 + $0x724] ss:$16 sps:$4 sm:$0xff]   ;;  %v23974_v14 = vld [vmem:[%s36103_s3 + $0x72c] ss:$16 sps:$4 sm:$0xff]  }
  0xb4   :  { %3845 = vmatpush1.bf16.msra.mxu0 %v23891_v15  ;;  %4255 = vmatpush1.bf16.msra.mxu1 %v23894_v17  ;;  %v23969_v15 = vld [vmem:[%s36103_s3 + $0x720] ss:$16 sps:$4 sm:$0xff]   ;;  %v23972_v17 = vld [vmem:[%s36103_s3 + $0x728] ss:$16 sps:$4 sm:$0xff]  }
  0xb5   :  { %3846 = vmatprep.subr.bf16.mxu0 %v23899_v18  ;;  %4256 = vmatprep.subr.bf16.mxu1 %v23902_v19  ;;  %v23977_v18 = vld [vmem:[%s36103_s3 + $0x744] ss:$16 sps:$4 sm:$0xff]   ;;  %v23980_v19 = vld [vmem:[%s36103_s3 + $0x74c] ss:$16 sps:$4 sm:$0xff]  }
  0xb8   :  { %3847 = vmatpush1.bf16.msra.mxu0 %v23897_v21  ;;  %4257 = vmatpush1.bf16.msra.mxu1 %v23900_v22  ;;  %v23975_v21 = vld [vmem:[%s36103_s3 + $0x740] ss:$16 sps:$4 sm:$0xff]   ;;  %v23978_v22 = vld [vmem:[%s36103_s3 + $0x748] ss:$16 sps:$4 sm:$0xff]  }
  0xb9   :  { %3848 = vmatprep.subr.bf16.mxu0 %v23905_v23  ;;  %4258 = vmatprep.subr.bf16.mxu1 %v23908_v25  ;;  %v23983_v23 = vld [vmem:[%s36103_s3 + $0x764] ss:$16 sps:$4 sm:$0xff]   ;;  %v23986_v25 = vld [vmem:[%s36103_s3 + $0x76c] ss:$16 sps:$4 sm:$0xff]  }
  0xbc   :  { %3849 = vmatpush1.bf16.msra.mxu0 %v23903_v9  ;;  %4259 = vmatpush1.bf16.msra.mxu1 %v23906_v29  ;;  %v23984_v9 = vld [vmem:[%s36103_s3 + $0x768] ss:$16 sps:$4 sm:$0xff]   ;;  %v23989_v29 = vld [vmem:[%s36103_s3 + $0x784] ss:$16 sps:$4 sm:$0xff]  }
  0xbd   :  { %3850 = vmatprep.subr.bf16.mxu0 %v23911_v30  ;;  %4260 = vmatprep.subr.bf16.mxu1 %v23914_v26  ;;  %v23992_v30 = vld [vmem:[%s36103_s3 + $0x78c] ss:$16 sps:$4 sm:$0xff]   ;;  %v23987_v26 = vld [vmem:[%s36103_s3 + $0x780] ss:$16 sps:$4 sm:$0xff]  }
  0xc0   :  { %3851 = vmatpush1.bf16.msra.mxu0 %v23909_v32  ;;  %4261 = vmatpush1.bf16.msra.mxu1 %v23912_v33  ;;  %v23990_v32 = vld [vmem:[%s36103_s3 + $0x788] ss:$16 sps:$4 sm:$0xff]   ;;  %v23995_v33 = vld [vmem:[%s36103_s3 + $0x7a4] ss:$16 sps:$4 sm:$0xff]  }
  0xc1   :  { %3861 = vmatprep.subr.bf16.mxu0 %v23917_v35  ;;  %4271 = vmatprep.subr.bf16.mxu1 %v23920_v36  ;;  %v23998_v35 = vld [vmem:[%s36103_s3 + $0x7ac] ss:$16 sps:$4 sm:$0xff]   ;;  %v23993_v36 = vld [vmem:[%s36103_s3 + $0x7a0] ss:$16 sps:$4 sm:$0xff]  }
  0xc3   :  { %3853 = vmatmul.mubr.bf16.vlgmr.msra.gmra.mrb[0].mxu0 %v28376_v38  ;;  %4263 = vmatmul.mubr.bf16.vlgmr.msra.gmra.mrb[0].mxu1 %v28376_v38 }
  0xc4   :  { %3862 = vmatpush1.bf16.msra.mxu0 %v23915_v39  ;;  %4272 = vmatpush1.bf16.msra.mxu1 %v23918_v40  ;;  %v24001_v39 = vld [vmem:[%s36103_s3 + $0x7c4] ss:$16 sps:$4 sm:$0xff]   ;;  %v24004_v40 = vld [vmem:[%s36103_s3 + $0x7cc] ss:$16 sps:$4 sm:$0xff]  }
  0xc5   :  { %3863 = vmatprep.subr.bf16.mxu0 %v23923_v41  ;;  %4273 = vmatprep.subr.bf16.mxu1 %v23926_v28  ;;  %v23999_v41 = vld [vmem:[%s36103_s3 + $0x7c0] ss:$16 sps:$4 sm:$0xff]  }
  0xc6   :  { %3893 = vmatprep.mubr.bf16.mxu0 %v28390_v42  ;;  %4303 = vmatprep.mubr.bf16.mxu1 %v28390_v42  ;;  %v28558_v28 = vld [vmem:[%s36119_s25 + $0x10] sm:$0xff] }
  0xc8   :  { %3864 = vmatpush1.bf16.msra.mxu0 %v23921_v44  ;;  %4274 = vmatpush1.bf16.msra.mxu1 %v23924_v45  ;;  %v24002_v44 = vld [vmem:[%s36103_s3 + $0x7c8] ss:$16 sps:$4 sm:$0xff]   ;;  %v24007_v45 = vld [vmem:[%s36103_s3 + $0x7e4] ss:$16 sps:$4 sm:$0xff]  }
  0xc9   :  { %3865 = vmatprep.subr.bf16.mxu0 %v23929_v46  ;;  %4275 = vmatprep.subr.bf16.mxu1 %v23932_v47  ;;  %v24010_v46 = vld [vmem:[%s36103_s3 + $0x7ec] ss:$16 sps:$4 sm:$0xff]   ;;  %v28571_v47 = vrot.slane %v28558_v28, %v27873_v49 }
  0xcc   :  { %3866 = vmatpush1.bf16.msra.mxu0 %v23927_v48  ;;  %4276 = vmatpush1.bf16.msra.mxu1 %v23930_v50  ;;  %v24005_v48 = vld [vmem:[%s36103_s3 + $0x7e0] ss:$16 sps:$4 sm:$0xff]   ;;  %v24008_v50 = vld [vmem:[%s36103_s3 + $0x7e8] ss:$16 sps:$4 sm:$0xff]  }
  0xcd   :  { %3867 = vmatprep.subr.bf16.mxu0 %v23935_v51  ;;  %4277 = vmatprep.subr.bf16.mxu1 %v23938_v52  ;;  %v24014_v51 = vld [vmem:[%s36103_s3 + $0x804] ss:$16 sps:$4 sm:$0xff]   ;;  %v24017_v52 = vld [vmem:[%s36103_s3 + $0x80c] ss:$16 sps:$4 sm:$0xff]  }
  0xd0   :  { %3868 = vmatpush1.bf16.msra.mxu0 %v23933_v53  ;;  %4278 = vmatpush1.bf16.msra.mxu1 %v23936_v54  ;;  %v111_v53 = vcombine.high %v28571_v47, %v28571_v47  ;;  %v24012_v54 = vld [vmem:[%s36103_s3 + $0x800] ss:$16 sps:$4 sm:$0xff]  }
  0xd1   :  { %3869 = vmatprep.subr.bf16.mxu0 %v23941_v55  ;;  %4279 = vmatprep.subr.bf16.mxu1 %v23944_v56  ;;  %v28592_v55 = vpack.c.bf16 %v28358_v31, %v28358_v31  ;;  %v24015_v56 = vld [vmem:[%s36103_s3 + $0x808] ss:$16 sps:$4 sm:$0xff]   ;;  %v24018_v31 = vld [vmem:[%s36103_s3 + $0x820] ss:$16 sps:$4 sm:$0xff]  }
  0xd4   :  { %3870 = vmatpush1.bf16.msra.mxu0 %v23939_v57  ;;  %4280 = vmatpush1.bf16.msra.mxu1 %v23942_v58  ;;  %v24020_v57 = vld [vmem:[%s36103_s3 + $0x824] ss:$16 sps:$4 sm:$0xff]   ;;  %v24023_v58 = vld [vmem:[%s36103_s3 + $0x82c] ss:$16 sps:$4 sm:$0xff]  }
  0xd5   :  { %3871 = vmatprep.subr.bf16.mxu0 %v23947_v59  ;;  %4281 = vmatprep.subr.bf16.mxu1 %v23950_v61  ;;  %v28603_v59 = vpack.c.bf16 %v111_v53, %v111_v53  ;;  %v24021_v61 = vld [vmem:[%s36103_s3 + $0x828] ss:$16 sps:$4 sm:$0xff]   ;;  %v24092_v53 = vld [vmem:[%s36103_s3 + $0x9a4] ss:$16 sps:$4 sm:$0xff]  }
  0xd8   :  { %3872 = vmatpush1.bf16.msra.mxu0 %v23945_v62  ;;  %4282 = vmatpush1.bf16.msra.mxu1 %v23948_v63  ;;  %v24026_v62 = vld [vmem:[%s36103_s3 + $0x844] ss:$16 sps:$4 sm:$0xff]   ;;  %v24029_v63 = vld [vmem:[%s36103_s3 + $0x84c] ss:$16 sps:$4 sm:$0xff]  }
  0xd9   :  { %3873 = vmatprep.subr.bf16.mxu0 %v23953_v0  ;;  %4283 = vmatprep.subr.bf16.mxu1 %v23956_v1  ;;  %v24024_v0 = vld [vmem:[%s36103_s3 + $0x840] ss:$16 sps:$4 sm:$0xff]   ;;  %v24027_v1 = vld [vmem:[%s36103_s3 + $0x848] ss:$16 sps:$4 sm:$0xff]  }
  0xdc   :  { %3874 = vmatpush1.bf16.msra.mxu0 %v23951_v2  ;;  %4284 = vmatpush1.bf16.msra.mxu1 %v23954_v3  ;;  %v24032_v2 = vld [vmem:[%s36103_s3 + $0x864] ss:$16 sps:$4 sm:$0xff]   ;;  %v24035_v3 = vld [vmem:[%s36103_s3 + $0x86c] ss:$16 sps:$4 sm:$0xff]  }
  0xdd   :  { %3875 = vmatprep.subr.bf16.mxu0 %v23959_v4  ;;  %4285 = vmatprep.subr.bf16.mxu1 %v23962_v5  ;;  %v24030_v4 = vld [vmem:[%s36103_s3 + $0x860] ss:$16 sps:$4 sm:$0xff]   ;;  %v24033_v5 = vld [vmem:[%s36103_s3 + $0x868] ss:$16 sps:$4 sm:$0xff]  }
  0xe0   :  { %3876 = vmatpush1.bf16.msra.mxu0 %v23957_v6  ;;  %4286 = vmatpush1.bf16.msra.mxu1 %v23960_v7  ;;  %v24038_v6 = vld [vmem:[%s36103_s3 + $0x884] ss:$16 sps:$4 sm:$0xff]   ;;  %v24041_v7 = vld [vmem:[%s36103_s3 + $0x88c] ss:$16 sps:$4 sm:$0xff]  }
  0xe1   :  { %3877 = vmatprep.subr.bf16.mxu0 %v23965_v8  ;;  %4287 = vmatprep.subr.bf16.mxu1 %v23968_v10  ;;  %v24036_v8 = vld [vmem:[%s36103_s3 + $0x880] ss:$16 sps:$4 sm:$0xff]   ;;  %v24039_v10 = vld [vmem:[%s36103_s3 + $0x888] ss:$16 sps:$4 sm:$0xff]  }
  0xe4   :  { %3878 = vmatpush1.bf16.msra.mxu0 %v23963_v11  ;;  %4288 = vmatpush1.bf16.msra.mxu1 %v23966_v12  ;;  %v24044_v11 = vld [vmem:[%s36103_s3 + $0x8a4] ss:$16 sps:$4 sm:$0xff]   ;;  %v24047_v12 = vld [vmem:[%s36103_s3 + $0x8ac] ss:$16 sps:$4 sm:$0xff]  }
  0xe5   :  { %3879 = vmatprep.subr.bf16.mxu0 %v23971_v13  ;;  %4289 = vmatprep.subr.bf16.mxu1 %v23974_v14  ;;  %v24042_v13 = vld [vmem:[%s36103_s3 + $0x8a0] ss:$16 sps:$4 sm:$0xff]   ;;  %v24045_v14 = vld [vmem:[%s36103_s3 + $0x8a8] ss:$16 sps:$4 sm:$0xff]  }
  0xe8   :  { %3880 = vmatpush1.bf16.msra.mxu0 %v23969_v15  ;;  %4290 = vmatpush1.bf16.msra.mxu1 %v23972_v17  ;;  %v24050_v15 = vld [vmem:[%s36103_s3 + $0x8c4] ss:$16 sps:$4 sm:$0xff]   ;;  %v24053_v17 = vld [vmem:[%s36103_s3 + $0x8cc] ss:$16 sps:$4 sm:$0xff]  }
  0xe9   :  { %3881 = vmatprep.subr.bf16.mxu0 %v23977_v18  ;;  %4291 = vmatprep.subr.bf16.mxu1 %v23980_v19  ;;  %v24048_v18 = vld [vmem:[%s36103_s3 + $0x8c0] ss:$16 sps:$4 sm:$0xff]   ;;  %v24051_v19 = vld [vmem:[%s36103_s3 + $0x8c8] ss:$16 sps:$4 sm:$0xff]  }
  0xec   :  { %3882 = vmatpush1.bf16.msra.mxu0 %v23975_v21  ;;  %4292 = vmatpush1.bf16.msra.mxu1 %v23978_v22  ;;  %v24056_v21 = vld [vmem:[%s36103_s3 + $0x8e4] ss:$16 sps:$4 sm:$0xff]   ;;  %v24059_v22 = vld [vmem:[%s36103_s3 + $0x8ec] ss:$16 sps:$4 sm:$0xff]  }
  0xed   :  { %3883 = vmatprep.subr.bf16.mxu0 %v23983_v23  ;;  %4293 = vmatprep.subr.bf16.mxu1 %v23986_v25  ;;  %v24054_v23 = vld [vmem:[%s36103_s3 + $0x8e0] ss:$16 sps:$4 sm:$0xff]   ;;  %v24057_v25 = vld [vmem:[%s36103_s3 + $0x8e8] ss:$16 sps:$4 sm:$0xff]  }
  0xf0   :  { %3884 = vmatpush1.bf16.msra.mxu0 %v23981_v27  ;;  %4294 = vmatpush1.bf16.msra.mxu1 %v23984_v9  ;;  %v24062_v27 = vld [vmem:[%s36103_s3 + $0x904] ss:$16 sps:$4 sm:$0xff]   ;;  %v24065_v9 = vld [vmem:[%s36103_s3 + $0x90c] ss:$16 sps:$4 sm:$0xff]  }
  0xf1   :  { %3885 = vmatprep.subr.bf16.mxu0 %v23989_v29  ;;  %4295 = vmatprep.subr.bf16.mxu1 %v23992_v30  ;;  %v24060_v29 = vld [vmem:[%s36103_s3 + $0x900] ss:$16 sps:$4 sm:$0xff]   ;;  %v24063_v30 = vld [vmem:[%s36103_s3 + $0x908] ss:$16 sps:$4 sm:$0xff]  }
  0xf4   :  { %3886 = vmatpush1.bf16.msra.mxu0 %v23987_v26  ;;  %4296 = vmatpush1.bf16.msra.mxu1 %v23990_v32  ;;  %v24068_v26 = vld [vmem:[%s36103_s3 + $0x924] ss:$16 sps:$4 sm:$0xff]   ;;  %v24071_v32 = vld [vmem:[%s36103_s3 + $0x92c] ss:$16 sps:$4 sm:$0xff]  }
  0xf5   :  { %3887 = vmatprep.subr.bf16.mxu0 %v23995_v33  ;;  %4297 = vmatprep.subr.bf16.mxu1 %v23998_v35  ;;  %v24066_v33 = vld [vmem:[%s36103_s3 + $0x920] ss:$16 sps:$4 sm:$0xff]   ;;  %v24069_v35 = vld [vmem:[%s36103_s3 + $0x928] ss:$16 sps:$4 sm:$0xff]  }
  0xf8   :  { %3888 = vmatpush1.bf16.msra.mxu0 %v23993_v36  ;;  %4298 = vmatpush1.bf16.msra.mxu1 %v23996_v37  ;;  %v24074_v36 = vld [vmem:[%s36103_s3 + $0x944] ss:$16 sps:$4 sm:$0xff]   ;;  %v24077_v37 = vld [vmem:[%s36103_s3 + $0x94c] ss:$16 sps:$4 sm:$0xff]  }
  0xf9   :  { %3889 = vmatprep.subr.bf16.mxu0 %v24001_v39  ;;  %4299 = vmatprep.subr.bf16.mxu1 %v24004_v40  ;;  %v24072_v39 = vld [vmem:[%s36103_s3 + $0x940] ss:$16 sps:$4 sm:$0xff]   ;;  %v24075_v40 = vld [vmem:[%s36103_s3 + $0x948] ss:$16 sps:$4 sm:$0xff]  }
  0xfc   :  { %3890 = vmatpush1.bf16.msra.mxu0 %v23999_v41  ;;  %4300 = vmatpush1.bf16.msra.mxu1 %v24002_v44  ;;  %v24080_v41 = vld [vmem:[%s36103_s3 + $0x964] ss:$16 sps:$4 sm:$0xff]   ;;  %v24083_v44 = vld [vmem:[%s36103_s3 + $0x96c] ss:$16 sps:$4 sm:$0xff]  }
  0xfd   :  { %3891 = vmatprep.subr.bf16.mxu0 %v24007_v45  ;;  %4301 = vmatprep.subr.bf16.mxu1 %v24010_v46  ;;  %v24078_v45 = vld [vmem:[%s36103_s3 + $0x960] ss:$16 sps:$4 sm:$0xff]   ;;  %v24081_v46 = vld [vmem:[%s36103_s3 + $0x968] ss:$16 sps:$4 sm:$0xff]  }
 0x100   :  { %3892 = vmatpush1.bf16.msra.mxu0 %v24005_v48  ;;  %4302 = vmatpush1.bf16.msra.mxu1 %v24008_v50  ;;  %v24086_v48 = vld [vmem:[%s36103_s3 + $0x984] ss:$16 sps:$4 sm:$0xff]   ;;  %v24089_v50 = vld [vmem:[%s36103_s3 + $0x98c] ss:$16 sps:$4 sm:$0xff]  }
 0x101   :  { %3902 = vmatprep.subr.bf16.mxu0 %v24014_v51  ;;  %4312 = vmatprep.subr.bf16.mxu1 %v24017_v52  ;;  %v24084_v51 = vld [vmem:[%s36103_s3 + $0x980] ss:$16 sps:$4 sm:$0xff]   ;;  %v24087_v52 = vld [vmem:[%s36103_s3 + $0x988] ss:$16 sps:$4 sm:$0xff]  }
 0x103   :  { %3894 = vmatmul.mubr.bf16.vlgmr.msra.gmra.mrb[0].mxu0 %v28592_v55  ;;  %4304 = vmatmul.mubr.bf16.vlgmr.msra.gmra.mrb[0].mxu1 %v28592_v55 }
 0x104   :  { %3903 = vmatpush1.bf16.msra.mxu0 %v24012_v54  ;;  %4313 = vmatpush1.bf16.msra.mxu1 %v24015_v56  ;;  %v24095_v54 = vld [vmem:[%s36103_s3 + $0x9ac] ss:$16 sps:$4 sm:$0xff]   ;;  %v24090_v56 = vld [vmem:[%s36103_s3 + $0x9a0] ss:$16 sps:$4 sm:$0xff]  }
 0x105   :  { %3904 = vmatprep.subr.bf16.mxu0 %v24020_v57  ;;  %4314 = vmatprep.subr.bf16.mxu1 %v24023_v58  ;;  %v24093_v57 = vld [vmem:[%s36103_s3 + $0x9a8] ss:$16 sps:$4 sm:$0xff]   ;;  %v24098_v58 = vld [vmem:[%s36103_s3 + $0x9c4] ss:$16 sps:$4 sm:$0xff]  }
 0x106   :  { %3934 = vmatprep.mubr.bf16.mxu0 %v28603_v59  ;;  %4344 = vmatprep.mubr.bf16.mxu1 %v28603_v59 }
 0x108   :  { %3905 = vmatpush1.bf16.msra.mxu0 %v24018_v31  ;;  %4315 = vmatpush1.bf16.msra.mxu1 %v24021_v61  ;;  %v24101_v31 = vld [vmem:[%s36103_s3 + $0x9cc] ss:$16 sps:$4 sm:$0xff]   ;;  %v96_v61 = vcombine.high %v28558_v28, %v28558_v28 }
 0x109   :  { %3906 = vmatprep.subr.bf16.mxu0 %v24026_v62  ;;  %4316 = vmatprep.subr.bf16.mxu1 %v24029_v63  ;;  %v24096_v62 = vld [vmem:[%s36103_s3 + $0x9c0] ss:$16 sps:$4 sm:$0xff]   ;;  %v24099_v63 = vld [vmem:[%s36103_s3 + $0x9c8] ss:$16 sps:$4 sm:$0xff]   ;;  %v24107_v28 = vld [vmem:[%s36103_s3 + $0x9ec] ss:$16 sps:$4 sm:$0xff]  }
 0x10c   :  { %3907 = vmatpush1.bf16.msra.mxu0 %v24024_v0  ;;  %4317 = vmatpush1.bf16.msra.mxu1 %v24027_v1  ;;  %v24104_v0 = vld [vmem:[%s36103_s3 + $0x9e4] ss:$16 sps:$4 sm:$0xff]   ;;  %v28780_v1 = vrot.slane %v96_v61, %v27873_v49  ;;  %v24168_v61 = vld [vmem:[%s36103_s3 + $0xb40] ss:$16 sps:$4 sm:$0xff]  }
 0x10d   :  { %3908 = vmatprep.subr.bf16.mxu0 %v24032_v2  ;;  %4318 = vmatprep.subr.bf16.mxu1 %v24035_v3  ;;  %v24102_v2 = vld [vmem:[%s36103_s3 + $0x9e0] ss:$16 sps:$4 sm:$0xff]   ;;  %v24105_v3 = vld [vmem:[%s36103_s3 + $0x9e8] ss:$16 sps:$4 sm:$0xff]  }
 0x110   :  { %3909 = vmatpush1.bf16.msra.mxu0 %v24030_v4  ;;  %4319 = vmatpush1.bf16.msra.mxu1 %v24033_v5  ;;  %v24110_v4 = vld [vmem:[%s36103_s3 + $0xa04] ss:$16 sps:$4 sm:$0xff]   ;;  %v24113_v5 = vld [vmem:[%s36103_s3 + $0xa0c] ss:$16 sps:$4 sm:$0xff]  }
 0x111   :  { %3910 = vmatprep.subr.bf16.mxu0 %v24038_v6  ;;  %4320 = vmatprep.subr.bf16.mxu1 %v24041_v7  ;;  %v112_v6 = vcombine.high %v28780_v1, %v28780_v1  ;;  %v28798_v7 = vpack.c.bf16 %v28571_v47, %v28571_v47  ;;  %v24119_v47 = vld [vmem:[%s36103_s3 + $0xa2c] ss:$16 sps:$4 sm:$0xff]  }
 0x114   :  { %3911 = vmatpush1.bf16.msra.mxu0 %v24036_v8  ;;  %4321 = vmatpush1.bf16.msra.mxu1 %v24039_v10  ;;  %v24108_v8 = vld [vmem:[%s36103_s3 + $0xa00] ss:$16 sps:$4 sm:$0xff]   ;;  %v24111_v10 = vld [vmem:[%s36103_s3 + $0xa08] ss:$16 sps:$4 sm:$0xff]  }
 0x115   :  { %3912 = vmatprep.subr.bf16.mxu0 %v24044_v11  ;;  %4322 = vmatprep.subr.bf16.mxu1 %v24047_v12  ;;  %v24116_v11 = vld [vmem:[%s36103_s3 + $0xa24] ss:$16 sps:$4 sm:$0xff]   ;;  %v28812_v12 = vpack.c.bf16 %v112_v6, %v112_v6  ;;  %v24183_v6 = vld [vmem:[%s36103_s3 + $0xb88] ss:$16 sps:$4 sm:$0xff]  }
 0x118   :  { %3913 = vmatpush1.bf16.msra.mxu0 %v24042_v13  ;;  %4323 = vmatpush1.bf16.msra.mxu1 %v24045_v14  ;;  %v24114_v13 = vld [vmem:[%s36103_s3 + $0xa20] ss:$16 sps:$4 sm:$0xff]   ;;  %v24117_v14 = vld [vmem:[%s36103_s3 + $0xa28] ss:$16 sps:$4 sm:$0xff]  }
 0x119   :  { %3914 = vmatprep.subr.bf16.mxu0 %v24050_v15  ;;  %4324 = vmatprep.subr.bf16.mxu1 %v24053_v17  ;;  %v24122_v15 = vld [vmem:[%s36103_s3 + $0xa44] ss:$16 sps:$4 sm:$0xff]   ;;  %v24125_v17 = vld [vmem:[%s36103_s3 + $0xa4c] ss:$16 sps:$4 sm:$0xff]  }
 0x11c   :  { %3915 = vmatpush1.bf16.msra.mxu0 %v24048_v18  ;;  %4325 = vmatpush1.bf16.msra.mxu1 %v24051_v19  ;;  %v24120_v18 = vld [vmem:[%s36103_s3 + $0xa40] ss:$16 sps:$4 sm:$0xff]   ;;  %v24123_v19 = vld [vmem:[%s36103_s3 + $0xa48] ss:$16 sps:$4 sm:$0xff]  }
 0x11d   :  { %3916 = vmatprep.subr.bf16.mxu0 %v24056_v21  ;;  %4326 = vmatprep.subr.bf16.mxu1 %v24059_v22  ;;  %v24128_v21 = vld [vmem:[%s36103_s3 + $0xa64] ss:$16 sps:$4 sm:$0xff]   ;;  %v24131_v22 = vld [vmem:[%s36103_s3 + $0xa6c] ss:$16 sps:$4 sm:$0xff]  }
 0x120   :  { %3917 = vmatpush1.bf16.msra.mxu0 %v24054_v23  ;;  %4327 = vmatpush1.bf16.msra.mxu1 %v24057_v25  ;;  %v24126_v23 = vld [vmem:[%s36103_s3 + $0xa60] ss:$16 sps:$4 sm:$0xff]   ;;  %v24129_v25 = vld [vmem:[%s36103_s3 + $0xa68] ss:$16 sps:$4 sm:$0xff]  }
 0x121   :  { %3918 = vmatprep.subr.bf16.mxu0 %v24062_v27  ;;  %4328 = vmatprep.subr.bf16.mxu1 %v24065_v9  ;;  %v24134_v27 = vld [vmem:[%s36103_s3 + $0xa84] ss:$16 sps:$4 sm:$0xff]   ;;  %v24137_v9 = vld [vmem:[%s36103_s3 + $0xa8c] ss:$16 sps:$4 sm:$0xff]  }
 0x124   :  { %3919 = vmatpush1.bf16.msra.mxu0 %v24060_v29  ;;  %4329 = vmatpush1.bf16.msra.mxu1 %v24063_v30  ;;  %v24132_v29 = vld [vmem:[%s36103_s3 + $0xa80] ss:$16 sps:$4 sm:$0xff]   ;;  %v24135_v30 = vld [vmem:[%s36103_s3 + $0xa88] ss:$16 sps:$4 sm:$0xff]  }
 0x125   :  { %3920 = vmatprep.subr.bf16.mxu0 %v24068_v26  ;;  %4330 = vmatprep.subr.bf16.mxu1 %v24071_v32  ;;  %v24140_v26 = vld [vmem:[%s36103_s3 + $0xaa4] ss:$16 sps:$4 sm:$0xff]   ;;  %v24143_v32 = vld [vmem:[%s36103_s3 + $0xaac] ss:$16 sps:$4 sm:$0xff]  }
 0x128   :  { %3921 = vmatpush1.bf16.msra.mxu0 %v24066_v33  ;;  %4331 = vmatpush1.bf16.msra.mxu1 %v24069_v35  ;;  %v24138_v33 = vld [vmem:[%s36103_s3 + $0xaa0] ss:$16 sps:$4 sm:$0xff]   ;;  %v24141_v35 = vld [vmem:[%s36103_s3 + $0xaa8] ss:$16 sps:$4 sm:$0xff]  }
 0x129   :  { %3922 = vmatprep.subr.bf16.mxu0 %v24074_v36  ;;  %4332 = vmatprep.subr.bf16.mxu1 %v24077_v37  ;;  %v24146_v36 = vld [vmem:[%s36103_s3 + $0xac4] ss:$16 sps:$4 sm:$0xff]   ;;  %v24149_v37 = vld [vmem:[%s36103_s3 + $0xacc] ss:$16 sps:$4 sm:$0xff]  }
 0x12c   :  { %3923 = vmatpush1.bf16.msra.mxu0 %v24072_v39  ;;  %4333 = vmatpush1.bf16.msra.mxu1 %v24075_v40  ;;  %v24144_v39 = vld [vmem:[%s36103_s3 + $0xac0] ss:$16 sps:$4 sm:$0xff]   ;;  %v24147_v40 = vld [vmem:[%s36103_s3 + $0xac8] ss:$16 sps:$4 sm:$0xff]  }
 0x12d   :  { %3924 = vmatprep.subr.bf16.mxu0 %v24080_v41  ;;  %4334 = vmatprep.subr.bf16.mxu1 %v24083_v44  ;;  %v24152_v41 = vld [vmem:[%s36103_s3 + $0xae4] ss:$16 sps:$4 sm:$0xff]   ;;  %v24155_v44 = vld [vmem:[%s36103_s3 + $0xaec] ss:$16 sps:$4 sm:$0xff]  }
 0x130   :  { %3925 = vmatpush1.bf16.msra.mxu0 %v24078_v45  ;;  %4335 = vmatpush1.bf16.msra.mxu1 %v24081_v46  ;;  %v24150_v45 = vld [vmem:[%s36103_s3 + $0xae0] ss:$16 sps:$4 sm:$0xff]   ;;  %v24153_v46 = vld [vmem:[%s36103_s3 + $0xae8] ss:$16 sps:$4 sm:$0xff]  }
 0x131   :  { %3926 = vmatprep.subr.bf16.mxu0 %v24086_v48  ;;  %4336 = vmatprep.subr.bf16.mxu1 %v24089_v50  ;;  %v24158_v48 = vld [vmem:[%s36103_s3 + $0xb04] ss:$16 sps:$4 sm:$0xff]   ;;  %v24161_v50 = vld [vmem:[%s36103_s3 + $0xb0c] ss:$16 sps:$4 sm:$0xff]  }
 0x134   :  { %3927 = vmatpush1.bf16.msra.mxu0 %v24084_v51  ;;  %4337 = vmatpush1.bf16.msra.mxu1 %v24087_v52  ;;  %v24156_v51 = vld [vmem:[%s36103_s3 + $0xb00] ss:$16 sps:$4 sm:$0xff]   ;;  %v24159_v52 = vld [vmem:[%s36103_s3 + $0xb08] ss:$16 sps:$4 sm:$0xff]  }
 0x135   :  { %3928 = vmatprep.subr.bf16.mxu0 %v24092_v53  ;;  %4338 = vmatprep.subr.bf16.mxu1 %v24095_v54  ;;  %v24164_v53 = vld [vmem:[%s36103_s3 + $0xb24] ss:$16 sps:$4 sm:$0xff]   ;;  %v24167_v54 = vld [vmem:[%s36103_s3 + $0xb2c] ss:$16 sps:$4 sm:$0xff]  }
 0x138   :  { %3929 = vmatpush1.bf16.msra.mxu0 %v24090_v56  ;;  %4339 = vmatpush1.bf16.msra.mxu1 %v24093_v57  ;;  %v24162_v56 = vld [vmem:[%s36103_s3 + $0xb20] ss:$16 sps:$4 sm:$0xff]   ;;  %v24165_v57 = vld [vmem:[%s36103_s3 + $0xb28] ss:$16 sps:$4 sm:$0xff]  }
 0x139   :  { %3930 = vmatprep.subr.bf16.mxu0 %v24098_v58  ;;  %4340 = vmatprep.subr.bf16.mxu1 %v24101_v31  ;;  %v24170_v58 = vld [vmem:[%s36103_s3 + $0xb44] ss:$16 sps:$4 sm:$0xff]   ;;  %v24173_v31 = vld [vmem:[%s36103_s3 + $0xb4c] ss:$16 sps:$4 sm:$0xff]  }
 0x13c   :  { %3931 = vmatpush1.bf16.msra.mxu0 %v24096_v62  ;;  %4341 = vmatpush1.bf16.msra.mxu1 %v24099_v63  ;;  %v24171_v62 = vld [vmem:[%s36103_s3 + $0xb48] ss:$16 sps:$4 sm:$0xff]   ;;  %v24176_v63 = vld [vmem:[%s36103_s3 + $0xb64] ss:$16 sps:$4 sm:$0xff]  }
 0x13d   :  { %3932 = vmatprep.subr.bf16.mxu0 %v24104_v0  ;;  %4342 = vmatprep.subr.bf16.mxu1 %v24107_v28  ;;  %v24179_v0 = vld [vmem:[%s36103_s3 + $0xb6c] ss:$16 sps:$4 sm:$0xff]   ;;  %v24174_v28 = vld [vmem:[%s36103_s3 + $0xb60] ss:$16 sps:$4 sm:$0xff]  }
 0x140   :  { %3933 = vmatpush1.bf16.msra.mxu0 %v24102_v2  ;;  %4343 = vmatpush1.bf16.msra.mxu1 %v24105_v3  ;;  %v24177_v2 = vld [vmem:[%s36103_s3 + $0xb68] ss:$16 sps:$4 sm:$0xff]   ;;  %v24182_v3 = vld [vmem:[%s36103_s3 + $0xb84] ss:$16 sps:$4 sm:$0xff]  }
 0x141   :  { %3943 = vmatprep.subr.bf16.mxu0 %v24110_v4  ;;  %4353 = vmatprep.subr.bf16.mxu1 %v24113_v5  ;;  %v24185_v4 = vld [vmem:[%s36103_s3 + $0xb8c] ss:$16 sps:$4 sm:$0xff]   ;;  %v24180_v5 = vld [vmem:[%s36103_s3 + $0xb80] ss:$16 sps:$4 sm:$0xff]  }
 0x143   :  { %3935 = vmatmul.mubr.bf16.vlgmr.msra.gmra.mrb[0].mxu0 %v28798_v7  ;;  %4345 = vmatmul.mubr.bf16.vlgmr.msra.gmra.mrb[0].mxu1 %v28798_v7 }
 0x144   :  { %3944 = vmatpush1.bf16.msra.mxu0 %v24108_v8  ;;  %4354 = vmatpush1.bf16.msra.mxu1 %v24111_v10  ;;  %v24188_v8 = vld [vmem:[%s36103_s3 + $0xba4] ss:$16 sps:$4 sm:$0xff]   ;;  %v24191_v10 = vld [vmem:[%s36103_s3 + $0xbac] ss:$16 sps:$4 sm:$0xff]  }
 0x145   :  { %3945 = vmatprep.subr.bf16.mxu0 %v24116_v11  ;;  %4355 = vmatprep.subr.bf16.mxu1 %v24119_v47  ;;  %v24186_v11 = vld [vmem:[%s36103_s3 + $0xba0] ss:$16 sps:$4 sm:$0xff]   ;;  %v24189_v47 = vld [vmem:[%s36103_s3 + $0xba8] ss:$16 sps:$4 sm:$0xff]  }
 0x146   :  { %3975 = vmatprep.mubr.bf16.mxu0 %v28812_v12  ;;  %4385 = vmatprep.mubr.bf16.mxu1 %v28812_v12 }
 0x148   :  { %3946 = vmatpush1.bf16.msra.mxu0 %v24114_v13  ;;  %4356 = vmatpush1.bf16.msra.mxu1 %v24117_v14  ;;  %v24194_v13 = vld [vmem:[%s36103_s3 + $0xbc4] ss:$16 sps:$4 sm:$0xff]   ;;  %v24197_v14 = vld [vmem:[%s36103_s3 + $0xbcc] ss:$16 sps:$4 sm:$0xff]  }
 0x149   :  { %3947 = vmatprep.subr.bf16.mxu0 %v24122_v15  ;;  %4357 = vmatprep.subr.bf16.mxu1 %v24125_v17  ;;  %v28977_v15 = vld [vmem:[%s36119_s25 + $0x18] sm:$0xff]  ;;  %v24192_v17 = vld [vmem:[%s36103_s3 + $0xbc0] ss:$16 sps:$4 sm:$0xff]  }
 0x14c   :  { %3948 = vmatpush1.bf16.msra.mxu0 %v24120_v18  ;;  %4358 = vmatpush1.bf16.msra.mxu1 %v24123_v19  ;;  %v24195_v18 = vld [vmem:[%s36103_s3 + $0xbc8] ss:$16 sps:$4 sm:$0xff]   ;;  %v24200_v19 = vld [vmem:[%s36103_s3 + $0xbe4] ss:$16 sps:$4 sm:$0xff]  }
 0x14d   :  { %3949 = vmatprep.subr.bf16.mxu0 %v24128_v21  ;;  %4359 = vmatprep.subr.bf16.mxu1 %v24131_v22  ;;  %v24203_v21 = vld [vmem:[%s36103_s3 + $0xbec] ss:$16 sps:$4 sm:$0xff]   ;;  %v28993_v22 = vrot.slane %v28977_v15, %v27873_v49 }
 0x150   :  { %3950 = vmatpush1.bf16.msra.mxu0 %v24126_v23  ;;  %4360 = vmatpush1.bf16.msra.mxu1 %v24129_v25  ;;  %v24198_v23 = vld [vmem:[%s36103_s3 + $0xbe0] ss:$16 sps:$4 sm:$0xff]   ;;  %v24201_v25 = vld [vmem:[%s36103_s3 + $0xbe8] ss:$16 sps:$4 sm:$0xff]  }
 0x151   :  { %3951 = vmatprep.subr.bf16.mxu0 %v24134_v27  ;;  %4361 = vmatprep.subr.bf16.mxu1 %v24137_v9  ;;  %v24207_v27 = vld [vmem:[%s36103_s3 + $0xc04] ss:$16 sps:$4 sm:$0xff]   ;;  %v24210_v9 = vld [vmem:[%s36103_s3 + $0xc0c] ss:$16 sps:$4 sm:$0xff]  }
 0x154   :  { %3952 = vmatpush1.bf16.msra.mxu0 %v24132_v29  ;;  %4362 = vmatpush1.bf16.msra.mxu1 %v24135_v30  ;;  %v128_v29 = vcombine.high %v28993_v22, %v28993_v22  ;;  %v29011_v30 = vpack.c.bf16 %v28780_v1, %v28780_v1  ;;  %v24216_v1 = vld [vmem:[%s36103_s3 + $0xc2c] ss:$16 sps:$4 sm:$0xff]  }
 0x155   :  { %3953 = vmatprep.subr.bf16.mxu0 %v24140_v26  ;;  %4363 = vmatprep.subr.bf16.mxu1 %v24143_v32  ;;  %v24205_v26 = vld [vmem:[%s36103_s3 + $0xc00] ss:$16 sps:$4 sm:$0xff]   ;;  %v24208_v32 = vld [vmem:[%s36103_s3 + $0xc08] ss:$16 sps:$4 sm:$0xff]  }
 0x158   :  { %3954 = vmatpush1.bf16.msra.mxu0 %v24138_v33  ;;  %4364 = vmatpush1.bf16.msra.mxu1 %v24141_v35  ;;  %v24213_v33 = vld [vmem:[%s36103_s3 + $0xc24] ss:$16 sps:$4 sm:$0xff]   ;;  %v29025_v35 = vpack.c.bf16 %v128_v29, %v128_v29 }
 0x159   :  { %3955 = vmatprep.subr.bf16.mxu0 %v24146_v36  ;;  %4365 = vmatprep.subr.bf16.mxu1 %v24149_v37  ;;  %v24211_v36 = vld [vmem:[%s36103_s3 + $0xc20] ss:$16 sps:$4 sm:$0xff]   ;;  %v24214_v37 = vld [vmem:[%s36103_s3 + $0xc28] ss:$16 sps:$4 sm:$0xff]   ;;  %v24279_v29 = vld [vmem:[%s36103_s3 + $0xd84] ss:$16 sps:$4 sm:$0xff]  }
 0x15c   :  { %3956 = vmatpush1.bf16.msra.mxu0 %v24144_v39  ;;  %4366 = vmatpush1.bf16.msra.mxu1 %v24147_v40  ;;  %v24219_v39 = vld [vmem:[%s36103_s3 + $0xc44] ss:$16 sps:$4 sm:$0xff]   ;;  %v24222_v40 = vld [vmem:[%s36103_s3 + $0xc4c] ss:$16 sps:$4 sm:$0xff]  }
 0x15d   :  { %3957 = vmatprep.subr.bf16.mxu0 %v24152_v41  ;;  %4367 = vmatprep.subr.bf16.mxu1 %v24155_v44  ;;  %v24217_v41 = vld [vmem:[%s36103_s3 + $0xc40] ss:$16 sps:$4 sm:$0xff]   ;;  %v24220_v44 = vld [vmem:[%s36103_s3 + $0xc48] ss:$16 sps:$4 sm:$0xff]  }
 0x160   :  { %3958 = vmatpush1.bf16.msra.mxu0 %v24150_v45  ;;  %4368 = vmatpush1.bf16.msra.mxu1 %v24153_v46  ;;  %v24225_v45 = vld [vmem:[%s36103_s3 + $0xc64] ss:$16 sps:$4 sm:$0xff]   ;;  %v24228_v46 = vld [vmem:[%s36103_s3 + $0xc6c] ss:$16 sps:$4 sm:$0xff]  }
 0x161   :  { %3959 = vmatprep.subr.bf16.mxu0 %v24158_v48  ;;  %4369 = vmatprep.subr.bf16.mxu1 %v24161_v50  ;;  %v24223_v48 = vld [vmem:[%s36103_s3 + $0xc60] ss:$16 sps:$4 sm:$0xff]   ;;  %v24226_v50 = vld [vmem:[%s36103_s3 + $0xc68] ss:$16 sps:$4 sm:$0xff]  }
 0x164   :  { %3960 = vmatpush1.bf16.msra.mxu0 %v24156_v51  ;;  %4370 = vmatpush1.bf16.msra.mxu1 %v24159_v52  ;;  %v24231_v51 = vld [vmem:[%s36103_s3 + $0xc84] ss:$16 sps:$4 sm:$0xff]   ;;  %v24234_v52 = vld [vmem:[%s36103_s3 + $0xc8c] ss:$16 sps:$4 sm:$0xff]  }
 0x165   :  { %3961 = vmatprep.subr.bf16.mxu0 %v24164_v53  ;;  %4371 = vmatprep.subr.bf16.mxu1 %v24167_v54  ;;  %v24229_v53 = vld [vmem:[%s36103_s3 + $0xc80] ss:$16 sps:$4 sm:$0xff]   ;;  %v24232_v54 = vld [vmem:[%s36103_s3 + $0xc88] ss:$16 sps:$4 sm:$0xff]  }
 0x168   :  { %3962 = vmatpush1.bf16.msra.mxu0 %v24162_v56  ;;  %4372 = vmatpush1.bf16.msra.mxu1 %v24165_v57  ;;  %v24237_v56 = vld [vmem:[%s36103_s3 + $0xca4] ss:$16 sps:$4 sm:$0xff]   ;;  %v24240_v57 = vld [vmem:[%s36103_s3 + $0xcac] ss:$16 sps:$4 sm:$0xff]  }
 0x169   :  { %3963 = vmatprep.subr.bf16.mxu0 %v24170_v58  ;;  %4373 = vmatprep.subr.bf16.mxu1 %v24173_v31  ;;  %v24235_v58 = vld [vmem:[%s36103_s3 + $0xca0] ss:$16 sps:$4 sm:$0xff]   ;;  %v24238_v31 = vld [vmem:[%s36103_s3 + $0xca8] ss:$16 sps:$4 sm:$0xff]  }
 0x16c   :  { %3964 = vmatpush1.bf16.msra.mxu0 %v24168_v61  ;;  %4374 = vmatpush1.bf16.msra.mxu1 %v24171_v62  ;;  %v24243_v61 = vld [vmem:[%s36103_s3 + $0xcc4] ss:$16 sps:$4 sm:$0xff]   ;;  %v24246_v62 = vld [vmem:[%s36103_s3 + $0xccc] ss:$16 sps:$4 sm:$0xff]  }
 0x16d   :  { %3965 = vmatprep.subr.bf16.mxu0 %v24176_v63  ;;  %4375 = vmatprep.subr.bf16.mxu1 %v24179_v0  ;;  %v24241_v63 = vld [vmem:[%s36103_s3 + $0xcc0] ss:$16 sps:$4 sm:$0xff]   ;;  %v24244_v0 = vld [vmem:[%s36103_s3 + $0xcc8] ss:$16 sps:$4 sm:$0xff]  }
 0x170   :  { %3966 = vmatpush1.bf16.msra.mxu0 %v24174_v28  ;;  %4376 = vmatpush1.bf16.msra.mxu1 %v24177_v2  ;;  %v24249_v28 = vld [vmem:[%s36103_s3 + $0xce4] ss:$16 sps:$4 sm:$0xff]   ;;  %v24252_v2 = vld [vmem:[%s36103_s3 + $0xcec] ss:$16 sps:$4 sm:$0xff]  }
 0x171   :  { %3967 = vmatprep.subr.bf16.mxu0 %v24182_v3  ;;  %4377 = vmatprep.subr.bf16.mxu1 %v24185_v4  ;;  %v24247_v3 = vld [vmem:[%s36103_s3 + $0xce0] ss:$16 sps:$4 sm:$0xff]   ;;  %v24250_v4 = vld [vmem:[%s36103_s3 + $0xce8] ss:$16 sps:$4 sm:$0xff]  }
 0x174   :  { %3968 = vmatpush1.bf16.msra.mxu0 %v24180_v5  ;;  %4378 = vmatpush1.bf16.msra.mxu1 %v24183_v6  ;;  %v24255_v5 = vld [vmem:[%s36103_s3 + $0xd04] ss:$16 sps:$4 sm:$0xff]   ;;  %v24258_v6 = vld [vmem:[%s36103_s3 + $0xd0c] ss:$16 sps:$4 sm:$0xff]  }
 0x175   :  { %3969 = vmatprep.subr.bf16.mxu0 %v24188_v8  ;;  %4379 = vmatprep.subr.bf16.mxu1 %v24191_v10  ;;  %v24253_v8 = vld [vmem:[%s36103_s3 + $0xd00] ss:$16 sps:$4 sm:$0xff]   ;;  %v24256_v10 = vld [vmem:[%s36103_s3 + $0xd08] ss:$16 sps:$4 sm:$0xff]  }
 0x178   :  { %3970 = vmatpush1.bf16.msra.mxu0 %v24186_v11  ;;  %4380 = vmatpush1.bf16.msra.mxu1 %v24189_v47  ;;  %v24261_v11 = vld [vmem:[%s36103_s3 + $0xd24] ss:$16 sps:$4 sm:$0xff]   ;;  %v24264_v47 = vld [vmem:[%s36103_s3 + $0xd2c] ss:$16 sps:$4 sm:$0xff]  }
 0x179   :  { %3971 = vmatprep.subr.bf16.mxu0 %v24194_v13  ;;  %4381 = vmatprep.subr.bf16.mxu1 %v24197_v14  ;;  %v24259_v13 = vld [vmem:[%s36103_s3 + $0xd20] ss:$16 sps:$4 sm:$0xff]   ;;  %v24262_v14 = vld [vmem:[%s36103_s3 + $0xd28] ss:$16 sps:$4 sm:$0xff]  }
 0x17c   :  { %3972 = vmatpush1.bf16.msra.mxu0 %v24192_v17  ;;  %4382 = vmatpush1.bf16.msra.mxu1 %v24195_v18  ;;  %v24267_v17 = vld [vmem:[%s36103_s3 + $0xd44] ss:$16 sps:$4 sm:$0xff]   ;;  %v24270_v18 = vld [vmem:[%s36103_s3 + $0xd4c] ss:$16 sps:$4 sm:$0xff]  }
 0x17d   :  { %3973 = vmatprep.subr.bf16.mxu0 %v24200_v19  ;;  %4383 = vmatprep.subr.bf16.mxu1 %v24203_v21  ;;  %v24265_v19 = vld [vmem:[%s36103_s3 + $0xd40] ss:$16 sps:$4 sm:$0xff]   ;;  %v24268_v21 = vld [vmem:[%s36103_s3 + $0xd48] ss:$16 sps:$4 sm:$0xff]  }
 0x180   :  { %3974 = vmatpush1.bf16.msra.mxu0 %v24198_v23  ;;  %4384 = vmatpush1.bf16.msra.mxu1 %v24201_v25  ;;  %v24273_v23 = vld [vmem:[%s36103_s3 + $0xd64] ss:$16 sps:$4 sm:$0xff]   ;;  %v24276_v25 = vld [vmem:[%s36103_s3 + $0xd6c] ss:$16 sps:$4 sm:$0xff]  }
 0x181   :  { %3984 = vmatprep.subr.bf16.mxu0 %v24207_v27  ;;  %4394 = vmatprep.subr.bf16.mxu1 %v24210_v9  ;;  %v24271_v27 = vld [vmem:[%s36103_s3 + $0xd60] ss:$16 sps:$4 sm:$0xff]   ;;  %v24274_v9 = vld [vmem:[%s36103_s3 + $0xd68] ss:$16 sps:$4 sm:$0xff]  }
 0x183   :  { %3976 = vmatmul.mubr.bf16.vlgmr.msra.gmra.mrb[0].mxu0 %v29011_v30  ;;  %4386 = vmatmul.mubr.bf16.vlgmr.msra.gmra.mrb[0].mxu1 %v29011_v30 }
 0x184   :  { %3985 = vmatpush1.bf16.msra.mxu0 %v24205_v26  ;;  %4395 = vmatpush1.bf16.msra.mxu1 %v24208_v32  ;;  %v24282_v26 = vld [vmem:[%s36103_s3 + $0xd8c] ss:$16 sps:$4 sm:$0xff]   ;;  %v24277_v32 = vld [vmem:[%s36103_s3 + $0xd80] ss:$16 sps:$4 sm:$0xff]  }
 0x185   :  { %3986 = vmatprep.subr.bf16.mxu0 %v24213_v33  ;;  %4396 = vmatprep.subr.bf16.mxu1 %v24216_v1  ;;  %v24280_v33 = vld [vmem:[%s36103_s3 + $0xd88] ss:$16 sps:$4 sm:$0xff]   ;;  %v24285_v1 = vld [vmem:[%s36103_s3 + $0xda4] ss:$16 sps:$4 sm:$0xff]  }
 0x186   :  { %4016 = vmatprep.mubr.bf16.mxu0 %v29025_v35  ;;  %4426 = vmatprep.mubr.bf16.mxu1 %v29025_v35 }
 0x188   :  { %3987 = vmatpush1.bf16.msra.mxu0 %v24211_v36  ;;  %4397 = vmatpush1.bf16.msra.mxu1 %v24214_v37  ;;  %v24288_v36 = vld [vmem:[%s36103_s3 + $0xdac] ss:$16 sps:$4 sm:$0xff]   ;;  %v24283_v37 = vld [vmem:[%s36103_s3 + $0xda0] ss:$16 sps:$4 sm:$0xff]  }
 0x189   :  { %3988 = vmatprep.subr.bf16.mxu0 %v24219_v39  ;;  %4398 = vmatprep.subr.bf16.mxu1 %v24222_v40  ;;  %v24286_v39 = vld [vmem:[%s36103_s3 + $0xda8] ss:$16 sps:$4 sm:$0xff]   ;;  %v24291_v40 = vld [vmem:[%s36103_s3 + $0xdc4] ss:$16 sps:$4 sm:$0xff]  }
 0x18c   :  { %3989 = vmatpush1.bf16.msra.mxu0 %v24217_v41  ;;  %4399 = vmatpush1.bf16.msra.mxu1 %v24220_v44  ;;  %v24294_v41 = vld [vmem:[%s36103_s3 + $0xdcc] ss:$16 sps:$4 sm:$0xff]   ;;  %v113_v44 = vcombine.high %v28977_v15, %v28977_v15 }
 0x18d   :  { %3990 = vmatprep.subr.bf16.mxu0 %v24225_v45  ;;  %4400 = vmatprep.subr.bf16.mxu1 %v24228_v46  ;;  %v24289_v45 = vld [vmem:[%s36103_s3 + $0xdc0] ss:$16 sps:$4 sm:$0xff]   ;;  %v24292_v46 = vld [vmem:[%s36103_s3 + $0xdc8] ss:$16 sps:$4 sm:$0xff]   ;;  %v24300_v15 = vld [vmem:[%s36103_s3 + $0xdec] ss:$16 sps:$4 sm:$0xff]  }
 0x190   :  { %3991 = vmatpush1.bf16.msra.mxu0 %v24223_v48  ;;  %4401 = vmatpush1.bf16.msra.mxu1 %v24226_v50  ;;  %v24297_v48 = vld [vmem:[%s36103_s3 + $0xde4] ss:$16 sps:$4 sm:$0xff]   ;;  %v29202_v50 = vrot.slane %v113_v44, %v27873_v49  ;;  %v24355_v44 = vld [vmem:[%s36103_s3 + $0xf20] ss:$16 sps:$4 sm:$0xff]  }
 0x191   :  { %3992 = vmatprep.subr.bf16.mxu0 %v24231_v51  ;;  %4402 = vmatprep.subr.bf16.mxu1 %v24234_v52  ;;  %v24295_v51 = vld [vmem:[%s36103_s3 + $0xde0] ss:$16 sps:$4 sm:$0xff]   ;;  %v24298_v52 = vld [vmem:[%s36103_s3 + $0xde8] ss:$16 sps:$4 sm:$0xff]  }
 0x194   :  { %3993 = vmatpush1.bf16.msra.mxu0 %v24229_v53  ;;  %4403 = vmatpush1.bf16.msra.mxu1 %v24232_v54  ;;  %v24303_v53 = vld [vmem:[%s36103_s3 + $0xe04] ss:$16 sps:$4 sm:$0xff]   ;;  %v24306_v54 = vld [vmem:[%s36103_s3 + $0xe0c] ss:$16 sps:$4 sm:$0xff]  }
 0x195   :  { %3994 = vmatprep.subr.bf16.mxu0 %v24237_v56  ;;  %4404 = vmatprep.subr.bf16.mxu1 %v24240_v57  ;;  %v24301_v56 = vld [vmem:[%s36103_s3 + $0xe00] ss:$16 sps:$4 sm:$0xff]   ;;  %v24304_v57 = vld [vmem:[%s36103_s3 + $0xe08] ss:$16 sps:$4 sm:$0xff]  }
 0x198   :  { %3995 = vmatpush1.bf16.msra.mxu0 %v24235_v58  ;;  %4405 = vmatpush1.bf16.msra.mxu1 %v24238_v31  ;;  %v129_v58 = vcombine.high %v29202_v50, %v29202_v50  ;;  %v29226_v31 = vpack.c.bf16 %v28993_v22, %v28993_v22  ;;  %v24307_v22 = vld [vmem:[%s36103_s3 + $0xe20] ss:$16 sps:$4 sm:$0xff]  }
 0x199   :  { %3996 = vmatprep.subr.bf16.mxu0 %v24243_v61  ;;  %4406 = vmatprep.subr.bf16.mxu1 %v24246_v62  ;;  %v24309_v61 = vld [vmem:[%s36103_s3 + $0xe24] ss:$16 sps:$4 sm:$0xff]   ;;  %v24312_v62 = vld [vmem:[%s36103_s3 + $0xe2c] ss:$16 sps:$4 sm:$0xff]  }
 0x19c   :  { %3997 = vmatpush1.bf16.msra.mxu0 %v24241_v63  ;;  %4407 = vmatpush1.bf16.msra.mxu1 %v24244_v0  ;;  %v29234_v63 = vpack.c.bf16 %v129_v58, %v129_v58  ;;  %v24310_v0 = vld [vmem:[%s36103_s3 + $0xe28] ss:$16 sps:$4 sm:$0xff]   ;;  %v24378_v58 = vld [vmem:[%s36103_s3 + $0xf8c] ss:$16 sps:$4 sm:$0xff]  }
 0x19d   :  { %3998 = vmatprep.subr.bf16.mxu0 %v24249_v28  ;;  %4408 = vmatprep.subr.bf16.mxu1 %v24252_v2  ;;  %v24315_v28 = vld [vmem:[%s36103_s3 + $0xe44] ss:$16 sps:$4 sm:$0xff]   ;;  %v24318_v2 = vld [vmem:[%s36103_s3 + $0xe4c] ss:$16 sps:$4 sm:$0xff]  }
 0x1a0   :  { %3999 = vmatpush1.bf16.msra.mxu0 %v24247_v3  ;;  %4409 = vmatpush1.bf16.msra.mxu1 %v24250_v4  ;;  %v24313_v3 = vld [vmem:[%s36103_s3 + $0xe40] ss:$16 sps:$4 sm:$0xff]   ;;  %v24316_v4 = vld [vmem:[%s36103_s3 + $0xe48] ss:$16 sps:$4 sm:$0xff]  }
 0x1a1   :  { %4000 = vmatprep.subr.bf16.mxu0 %v24255_v5  ;;  %4410 = vmatprep.subr.bf16.mxu1 %v24258_v6  ;;  %v24321_v5 = vld [vmem:[%s36103_s3 + $0xe64] ss:$16 sps:$4 sm:$0xff]   ;;  %v24324_v6 = vld [vmem:[%s36103_s3 + $0xe6c] ss:$16 sps:$4 sm:$0xff]  }
 0x1a4   :  { %4001 = vmatpush1.bf16.msra.mxu0 %v24253_v8  ;;  %4411 = vmatpush1.bf16.msra.mxu1 %v24256_v10  ;;  %v24319_v8 = vld [vmem:[%s36103_s3 + $0xe60] ss:$16 sps:$4 sm:$0xff]   ;;  %v24322_v10 = vld [vmem:[%s36103_s3 + $0xe68] ss:$16 sps:$4 sm:$0xff]  }
 0x1a5   :  { %4002 = vmatprep.subr.bf16.mxu0 %v24261_v11  ;;  %4412 = vmatprep.subr.bf16.mxu1 %v24264_v47  ;;  %v24327_v11 = vld [vmem:[%s36103_s3 + $0xe84] ss:$16 sps:$4 sm:$0xff]   ;;  %v24330_v47 = vld [vmem:[%s36103_s3 + $0xe8c] ss:$16 sps:$4 sm:$0xff]  }
 0x1a8   :  { %4003 = vmatpush1.bf16.msra.mxu0 %v24259_v13  ;;  %4413 = vmatpush1.bf16.msra.mxu1 %v24262_v14  ;;  %v24325_v13 = vld [vmem:[%s36103_s3 + $0xe80] ss:$16 sps:$4 sm:$0xff]   ;;  %v24328_v14 = vld [vmem:[%s36103_s3 + $0xe88] ss:$16 sps:$4 sm:$0xff]  }
 0x1a9   :  { %4004 = vmatprep.subr.bf16.mxu0 %v24267_v17  ;;  %4414 = vmatprep.subr.bf16.mxu1 %v24270_v18  ;;  %v24333_v17 = vld [vmem:[%s36103_s3 + $0xea4] ss:$16 sps:$4 sm:$0xff]   ;;  %v24336_v18 = vld [vmem:[%s36103_s3 + $0xeac] ss:$16 sps:$4 sm:$0xff]  }
 0x1ac   :  { %4005 = vmatpush1.bf16.msra.mxu0 %v24265_v19  ;;  %4415 = vmatpush1.bf16.msra.mxu1 %v24268_v21  ;;  %v24331_v19 = vld [vmem:[%s36103_s3 + $0xea0] ss:$16 sps:$4 sm:$0xff]   ;;  %v24334_v21 = vld [vmem:[%s36103_s3 + $0xea8] ss:$16 sps:$4 sm:$0xff]  }
 0x1ad   :  { %4006 = vmatprep.subr.bf16.mxu0 %v24273_v23  ;;  %4416 = vmatprep.subr.bf16.mxu1 %v24276_v25  ;;  %v24339_v23 = vld [vmem:[%s36103_s3 + $0xec4] ss:$16 sps:$4 sm:$0xff]   ;;  %v24342_v25 = vld [vmem:[%s36103_s3 + $0xecc] ss:$16 sps:$4 sm:$0xff]  }
 0x1b0   :  { %4007 = vmatpush1.bf16.msra.mxu0 %v24271_v27  ;;  %4417 = vmatpush1.bf16.msra.mxu1 %v24274_v9  ;;  %v24337_v27 = vld [vmem:[%s36103_s3 + $0xec0] ss:$16 sps:$4 sm:$0xff]   ;;  %v24340_v9 = vld [vmem:[%s36103_s3 + $0xec8] ss:$16 sps:$4 sm:$0xff]  }
 0x1b1   :  { %4008 = vmatprep.subr.bf16.mxu0 %v24279_v29  ;;  %4418 = vmatprep.subr.bf16.mxu1 %v24282_v26  ;;  %v24345_v29 = vld [vmem:[%s36103_s3 + $0xee4] ss:$16 sps:$4 sm:$0xff]   ;;  %v24348_v26 = vld [vmem:[%s36103_s3 + $0xeec] ss:$16 sps:$4 sm:$0xff]  }
 0x1b4   :  { %4009 = vmatpush1.bf16.msra.mxu0 %v24277_v32  ;;  %4419 = vmatpush1.bf16.msra.mxu1 %v24280_v33  ;;  %v24343_v32 = vld [vmem:[%s36103_s3 + $0xee0] ss:$16 sps:$4 sm:$0xff]   ;;  %v24346_v33 = vld [vmem:[%s36103_s3 + $0xee8] ss:$16 sps:$4 sm:$0xff]  }
 0x1b5   :  { %4010 = vmatprep.subr.bf16.mxu0 %v24285_v1  ;;  %4420 = vmatprep.subr.bf16.mxu1 %v24288_v36  ;;  %v24351_v1 = vld [vmem:[%s36103_s3 + $0xf04] ss:$16 sps:$4 sm:$0xff]   ;;  %v24354_v36 = vld [vmem:[%s36103_s3 + $0xf0c] ss:$16 sps:$4 sm:$0xff]  }
 0x1b8   :  { %4011 = vmatpush1.bf16.msra.mxu0 %v24283_v37  ;;  %4421 = vmatpush1.bf16.msra.mxu1 %v24286_v39  ;;  %v24349_v37 = vld [vmem:[%s36103_s3 + $0xf00] ss:$16 sps:$4 sm:$0xff]   ;;  %v24352_v39 = vld [vmem:[%s36103_s3 + $0xf08] ss:$16 sps:$4 sm:$0xff]  }
 0x1b9   :  { %4012 = vmatprep.subr.bf16.mxu0 %v24291_v40  ;;  %4422 = vmatprep.subr.bf16.mxu1 %v24294_v41  ;;  %v24357_v40 = vld [vmem:[%s36103_s3 + $0xf24] ss:$16 sps:$4 sm:$0xff]   ;;  %v24360_v41 = vld [vmem:[%s36103_s3 + $0xf2c] ss:$16 sps:$4 sm:$0xff]  }
 0x1bc   :  { %4013 = vmatpush1.bf16.msra.mxu0 %v24289_v45  ;;  %4423 = vmatpush1.bf16.msra.mxu1 %v24292_v46  ;;  %v24358_v45 = vld [vmem:[%s36103_s3 + $0xf28] ss:$16 sps:$4 sm:$0xff]   ;;  %v24363_v46 = vld [vmem:[%s36103_s3 + $0xf44] ss:$16 sps:$4 sm:$0xff]  }
 0x1bd   :  { %4014 = vmatprep.subr.bf16.mxu0 %v24297_v48  ;;  %4424 = vmatprep.subr.bf16.mxu1 %v24300_v15  ;;  %v24366_v48 = vld [vmem:[%s36103_s3 + $0xf4c] ss:$16 sps:$4 sm:$0xff]   ;;  %v24361_v15 = vld [vmem:[%s36103_s3 + $0xf40] ss:$16 sps:$4 sm:$0xff]  }
 0x1c0   :  { %4015 = vmatpush1.bf16.msra.mxu0 %v24295_v51  ;;  %4425 = vmatpush1.bf16.msra.mxu1 %v24298_v52  ;;  %v24364_v51 = vld [vmem:[%s36103_s3 + $0xf48] ss:$16 sps:$4 sm:$0xff]   ;;  %v24369_v52 = vld [vmem:[%s36103_s3 + $0xf64] ss:$16 sps:$4 sm:$0xff]  }
 0x1c1   :  { %4025 = vmatprep.subr.bf16.mxu0 %v24303_v53  ;;  %4435 = vmatprep.subr.bf16.mxu1 %v24306_v54  ;;  %v24372_v53 = vld [vmem:[%s36103_s3 + $0xf6c] ss:$16 sps:$4 sm:$0xff]   ;;  %v24367_v54 = vld [vmem:[%s36103_s3 + $0xf60] ss:$16 sps:$4 sm:$0xff]  }
 0x1c3   :  { %4017 = vmatmul.mubr.bf16.vlgmr.msra.gmra.mrb[0].mxu0 %v29226_v31  ;;  %4427 = vmatmul.mubr.bf16.vlgmr.msra.gmra.mrb[0].mxu1 %v29226_v31 }
 0x1c4   :  { %4026 = vmatpush1.bf16.msra.mxu0 %v24301_v56  ;;  %4436 = vmatpush1.bf16.msra.mxu1 %v24304_v57  ;;  %v24370_v56 = vld [vmem:[%s36103_s3 + $0xf68] ss:$16 sps:$4 sm:$0xff]   ;;  %v24375_v57 = vld [vmem:[%s36103_s3 + $0xf84] ss:$16 sps:$4 sm:$0xff]  }
 0x1c5   :  { %4027 = vmatprep.subr.bf16.mxu0 %v24309_v61  ;;  %4437 = vmatprep.subr.bf16.mxu1 %v24312_v62  ;;  %v24373_v61 = vld [vmem:[%s36103_s3 + $0xf80] ss:$16 sps:$4 sm:$0xff]   ;;  %v24376_v62 = vld [vmem:[%s36103_s3 + $0xf88] ss:$16 sps:$4 sm:$0xff]  }
 0x1c6   :  { %4057 = vmatprep.mubr.bf16.mxu0 %v29234_v63  ;;  %4467 = vmatprep.mubr.bf16.mxu1 %v29234_v63 }
 0x1c8   :  { %4028 = vmatpush1.bf16.msra.mxu0 %v24307_v22  ;;  %4438 = vmatpush1.bf16.msra.mxu1 %v24310_v0  ;;  %v24381_v22 = vld [vmem:[%s36103_s3 + $0xfa4] ss:$16 sps:$4 sm:$0xff]   ;;  %v24384_v0 = vld [vmem:[%s36103_s3 + $0xfac] ss:$16 sps:$4 sm:$0xff]  }
 0x1c9   :  { %4029 = vmatprep.subr.bf16.mxu0 %v24315_v28  ;;  %4439 = vmatprep.subr.bf16.mxu1 %v24318_v2  ;;  %v24379_v28 = vld [vmem:[%s36103_s3 + $0xfa0] ss:$16 sps:$4 sm:$0xff]   ;;  %v24382_v2 = vld [vmem:[%s36103_s3 + $0xfa8] ss:$16 sps:$4 sm:$0xff]  }
 0x1cc   :  { %4030 = vmatpush1.bf16.msra.mxu0 %v24313_v3  ;;  %4440 = vmatpush1.bf16.msra.mxu1 %v24316_v4  ;;  %v24387_v3 = vld [vmem:[%s36103_s3 + $0xfc4] ss:$16 sps:$4 sm:$0xff]   ;;  %v24390_v4 = vld [vmem:[%s36103_s3 + $0xfcc] ss:$16 sps:$4 sm:$0xff]  }
 0x1cd   :  { %4031 = vmatprep.subr.bf16.mxu0 %v24321_v5  ;;  %4441 = vmatprep.subr.bf16.mxu1 %v24324_v6  ;;  %v29399_v5 = vld [vmem:[%s36119_s25 + $0x20] sm:$0x3f] }
 0x1ce   :  { %v24385_v6 = vld [vmem:[%s36103_s3 + $0xfc0] ss:$16 sps:$4 sm:$0xff]  }
 0x1d0   :  { %4032 = vmatpush1.bf16.msra.mxu0 %v24319_v8  ;;  %4442 = vmatpush1.bf16.msra.mxu1 %v24322_v10  ;;  %v24388_v8 = vld [vmem:[%s36103_s3 + $0xfc8] ss:$16 sps:$4 sm:$0xff]   ;;  %v24393_v10 = vld [vmem:[%s36103_s3 + $0xfe4] ss:$16 sps:$4 sm:$0xff]  }
 0x1d1   :  { %4033 = vmatprep.subr.bf16.mxu0 %v24327_v11  ;;  %4443 = vmatprep.subr.bf16.mxu1 %v24330_v47  ;;  %v24396_v11 = vld [vmem:[%s36103_s3 + $0xfec] ss:$16 sps:$4 sm:$0xff]   ;;  %v24391_v47 = vld [vmem:[%s36103_s3 + $0xfe0] ss:$16 sps:$4 sm:$0xff]  }
 0x1d4   :  { %4034 = vmatpush1.bf16.msra.mxu0 %v24325_v13  ;;  %4444 = vmatpush1.bf16.msra.mxu1 %v24328_v14  ;;  %v24394_v13 = vld [vmem:[%s36103_s3 + $0xfe8] ss:$16 sps:$4 sm:$0xff]   ;;  %v29421_v14 = vrot.slane %v29399_v5, %v27873_v49 }
 0x1d5   :  { %4035 = vmatprep.subr.bf16.mxu0 %v24333_v17  ;;  %4445 = vmatprep.subr.bf16.mxu1 %v24336_v18  ;;  %v24400_v17 = vld [vmem:[%s36103_s3 + $0x1004] ss:$16 sps:$4 sm:$0xff]   ;;  %v24403_v18 = vld [vmem:[%s36103_s3 + $0x100c] ss:$16 sps:$4 sm:$0xff]  }
 0x1d8   :  { %4036 = vmatpush1.bf16.msra.mxu0 %v24331_v19  ;;  %4446 = vmatpush1.bf16.msra.mxu1 %v24334_v21  ;;  %v24398_v19 = vld [vmem:[%s36103_s3 + $0x1000] ss:$16 sps:$4 sm:$0xff]   ;;  %v24401_v21 = vld [vmem:[%s36103_s3 + $0x1008] ss:$16 sps:$4 sm:$0xff]  }
 0x1d9   :  { %4037 = vmatprep.subr.bf16.mxu0 %v24339_v23  ;;  %4447 = vmatprep.subr.bf16.mxu1 %v24342_v25  ;;  %v145_v23 = vcombine.high %v29421_v14, %v29421_v14  ;;  %v29439_v25 = vpack.c.bf16 %v29202_v50, %v29202_v50  ;;  %v24407_v50 = vld [vmem:[%s36103_s3 + $0x1028] ss:$16 sps:$4 sm:$0xff]  }
 0x1dc   :  { %4038 = vmatpush1.bf16.msra.mxu0 %v24337_v27  ;;  %4448 = vmatpush1.bf16.msra.mxu1 %v24340_v9  ;;  %v24406_v27 = vld [vmem:[%s36103_s3 + $0x1024] ss:$16 sps:$4 sm:$0xff]   ;;  %v24409_v9 = vld [vmem:[%s36103_s3 + $0x102c] ss:$16 sps:$4 sm:$0xff]  }
 0x1dd   :  { %4039 = vmatprep.subr.bf16.mxu0 %v24345_v29  ;;  %4449 = vmatprep.subr.bf16.mxu1 %v24348_v26  ;;  %v24404_v29 = vld [vmem:[%s36103_s3 + $0x1020] ss:$16 sps:$4 sm:$0xff]   ;;  %v29453_v26 = vpack.c.bf16 %v145_v23, %v145_v23 }
 0x1de   :  { %v24464_v23 = vld [vmem:[%s36103_s3 + $0x1160] ss:$16 sps:$4 sm:$0xff]  }
 0x1e0   :  { %4040 = vmatpush1.bf16.msra.mxu0 %v24343_v32  ;;  %4450 = vmatpush1.bf16.msra.mxu1 %v24346_v33  ;;  %v24412_v32 = vld [vmem:[%s36103_s3 + $0x1044] ss:$16 sps:$4 sm:$0xff]   ;;  %v24415_v33 = vld [vmem:[%s36103_s3 + $0x104c] ss:$16 sps:$4 sm:$0xff]  }
 0x1e1   :  { %4041 = vmatprep.subr.bf16.mxu0 %v24351_v1  ;;  %4451 = vmatprep.subr.bf16.mxu1 %v24354_v36  ;;  %v24410_v1 = vld [vmem:[%s36103_s3 + $0x1040] ss:$16 sps:$4 sm:$0xff]   ;;  %v24413_v36 = vld [vmem:[%s36103_s3 + $0x1048] ss:$16 sps:$4 sm:$0xff]  }
 0x1e4   :  { %4042 = vmatpush1.bf16.msra.mxu0 %v24349_v37  ;;  %4452 = vmatpush1.bf16.msra.mxu1 %v24352_v39  ;;  %v24418_v37 = vld [vmem:[%s36103_s3 + $0x1064] ss:$16 sps:$4 sm:$0xff]   ;;  %v24421_v39 = vld [vmem:[%s36103_s3 + $0x106c] ss:$16 sps:$4 sm:$0xff]  }
 0x1e5   :  { %4043 = vmatprep.subr.bf16.mxu0 %v24357_v40  ;;  %4453 = vmatprep.subr.bf16.mxu1 %v24360_v41  ;;  %v24416_v40 = vld [vmem:[%s36103_s3 + $0x1060] ss:$16 sps:$4 sm:$0xff]   ;;  %v24419_v41 = vld [vmem:[%s36103_s3 + $0x1068] ss:$16 sps:$4 sm:$0xff]  }
 0x1e8   :  { %4044 = vmatpush1.bf16.msra.mxu0 %v24355_v44  ;;  %4454 = vmatpush1.bf16.msra.mxu1 %v24358_v45  ;;  %v24424_v44 = vld [vmem:[%s36103_s3 + $0x1084] ss:$16 sps:$4 sm:$0xff]   ;;  %v24427_v45 = vld [vmem:[%s36103_s3 + $0x108c] ss:$16 sps:$4 sm:$0xff]  }
 0x1e9   :  { %4045 = vmatprep.subr.bf16.mxu0 %v24363_v46  ;;  %4455 = vmatprep.subr.bf16.mxu1 %v24366_v48  ;;  %v24422_v46 = vld [vmem:[%s36103_s3 + $0x1080] ss:$16 sps:$4 sm:$0xff]   ;;  %v24425_v48 = vld [vmem:[%s36103_s3 + $0x1088] ss:$16 sps:$4 sm:$0xff]  }
 0x1ec   :  { %4046 = vmatpush1.bf16.msra.mxu0 %v24361_v15  ;;  %4456 = vmatpush1.bf16.msra.mxu1 %v24364_v51  ;;  %v24430_v15 = vld [vmem:[%s36103_s3 + $0x10a4] ss:$16 sps:$4 sm:$0xff]   ;;  %v24433_v51 = vld [vmem:[%s36103_s3 + $0x10ac] ss:$16 sps:$4 sm:$0xff]  }
 0x1ed   :  { %4047 = vmatprep.subr.bf16.mxu0 %v24369_v52  ;;  %4457 = vmatprep.subr.bf16.mxu1 %v24372_v53  ;;  %v24428_v52 = vld [vmem:[%s36103_s3 + $0x10a0] ss:$16 sps:$4 sm:$0xff]   ;;  %v24431_v53 = vld [vmem:[%s36103_s3 + $0x10a8] ss:$16 sps:$4 sm:$0xff]  }
 0x1f0   :  { %4048 = vmatpush1.bf16.msra.mxu0 %v24367_v54  ;;  %4458 = vmatpush1.bf16.msra.mxu1 %v24370_v56  ;;  %v24436_v54 = vld [vmem:[%s36103_s3 + $0x10c4] ss:$16 sps:$4 sm:$0xff]   ;;  %v24439_v56 = vld [vmem:[%s36103_s3 + $0x10cc] ss:$16 sps:$4 sm:$0xff]  }
 0x1f1   :  { %4049 = vmatprep.subr.bf16.mxu0 %v24375_v57  ;;  %4459 = vmatprep.subr.bf16.mxu1 %v24378_v58  ;;  %v24434_v57 = vld [vmem:[%s36103_s3 + $0x10c0] ss:$16 sps:$4 sm:$0xff]   ;;  %v24437_v58 = vld [vmem:[%s36103_s3 + $0x10c8] ss:$16 sps:$4 sm:$0xff]  }
 0x1f4   :  { %4050 = vmatpush1.bf16.msra.mxu0 %v24373_v61  ;;  %4460 = vmatpush1.bf16.msra.mxu1 %v24376_v62  ;;  %v24442_v61 = vld [vmem:[%s36103_s3 + $0x10e4] ss:$16 sps:$4 sm:$0xff]   ;;  %v24445_v62 = vld [vmem:[%s36103_s3 + $0x10ec] ss:$16 sps:$4 sm:$0xff]  }
 0x1f5   :  { %4051 = vmatprep.subr.bf16.mxu0 %v24381_v22  ;;  %4461 = vmatprep.subr.bf16.mxu1 %v24384_v0  ;;  %v24440_v22 = vld [vmem:[%s36103_s3 + $0x10e0] ss:$16 sps:$4 sm:$0xff]   ;;  %v24443_v0 = vld [vmem:[%s36103_s3 + $0x10e8] ss:$16 sps:$4 sm:$0xff]  }
 0x1f8   :  { %4052 = vmatpush1.bf16.msra.mxu0 %v24379_v28  ;;  %4462 = vmatpush1.bf16.msra.mxu1 %v24382_v2  ;;  %v24448_v28 = vld [vmem:[%s36103_s3 + $0x1104] ss:$16 sps:$4 sm:$0xff]   ;;  %v24451_v2 = vld [vmem:[%s36103_s3 + $0x110c] ss:$16 sps:$4 sm:$0xff]  }
 0x1f9   :  { %4053 = vmatprep.subr.bf16.mxu0 %v24387_v3  ;;  %4463 = vmatprep.subr.bf16.mxu1 %v24390_v4  ;;  %v24446_v3 = vld [vmem:[%s36103_s3 + $0x1100] ss:$16 sps:$4 sm:$0xff]   ;;  %v24449_v4 = vld [vmem:[%s36103_s3 + $0x1108] ss:$16 sps:$4 sm:$0xff]  }
 0x1fc   :  { %4054 = vmatpush1.bf16.msra.mxu0 %v24385_v6  ;;  %4464 = vmatpush1.bf16.msra.mxu1 %v24388_v8  ;;  %v24454_v6 = vld [vmem:[%s36103_s3 + $0x1124] ss:$16 sps:$4 sm:$0xff]   ;;  %v24457_v8 = vld [vmem:[%s36103_s3 + $0x112c] ss:$16 sps:$4 sm:$0xff]  }
 0x1fd   :  { %4055 = vmatprep.subr.bf16.mxu0 %v24393_v10  ;;  %4465 = vmatprep.subr.bf16.mxu1 %v24396_v11  ;;  %v24452_v10 = vld [vmem:[%s36103_s3 + $0x1120] ss:$16 sps:$4 sm:$0xff]   ;;  %v24455_v11 = vld [vmem:[%s36103_s3 + $0x1128] ss:$16 sps:$4 sm:$0xff]  }
 0x200   :  { %4056 = vmatpush1.bf16.msra.mxu0 %v24391_v47  ;;  %4466 = vmatpush1.bf16.msra.mxu1 %v24394_v13  ;;  %v24460_v47 = vld [vmem:[%s36103_s3 + $0x1144] ss:$16 sps:$4 sm:$0xff]   ;;  %v24463_v13 = vld [vmem:[%s36103_s3 + $0x114c] ss:$16 sps:$4 sm:$0xff]  }
 0x201   :  { %4066 = vmatprep.subr.bf16.mxu0 %v24400_v17  ;;  %4476 = vmatprep.subr.bf16.mxu1 %v24403_v18  ;;  %v24458_v17 = vld [vmem:[%s36103_s3 + $0x1140] ss:$16 sps:$4 sm:$0xff]   ;;  %v24461_v18 = vld [vmem:[%s36103_s3 + $0x1148] ss:$16 sps:$4 sm:$0xff]  }
 0x203   :  { %4058 = vmatmul.mubr.bf16.vlgmr.msra.gmra.mrb[0].mxu0 %v29439_v25  ;;  %4468 = vmatmul.mubr.bf16.vlgmr.msra.gmra.mrb[0].mxu1 %v29439_v25 }
 0x204   :  { %4067 = vmatpush1.bf16.msra.mxu0 %v24398_v19  ;;  %4477 = vmatpush1.bf16.msra.mxu1 %v24401_v21  ;;  %v24466_v19 = vld [vmem:[%s36103_s3 + $0x1164] ss:$16 sps:$4 sm:$0xff]   ;;  %v24469_v21 = vld [vmem:[%s36103_s3 + $0x116c] ss:$16 sps:$4 sm:$0xff]  }
 0x205   :  { %4068 = vmatprep.subr.bf16.mxu0 %v24406_v27  ;;  %4478 = vmatprep.subr.bf16.mxu1 %v24409_v9  ;;  %v24467_v27 = vld [vmem:[%s36103_s3 + $0x1168] ss:$16 sps:$4 sm:$0xff]   ;;  %v24472_v9 = vld [vmem:[%s36103_s3 + $0x1184] ss:$16 sps:$4 sm:$0xff]  }
 0x206   :  { %4098 = vmatprep.mubr.bf16.mxu0 %v29453_v26  ;;  %4508 = vmatprep.mubr.bf16.mxu1 %v29453_v26 }
 0x208   :  { %4069 = vmatpush1.bf16.msra.mxu0 %v24404_v29  ;;  %4479 = vmatpush1.bf16.msra.mxu1 %v24407_v50  ;;  %v24475_v29 = vld [vmem:[%s36103_s3 + $0x118c] ss:$16 sps:$4 sm:$0xff]   ;;  %v24470_v50 = vld [vmem:[%s36103_s3 + $0x1180] ss:$16 sps:$4 sm:$0xff]  }
 0x209   :  { %4070 = vmatprep.subr.bf16.mxu0 %v24412_v32  ;;  %4480 = vmatprep.subr.bf16.mxu1 %v24415_v33  ;;  %v24473_v32 = vld [vmem:[%s36103_s3 + $0x1188] ss:$16 sps:$4 sm:$0xff]   ;;  %v24478_v33 = vld [vmem:[%s36103_s3 + $0x11a4] ss:$16 sps:$4 sm:$0xff]  }
 0x20c   :  { %4071 = vmatpush1.bf16.msra.mxu0 %v24410_v1  ;;  %4481 = vmatpush1.bf16.msra.mxu1 %v24413_v36  ;;  %v24481_v1 = vld [vmem:[%s36103_s3 + $0x11ac] ss:$16 sps:$4 sm:$0xff]   ;;  %v24476_v36 = vld [vmem:[%s36103_s3 + $0x11a0] ss:$16 sps:$4 sm:$0xff]  }
 0x20d   :  { %4072 = vmatprep.subr.bf16.mxu0 %v24418_v37  ;;  %4482 = vmatprep.subr.bf16.mxu1 %v24421_v39  ;;  %v24479_v37 = vld [vmem:[%s36103_s3 + $0x11a8] ss:$16 sps:$4 sm:$0xff]   ;;  %v24484_v39 = vld [vmem:[%s36103_s3 + $0x11c4] ss:$16 sps:$4 sm:$0xff]  }
 0x210   :  { %4073 = vmatpush1.bf16.msra.mxu0 %v24416_v40  ;;  %4483 = vmatpush1.bf16.msra.mxu1 %v24419_v41  ;;  %v24487_v40 = vld [vmem:[%s36103_s3 + $0x11cc] ss:$16 sps:$4 sm:$0xff]   ;;  %v24482_v41 = vld [vmem:[%s36103_s3 + $0x11c0] ss:$16 sps:$4 sm:$0xff]  }
 0x211   :  { %4074 = vmatprep.subr.bf16.mxu0 %v24424_v44  ;;  %4484 = vmatprep.subr.bf16.mxu1 %v24427_v45  ;;  %v24485_v44 = vld [vmem:[%s36103_s3 + $0x11c8] ss:$16 sps:$4 sm:$0xff]   ;;  %v24490_v45 = vld [vmem:[%s36103_s3 + $0x11e4] ss:$16 sps:$4 sm:$0xff]  }
 0x214   :  { %4075 = vmatpush1.bf16.msra.mxu0 %v24422_v46  ;;  %4485 = vmatpush1.bf16.msra.mxu1 %v24425_v48  ;;  %v24493_v46 = vld [vmem:[%s36103_s3 + $0x11ec] ss:$16 sps:$4 sm:$0xff]   ;;  %v24488_v48 = vld [vmem:[%s36103_s3 + $0x11e0] ss:$16 sps:$4 sm:$0xff]  }
 0x215   :  { %4076 = vmatprep.subr.bf16.mxu0 %v24430_v15  ;;  %4486 = vmatprep.subr.bf16.mxu1 %v24433_v51  ;;  %v24491_v15 = vld [vmem:[%s36103_s3 + $0x11e8] ss:$16 sps:$4 sm:$0xff]   ;;  %v24497_v51 = vld [vmem:[%s36103_s3 + $0x1204] ss:$16 sps:$4 sm:$0xff]  }
 0x218   :  { %4077 = vmatpush1.bf16.msra.mxu0 %v24428_v52  ;;  %4487 = vmatpush1.bf16.msra.mxu1 %v24431_v53  ;;  %v24500_v52 = vld [vmem:[%s36103_s3 + $0x120c] ss:$16 sps:$4 sm:$0xff]   ;;  %v24495_v53 = vld [vmem:[%s36103_s3 + $0x1200] ss:$16 sps:$4 sm:$0xff]  }
 0x219   :  { %4078 = vmatprep.subr.bf16.mxu0 %v24436_v54  ;;  %4488 = vmatprep.subr.bf16.mxu1 %v24439_v56  ;;  %v24498_v54 = vld [vmem:[%s36103_s3 + $0x1208] ss:$16 sps:$4 sm:$0xff]   ;;  %v29641_v56 = vpack.c.bf16 %v29421_v14, %v29421_v14 }
 0x21a   :  { %v24504_v14 = vld [vmem:[%s36103_s3 + $0x1228] ss:$16 sps:$4 sm:$0xff]  }
 0x21c   :  { %4079 = vmatpush1.bf16.msra.mxu0 %v24434_v57  ;;  %4489 = vmatpush1.bf16.msra.mxu1 %v24437_v58  ;;  %v24503_v57 = vld [vmem:[%s36103_s3 + $0x1224] ss:$16 sps:$4 sm:$0xff]   ;;  %v24506_v58 = vld [vmem:[%s36103_s3 + $0x122c] ss:$16 sps:$4 sm:$0xff]  }
 0x21d   :  { %4080 = vmatprep.subr.bf16.mxu0 %v24442_v61  ;;  %4490 = vmatprep.subr.bf16.mxu1 %v24445_v62  ;;  %v24501_v61 = vld [vmem:[%s36103_s3 + $0x1220] ss:$16 sps:$4 sm:$0xff]   ;;  %v130_v62 = vcombine.high %v29399_v5, %v29399_v5 }
 0x21e   :  { %v24507_v5 = vld [vmem:[%s36103_s3 + $0x1240] ss:$16 sps:$4 sm:$0xff]  }
 0x220   :  { %4081 = vmatpush1.bf16.msra.mxu0 %v24440_v22  ;;  %4491 = vmatpush1.bf16.msra.mxu1 %v24443_v0  ;;  %v24509_v22 = vld [vmem:[%s36103_s3 + $0x1244] ss:$16 sps:$4 sm:$0xff]   ;;  %v24512_v0 = vld [vmem:[%s36103_s3 + $0x124c] ss:$16 sps:$4 sm:$0xff]  }
 0x221   :  { %4082 = vmatprep.subr.bf16.mxu0 %v24448_v28  ;;  %4492 = vmatprep.subr.bf16.mxu1 %v24451_v2  ;;  %v24510_v28 = vld [vmem:[%s36103_s3 + $0x1248] ss:$16 sps:$4 sm:$0xff]   ;;  %v27646_v2 = vmov 0  }
 0x224   :  { %4083 = vmatpush1.bf16.msra.mxu0 %v24446_v3  ;;  %4493 = vmatpush1.bf16.msra.mxu1 %v24449_v4  ;;  %v144_v3 = vrot.slane %v130_v62, %v27873_v49  ;;  %v24515_v4 = vld [vmem:[%s36104_s4 + $0x4] ss:$8 sps:$4 sm:$0xff]  }
 0x225   :  { %4084 = vmatprep.subr.bf16.mxu0 %v24454_v6  ;;  %4494 = vmatprep.subr.bf16.mxu1 %v24457_v8  ;;  %v24513_v6 = vld [vmem:[%s36104_s4] ss:$8 sps:$4 sm:$0xff]  }
 0x226   :  { %v29680_v8 = vpack.c.bf16 %v144_v3, %v144_v3  ;;  %v24612_v62 = vld [vmem:[%s36105_s5 + $0x8] sm:$0xff]   ;;  %v24617_v3 = vld [vmem:[%s36105_s5 + $0x60] sm:$0xff]  }
 0x228   :  { %4085 = vmatpush1.bf16.msra.mxu0 %v24452_v10  ;;  %4495 = vmatpush1.bf16.msra.mxu1 %v24455_v11  ;;  %v24518_v10 = vld [vmem:[%s36104_s4 + $0x14] ss:$8 sps:$4 sm:$0xff]   ;;  %v24516_v11 = vld [vmem:[%s36104_s4 + $0x10] ss:$8 sps:$4 sm:$0xff]  }
 0x229   :  { %4086 = vmatprep.subr.bf16.mxu0 %v24460_v47  ;;  %4496 = vmatprep.subr.bf16.mxu1 %v24463_v13  ;;  %v24521_v47 = vld [vmem:[%s36104_s4 + $0x24] ss:$8 sps:$4 sm:$0xff]   ;;  %v24519_v13 = vld [vmem:[%s36104_s4 + $0x20] ss:$8 sps:$4 sm:$0xff]  }
 0x22c   :  { %4087 = vmatpush1.bf16.msra.mxu0 %v24458_v17  ;;  %4497 = vmatpush1.bf16.msra.mxu1 %v24461_v18  ;;  %v24524_v17 = vld [vmem:[%s36104_s4 + $0x34] ss:$8 sps:$4 sm:$0xff]   ;;  %v24522_v18 = vld [vmem:[%s36104_s4 + $0x30] ss:$8 sps:$4 sm:$0xff]  }
 0x22d   :  { %4088 = vmatprep.subr.bf16.mxu0 %v24466_v19  ;;  %4498 = vmatprep.subr.bf16.mxu1 %v24469_v21  ;;  %v24527_v19 = vld [vmem:[%s36104_s4 + $0x44] ss:$8 sps:$4 sm:$0xff]   ;;  %v24525_v21 = vld [vmem:[%s36104_s4 + $0x40] ss:$8 sps:$4 sm:$0xff]  }
 0x230   :  { %4089 = vmatpush1.bf16.msra.mxu0 %v24464_v23  ;;  %4499 = vmatpush1.bf16.msra.mxu1 %v24467_v27  ;;  %v24530_v23 = vld [vmem:[%s36104_s4 + $0x54] ss:$8 sps:$4 sm:$0xff]   ;;  %v24528_v27 = vld [vmem:[%s36104_s4 + $0x50] ss:$8 sps:$4 sm:$0xff]  }
 0x231   :  { %4090 = vmatprep.subr.bf16.mxu0 %v24472_v9  ;;  %4500 = vmatprep.subr.bf16.mxu1 %v24475_v29  ;;  %v24533_v9 = vld [vmem:[%s36104_s4 + $0x64] ss:$8 sps:$4 sm:$0xff]   ;;  %v24531_v29 = vld [vmem:[%s36104_s4 + $0x60] ss:$8 sps:$4 sm:$0xff]  }
 0x234   :  { %4091 = vmatpush1.bf16.msra.mxu0 %v24470_v50  ;;  %4501 = vmatpush1.bf16.msra.mxu1 %v24473_v32  ;;  %v24536_v50 = vld [vmem:[%s36104_s4 + $0x74] ss:$8 sps:$4 sm:$0xff]   ;;  %v24534_v32 = vld [vmem:[%s36104_s4 + $0x70] ss:$8 sps:$4 sm:$0xff]  }
 0x235   :  { %4092 = vmatprep.subr.bf16.mxu0 %v24478_v33  ;;  %4502 = vmatprep.subr.bf16.mxu1 %v24481_v1  ;;  %v24539_v33 = vld [vmem:[%s36104_s4 + $0x84] ss:$8 sps:$4 sm:$0xff]   ;;  %v24537_v1 = vld [vmem:[%s36104_s4 + $0x80] ss:$8 sps:$4 sm:$0xff]  }
 0x238   :  { %4093 = vmatpush1.bf16.msra.mxu0 %v24476_v36  ;;  %4503 = vmatpush1.bf16.msra.mxu1 %v24479_v37  ;;  %v24542_v36 = vld [vmem:[%s36104_s4 + $0x94] ss:$8 sps:$4 sm:$0xff]   ;;  %v24540_v37 = vld [vmem:[%s36104_s4 + $0x90] ss:$8 sps:$4 sm:$0xff]  }
 0x239   :  { %4094 = vmatprep.subr.bf16.mxu0 %v24484_v39  ;;  %4504 = vmatprep.subr.bf16.mxu1 %v24487_v40  ;;  %v24545_v39 = vld [vmem:[%s36104_s4 + $0xa4] ss:$8 sps:$4 sm:$0xff]   ;;  %v24543_v40 = vld [vmem:[%s36104_s4 + $0xa0] ss:$8 sps:$4 sm:$0xff]  }
 0x23c   :  { %4095 = vmatpush1.bf16.msra.mxu0 %v24482_v41  ;;  %4505 = vmatpush1.bf16.msra.mxu1 %v24485_v44  ;;  %v24548_v41 = vld [vmem:[%s36104_s4 + $0xb4] ss:$8 sps:$4 sm:$0xff]   ;;  %v24546_v44 = vld [vmem:[%s36104_s4 + $0xb0] ss:$8 sps:$4 sm:$0xff]  }
 0x23d   :  { %4096 = vmatprep.subr.bf16.mxu0 %v24490_v45  ;;  %4506 = vmatprep.subr.bf16.mxu1 %v24493_v46  ;;  %v24551_v45 = vld [vmem:[%s36104_s4 + $0xc4] ss:$8 sps:$4 sm:$0xff]   ;;  %v24549_v46 = vld [vmem:[%s36104_s4 + $0xc0] ss:$8 sps:$4 sm:$0xff]  }
 0x240   :  { %4097 = vmatpush1.bf16.msra.mxu0 %v24488_v48  ;;  %4507 = vmatpush1.bf16.msra.mxu1 %v24491_v15  ;;  %v24554_v48 = vld [vmem:[%s36104_s4 + $0xd4] ss:$8 sps:$4 sm:$0xff]   ;;  %v24552_v15 = vld [vmem:[%s36104_s4 + $0xd0] ss:$8 sps:$4 sm:$0xff]  }
 0x241   :  { %4107 = vmatprep.subr.bf16.mxu0 %v24497_v51  ;;  %4517 = vmatprep.subr.bf16.mxu1 %v24500_v52  ;;  %v24557_v51 = vld [vmem:[%s36104_s4 + $0xe4] ss:$8 sps:$4 sm:$0xff]   ;;  %v24555_v52 = vld [vmem:[%s36104_s4 + $0xe0] ss:$8 sps:$4 sm:$0xff]  }
 0x243   :  { %4099 = vmatmul.mubr.bf16.vlgmr.msra.gmra.mrb[0].mxu0 %v29641_v56  ;;  %4509 = vmatmul.mubr.bf16.vlgmr.msra.gmra.mrb[0].mxu1 %v29641_v56 }
 0x244   :  { %4108 = vmatpush1.bf16.msra.mxu0 %v24495_v53  ;;  %4518 = vmatpush1.bf16.msra.mxu1 %v24498_v54  ;;  %v24560_v53 = vld [vmem:[%s36104_s4 + $0xf4] ss:$8 sps:$4 sm:$0xff]   ;;  %v24558_v54 = vld [vmem:[%s36104_s4 + $0xf0] ss:$8 sps:$4 sm:$0xff]  }
 0x245   :  { %4109 = vmatprep.subr.bf16.mxu0 %v24503_v57  ;;  %4519 = vmatprep.subr.bf16.mxu1 %v24506_v58  ;;  %v24563_v57 = vld [vmem:[%s36104_s4 + $0x104] ss:$8 sps:$4 sm:$0xff]  }
 0x246   :  { %4139 = vmatprep.mubr.bf16.mxu0 %v27646_v2  ;;  %4549 = vmatprep.mubr.bf16.mxu1 %v27646_v2  ;;  %v24609_v58 = vld [vmem:[%s36105_s5 + $0x40] sm:$0xff]  }
 0x248   :  { %4110 = vmatpush1.bf16.msra.mxu0 %v24501_v61  ;;  %4520 = vmatpush1.bf16.msra.mxu1 %v24504_v14  ;;  %v24610_v61 = vld [vmem:[%s36105_s5] sm:$0xff]   ;;  %v24611_v14 = vld [vmem:[%s36105_s5 + $0x48] sm:$0xff]  }
 0x249   :  { %4111 = vmatprep.subr.bf16.mxu0 %v24509_v22  ;;  %4521 = vmatprep.subr.bf16.mxu1 %v24512_v0  ;;  %v24613_v22 = vld [vmem:[%s36105_s5 + $0x50] sm:$0xff]  }
 0x24a   :  { %v24614_v0 = vld [vmem:[%s36105_s5 + $0x10] sm:$0xff]  }
 0x24c   :  { %4112 = vmatpush1.bf16.msra.mxu0 %v24507_v5  ;;  %4522 = vmatpush1.bf16.msra.mxu1 %v24510_v28  ;;  %v24615_v5 = vld [vmem:[%s36105_s5 + $0x58] sm:$0xff]  }
 0x24d   :  { %4962 = vmatprep.subr.bf16.mxu0 %v24515_v4  ;;  %23198 = vmatprep.subr.bf16.mxu1 %v24609_v58  ;;  %v24616_v28 = vld [vmem:[%s36105_s5 + $0x18] sm:$0xff]   ;;  %v24618_v4 = vld [vmem:[%s36105_s5 + $0x20] sm:$0xff]  }
 0x24e   :  { %v24570_v58 = vld [vmem:[%s36104_s4 + $0x130] ss:$8 sps:$4 sm:$0xff]  }
 0x24f   :  { %21159 = vmatmul.mubr.msk.bf16.vlgmr.msra.gmra.mrb[0].mxu0 %vm3734_vm0, %v29680_v8  ;;  %21160 = vmatmul.mubr.msk.bf16.vlgmr.msra.gmra.mrb[0].mxu1 %vm3734_vm0, %v29680_v8 }
 0x250   :  { %4963 = vmatpush1.bf16.msra.mxu0 %v24513_v6  ;;  %23199 = vmatpush3.bf16.msra.mxu1 %v24610_v61  ;;  %v24619_v6 = vld [vmem:[%s36105_s5 + $0x68] sm:$0xff]  }
 0x251   :  { %4964 = vmatprep.subr.bf16.mxu0 %v24518_v10  ;;  %23200 = vmatprep.subr.bf16.mxu1 %v24611_v14  ;;  %v24620_v10 = vld [vmem:[%s36105_s5 + $0x28] sm:$0xff]  }
 0x252   :  { %v24575_v61 = vld [vmem:[%s36104_s4 + $0x144] ss:$8 sps:$4 sm:$0xff]   ;;  %v24573_v14 = vld [vmem:[%s36104_s4 + $0x140] ss:$8 sps:$4 sm:$0xff]  }
 0x254   :  { %4965 = vmatpush1.bf16.msra.mxu0 %v24516_v11  ;;  %23201 = vmatpush3.bf16.msra.mxu1 %v24612_v62  ;;  %v29818_v11 = vld [vmem:[%s36113_s13] sm:$0xf]  ;;  %v24578_v62 = vld [vmem:[%s36104_s4 + $0x154] ss:$8 sps:$4 sm:$0xff]  }
 0x255   :  { %4966 = vmatprep.subr.bf16.mxu0 %v24521_v47  ;;  %23202 = vmatprep.subr.bf16.mxu1 %v24613_v22  ;;  %v29821_v47 = vsub.s32 0, %v27855_v43  ;;  %v24576_v22 = vld [vmem:[%s36104_s4 + $0x150] ss:$8 sps:$4 sm:$0xff]  }
 0x258   :  { %4967 = vmatpush1.bf16.msra.mxu0 %v24519_v13  ;;  %23203 = vmatpush3.bf16.msra.mxu1 %v24614_v0  ;;  %v29824_v13 = vsub.s32 1, %v27855_v43  ;;  %v24581_v0 = vld [vmem:[%s36104_s4 + $0x164] ss:$8 sps:$4 sm:$0xff]  }
 0x259   :  { %4968 = vmatprep.subr.bf16.mxu0 %v24524_v17  ;;  %23204 = vmatprep.subr.bf16.mxu1 %v24615_v5  ;;  %v29827_v17 = vsub.s32 3, %v27855_v43  ;;  %v24579_v5 = vld [vmem:[%s36104_s4 + $0x160] ss:$8 sps:$4 sm:$0xff]  }
 0x25c   :  { %4969 = vmatpush1.bf16.msra.mxu0 %v24522_v18  ;;  %23205 = vmatpush3.bf16.msra.mxu1 %v24616_v28  ;;  %v777_v18 = vrot.slane %v29818_v11, %v29821_v47  ;;  %v24584_v28 = vld [vmem:[%s36104_s4 + $0x174] ss:$8 sps:$4 sm:$0xff]  }
 0x25d   :  { %4970 = vmatprep.subr.bf16.mxu0 %v24527_v19  ;;  %23206 = vmatprep.subr.bf16.mxu1 %v24617_v3  ;;  %v781_v19 = vrot.slane %v29818_v11, %v29824_v13  ;;  %v24582_v3 = vld [vmem:[%s36104_s4 + $0x170] ss:$8 sps:$4 sm:$0xff]  }
 0x260   :  { %4971 = vmatpush1.bf16.msra.mxu0 %v24525_v21  ;;  %23207 = vmatpush3.bf16.msra.mxu1 %v24618_v4  ;;  %v789_v21 = vrot.slane %v29818_v11, %v29827_v17  ;;  %v24587_v4 = vld [vmem:[%s36104_s4 + $0x184] ss:$8 sps:$4 sm:$0xff]  }
 0x261   :  { %4972 = vmatprep.subr.bf16.mxu0 %v24530_v23  ;;  %23208 = vmatprep.subr.bf16.mxu1 %v24619_v6  ;;  %v24585_v6 = vld [vmem:[%s36104_s4 + $0x180] ss:$8 sps:$4 sm:$0xff]  }
 0x264   :  { %4973 = vmatpush1.bf16.msra.mxu0 %v24528_v27  ;;  %23209 = vmatpush3.bf16.msra.mxu1 %v24620_v10  ;;  %v24590_v10 = vld [vmem:[%s36104_s4 + $0x194] ss:$8 sps:$4 sm:$0xff]  }
 0x265   :  { %4974 = vmatprep.subr.bf16.mxu0 %v24533_v9 }
 0x268   :  { %4975 = vmatpush1.bf16.msra.mxu0 %v24531_v29 }
 0x269   :  { %4976 = vmatprep.subr.bf16.mxu0 %v24536_v50 }
 0x26c   :  { %4977 = vmatpush1.bf16.msra.mxu0 %v24534_v32 }
 0x26d   :  { %4978 = vmatprep.subr.bf16.mxu0 %v24539_v33 }
 0x270   :  { %4979 = vmatpush1.bf16.msra.mxu0 %v24537_v1 }
 0x271   :  { %4980 = vmatprep.subr.bf16.mxu0 %v24542_v36 }
 0x274   :  { %4981 = vmatpush1.bf16.msra.mxu0 %v24540_v37 }
 0x275   :  { %4982 = vmatprep.subr.bf16.mxu0 %v24545_v39 }
 0x278   :  { %4983 = vmatpush1.bf16.msra.mxu0 %v24543_v40 }
 0x279   :  { %4984 = vmatprep.subr.bf16.mxu0 %v24548_v41 }
 0x27c   :  { %4985 = vmatpush1.bf16.msra.mxu0 %v24546_v44 }
 0x27d   :  { %4986 = vmatprep.subr.bf16.mxu0 %v24551_v45  ;;  %v24561_v45 = vld [vmem:[%s36104_s4 + $0x100] ss:$8 sps:$4 sm:$0xff]  }
 0x280   :  { %4987 = vmatpush1.bf16.msra.mxu0 %v24549_v46  ;;  %v24566_v46 = vld [vmem:[%s36104_s4 + $0x114] ss:$8 sps:$4 sm:$0xff]  }
 0x281   :  { %4988 = vmatprep.subr.bf16.mxu0 %v24554_v48 }
 0x284   :  { %4989 = vmatpush1.bf16.msra.mxu0 %v24552_v15 }
 0x285   :  { %4990 = vmatprep.subr.bf16.mxu0 %v24557_v51 }
 0x288   :  { %4991 = vmatpush1.bf16.msra.mxu0 %v24555_v52  ;;  %v24564_v52 = vld [vmem:[%s36104_s4 + $0x110] ss:$8 sps:$4 sm:$0xff]  }
 0x289   :  { %4992 = vmatprep.subr.bf16.mxu0 %v24560_v53  ;;  %v24569_v53 = vld [vmem:[%s36104_s4 + $0x124] ss:$8 sps:$4 sm:$0xff]  }
 0x28c   :  { %4993 = vmatpush1.bf16.msra.mxu0 %v24558_v54  ;;  %v24567_v54 = vld [vmem:[%s36104_s4 + $0x120] ss:$8 sps:$4 sm:$0xff]  }
 0x28d   :  { %5003 = vmatprep.subr.bf16.mxu0 %v24563_v57  ;;  %v24572_v57 = vld [vmem:[%s36104_s4 + $0x134] ss:$8 sps:$4 sm:$0xff]  }
 0x322   :  { %v4141_v23 = vpop.f32.mrb[0].mxu0  ;;  %v29835_v27 = vpop.f32.mrb[0].mxu1 }
 0x323   :  { %v23352_v9 = vadd.f32 %v4141_v23, %v777_v18  ;;  %v4143_v29 = vpop.f32.mrb[1].mxu0  ;;  %v4553_v50 = vpop.f32.mrb[1].mxu1  ;;  %v24588_v18 = vld [vmem:[%s36104_s4 + $0x190] ss:$8 sps:$4 sm:$0xff]   ;;  %v24596_v23 = vld [vmem:[%s36104_s4 + $0x1b4] ss:$8 sps:$4 sm:$0xff]  }
 0x324   :  { %v23353_v32 = vadd.f32 %v4143_v29, %v781_v19  ;;  %v23355_v33 = vadd.f32 %v4553_v50, %v789_v21  ;;  %v4145_v1 = vpop.f32.mrb[2].mxu0  ;;  %v4555_v36 = vpop.f32.mrb[2].mxu1  ;;  %v24593_v19 = vld [vmem:[%s36104_s4 + $0x1a4] ss:$8 sps:$4 sm:$0xff]   ;;  %v24591_v21 = vld [vmem:[%s36104_s4 + $0x1a0] ss:$8 sps:$4 sm:$0xff]  }
 0x325   :  { %v4558_v37 = vmax.f32 %v23352_v9, 0.0  ;;  %v4146_v39 = vpop.f32.mrb[3].mxu0  ;;  %v4556_v40 = vpop.f32.mrb[3].mxu1  ;;  %v24594_v9 = vld [vmem:[%s36104_s4 + $0x1b0] ss:$8 sps:$4 sm:$0xff]  }
 0x326   :  { %v4559_v41 = vmax.f32 %v23353_v32, 0.0  ;;  %v4561_v44 = vmax.f32 %v23355_v33, 0.0  ;;  %v24599_v29 = vld [vmem:[%s36104_s4 + $0x1c4] ss:$8 sps:$4 sm:$0xff]   ;;  %v24597_v50 = vld [vmem:[%s36104_s4 + $0x1c0] ss:$8 sps:$4 sm:$0xff]  }
 0x327   :  { %v4562_v15 = vpack.c.bf16 %v4558_v37, %v4558_v37  ;;  %v24602_v32 = vld [vmem:[%s36104_s4 + $0x1d4] ss:$8 sps:$4 sm:$0xff]   ;;  %v29916_v33 = vsub.s32 2, %v27855_v43  ;;  %v24600_v1 = vld [vmem:[%s36104_s4 + $0x1d0] ss:$8 sps:$4 sm:$0xff]  }
 0x328   :  { %v4563_v48 = vpack.c.bf16 %v4559_v41, %v4559_v41  ;;  %v4565_v51 = vpack.c.bf16 %v4561_v44, %v4561_v44  ;;  %v24605_v36 = vld [vmem:[%s36104_s4 + $0x1e4] ss:$8 sps:$4 sm:$0xff]   ;;  %v24603_v39 = vld [vmem:[%s36104_s4 + $0x1e0] ss:$8 sps:$4 sm:$0xff]   ;;  %v24608_v40 = vld [vmem:[%s36104_s4 + $0x1f4] ss:$8 sps:$4 sm:$0xff]  }
 0x329   :  { %v785_v37 = vrot.slane %v29818_v11, %v29916_v33  ;;  %v24606_v44 = vld [vmem:[%s36104_s4 + $0x1f0] ss:$8 sps:$4 sm:$0xff]  }
 0x32a   :  { %4994 = vmatprep.mubr.bf16.mxu0 %v4563_v48  ;;  %v24622_v48 = vld [vmem:[%s36105_s5 + $0x30] sm:$0xff]  }
 0x32b   :  { %4995 = vmatmul.mubr.bf16.vlgmr.msra.gmra.mrb[4].mxu0 %v4562_v15  ;;  %v23354_v41 = vadd.f32 %v29835_v27, %v785_v37  ;;  %v24623_v27 = vld [vmem:[%s36105_s5 + $0x78] sm:$0xff]  }
 0x32c   :  { %5004 = vmatpush1.bf16.msra.mxu0 %v24561_v45  ;;  %5035 = vmatprep.mubr.bf16.mxu0 %v4565_v51  ;;  %v24624_v15 = vld [vmem:[%s36105_s5 + $0x38] sm:$0xff]   ;;  %v4630_v51 = vld [vmem:[%s36113_s13 + $0x4] sm:$0x3] }
 0x32d   :  { %5005 = vmatprep.subr.bf16.mxu0 %v24566_v46  ;;  %v4560_v45 = vmax.f32 %v23354_v41, 0.0  ;;  %v24621_v46 = vld [vmem:[%s36105_s5 + $0x70] sm:$0xff]  }
 0x32e   :  { %23210 = vmatprep.subr.bf16.mxu1 %v24621_v46 }
 0x32f   :  { %v4564_v11 = vpack.c.bf16 %v4560_v45, %v4560_v45  ;;  %23211 = vmatpush3.bf16.msra.mxu1 %v24622_v48 }
 0x330   :  { %5006 = vmatpush1.bf16.msra.mxu0 %v24564_v52  ;;  %23212 = vmatprep.subr.bf16.mxu1 %v24623_v27  ;;  %v4635_v52 = vrot.slane %v4630_v51, %v29821_v47 }
 0x331   :  { %5007 = vmatprep.subr.bf16.mxu0 %v24569_v53  ;;  %v4639_v53 = vrot.slane %v4630_v51, %v29824_v13 }
 0x333   :  { %23213 = vmatpush3.bf16.msra.mxu1 %v24624_v15 }
 0x334   :  { %5008 = vmatpush1.bf16.msra.mxu0 %v24567_v54 }
 0x335   :  { %5009 = vmatprep.subr.bf16.mxu0 %v24572_v57 }
 0x338   :  { %5010 = vmatpush1.bf16.msra.mxu0 %v24570_v58 }
 0x339   :  { %5011 = vmatprep.subr.bf16.mxu0 %v24575_v61 }
 0x33c   :  { %5012 = vmatpush1.bf16.msra.mxu0 %v24573_v14 }
 0x33d   :  { %5013 = vmatprep.subr.bf16.mxu0 %v24578_v62 }
 0x340   :  { %5014 = vmatpush1.bf16.msra.mxu0 %v24576_v22 }
 0x341   :  { %5015 = vmatprep.subr.bf16.mxu0 %v24581_v0 }
 0x344   :  { %5016 = vmatpush1.bf16.msra.mxu0 %v24579_v5 }
 0x345   :  { %5017 = vmatprep.subr.bf16.mxu0 %v24584_v28 }
 0x348   :  { %5018 = vmatpush1.bf16.msra.mxu0 %v24582_v3 }
 0x349   :  { %5019 = vmatprep.subr.bf16.mxu0 %v24587_v4 }
 0x34c   :  { %5020 = vmatpush1.bf16.msra.mxu0 %v24585_v6 }
 0x34d   :  { %5021 = vmatprep.subr.bf16.mxu0 %v24590_v10 }
 0x350   :  { %5022 = vmatpush1.bf16.msra.mxu0 %v24588_v18 }
 0x351   :  { %5023 = vmatprep.subr.bf16.mxu0 %v24593_v19 }
 0x354   :  { %5024 = vmatpush1.bf16.msra.mxu0 %v24591_v21 }
 0x355   :  { %5025 = vmatprep.subr.bf16.mxu0 %v24596_v23 }
 0x358   :  { %5026 = vmatpush1.bf16.msra.mxu0 %v24594_v9 }
 0x359   :  { %5027 = vmatprep.subr.bf16.mxu0 %v24599_v29 }
 0x35c   :  { %5028 = vmatpush1.bf16.msra.mxu0 %v24597_v50 }
 0x35d   :  { %5029 = vmatprep.subr.bf16.mxu0 %v24602_v32 }
 0x360   :  { %5030 = vmatpush1.bf16.msra.mxu0 %v24600_v1 }
 0x361   :  { %5031 = vmatprep.subr.bf16.mxu0 %v24605_v36 }
 0x364   :  { %5032 = vmatpush1.bf16.msra.mxu0 %v24603_v39 }
 0x365   :  { %5033 = vmatprep.subr.bf16.mxu0 %v24608_v40 }
 0x368   :  { %5034 = vmatpush1.bf16.msra.mxu0 %v24606_v44 }
 0x36b   :  { %5036 = vmatmul.mubr.bf16.vlgmr.msra.gmra.mrb[4].mxu0 %v4564_v11 }
 0x43e   :  { %v5037_v54 = vpop.f32.mrb[4].mxu0 }
 0x43f   :  { %v23356_v57 = vadd.f32 %v5037_v54, %v4635_v52  ;;  %v5039_v58 = vpop.f32.mrb[5].mxu0 }
 0x440   :  { %v23357_v61 = vadd.f32 %v5039_v58, %v4639_v53  ;;  %v5041_v14 = vpop.f32.mrb[6].mxu0 }
 0x441   :  { %v5044_v62 = vmax.f32 %v23356_v57, 0.0  ;;  %v5042_v22 = vpop.f32.mrb[7].mxu0 }
 0x442   :  { %v5045_v0 = vmax.f32 %v23357_v61, 0.0 }
 0x443   :  { %v5046_v28 = vpack.c.bf16 %v5044_v62, %v5044_v62 }
 0x444   :  { %v5047_v5 = vpack.c.bf16 %v5045_v0, %v5045_v0 }
 0x446   :  { %5215 = vmatprep.mubr.bf16.mxu1 %v5047_v5 }
 0x447   :  { %5216 = vmatmul.mubr.bf16.vlgmr.msra.gmra.mrb[4].mxu1 %v5046_v28 }
 0x448   :  { %5428 = vmatprep.mubr.bf16.mxu1 %v27646_v2 }
 0x449   :  { %22 = vsyncpa [#allocation3], 0  ;;  %v5224_v3 = vld [vmem:[%s36101_s1] sm:$0x3]  ;;  %v21225_v9 = vld [vmem:[%s36113_s13 + $0x6] ss:$0 sm:$0xff] }
 0x44a   :  { %v5225_v4 = vadd.f32 1e-10, %v5224_v3  ;;  %vm5256_vm1 = vcmask 320672   ;;  %vm5233_vm2 = vcmask 156672   ;;  %vm5287_vm3 = vcmask 484672   ;;  %s27647_s1 = smov 108  }
 0x44b   :  { %s27648_s19 = smov 88   ;;  %v24627_v28 = vld [vmem:[%s36106_s6 + $0x4] ss:$8 sps:$4 sm:$0xff]   ;;  %v24625_v3 = vld [vmem:[%s36106_s6] ss:$8 sps:$4 sm:$0xff]   ;;  %s27649_s28 = smov 2  }
 0x44c   :  { %27439 = vlog2.f32 %v5225_v4  ;;  %v15524_v4 = vld [vmem:[%s36102_s2] sm:$0x3]  ;;  %5396 = vmatprep.subr.bf16.mxu1 %v24627_v28  ;;  %vm5389_vm4 = vcmask 1045504   ;;  %vm5318_vm5 = vcmask 162816   ;;  %vm5320_vm6 = vcmask 326656   ;;  %s27651_s30 = smov 126  }
 0x44d   :  { %5397 = vmatpush1.bf16.msra.mxu1 %v24625_v3  ;;  %vm5385_vm7 = vcmask 490496   ;;  %v24649_v28 = vld [vmem:[%s36107_s7 + $0x80] ss:$16 sps:$4 sm:$0xff]   ;;  %v24654_v3 = vld [vmem:[%s36107_s7 + $0xa4] ss:$16 sps:$4 sm:$0xff]   ;;  %vm10794_vm8 = vcmask 1041408  }
 0x44e   :  { %vm10795_vm9 = vcmask 1043458   ;;  %vm10797_vm11 = vcmask 390148   ;;  %vm15588_vm13 = vcmask 1040384   ;;  %vm15584_vm14 = vcmask 15360  }
 0x44f   :  { %vm10796_vm10 = vmor %vm10795_vm9, %vm10794_vm8  ;;  %vm5324_vm15 = vcmask 484352  }
 0x450   :  { %vm33040_vm12 = vmor %vm10797_vm11, %vm10796_vm10 }
 0x456   :  { %v27440_v6 = vpop.eup %27439 }
 0x457   :  { %v5227_v10 = vmul.f32 0.6931472, %v27440_v6  ;;  %v24630_v6 = vld [vmem:[%s36106_s6 + $0x14] ss:$8 sps:$4 sm:$0xff]  }
 0x458   :  { %5398 = vmatprep.subr.bf16.mxu1 %v24630_v6  ;;  %v24657_v6 = vld [vmem:[%s36107_s7 + $0xc4] ss:$16 sps:$4 sm:$0xff]  }
 0x459   :  { %v5228_v18 = vsub.f32 1e-10, %v5227_v10  ;;  %v24628_v10 = vld [vmem:[%s36106_s6 + $0x10] ss:$8 sps:$4 sm:$0xff]  }
 0x45a   :  { %5399 = vmatpush1.bf16.msra.mxu1 %v24628_v10 }
 0x45b   :  { %27441 = vlog2.f32 %v5228_v18  ;;  %v24633_v18 = vld [vmem:[%s36106_s6 + $0x24] ss:$8 sps:$4 sm:$0xff]  }
 0x45c   :  { %5400 = vmatprep.subr.bf16.mxu1 %v24633_v18  ;;  %v24655_v18 = vld [vmem:[%s36107_s7 + $0xc0] ss:$16 sps:$4 sm:$0xff]  }
 0x465   :  { %v27442_v19 = vpop.eup %27441 }
 0x466   :  { %v5230_v23 = vmul.f32 0.6931472, %v27442_v19  ;;  %v24631_v19 = vld [vmem:[%s36106_s6 + $0x20] ss:$8 sps:$4 sm:$0xff]  }
 0x467   :  { %5401 = vmatpush1.bf16.msra.mxu1 %v24631_v19  ;;  %v24660_v19 = vld [vmem:[%s36107_s7 + $0xe4] ss:$16 sps:$4 sm:$0xff]  }
 0x468   :  { %v5231_v37 = vsub.f32 0.0, %v5230_v23  ;;  %v24636_v23 = vld [vmem:[%s36106_s6 + $0x30] ss:$8 sps:$4 sm:$0x3f]  }
 0x51a   :  { %v23214_v21 = vpop.f32.mrb[4].mxu1 }
 0x51b   :  { %v23215_v29 = vpop.f32.mrb[5].mxu1 }
 0x51c   :  { %v23216_v50 = vadd.f32 %v23215_v29, %v23214_v21  ;;  %v23217_v32 = vpop.f32.mrb[6].mxu1  ;;  %v24634_v21 = vld [vmem:[%s36106_s6 + $0x34] ss:$8 sps:$4 sm:$0x3f]  }
 0x51d   :  { %v23218_v1 = vpop.f32.mrb[7].mxu1  ;;  %21250 = vmatprep.subr.msk.bf16.mxu1 %vm5389_vm4, %v24634_v21  ;;  %v24639_v32 = vld [vmem:[%s36107_s7 + $0x4] ss:$16 sps:$4 sm:$0xff]   ;;  %v24658_v21 = vld [vmem:[%s36107_s7 + $0xe0] ss:$16 sps:$4 sm:$0xff]  }
 0x51e   :  { %v5218_v36 = vadd.f32 %v23216_v50, %v21225_v9  ;;  %v5391_v9 = vsel %vm5389_vm4, %v24636_v23, 0  ;;  %v24663_v23 = vld [vmem:[%s36107_s7 + $0x104] ss:$16 sps:$4 sm:$0xff]  }
 0x51f   :  { %5403 = vmatpush1.bf16.msra.mxu1 %v5391_v9  ;;  %v24661_v9 = vld [vmem:[%s36107_s7 + $0x100] ss:$16 sps:$4 sm:$0xff]  }
 0x520   :  { %v29960_v39 = vmax.f32 %v5218_v36, 0.0  ;;  %5847 = vmatprep.subr.bf16.mxu1 %v24639_v32  ;;  %v24669_v32 = vld [vmem:[%s36107_s7 + $0x144] ss:$16 sps:$4 sm:$0xff]  }
 0x522   :  { %v5232_v40 = vadd.f32 %v5231_v37, %v29960_v39  ;;  %v5303_v29 = vsel %vm5287_vm3, %v29960_v39, -inf  ;;  %v5245_v50 = vsel %vm5233_vm2, %v29960_v39, -inf }
 0x524   :  { %v5257_v41 = vsel %vm5256_vm1, %v5232_v40, -inf  ;;  %v5234_v44 = vsel %vm5233_vm2, %v5232_v40, -inf  ;;  %v5288_v45 = vsel %vm5287_vm3, %v5232_v40, -inf }
 0x525   :  { %5258 = vmax.xlane.f32.xlu0 %v5257_v41  ;;  %5235 = vmax.xlane.f32.xlu1 %v5234_v44 }
 0x529   :  { %5289 = vmax.xlane.f32.xlu0 %v5288_v45 }
 0x5b2   :  { %v5259_v11 = vpop.xlane.xlu0 %5258  ;;  %v5236_v54 = vpop.xlane.xlu1 %5235 }
 0x5b3   :  { %v5260_v46 = vsub.f32 %v5232_v40, %v5259_v11  ;;  %v5237_v57 = vsub.f32 %v5232_v40, %v5236_v54  ;;  %v24642_v54 = vld [vmem:[%s36107_s7 + $0x24] ss:$16 sps:$4 sm:$0xff]  }
 0x5b5   :  { %v5261_v48 = vmul.f32 1.442695, %v5260_v46  ;;  %v5238_v58 = vmul.f32 1.442695, %v5237_v57 }
 0x5b6   :  { %v5290_v27 = vpop.xlane.xlu0 %5289 }
 0x5b7   :  { %27443 = vpow2.f32 %v5261_v48  ;;  %v5291_v15 = vsub.f32 %v5232_v40, %v5290_v27 }
 0x5b9   :  { %v5292_v51 = vmul.f32 1.442695, %v5291_v15  ;;  %v24637_v15 = vld [vmem:[%s36107_s7] ss:$16 sps:$4 sm:$0xff]  }
 0x5bb   :  { %27445 = vpow2.f32 %v5292_v51 }
 0x5bc   :  { %27447 = vpow2.f32 %v5238_v58 }
 0x5c1   :  { %v27444_v52 = vpop.eup %27443 }
 0x5c2   :  { %5264 = vrot.lane.b32.xlu1 %v27444_v52, %s27647_s1 }
 0x5c5   :  { %v27446_v53 = vpop.eup %27445 }
 0x5c6   :  { %5295 = vrot.lane.b32.xlu0 %v27446_v53, %s27648_s19  ;;  %v27448_v61 = vpop.eup %27447 }
 0x5c7   :  { %v5240_v14 = vsel %vm5233_vm2, %v27448_v61, 0.0 }
 0x5e6   :  { %5241 = vadd.xlane.f32.xlu1 %v5240_v14  ;;  %v24645_v14 = vld [vmem:[%s36107_s7 + $0x44] ss:$16 sps:$4 sm:$0xff]  }
 0x634   :  { %v5265_v62 = vpop.permute.xlu1 %5264 }
 0x635   :  { %v5267_v22 = vsel %vm5233_vm2, %v5265_v62, 0.0 }
 0x636   :  { %5268 = vadd.xlane.f32.xlu0 %v5267_v22  ;;  %v24648_v22 = vld [vmem:[%s36107_s7 + $0x64] ss:$16 sps:$4 sm:$0xff]  }
 0x638   :  { %v5296_v0 = vpop.permute.xlu0 %5295 }
 0x639   :  { %v5298_v5 = vsel %vm5233_vm2, %v5296_v0, 0.0  ;;  %v24646_v0 = vld [vmem:[%s36107_s7 + $0x60] ss:$16 sps:$4 sm:$0xff]  }
 0x63a   :  { %5299 = vadd.xlane.f32.xlu1 %v5298_v5  ;;  %v24651_v5 = vld [vmem:[%s36107_s7 + $0x84] ss:$16 sps:$4 sm:$0xff]  }
 0x64c   :  { %15526 = vrot.lane.b32.xlu0 %v15524_v4, %s27649_s28  ;;  %v24652_v4 = vld [vmem:[%s36107_s7 + $0xa0] ss:$16 sps:$4 sm:$0xff]  }
 0x66b   :  { %5304 = vmax.xlane.f32.xlu0 %v5303_v29  ;;  %v24666_v29 = vld [vmem:[%s36107_s7 + $0x124] ss:$16 sps:$4 sm:$0xff]  }
 0x66f   :  { %5246 = vmax.xlane.f32.xlu0 %v5245_v50  ;;  %v24664_v50 = vld [vmem:[%s36107_s7 + $0x120] ss:$16 sps:$4 sm:$0xff]  }
 0x673   :  { %v5242_v1 = vpop.xlane.xlu1 %5241 }
 0x6c3   :  { %v5269_v36 = vpop.xlane.xlu0 %5268 }
 0x6c4   :  { %27449 = vrcp.f32 %v5269_v36  ;;  %v24672_v36 = vld [vmem:[%s36107_s7 + $0x164] ss:$16 sps:$4 sm:$0xff]  }
 0x6c5   :  { %27451 = vrcp.f32 %v5242_v1  ;;  %v24667_v1 = vld [vmem:[%s36107_s7 + $0x140] ss:$16 sps:$4 sm:$0xff]  }
 0x6c7   :  { %v5300_v37 = vpop.xlane.xlu1 %5299 }
 0x6c8   :  { %27453 = vrcp.f32 %v5300_v37  ;;  %v24670_v37 = vld [vmem:[%s36107_s7 + $0x160] ss:$16 sps:$4 sm:$0xff]  }
 0x6ce   :  { %v27450_v40 = vpop.eup %27449 }
 0x6cf   :  { %v27452_v41 = vpop.eup %27451  ;;  %v5271_v44 = vmul.f32 %v27450_v40, %v27444_v52  ;;  %v24640_v52 = vld [vmem:[%s36107_s7 + $0x20] ss:$16 sps:$4 sm:$0xff]   ;;  %v24675_v40 = vld [vmem:[%s36107_s7 + $0x184] ss:$16 sps:$4 sm:$0xff]  }
 0x6d0   :  { %v5244_v11 = vmul.f32 %v27452_v41, %v27448_v61  ;;  %v24643_v61 = vld [vmem:[%s36107_s7 + $0x40] ss:$16 sps:$4 sm:$0xff]  }
 0x6d1   :  { %v24673_v41 = vld [vmem:[%s36107_s7 + $0x180] ss:$16 sps:$4 sm:$0xff]  }
 0x6d2   :  { %v27454_v45 = vpop.eup %27453  ;;  %v5319_v48 = vsel %vm5318_vm5, %v5244_v11, %v5271_v44  ;;  %v24678_v44 = vld [vmem:[%s36107_s7 + $0x1a4] ss:$16 sps:$4 sm:$0xff]  }
 0x6d3   :  { %v5302_v46 = vmul.f32 %v27454_v45, %v27446_v53  ;;  %v30016_v53 = vpop.permute.xlu0 %15526  ;;  %v24676_v45 = vld [vmem:[%s36107_s7 + $0x1a0] ss:$16 sps:$4 sm:$0xff]   ;;  %v24681_v11 = vld [vmem:[%s36107_s7 + $0x1c4] ss:$16 sps:$4 sm:$0xff]  }
 0x6d5   :  { %v5321_v27 = vsel %vm5320_vm6, %v5319_v48, %v5302_v46  ;;  %v24679_v46 = vld [vmem:[%s36107_s7 + $0x1c0] ss:$16 sps:$4 sm:$0xff]   ;;  %v24684_v48 = vld [vmem:[%s36107_s7 + $0x1e4] ss:$16 sps:$4 sm:$0xff]  }
 0x6d6   :  { %v5326_v51 = vpack.c.bf16 %v5321_v27, %v5321_v27  ;;  %v24682_v27 = vld [vmem:[%s36107_s7 + $0x1e0] ss:$16 sps:$4 sm:$0xff]  }
 0x6d8   :  { %21251 = vmatmul.mubr.msk.bf16.vlgmr.msra.gmra.mrb[8].mxu1 %vm5385_vm7, %v5326_v51  ;;  %v24733_v51 = vld [vmem:[%s36108_s8] ss:$76 sps:$4 sm:$0xff]  }
 0x6d9   :  { %5848 = vmatpush1.bf16.msra.mxu1 %v24637_v15  ;;  %v24687_v15 = vld [vmem:[%s36107_s7 + $0xc] ss:$16 sps:$4 sm:$0xff]  }
 0x6da   :  { %5849 = vmatprep.subr.bf16.mxu1 %v24642_v54  ;;  %v24735_v54 = vld [vmem:[%s36108_s8 + $0x4] ss:$76 sps:$4 sm:$0xff]  }
 0x6db   :  { %9750 = vmatprep.subr.bf16.mxu0 %v24735_v54 }
 0x6dc   :  { %9751 = vmatpush1.bf16.msra.mxu0 %v24733_v51 }
 0x6dd   :  { %5850 = vmatpush1.bf16.msra.mxu1 %v24640_v52  ;;  %v24741_v52 = vld [vmem:[%s36108_s8 + $0x9c] ss:$76 sps:$4 sm:$0xff]  }
 0x6de   :  { %5851 = vmatprep.subr.bf16.mxu1 %v24645_v14  ;;  %9752 = vmatprep.subr.bf16.mxu0 %v24741_v52  ;;  %v24753_v14 = vld [vmem:[%s36108_s8 + $0x1cc] ss:$76 sps:$4 sm:$0xff]  }
 0x6e1   :  { %5852 = vmatpush1.bf16.msra.mxu1 %v24643_v61  ;;  %v24745_v61 = vld [vmem:[%s36108_s8 + $0x130] ss:$76 sps:$4 sm:$0xff]  }
 0x6e2   :  { %5853 = vmatprep.subr.bf16.mxu1 %v24648_v22  ;;  %v24759_v22 = vld [vmem:[%s36108_s8 + $0x264] ss:$76 sps:$4 sm:$0xff]  }
 0x6e5   :  { %5854 = vmatpush1.bf16.msra.mxu1 %v24646_v0  ;;  %v24757_v0 = vld [vmem:[%s36108_s8 + $0x260] ss:$76 sps:$4 sm:$0xff]  }
 0x6e6   :  { %5855 = vmatprep.subr.bf16.mxu1 %v24651_v5  ;;  %v24765_v5 = vld [vmem:[%s36108_s8 + $0x2fc] ss:$76 sps:$4 sm:$0xff]  }
 0x6e9   :  { %5856 = vmatpush1.bf16.msra.mxu1 %v24649_v28  ;;  %v24763_v28 = vld [vmem:[%s36108_s8 + $0x2f8] ss:$76 sps:$4 sm:$0xff]  }
 0x6ea   :  { %5857 = vmatprep.subr.bf16.mxu1 %v24654_v3  ;;  %v24771_v3 = vld [vmem:[%s36108_s8 + $0x394] ss:$76 sps:$4 sm:$0xff]  }
 0x6ed   :  { %5858 = vmatpush1.bf16.msra.mxu1 %v24652_v4  ;;  %v24769_v4 = vld [vmem:[%s36108_s8 + $0x390] ss:$76 sps:$4 sm:$0xff]  }
 0x6ee   :  { %5859 = vmatprep.subr.bf16.mxu1 %v24657_v6  ;;  %v24777_v6 = vld [vmem:[%s36108_s8 + $0x42c] ss:$76 sps:$4 sm:$0xff]  }
 0x6f1   :  { %5860 = vmatpush1.bf16.msra.mxu1 %v24655_v18  ;;  %v24775_v18 = vld [vmem:[%s36108_s8 + $0x428] ss:$76 sps:$4 sm:$0xff]  }
 0x6f2   :  { %5861 = vmatprep.subr.bf16.mxu1 %v24660_v19  ;;  %v24783_v19 = vld [vmem:[%s36108_s8 + $0x4c4] ss:$76 sps:$4 sm:$0xff]  }
 0x6f5   :  { %5862 = vmatpush1.bf16.msra.mxu1 %v24658_v21  ;;  %v24781_v21 = vld [vmem:[%s36108_s8 + $0x4c0] ss:$76 sps:$4 sm:$0xff]  }
 0x6f6   :  { %5863 = vmatprep.subr.bf16.mxu1 %v24663_v23  ;;  %v24789_v23 = vld [vmem:[%s36108_s8 + $0x55c] ss:$76 sps:$4 sm:$0xff]  }
 0x6f8   :  { %v5305_v57 = vpop.xlane.xlu0 %5304 }
 0x6f9   :  { %v5306_v58 = vsub.f32 %v29960_v39, %v5305_v57  ;;  %5864 = vmatpush1.bf16.msra.mxu1 %v24661_v9  ;;  %v24739_v57 = vld [vmem:[%s36108_s8 + $0x98] ss:$76 sps:$4 sm:$0xff]  }
 0x6fa   :  { %5865 = vmatprep.subr.bf16.mxu1 %v24666_v29  ;;  %9753 = vmatpush1.bf16.msra.mxu0 %v24739_v57  ;;  %v24787_v9 = vld [vmem:[%s36108_s8 + $0x558] ss:$76 sps:$4 sm:$0xff]   ;;  %v24795_v29 = vld [vmem:[%s36108_s8 + $0x5f4] ss:$76 sps:$4 sm:$0xff]  }
 0x6fb   :  { %v5307_v62 = vmul.f32 1.442695, %v5306_v58  ;;  %v24747_v58 = vld [vmem:[%s36108_s8 + $0x134] ss:$76 sps:$4 sm:$0xff]  }
 0x6fc   :  { %9754 = vmatprep.subr.bf16.mxu0 %v24747_v58 }
 0x6fd   :  { %27455 = vpow2.f32 %v5307_v62  ;;  %5866 = vmatpush1.bf16.msra.mxu1 %v24664_v50  ;;  %v24751_v62 = vld [vmem:[%s36108_s8 + $0x1c8] ss:$76 sps:$4 sm:$0xff]   ;;  %v24793_v50 = vld [vmem:[%s36108_s8 + $0x5f0] ss:$76 sps:$4 sm:$0xff]  }
 0x6fe   :  { %5867 = vmatprep.subr.bf16.mxu1 %v24669_v32  ;;  %9755 = vmatpush1.bf16.msra.mxu0 %v24745_v61  ;;  %v24801_v32 = vld [vmem:[%s36108_s8 + $0x68c] ss:$76 sps:$4 sm:$0xff]  }
 0x6ff   :  { %9756 = vmatprep.subr.bf16.mxu0 %v24753_v14  ;;  %v24685_v61 = vld [vmem:[%s36107_s7 + $0x8] ss:$16 sps:$4 sm:$0xff]  }
 0x701   :  { %5868 = vmatpush1.bf16.msra.mxu1 %v24667_v1  ;;  %v24799_v1 = vld [vmem:[%s36108_s8 + $0x688] ss:$76 sps:$4 sm:$0xff]  }
 0x702   :  { %5869 = vmatprep.subr.bf16.mxu1 %v24672_v36  ;;  %9757 = vmatpush1.bf16.msra.mxu0 %v24751_v62  ;;  %v24807_v36 = vld [vmem:[%s36108_s8 + $0x724] ss:$76 sps:$4 sm:$0xff]   ;;  %v24690_v62 = vld [vmem:[%s36107_s7 + $0x2c] ss:$16 sps:$4 sm:$0xff]  }
 0x703   :  { %9758 = vmatprep.subr.bf16.mxu0 %v24759_v22  ;;  %v24688_v22 = vld [vmem:[%s36107_s7 + $0x28] ss:$16 sps:$4 sm:$0xff]  }
 0x705   :  { %5870 = vmatpush1.bf16.msra.mxu1 %v24670_v37  ;;  %v24805_v37 = vld [vmem:[%s36108_s8 + $0x720] ss:$76 sps:$4 sm:$0xff]  }
 0x706   :  { %5871 = vmatprep.subr.bf16.mxu1 %v24675_v40  ;;  %9759 = vmatpush1.bf16.msra.mxu0 %v24757_v0  ;;  %v5335_v40 = vld [vmem:[%s36113_s13 + $0x7] sm:$0x3]  ;;  %v24693_v0 = vld [vmem:[%s36107_s7 + $0x4c] ss:$16 sps:$4 sm:$0xff]  }
 0x707   :  { %v30046_v10 = vpop.eup %27455  ;;  %9760 = vmatprep.subr.bf16.mxu0 %v24765_v5  ;;  %v24691_v5 = vld [vmem:[%s36107_s7 + $0x48] ss:$16 sps:$4 sm:$0xff]  }
 0x708   :  { %5310 = vrot.lane.b32.xlu0 %v30046_v10, %s27648_s19 }
 0x709   :  { %5872 = vmatpush1.bf16.msra.mxu1 %v24673_v41  ;;  %v24813_v41 = vld [vmem:[%s36108_s8 + $0x7bc] ss:$76 sps:$4 sm:$0xff]  }
 0x70a   :  { %5873 = vmatprep.subr.bf16.mxu1 %v24678_v44  ;;  %9761 = vmatpush1.bf16.msra.mxu0 %v24763_v28  ;;  %v24811_v44 = vld [vmem:[%s36108_s8 + $0x7b8] ss:$76 sps:$4 sm:$0xff]   ;;  %v24696_v28 = vld [vmem:[%s36107_s7 + $0x6c] ss:$16 sps:$4 sm:$0xff]  }
 0x70b   :  { %9762 = vmatprep.subr.bf16.mxu0 %v24771_v3  ;;  %v24694_v3 = vld [vmem:[%s36107_s7 + $0x68] ss:$16 sps:$4 sm:$0xff]  }
 0x70d   :  { %5874 = vmatpush1.bf16.msra.mxu1 %v24676_v45  ;;  %v5340_v45 = vrot.slane %v5335_v40, %v29821_v47 }
 0x70e   :  { %5875 = vmatprep.subr.bf16.mxu1 %v24681_v11  ;;  %9763 = vmatpush1.bf16.msra.mxu0 %v24769_v4  ;;  %v5344_v11 = vrot.slane %v5335_v40, %v29824_v13  ;;  %v24699_v4 = vld [vmem:[%s36107_s7 + $0x8c] ss:$16 sps:$4 sm:$0xff]   ;;  %v24715_v40 = vld [vmem:[%s36107_s7 + $0x148] ss:$16 sps:$4 sm:$0xff]  }
 0x70f   :  { %9764 = vmatprep.subr.bf16.mxu0 %v24777_v6  ;;  %v24697_v6 = vld [vmem:[%s36107_s7 + $0x88] ss:$16 sps:$4 sm:$0xff]  }
 0x711   :  { %5876 = vmatpush1.bf16.msra.mxu1 %v24679_v46 }
 0x712   :  { %5877 = vmatprep.subr.bf16.mxu1 %v24684_v48  ;;  %9765 = vmatpush1.bf16.msra.mxu0 %v24775_v18  ;;  %v24702_v18 = vld [vmem:[%s36107_s7 + $0xac] ss:$16 sps:$4 sm:$0xff]  }
 0x713   :  { %9766 = vmatprep.subr.bf16.mxu0 %v24783_v19  ;;  %v24700_v19 = vld [vmem:[%s36107_s7 + $0xa8] ss:$16 sps:$4 sm:$0xff]  }
 0x715   :  { %5878 = vmatpush1.bf16.msra.mxu1 %v24682_v27 }
 0x716   :  { %5888 = vmatprep.subr.bf16.mxu1 %v24687_v15  ;;  %9767 = vmatpush1.bf16.msra.mxu0 %v24781_v21  ;;  %v24705_v21 = vld [vmem:[%s36107_s7 + $0xcc] ss:$16 sps:$4 sm:$0xff]  }
 0x717   :  { %9768 = vmatprep.subr.bf16.mxu0 %v24789_v23  ;;  %v24703_v23 = vld [vmem:[%s36107_s7 + $0xc8] ss:$16 sps:$4 sm:$0xff]  }
 0x71a   :  { %9769 = vmatpush1.bf16.msra.mxu0 %v24787_v9  ;;  %v24708_v9 = vld [vmem:[%s36107_s7 + $0xec] ss:$16 sps:$4 sm:$0xff]  }
 0x71b   :  { %9770 = vmatprep.subr.bf16.mxu0 %v24795_v29  ;;  %v24706_v29 = vld [vmem:[%s36107_s7 + $0xe8] ss:$16 sps:$4 sm:$0xff]  }
 0x71e   :  { %9771 = vmatpush1.bf16.msra.mxu0 %v24793_v50  ;;  %v24711_v50 = vld [vmem:[%s36107_s7 + $0x10c] ss:$16 sps:$4 sm:$0xff]  }
 0x71f   :  { %9772 = vmatprep.subr.bf16.mxu0 %v24801_v32  ;;  %v24709_v32 = vld [vmem:[%s36107_s7 + $0x108] ss:$16 sps:$4 sm:$0xff]  }
 0x722   :  { %9773 = vmatpush1.bf16.msra.mxu0 %v24799_v1  ;;  %v24714_v1 = vld [vmem:[%s36107_s7 + $0x12c] ss:$16 sps:$4 sm:$0xff]  }
 0x723   :  { %9774 = vmatprep.subr.bf16.mxu0 %v24807_v36  ;;  %v24712_v36 = vld [vmem:[%s36107_s7 + $0x128] ss:$16 sps:$4 sm:$0xff]  }
 0x726   :  { %9775 = vmatpush1.bf16.msra.mxu0 %v24805_v37  ;;  %v24717_v37 = vld [vmem:[%s36107_s7 + $0x14c] ss:$16 sps:$4 sm:$0xff]  }
 0x727   :  { %9776 = vmatprep.subr.bf16.mxu0 %v24813_v41  ;;  %v24720_v41 = vld [vmem:[%s36107_s7 + $0x16c] ss:$16 sps:$4 sm:$0xff]  }
 0x72a   :  { %9777 = vmatpush1.bf16.msra.mxu0 %v24811_v44  ;;  %v24718_v44 = vld [vmem:[%s36107_s7 + $0x168] ss:$16 sps:$4 sm:$0xff]  }
 0x7ab   :  { %v5430_v46 = vpop.f32.mrb[8].mxu1 }
 0x7ac   :  { %v5431_v48 = vadd.f32 %v5430_v46, %v5340_v45  ;;  %v5432_v27 = vpop.f32.mrb[9].mxu1  ;;  %v24723_v45 = vld [vmem:[%s36107_s7 + $0x18c] ss:$16 sps:$4 sm:$0xff]  }
 0x7ad   :  { %v5433_v15 = vadd.f32 %v5432_v27, %v5344_v11  ;;  %v5434_v51 = vpop.f32.mrb[10].mxu1  ;;  %v24721_v11 = vld [vmem:[%s36107_s7 + $0x188] ss:$16 sps:$4 sm:$0xff]   ;;  %v24726_v46 = vld [vmem:[%s36107_s7 + $0x1ac] ss:$16 sps:$4 sm:$0xff]  }
 0x7ae   :  { %v5437_v54 = vmax.f32 %v5431_v48, 0.0  ;;  %v5435_v52 = vpop.f32.mrb[11].mxu1  ;;  %v24724_v48 = vld [vmem:[%s36107_s7 + $0x1a8] ss:$16 sps:$4 sm:$0xff]   ;;  %v24729_v27 = vld [vmem:[%s36107_s7 + $0x1cc] ss:$16 sps:$4 sm:$0xff]  }
 0x7af   :  { %v5438_v57 = vmax.f32 %v5433_v15, 0.0  ;;  %v24727_v15 = vld [vmem:[%s36107_s7 + $0x1c8] ss:$16 sps:$4 sm:$0xff]   ;;  %v24732_v51 = vld [vmem:[%s36107_s7 + $0x1ec] ss:$16 sps:$4 sm:$0xff]  }
 0x7b0   :  { %v30202_v14 = vpack.c.bf16 %v5437_v54, %v5437_v54  ;;  %v24730_v54 = vld [vmem:[%s36107_s7 + $0x1e8] ss:$16 sps:$4 sm:$0xff]  }
 0x7b1   :  { %v5440_v58 = vpack.c.bf16 %v5438_v57, %v5438_v57  ;;  %v24738_v52 = vld [vmem:[%s36108_s8 + $0xc] ss:$76 sps:$4 sm:$0xff]   ;;  %v24736_v57 = vld [vmem:[%s36108_s8 + $0x8] ss:$76 sps:$4 sm:$0xff]  }
 0x7b3   :  { %5879 = vmatprep.mubr.bf16.mxu1 %v5440_v58 }
 0x7b4   :  { %5880 = vmatmul.mubr.bf16.vlgmr.msra.gmra.mrb[12].mxu1 %v30202_v14 }
 0x7b5   :  { %5889 = vmatpush1.bf16.msra.mxu1 %v24685_v61  ;;  %5920 = vmatprep.mubr.bf16.mxu1 %v5440_v58  ;;  %v24744_v58 = vld [vmem:[%s36108_s8 + $0xa4] ss:$76 sps:$4 sm:$0xff]   ;;  %v24742_v61 = vld [vmem:[%s36108_s8 + $0xa0] ss:$76 sps:$4 sm:$0xff]  }
 0x7b6   :  { %5890 = vmatprep.subr.bf16.mxu1 %v24690_v62  ;;  %v24750_v62 = vld [vmem:[%s36108_s8 + $0x13c] ss:$76 sps:$4 sm:$0xff]  }
 0x7b9   :  { %5891 = vmatpush1.bf16.msra.mxu1 %v24688_v22  ;;  %v24748_v22 = vld [vmem:[%s36108_s8 + $0x138] ss:$76 sps:$4 sm:$0xff]  }
 0x7ba   :  { %5892 = vmatprep.subr.bf16.mxu1 %v24693_v0  ;;  %v24754_v0 = vld [vmem:[%s36108_s8 + $0x1d0] ss:$76 sps:$4 sm:$0xff]  }
 0x7bd   :  { %5893 = vmatpush1.bf16.msra.mxu1 %v24691_v5  ;;  %v24762_v5 = vld [vmem:[%s36108_s8 + $0x26c] ss:$76 sps:$4 sm:$0xff]  }
 0x7be   :  { %5894 = vmatprep.subr.bf16.mxu1 %v24696_v28  ;;  %v24760_v28 = vld [vmem:[%s36108_s8 + $0x268] ss:$76 sps:$4 sm:$0xff]  }
 0x7c1   :  { %5895 = vmatpush1.bf16.msra.mxu1 %v24694_v3  ;;  %v24768_v3 = vld [vmem:[%s36108_s8 + $0x304] ss:$76 sps:$4 sm:$0xff]  }
 0x7c2   :  { %5896 = vmatprep.subr.bf16.mxu1 %v24699_v4  ;;  %v24766_v4 = vld [vmem:[%s36108_s8 + $0x300] ss:$76 sps:$4 sm:$0xff]  }
 0x7c5   :  { %5897 = vmatpush1.bf16.msra.mxu1 %v24697_v6  ;;  %v24774_v6 = vld [vmem:[%s36108_s8 + $0x39c] ss:$76 sps:$4 sm:$0xff]  }
 0x7c6   :  { %5898 = vmatprep.subr.bf16.mxu1 %v24702_v18  ;;  %v24819_v18 = vld [vmem:[%s36108_s8 + $0x854] ss:$76 sps:$4 sm:$0xff]  }
 0x7c7   :  { %9778 = vmatprep.subr.bf16.mxu0 %v24819_v18 }
 0x7c9   :  { %5899 = vmatpush1.bf16.msra.mxu1 %v24700_v19  ;;  %v24817_v19 = vld [vmem:[%s36108_s8 + $0x850] ss:$76 sps:$4 sm:$0xff]  }
 0x7ca   :  { %5900 = vmatprep.subr.bf16.mxu1 %v24705_v21  ;;  %v24772_v21 = vld [vmem:[%s36108_s8 + $0x398] ss:$76 sps:$4 sm:$0xff]   ;;  %9779 = vmatpush1.bf16.msra.mxu0 %v24817_v19 }
 0x7cd   :  { %5901 = vmatpush1.bf16.msra.mxu1 %v24703_v23  ;;  %v24780_v23 = vld [vmem:[%s36108_s8 + $0x434] ss:$76 sps:$4 sm:$0xff]  }
 0x7ce   :  { %5902 = vmatprep.subr.bf16.mxu1 %v24708_v9  ;;  %v24825_v9 = vld [vmem:[%s36108_s8 + $0x8ec] ss:$76 sps:$4 sm:$0xff]  }
 0x7cf   :  { %9780 = vmatprep.subr.bf16.mxu0 %v24825_v9 }
 0x7d1   :  { %5903 = vmatpush1.bf16.msra.mxu1 %v24706_v29  ;;  %v24823_v29 = vld [vmem:[%s36108_s8 + $0x8e8] ss:$76 sps:$4 sm:$0xff]  }
 0x7d2   :  { %5904 = vmatprep.subr.bf16.mxu1 %v24711_v50  ;;  %v24778_v50 = vld [vmem:[%s36108_s8 + $0x430] ss:$76 sps:$4 sm:$0xff]   ;;  %9781 = vmatpush1.bf16.msra.mxu0 %v24823_v29 }
 0x7d3   :  { %v24837_v29 = vld [vmem:[%s36108_s8 + $0xa1c] ss:$76 sps:$4 sm:$0xff]  }
 0x7d5   :  { %5905 = vmatpush1.bf16.msra.mxu1 %v24709_v32  ;;  %v24786_v32 = vld [vmem:[%s36108_s8 + $0x4cc] ss:$76 sps:$4 sm:$0xff]  }
 0x7d6   :  { %5906 = vmatprep.subr.bf16.mxu1 %v24714_v1  ;;  %v24831_v1 = vld [vmem:[%s36108_s8 + $0x984] ss:$76 sps:$4 sm:$0xff]  }
 0x7d7   :  { %9791 = vmatprep.subr.bf16.mxu0 %v24831_v1  ;;  %v24838_v1 = vld [vmem:[%s36108_s8 + $0xa20] ss:$76 sps:$4 sm:$0xff]  }
 0x7d9   :  { %5907 = vmatpush1.bf16.msra.mxu1 %v24712_v36  ;;  %v24784_v36 = vld [vmem:[%s36108_s8 + $0x4c8] ss:$76 sps:$4 sm:$0xff]  }
 0x7da   :  { %5908 = vmatprep.subr.bf16.mxu1 %v24717_v37  ;;  %v24792_v37 = vld [vmem:[%s36108_s8 + $0x564] ss:$76 sps:$4 sm:$0xff]  }
 0x7dd   :  { %5909 = vmatpush1.bf16.msra.mxu1 %v24715_v40  ;;  %v24790_v40 = vld [vmem:[%s36108_s8 + $0x560] ss:$76 sps:$4 sm:$0xff]  }
 0x7de   :  { %5910 = vmatprep.subr.bf16.mxu1 %v24720_v41  ;;  %v24798_v41 = vld [vmem:[%s36108_s8 + $0x5fc] ss:$76 sps:$4 sm:$0xff]  }
 0x7e1   :  { %5911 = vmatpush1.bf16.msra.mxu1 %v24718_v44  ;;  %v24796_v44 = vld [vmem:[%s36108_s8 + $0x5f8] ss:$76 sps:$4 sm:$0xff]  }
 0x7e2   :  { %5912 = vmatprep.subr.bf16.mxu1 %v24723_v45  ;;  %v24804_v45 = vld [vmem:[%s36108_s8 + $0x694] ss:$76 sps:$4 sm:$0xff]  }
 0x7e5   :  { %5913 = vmatpush1.bf16.msra.mxu1 %v24721_v11  ;;  %v24802_v11 = vld [vmem:[%s36108_s8 + $0x690] ss:$76 sps:$4 sm:$0xff]  }
 0x7e6   :  { %5914 = vmatprep.subr.bf16.mxu1 %v24726_v46  ;;  %v24810_v46 = vld [vmem:[%s36108_s8 + $0x72c] ss:$76 sps:$4 sm:$0xff]  }
 0x7e9   :  { %5915 = vmatpush1.bf16.msra.mxu1 %v24724_v48  ;;  %v24808_v48 = vld [vmem:[%s36108_s8 + $0x728] ss:$76 sps:$4 sm:$0xff]  }
 0x7ea   :  { %5916 = vmatprep.subr.bf16.mxu1 %v24729_v27  ;;  %v24816_v27 = vld [vmem:[%s36108_s8 + $0x7c4] ss:$76 sps:$4 sm:$0xff]  }
 0x7ed   :  { %5917 = vmatpush1.bf16.msra.mxu1 %v24727_v15  ;;  %v24814_v15 = vld [vmem:[%s36108_s8 + $0x7c0] ss:$76 sps:$4 sm:$0xff]  }
 0x7ee   :  { %5918 = vmatprep.subr.bf16.mxu1 %v24732_v51  ;;  %v24822_v51 = vld [vmem:[%s36108_s8 + $0x85c] ss:$76 sps:$4 sm:$0xff]  }
 0x7f1   :  { %5919 = vmatpush1.bf16.msra.mxu1 %v24730_v54  ;;  %v24820_v54 = vld [vmem:[%s36108_s8 + $0x858] ss:$76 sps:$4 sm:$0xff]  }
 0x7f2   :  { %9832 = vmatprep.subr.bf16.mxu1 %v24738_v52  ;;  %v24828_v52 = vld [vmem:[%s36108_s8 + $0x8f4] ss:$76 sps:$4 sm:$0xff]  }
 0x7f4   :  { %5921 = vmatmul.mubr.bf16.vlgmr.msra.gmra.mrb[16].mxu1 %v30202_v14  ;;  %v24756_v14 = vld [vmem:[%s36108_s8 + $0x1d4] ss:$76 sps:$4 sm:$0xff]  }
 0x7f5   :  { %9833 = vmatpush1.bf16.msra.mxu1 %v24736_v57  ;;  %v24826_v57 = vld [vmem:[%s36108_s8 + $0x8f0] ss:$76 sps:$4 sm:$0xff]  }
 0x7f6   :  { %9834 = vmatprep.subr.bf16.mxu1 %v24744_v58  ;;  %v24834_v58 = vld [vmem:[%s36108_s8 + $0x98c] ss:$76 sps:$4 sm:$0xff]  }
 0x7f9   :  { %9835 = vmatpush1.bf16.msra.mxu1 %v24742_v61  ;;  %v30413_v61 = vld [vmem:[%s36113_s13 + $0x9] sm:$0xf] }
 0x7fa   :  { %9836 = vmatprep.subr.bf16.mxu1 %v24750_v62  ;;  %v5510_v62 = vrot.slane %v30413_v61, %v29821_v47 }
 0x7fd   :  { %9837 = vmatpush1.bf16.msra.mxu1 %v24748_v22  ;;  %v5514_v22 = vrot.slane %v30413_v61, %v29824_v13 }
 0x7fe   :  { %9838 = vmatprep.subr.bf16.mxu1 %v24756_v14 }
 0x801   :  { %9839 = vmatpush1.bf16.msra.mxu1 %v24754_v0 }
 0x802   :  { %9840 = vmatprep.subr.bf16.mxu1 %v24762_v5 }
 0x805   :  { %9841 = vmatpush1.bf16.msra.mxu1 %v24760_v28 }
 0x806   :  { %9842 = vmatprep.subr.bf16.mxu1 %v24768_v3 }
 0x809   :  { %9843 = vmatpush1.bf16.msra.mxu1 %v24766_v4 }
 0x80a   :  { %9844 = vmatprep.subr.bf16.mxu1 %v24774_v6 }
 0x80d   :  { %9845 = vmatpush1.bf16.msra.mxu1 %v24772_v21  ;;  %v24829_v21 = vld [vmem:[%s36108_s8 + $0x980] ss:$76 sps:$4 sm:$0xff]  }
 0x80e   :  { %9846 = vmatprep.subr.bf16.mxu1 %v24780_v23  ;;  %v24832_v23 = vld [vmem:[%s36108_s8 + $0x988] ss:$76 sps:$4 sm:$0xff]  }
 0x811   :  { %9847 = vmatpush1.bf16.msra.mxu1 %v24778_v50  ;;  %v24840_v50 = vld [vmem:[%s36108_s8 + $0xa24] ss:$76 sps:$4 sm:$0xff]  }
 0x812   :  { %9848 = vmatprep.subr.bf16.mxu1 %v24786_v32  ;;  %v24835_v32 = vld [vmem:[%s36108_s8 + $0xa18] ss:$76 sps:$4 sm:$0xff]  }
 0x815   :  { %9849 = vmatpush1.bf16.msra.mxu1 %v24784_v36  ;;  %v24843_v36 = vld [vmem:[%s36108_s8 + $0xab4] ss:$76 sps:$4 sm:$0xff]  }
 0x816   :  { %9850 = vmatprep.subr.bf16.mxu1 %v24792_v37  ;;  %v24846_v37 = vld [vmem:[%s36108_s8 + $0xabc] ss:$76 sps:$4 sm:$0xff]  }
 0x819   :  { %9851 = vmatpush1.bf16.msra.mxu1 %v24790_v40  ;;  %v24841_v40 = vld [vmem:[%s36108_s8 + $0xab0] ss:$76 sps:$4 sm:$0xff]  }
 0x81a   :  { %9852 = vmatprep.subr.bf16.mxu1 %v24798_v41  ;;  %v24844_v41 = vld [vmem:[%s36108_s8 + $0xab8] ss:$76 sps:$4 sm:$0xff]  }
 0x81d   :  { %9853 = vmatpush1.bf16.msra.mxu1 %v24796_v44  ;;  %v24849_v44 = vld [vmem:[%s36108_s8 + $0xb4c] ss:$76 sps:$4 sm:$0xff]  }
 0x81e   :  { %9854 = vmatprep.subr.bf16.mxu1 %v24804_v45  ;;  %v24852_v45 = vld [vmem:[%s36108_s8 + $0xb54] ss:$76 sps:$4 sm:$0xff]  }
 0x821   :  { %9855 = vmatpush1.bf16.msra.mxu1 %v24802_v11  ;;  %v24847_v11 = vld [vmem:[%s36108_s8 + $0xb48] ss:$76 sps:$4 sm:$0xff]  }
 0x822   :  { %9856 = vmatprep.subr.bf16.mxu1 %v24810_v46  ;;  %v24850_v46 = vld [vmem:[%s36108_s8 + $0xb50] ss:$76 sps:$4 sm:$0xff]  }
 0x825   :  { %9857 = vmatpush1.bf16.msra.mxu1 %v24808_v48  ;;  %v24855_v48 = vld [vmem:[%s36108_s8 + $0xbe4] ss:$76 sps:$4 sm:$0xff]  }
 0x826   :  { %9858 = vmatprep.subr.bf16.mxu1 %v24816_v27  ;;  %v24858_v27 = vld [vmem:[%s36108_s8 + $0xbec] ss:$76 sps:$4 sm:$0xff]  }
 0x829   :  { %9859 = vmatpush1.bf16.msra.mxu1 %v24814_v15  ;;  %v24853_v15 = vld [vmem:[%s36108_s8 + $0xbe0] ss:$76 sps:$4 sm:$0xff]  }
 0x82a   :  { %9860 = vmatprep.subr.bf16.mxu1 %v24822_v51  ;;  %v24856_v51 = vld [vmem:[%s36108_s8 + $0xbe8] ss:$76 sps:$4 sm:$0xff]  }
 0x82d   :  { %9861 = vmatpush1.bf16.msra.mxu1 %v24820_v54  ;;  %v24861_v54 = vld [vmem:[%s36108_s8 + $0xc7c] ss:$76 sps:$4 sm:$0xff]  }
 0x82e   :  { %9862 = vmatprep.subr.bf16.mxu1 %v24828_v52  ;;  %v24864_v52 = vld [vmem:[%s36108_s8 + $0xc84] ss:$76 sps:$4 sm:$0xff]  }
 0x831   :  { %9863 = vmatpush1.bf16.msra.mxu1 %v24826_v57  ;;  %v24859_v57 = vld [vmem:[%s36108_s8 + $0xc78] ss:$76 sps:$4 sm:$0xff]  }
 0x832   :  { %9873 = vmatprep.subr.bf16.mxu1 %v24834_v58  ;;  %v24862_v58 = vld [vmem:[%s36108_s8 + $0xc80] ss:$76 sps:$4 sm:$0xff]  }
 0x887   :  { %v5881_v14 = vpop.f32.mrb[12].mxu1 }
 0x888   :  { %v5882_v0 = vadd.f32 %v5881_v14, %v5510_v62  ;;  %v5883_v5 = vpop.f32.mrb[13].mxu1  ;;  %v24867_v62 = vld [vmem:[%s36108_s8 + $0xd14] ss:$76 sps:$4 sm:$0xff]   ;;  %v24865_v14 = vld [vmem:[%s36108_s8 + $0xd10] ss:$76 sps:$4 sm:$0xff]  }
 0x889   :  { %v5884_v28 = vadd.f32 %v5883_v5, %v5514_v22  ;;  %v5885_v3 = vpop.f32.mrb[14].mxu1  ;;  %v24870_v22 = vld [vmem:[%s36108_s8 + $0xd1c] ss:$76 sps:$4 sm:$0xff]   ;;  %v24873_v5 = vld [vmem:[%s36108_s8 + $0xdac] ss:$76 sps:$4 sm:$0xff]  }
 0x88a   :  { %v5929_v4 = vmax.f32 %v5882_v0, 0.0  ;;  %v5886_v6 = vpop.f32.mrb[15].mxu1  ;;  %v24868_v0 = vld [vmem:[%s36108_s8 + $0xd18] ss:$76 sps:$4 sm:$0xff]   ;;  %v24871_v3 = vld [vmem:[%s36108_s8 + $0xda8] ss:$76 sps:$4 sm:$0xff]  }
 0x88b   :  { %v5930_v18 = vmax.f32 %v5884_v28, 0.0  ;;  %v24876_v28 = vld [vmem:[%s36108_s8 + $0xdb4] ss:$76 sps:$4 sm:$0xff]   ;;  %v24879_v6 = vld [vmem:[%s36108_s8 + $0xe44] ss:$76 sps:$4 sm:$0xff]  }
 0x88c   :  { %v30427_v9 = vpack.c.bf16 %v5929_v4, %v5929_v4  ;;  %v24874_v4 = vld [vmem:[%s36108_s8 + $0xdb0] ss:$76 sps:$4 sm:$0xff]  }
 0x88d   :  { %v30419_v19 = vpack.c.bf16 %v5930_v18, %v5930_v18  ;;  %v24882_v18 = vld [vmem:[%s36108_s8 + $0xe4c] ss:$76 sps:$4 sm:$0xff]  }
 0x88f   :  { %9782 = vmatprep.mubr.bf16.mxu0 %v30419_v19  ;;  %9864 = vmatprep.mubr.bf16.mxu1 %v30419_v19 }
 0x890   :  { %9783 = vmatmul.mubr.bf16.vlgmr.msra.gmra.mrb[8].mxu0 %v30427_v9  ;;  %9865 = vmatmul.mubr.bf16.vlgmr.msra.gmra.mrb[20].mxu1 %v30427_v9 }
 0x891   :  { %9792 = vmatpush1.bf16.msra.mxu0 %v24829_v21  ;;  %9874 = vmatpush1.bf16.msra.mxu1 %v24832_v23  ;;  %v24877_v21 = vld [vmem:[%s36108_s8 + $0xe40] ss:$76 sps:$4 sm:$0xff]   ;;  %v24880_v23 = vld [vmem:[%s36108_s8 + $0xe48] ss:$76 sps:$4 sm:$0xff]  }
 0x892   :  { %9793 = vmatprep.subr.bf16.mxu0 %v24837_v29  ;;  %9875 = vmatprep.subr.bf16.mxu1 %v24840_v50  ;;  %v24885_v29 = vld [vmem:[%s36108_s8 + $0xedc] ss:$76 sps:$4 sm:$0xff]   ;;  %v24888_v50 = vld [vmem:[%s36108_s8 + $0xee4] ss:$76 sps:$4 sm:$0xff]  }
 0x895   :  { %9794 = vmatpush1.bf16.msra.mxu0 %v24835_v32  ;;  %9876 = vmatpush1.bf16.msra.mxu1 %v24838_v1  ;;  %v24883_v32 = vld [vmem:[%s36108_s8 + $0xed8] ss:$76 sps:$4 sm:$0xff]   ;;  %v24886_v1 = vld [vmem:[%s36108_s8 + $0xee0] ss:$76 sps:$4 sm:$0xff]  }
 0x896   :  { %9795 = vmatprep.subr.bf16.mxu0 %v24843_v36  ;;  %9877 = vmatprep.subr.bf16.mxu1 %v24846_v37  ;;  %v24891_v36 = vld [vmem:[%s36108_s8 + $0xf74] ss:$76 sps:$4 sm:$0xff]   ;;  %v24894_v37 = vld [vmem:[%s36108_s8 + $0xf7c] ss:$76 sps:$4 sm:$0xff]  }
 0x899   :  { %9796 = vmatpush1.bf16.msra.mxu0 %v24841_v40  ;;  %9878 = vmatpush1.bf16.msra.mxu1 %v24844_v41  ;;  %v24889_v40 = vld [vmem:[%s36108_s8 + $0xf70] ss:$76 sps:$4 sm:$0xff]   ;;  %v24892_v41 = vld [vmem:[%s36108_s8 + $0xf78] ss:$76 sps:$4 sm:$0xff]  }
 0x89a   :  { %9797 = vmatprep.subr.bf16.mxu0 %v24849_v44  ;;  %9879 = vmatprep.subr.bf16.mxu1 %v24852_v45  ;;  %v24897_v44 = vld [vmem:[%s36108_s8 + $0x100c] ss:$76 sps:$4 sm:$0xff]   ;;  %v24900_v45 = vld [vmem:[%s36108_s8 + $0x1014] ss:$76 sps:$4 sm:$0xff]  }
 0x89d   :  { %9798 = vmatpush1.bf16.msra.mxu0 %v24847_v11  ;;  %9880 = vmatpush1.bf16.msra.mxu1 %v24850_v46  ;;  %v24895_v11 = vld [vmem:[%s36108_s8 + $0x1008] ss:$76 sps:$4 sm:$0xff]   ;;  %v24898_v46 = vld [vmem:[%s36108_s8 + $0x1010] ss:$76 sps:$4 sm:$0xff]  }
 0x89e   :  { %9799 = vmatprep.subr.bf16.mxu0 %v24855_v48  ;;  %9881 = vmatprep.subr.bf16.mxu1 %v24858_v27  ;;  %v24903_v48 = vld [vmem:[%s36108_s8 + $0x10a4] ss:$76 sps:$4 sm:$0xff]   ;;  %v24906_v27 = vld [vmem:[%s36108_s8 + $0x10ac] ss:$76 sps:$4 sm:$0xff]  }
 0x8a1   :  { %9800 = vmatpush1.bf16.msra.mxu0 %v24853_v15  ;;  %9882 = vmatpush1.bf16.msra.mxu1 %v24856_v51  ;;  %v24901_v15 = vld [vmem:[%s36108_s8 + $0x10a0] ss:$76 sps:$4 sm:$0xff]   ;;  %v24904_v51 = vld [vmem:[%s36108_s8 + $0x10a8] ss:$76 sps:$4 sm:$0xff]  }
 0x8a2   :  { %9801 = vmatprep.subr.bf16.mxu0 %v24861_v54  ;;  %9883 = vmatprep.subr.bf16.mxu1 %v24864_v52  ;;  %v24909_v54 = vld [vmem:[%s36108_s8 + $0x113c] ss:$76 sps:$4 sm:$0xff]   ;;  %v24912_v52 = vld [vmem:[%s36108_s8 + $0x1144] ss:$76 sps:$4 sm:$0xff]  }
 0x8a5   :  { %9802 = vmatpush1.bf16.msra.mxu0 %v24859_v57  ;;  %9884 = vmatpush1.bf16.msra.mxu1 %v24862_v58  ;;  %v24907_v57 = vld [vmem:[%s36108_s8 + $0x1138] ss:$76 sps:$4 sm:$0xff]   ;;  %v24910_v58 = vld [vmem:[%s36108_s8 + $0x1140] ss:$76 sps:$4 sm:$0xff]  }
 0x8a6   :  { %9803 = vmatprep.subr.bf16.mxu0 %v24867_v62  ;;  %9885 = vmatprep.subr.bf16.mxu1 %v24870_v22  ;;  %v24915_v62 = vld [vmem:[%s36108_s8 + $0x11d4] ss:$76 sps:$4 sm:$0xff]   ;;  %v24918_v22 = vld [vmem:[%s36108_s8 + $0x11dc] ss:$76 sps:$4 sm:$0xff]  }
 0x8a9   :  { %9804 = vmatpush1.bf16.msra.mxu0 %v24865_v14  ;;  %9886 = vmatpush1.bf16.msra.mxu1 %v24868_v0  ;;  %v5518_v14 = vrot.slane %v30413_v61, %v29916_v33  ;;  %v5522_v0 = vrot.slane %v30413_v61, %v29827_v17 }
 0x8aa   :  { %9805 = vmatprep.subr.bf16.mxu0 %v24873_v5  ;;  %9887 = vmatprep.subr.bf16.mxu1 %v24876_v28  ;;  %v24913_v5 = vld [vmem:[%s36108_s8 + $0x11d0] ss:$76 sps:$4 sm:$0xff]   ;;  %v24916_v28 = vld [vmem:[%s36108_s8 + $0x11d8] ss:$76 sps:$4 sm:$0xff]  }
 0x8ad   :  { %9806 = vmatpush1.bf16.msra.mxu0 %v24871_v3  ;;  %9888 = vmatpush1.bf16.msra.mxu1 %v24874_v4  ;;  %v24921_v3 = vld [vmem:[%s36108_s8 + $0x126c] ss:$76 sps:$4 sm:$0xff]   ;;  %v24924_v4 = vld [vmem:[%s36108_s8 + $0x1274] ss:$76 sps:$4 sm:$0xff]  }
 0x8ae   :  { %9807 = vmatprep.subr.bf16.mxu0 %v24879_v6  ;;  %9889 = vmatprep.subr.bf16.mxu1 %v24882_v18 }
 0x8b1   :  { %9808 = vmatpush1.bf16.msra.mxu0 %v24877_v21  ;;  %9890 = vmatpush1.bf16.msra.mxu1 %v24880_v23 }
 0x8b2   :  { %9809 = vmatprep.subr.bf16.mxu0 %v24885_v29  ;;  %9891 = vmatprep.subr.bf16.mxu1 %v24888_v50  ;;  %v24919_v29 = vld [vmem:[%s36108_s8 + $0x1268] ss:$76 sps:$4 sm:$0xff]   ;;  %v24922_v50 = vld [vmem:[%s36108_s8 + $0x1270] ss:$76 sps:$4 sm:$0xff]  }
 0x8b5   :  { %9810 = vmatpush1.bf16.msra.mxu0 %v24883_v32  ;;  %9892 = vmatpush1.bf16.msra.mxu1 %v24886_v1 }
 0x8b6   :  { %9811 = vmatprep.subr.bf16.mxu0 %v24891_v36  ;;  %9893 = vmatprep.subr.bf16.mxu1 %v24894_v37  ;;  %v24927_v36 = vld [vmem:[%s36108_s8 + $0x14] ss:$76 sps:$4 sm:$0xff]   ;;  %v24930_v37 = vld [vmem:[%s36108_s8 + $0x1c] ss:$76 sps:$4 sm:$0xff]  }
 0x8b9   :  { %9812 = vmatpush1.bf16.msra.mxu0 %v24889_v40  ;;  %9894 = vmatpush1.bf16.msra.mxu1 %v24892_v41 }
 0x8ba   :  { %9813 = vmatprep.subr.bf16.mxu0 %v24897_v44  ;;  %9895 = vmatprep.subr.bf16.mxu1 %v24900_v45  ;;  %v24925_v44 = vld [vmem:[%s36108_s8 + $0x10] ss:$76 sps:$4 sm:$0xff]  }
 0x8bd   :  { %9814 = vmatpush1.bf16.msra.mxu0 %v24895_v11  ;;  %9896 = vmatpush1.bf16.msra.mxu1 %v24898_v46  ;;  %v24928_v11 = vld [vmem:[%s36108_s8 + $0x18] ss:$76 sps:$4 sm:$0xff]  }
 0x8be   :  { %9815 = vmatprep.subr.bf16.mxu0 %v24903_v48  ;;  %9897 = vmatprep.subr.bf16.mxu1 %v24906_v27  ;;  %v24933_v46 = vld [vmem:[%s36108_s8 + $0xac] ss:$76 sps:$4 sm:$0xff]   ;;  %v24936_v48 = vld [vmem:[%s36108_s8 + $0xb4] ss:$76 sps:$4 sm:$0xff]  }
 0x8bf   :  { %v24931_v27 = vld [vmem:[%s36108_s8 + $0xa8] ss:$76 sps:$4 sm:$0xff]  }
 0x8c1   :  { %9816 = vmatpush1.bf16.msra.mxu0 %v24901_v15  ;;  %9898 = vmatpush1.bf16.msra.mxu1 %v24904_v51  ;;  %v24934_v15 = vld [vmem:[%s36108_s8 + $0xb0] ss:$76 sps:$4 sm:$0xff]  }
 0x8c2   :  { %9817 = vmatprep.subr.bf16.mxu0 %v24909_v54  ;;  %9899 = vmatprep.subr.bf16.mxu1 %v24912_v52  ;;  %v24939_v51 = vld [vmem:[%s36108_s8 + $0x144] ss:$76 sps:$4 sm:$0xff]   ;;  %v24942_v54 = vld [vmem:[%s36108_s8 + $0x14c] ss:$76 sps:$4 sm:$0xff]  }
 0x8c3   :  { %v24937_v52 = vld [vmem:[%s36108_s8 + $0x140] ss:$76 sps:$4 sm:$0xff]  }
 0x8c5   :  { %9818 = vmatpush1.bf16.msra.mxu0 %v24907_v57  ;;  %9900 = vmatpush1.bf16.msra.mxu1 %v24910_v58  ;;  %v24940_v57 = vld [vmem:[%s36108_s8 + $0x148] ss:$76 sps:$4 sm:$0xff]  }
 0x8c6   :  { %9819 = vmatprep.subr.bf16.mxu0 %v24915_v62  ;;  %9901 = vmatprep.subr.bf16.mxu1 %v24918_v22  ;;  %v24945_v58 = vld [vmem:[%s36108_s8 + $0x1dc] ss:$76 sps:$4 sm:$0xff]   ;;  %v24948_v62 = vld [vmem:[%s36108_s8 + $0x1e4] ss:$76 sps:$4 sm:$0xff]  }
 0x8c7   :  { %v5922_v6 = vpop.f32.mrb[16].mxu1  ;;  %v24943_v22 = vld [vmem:[%s36108_s8 + $0x1d8] ss:$76 sps:$4 sm:$0xff]  }
 0x8c8   :  { %v5923_v61 = vadd.f32 %v5922_v6, %v5518_v14  ;;  %v5924_v18 = vpop.f32.mrb[17].mxu1  ;;  %v24946_v14 = vld [vmem:[%s36108_s8 + $0x1e0] ss:$76 sps:$4 sm:$0xff]  }
 0x8c9   :  { %v5925_v21 = vadd.f32 %v5924_v18, %v5522_v0  ;;  %v5926_v23 = vpop.f32.mrb[18].mxu1  ;;  %9820 = vmatpush1.bf16.msra.mxu0 %v24913_v5  ;;  %9902 = vmatpush1.bf16.msra.mxu1 %v24916_v28  ;;  %v24951_v0 = vld [vmem:[%s36108_s8 + $0x274] ss:$76 sps:$4 sm:$0xff]   ;;  %v24954_v5 = vld [vmem:[%s36108_s8 + $0x27c] ss:$76 sps:$4 sm:$0xff]  }
 0x8ca   :  { %v5931_v32 = vmax.f32 %v5923_v61, 0.0  ;;  %v5927_v1 = vpop.f32.mrb[19].mxu1  ;;  %9821 = vmatprep.subr.bf16.mxu0 %v24921_v3  ;;  %9903 = vmatprep.subr.bf16.mxu1 %v24924_v4  ;;  %v24949_v28 = vld [vmem:[%s36108_s8 + $0x270] ss:$76 sps:$4 sm:$0xff]   ;;  %v24952_v3 = vld [vmem:[%s36108_s8 + $0x278] ss:$76 sps:$4 sm:$0xff]  }
 0x8cb   :  { %v5932_v40 = vmax.f32 %v5925_v21, 0.0  ;;  %v24957_v4 = vld [vmem:[%s36108_s8 + $0x30c] ss:$76 sps:$4 sm:$0xff]   ;;  %v24960_v6 = vld [vmem:[%s36108_s8 + $0x314] ss:$76 sps:$4 sm:$0xff]  }
 0x8cc   :  { %v30628_v45 = vpack.c.bf16 %v5931_v32, %v5931_v32  ;;  %v24955_v61 = vld [vmem:[%s36108_s8 + $0x308] ss:$76 sps:$4 sm:$0xff]   ;;  %v24958_v18 = vld [vmem:[%s36108_s8 + $0x310] ss:$76 sps:$4 sm:$0xff]   ;;  %v24966_v23 = vld [vmem:[%s36108_s8 + $0x3ac] ss:$76 sps:$4 sm:$0xff]  }
 0x8cd   :  { %v30623_v41 = vpack.c.bf16 %v5932_v40, %v5932_v40  ;;  %9822 = vmatpush1.bf16.msra.mxu0 %v24919_v29  ;;  %9904 = vmatpush1.bf16.msra.mxu1 %v24922_v50  ;;  %v24963_v21 = vld [vmem:[%s36108_s8 + $0x3a4] ss:$76 sps:$4 sm:$0xff]   ;;  %v24961_v29 = vld [vmem:[%s36108_s8 + $0x3a0] ss:$76 sps:$4 sm:$0xff]   ;;  %v24964_v50 = vld [vmem:[%s36108_s8 + $0x3a8] ss:$76 sps:$4 sm:$0xff]  }
 0x8ce   :  { %9914 = vmatprep.subr.bf16.mxu0 %v24927_v36  ;;  %9996 = vmatprep.subr.bf16.mxu1 %v24930_v37  ;;  %v24969_v32 = vld [vmem:[%s36108_s8 + $0x43c] ss:$76 sps:$4 sm:$0xff]   ;;  %v24972_v1 = vld [vmem:[%s36108_s8 + $0x444] ss:$76 sps:$4 sm:$0xff]   ;;  %v24970_v37 = vld [vmem:[%s36108_s8 + $0x440] ss:$76 sps:$4 sm:$0xff]  }
 0x8cf   :  { %9823 = vmatprep.mubr.bf16.mxu0 %v30623_v41  ;;  %9905 = vmatprep.mubr.bf16.mxu1 %v30623_v41  ;;  %v24967_v36 = vld [vmem:[%s36108_s8 + $0x438] ss:$76 sps:$4 sm:$0xff]   ;;  %v24975_v40 = vld [vmem:[%s36108_s8 + $0x4d4] ss:$76 sps:$4 sm:$0xff]  }
 0x8d0   :  { %9824 = vmatmul.mubr.bf16.vlgmr.msra.gmra.mrb[8].mxu0 %v30628_v45  ;;  %9906 = vmatmul.mubr.bf16.vlgmr.msra.gmra.mrb[20].mxu1 %v30628_v45 }
 0x8d1   :  { %9915 = vmatpush1.bf16.msra.mxu0 %v24925_v44  ;;  %9946 = vmatprep.mubr.bf16.mxu0 %v30419_v19  ;;  %v24978_v44 = vld [vmem:[%s36108_s8 + $0x4dc] ss:$76 sps:$4 sm:$0xff]  }
 0x8d2   :  { %9997 = vmatpush1.bf16.msra.mxu1 %v24928_v11  ;;  %10028 = vmatprep.mubr.bf16.mxu1 %v30419_v19  ;;  %v24973_v11 = vld [vmem:[%s36108_s8 + $0x4d0] ss:$76 sps:$4 sm:$0xff]  }
 0x8d3   :  { %9916 = vmatprep.subr.bf16.mxu0 %v24933_v46  ;;  %9998 = vmatprep.subr.bf16.mxu1 %v24936_v48  ;;  %v24976_v46 = vld [vmem:[%s36108_s8 + $0x4d8] ss:$76 sps:$4 sm:$0xff]  }
 0x8d4   :  { %v24981_v48 = vld [vmem:[%s36108_s8 + $0x56c] ss:$76 sps:$4 sm:$0xff]  }
 0x8d5   :  { %9917 = vmatpush1.bf16.msra.mxu0 %v24931_v27  ;;  %v24984_v27 = vld [vmem:[%s36108_s8 + $0x574] ss:$76 sps:$4 sm:$0xff]  }
 0x8d6   :  { %9999 = vmatpush1.bf16.msra.mxu1 %v24934_v15  ;;  %9918 = vmatprep.subr.bf16.mxu0 %v24939_v51  ;;  %v24979_v15 = vld [vmem:[%s36108_s8 + $0x568] ss:$76 sps:$4 sm:$0xff]   ;;  %v24982_v51 = vld [vmem:[%s36108_s8 + $0x570] ss:$76 sps:$4 sm:$0xff]  }
 0x8d7   :  { %10000 = vmatprep.subr.bf16.mxu1 %v24942_v54  ;;  %v24987_v54 = vld [vmem:[%s36108_s8 + $0x604] ss:$76 sps:$4 sm:$0xff]  }
 0x8d9   :  { %9919 = vmatpush1.bf16.msra.mxu0 %v24937_v52  ;;  %v24990_v52 = vld [vmem:[%s36108_s8 + $0x60c] ss:$76 sps:$4 sm:$0xff]  }
 0x8da   :  { %10001 = vmatpush1.bf16.msra.mxu1 %v24940_v57  ;;  %9920 = vmatprep.subr.bf16.mxu0 %v24945_v58  ;;  %v24985_v57 = vld [vmem:[%s36108_s8 + $0x600] ss:$76 sps:$4 sm:$0xff]   ;;  %v24988_v58 = vld [vmem:[%s36108_s8 + $0x608] ss:$76 sps:$4 sm:$0xff]  }
 0x8db   :  { %10002 = vmatprep.subr.bf16.mxu1 %v24948_v62  ;;  %v24993_v62 = vld [vmem:[%s36108_s8 + $0x69c] ss:$76 sps:$4 sm:$0xff]  }
 0x8dd   :  { %9921 = vmatpush1.bf16.msra.mxu0 %v24943_v22  ;;  %v24996_v22 = vld [vmem:[%s36108_s8 + $0x6a4] ss:$76 sps:$4 sm:$0xff]  }
 0x8de   :  { %10003 = vmatpush1.bf16.msra.mxu1 %v24946_v14  ;;  %9922 = vmatprep.subr.bf16.mxu0 %v24951_v0  ;;  %v24991_v14 = vld [vmem:[%s36108_s8 + $0x698] ss:$76 sps:$4 sm:$0xff]   ;;  %v24994_v0 = vld [vmem:[%s36108_s8 + $0x6a0] ss:$76 sps:$4 sm:$0xff]  }
 0x8df   :  { %10004 = vmatprep.subr.bf16.mxu1 %v24954_v5  ;;  %v24999_v5 = vld [vmem:[%s36108_s8 + $0x734] ss:$76 sps:$4 sm:$0xff]  }
 0x8e1   :  { %9923 = vmatpush1.bf16.msra.mxu0 %v24949_v28  ;;  %v25002_v28 = vld [vmem:[%s36108_s8 + $0x73c] ss:$76 sps:$4 sm:$0xff]  }
 0x8e2   :  { %10005 = vmatpush1.bf16.msra.mxu1 %v24952_v3  ;;  %9924 = vmatprep.subr.bf16.mxu0 %v24957_v4  ;;  %v24997_v3 = vld [vmem:[%s36108_s8 + $0x730] ss:$76 sps:$4 sm:$0xff]   ;;  %v25000_v4 = vld [vmem:[%s36108_s8 + $0x738] ss:$76 sps:$4 sm:$0xff]  }
 0x8e3   :  { %10006 = vmatprep.subr.bf16.mxu1 %v24960_v6  ;;  %v25005_v6 = vld [vmem:[%s36108_s8 + $0x7cc] ss:$76 sps:$4 sm:$0xff]  }
 0x8e5   :  { %9925 = vmatpush1.bf16.msra.mxu0 %v24955_v61  ;;  %v25008_v61 = vld [vmem:[%s36108_s8 + $0x7d4] ss:$76 sps:$4 sm:$0xff]  }
 0x8e6   :  { %10007 = vmatpush1.bf16.msra.mxu1 %v24958_v18  ;;  %9926 = vmatprep.subr.bf16.mxu0 %v24963_v21  ;;  %v25003_v18 = vld [vmem:[%s36108_s8 + $0x7c8] ss:$76 sps:$4 sm:$0xff]   ;;  %v25006_v21 = vld [vmem:[%s36108_s8 + $0x7d0] ss:$76 sps:$4 sm:$0xff]  }
 0x8e7   :  { %10008 = vmatprep.subr.bf16.mxu1 %v24966_v23  ;;  %v25011_v23 = vld [vmem:[%s36108_s8 + $0x864] ss:$76 sps:$4 sm:$0xff]  }
 0x8e9   :  { %9927 = vmatpush1.bf16.msra.mxu0 %v24961_v29  ;;  %v25014_v29 = vld [vmem:[%s36108_s8 + $0x86c] ss:$76 sps:$4 sm:$0xff]  }
 0x8ea   :  { %10009 = vmatpush1.bf16.msra.mxu1 %v24964_v50  ;;  %9928 = vmatprep.subr.bf16.mxu0 %v24969_v32  ;;  %v25009_v50 = vld [vmem:[%s36108_s8 + $0x860] ss:$76 sps:$4 sm:$0xff]   ;;  %v25012_v32 = vld [vmem:[%s36108_s8 + $0x868] ss:$76 sps:$4 sm:$0xff]  }
 0x8eb   :  { %10010 = vmatprep.subr.bf16.mxu1 %v24972_v1  ;;  %v25017_v1 = vld [vmem:[%s36108_s8 + $0x8fc] ss:$76 sps:$4 sm:$0xff]  }
 0x8ed   :  { %9929 = vmatpush1.bf16.msra.mxu0 %v24967_v36  ;;  %v25020_v36 = vld [vmem:[%s36108_s8 + $0x904] ss:$76 sps:$4 sm:$0xff]  }
 0x8ee   :  { %10011 = vmatpush1.bf16.msra.mxu1 %v24970_v37  ;;  %9930 = vmatprep.subr.bf16.mxu0 %v24975_v40  ;;  %v25015_v37 = vld [vmem:[%s36108_s8 + $0x8f8] ss:$76 sps:$4 sm:$0xff]   ;;  %v25018_v40 = vld [vmem:[%s36108_s8 + $0x900] ss:$76 sps:$4 sm:$0xff]  }
 0x8ef   :  { %10012 = vmatprep.subr.bf16.mxu1 %v24978_v44  ;;  %v25023_v44 = vld [vmem:[%s36108_s8 + $0x994] ss:$76 sps:$4 sm:$0xff]  }
 0x8f1   :  { %9931 = vmatpush1.bf16.msra.mxu0 %v24973_v11  ;;  %v25026_v11 = vld [vmem:[%s36108_s8 + $0x99c] ss:$76 sps:$4 sm:$0xff]  }
 0x8f2   :  { %10013 = vmatpush1.bf16.msra.mxu1 %v24976_v46  ;;  %9932 = vmatprep.subr.bf16.mxu0 %v24981_v48  ;;  %v25021_v46 = vld [vmem:[%s36108_s8 + $0x990] ss:$76 sps:$4 sm:$0xff]   ;;  %v25024_v48 = vld [vmem:[%s36108_s8 + $0x998] ss:$76 sps:$4 sm:$0xff]  }
 0x8f3   :  { %10014 = vmatprep.subr.bf16.mxu1 %v24984_v27  ;;  %v25029_v27 = vld [vmem:[%s36108_s8 + $0xa2c] ss:$76 sps:$4 sm:$0xff]  }
 0x8f5   :  { %9933 = vmatpush1.bf16.msra.mxu0 %v24979_v15  ;;  %v25032_v15 = vld [vmem:[%s36108_s8 + $0xa34] ss:$76 sps:$4 sm:$0xff]  }
 0x8f6   :  { %10015 = vmatpush1.bf16.msra.mxu1 %v24982_v51  ;;  %9934 = vmatprep.subr.bf16.mxu0 %v24987_v54  ;;  %v25027_v51 = vld [vmem:[%s36108_s8 + $0xa28] ss:$76 sps:$4 sm:$0xff]   ;;  %v25030_v54 = vld [vmem:[%s36108_s8 + $0xa30] ss:$76 sps:$4 sm:$0xff]  }
 0x8f7   :  { %10016 = vmatprep.subr.bf16.mxu1 %v24990_v52  ;;  %v25035_v52 = vld [vmem:[%s36108_s8 + $0xac4] ss:$76 sps:$4 sm:$0xff]  }
 0x8f9   :  { %9935 = vmatpush1.bf16.msra.mxu0 %v24985_v57  ;;  %v25038_v57 = vld [vmem:[%s36108_s8 + $0xacc] ss:$76 sps:$4 sm:$0xff]  }
 0x8fa   :  { %10017 = vmatpush1.bf16.msra.mxu1 %v24988_v58  ;;  %9936 = vmatprep.subr.bf16.mxu0 %v24993_v62  ;;  %v25033_v58 = vld [vmem:[%s36108_s8 + $0xac0] ss:$76 sps:$4 sm:$0xff]   ;;  %v25036_v62 = vld [vmem:[%s36108_s8 + $0xac8] ss:$76 sps:$4 sm:$0xff]  }
 0x8fb   :  { %10018 = vmatprep.subr.bf16.mxu1 %v24996_v22  ;;  %v25041_v22 = vld [vmem:[%s36108_s8 + $0xb5c] ss:$76 sps:$4 sm:$0xff]  }
 0x8fd   :  { %9937 = vmatpush1.bf16.msra.mxu0 %v24991_v14  ;;  %v25044_v14 = vld [vmem:[%s36108_s8 + $0xb64] ss:$76 sps:$4 sm:$0xff]  }
 0x8fe   :  { %10019 = vmatpush1.bf16.msra.mxu1 %v24994_v0  ;;  %9938 = vmatprep.subr.bf16.mxu0 %v24999_v5  ;;  %v25039_v0 = vld [vmem:[%s36108_s8 + $0xb58] ss:$76 sps:$4 sm:$0xff]   ;;  %v25042_v5 = vld [vmem:[%s36108_s8 + $0xb60] ss:$76 sps:$4 sm:$0xff]  }
 0x8ff   :  { %10020 = vmatprep.subr.bf16.mxu1 %v25002_v28  ;;  %v25047_v28 = vld [vmem:[%s36108_s8 + $0xbf4] ss:$76 sps:$4 sm:$0xff]  }
 0x901   :  { %9939 = vmatpush1.bf16.msra.mxu0 %v24997_v3  ;;  %v25050_v3 = vld [vmem:[%s36108_s8 + $0xbfc] ss:$76 sps:$4 sm:$0xff]  }
 0x902   :  { %10021 = vmatpush1.bf16.msra.mxu1 %v25000_v4  ;;  %9940 = vmatprep.subr.bf16.mxu0 %v25005_v6  ;;  %v25045_v4 = vld [vmem:[%s36108_s8 + $0xbf0] ss:$76 sps:$4 sm:$0xff]   ;;  %v25048_v6 = vld [vmem:[%s36108_s8 + $0xbf8] ss:$76 sps:$4 sm:$0xff]  }
 0x903   :  { %10022 = vmatprep.subr.bf16.mxu1 %v25008_v61  ;;  %v25053_v61 = vld [vmem:[%s36108_s8 + $0xc8c] ss:$76 sps:$4 sm:$0xff]  }
 0x905   :  { %9941 = vmatpush1.bf16.msra.mxu0 %v25003_v18  ;;  %v25056_v18 = vld [vmem:[%s36108_s8 + $0xc94] ss:$76 sps:$4 sm:$0xff]  }
 0x906   :  { %10023 = vmatpush1.bf16.msra.mxu1 %v25006_v21  ;;  %9942 = vmatprep.subr.bf16.mxu0 %v25011_v23  ;;  %v25051_v21 = vld [vmem:[%s36108_s8 + $0xc88] ss:$76 sps:$4 sm:$0xff]   ;;  %v25054_v23 = vld [vmem:[%s36108_s8 + $0xc90] ss:$76 sps:$4 sm:$0xff]  }
 0x907   :  { %10024 = vmatprep.subr.bf16.mxu1 %v25014_v29  ;;  %v25059_v29 = vld [vmem:[%s36108_s8 + $0xd24] ss:$76 sps:$4 sm:$0xff]  }
 0x909   :  { %9943 = vmatpush1.bf16.msra.mxu0 %v25009_v50  ;;  %v25062_v50 = vld [vmem:[%s36108_s8 + $0xd2c] ss:$76 sps:$4 sm:$0xff]  }
 0x90a   :  { %10025 = vmatpush1.bf16.msra.mxu1 %v25012_v32  ;;  %9944 = vmatprep.subr.bf16.mxu0 %v25017_v1  ;;  %v25057_v32 = vld [vmem:[%s36108_s8 + $0xd20] ss:$76 sps:$4 sm:$0xff]   ;;  %v25060_v1 = vld [vmem:[%s36108_s8 + $0xd28] ss:$76 sps:$4 sm:$0xff]  }
 0x90b   :  { %10026 = vmatprep.subr.bf16.mxu1 %v25020_v36  ;;  %v25065_v36 = vld [vmem:[%s36108_s8 + $0xdbc] ss:$76 sps:$4 sm:$0xff]  }
 0x90d   :  { %9945 = vmatpush1.bf16.msra.mxu0 %v25015_v37  ;;  %v25068_v37 = vld [vmem:[%s36108_s8 + $0xdc4] ss:$76 sps:$4 sm:$0xff]  }
 0x90e   :  { %10027 = vmatpush1.bf16.msra.mxu1 %v25018_v40  ;;  %9955 = vmatprep.subr.bf16.mxu0 %v25023_v44  ;;  %v25063_v40 = vld [vmem:[%s36108_s8 + $0xdb8] ss:$76 sps:$4 sm:$0xff]   ;;  %v25066_v44 = vld [vmem:[%s36108_s8 + $0xdc0] ss:$76 sps:$4 sm:$0xff]  }
 0x90f   :  { %10037 = vmatprep.subr.bf16.mxu1 %v25026_v11  ;;  %v25071_v11 = vld [vmem:[%s36108_s8 + $0xe54] ss:$76 sps:$4 sm:$0xff]  }
 0x910   :  { %9947 = vmatmul.mubr.bf16.vlgmr.msra.gmra.mrb[12].mxu0 %v30427_v9 }
 0x911   :  { %10029 = vmatmul.mubr.bf16.vlgmr.msra.gmra.mrb[24].mxu1 %v30427_v9  ;;  %9956 = vmatpush1.bf16.msra.mxu0 %v25021_v46  ;;  %v25074_v46 = vld [vmem:[%s36108_s8 + $0xe5c] ss:$76 sps:$4 sm:$0xff]  }
 0x912   :  { %9987 = vmatprep.mubr.bf16.mxu0 %v30623_v41  ;;  %10038 = vmatpush1.bf16.msra.mxu1 %v25024_v48  ;;  %v25069_v48 = vld [vmem:[%s36108_s8 + $0xe50] ss:$76 sps:$4 sm:$0xff]  }
 0x913   :  { %10069 = vmatprep.mubr.bf16.mxu1 %v30623_v41  ;;  %9957 = vmatprep.subr.bf16.mxu0 %v25029_v27  ;;  %v25072_v27 = vld [vmem:[%s36108_s8 + $0xe58] ss:$76 sps:$4 sm:$0xff]  }
 0x914   :  { %10039 = vmatprep.subr.bf16.mxu1 %v25032_v15  ;;  %v25077_v15 = vld [vmem:[%s36108_s8 + $0xeec] ss:$76 sps:$4 sm:$0xff]  }
 0x915   :  { %9958 = vmatpush1.bf16.msra.mxu0 %v25027_v51  ;;  %v25080_v51 = vld [vmem:[%s36108_s8 + $0xef4] ss:$76 sps:$4 sm:$0xff]  }
 0x916   :  { %10040 = vmatpush1.bf16.msra.mxu1 %v25030_v54  ;;  %9959 = vmatprep.subr.bf16.mxu0 %v25035_v52  ;;  %v25075_v54 = vld [vmem:[%s36108_s8 + $0xee8] ss:$76 sps:$4 sm:$0xff]   ;;  %v25078_v52 = vld [vmem:[%s36108_s8 + $0xef0] ss:$76 sps:$4 sm:$0xff]  }
 0x917   :  { %10041 = vmatprep.subr.bf16.mxu1 %v25038_v57  ;;  %v25083_v57 = vld [vmem:[%s36108_s8 + $0xf84] ss:$76 sps:$4 sm:$0xff]  }
 0x919   :  { %9960 = vmatpush1.bf16.msra.mxu0 %v25033_v58  ;;  %v25086_v58 = vld [vmem:[%s36108_s8 + $0xf8c] ss:$76 sps:$4 sm:$0xff]  }
 0x91a   :  { %10042 = vmatpush1.bf16.msra.mxu1 %v25036_v62  ;;  %9961 = vmatprep.subr.bf16.mxu0 %v25041_v22  ;;  %v25081_v62 = vld [vmem:[%s36108_s8 + $0xf80] ss:$76 sps:$4 sm:$0xff]   ;;  %v25084_v22 = vld [vmem:[%s36108_s8 + $0xf88] ss:$76 sps:$4 sm:$0xff]  }
 0x91b   :  { %10043 = vmatprep.subr.bf16.mxu1 %v25044_v14  ;;  %v25089_v14 = vld [vmem:[%s36108_s8 + $0x101c] ss:$76 sps:$4 sm:$0xff]  }
 0x91d   :  { %9962 = vmatpush1.bf16.msra.mxu0 %v25039_v0  ;;  %v25092_v0 = vld [vmem:[%s36108_s8 + $0x1024] ss:$76 sps:$4 sm:$0xff]  }
 0x91e   :  { %10044 = vmatpush1.bf16.msra.mxu1 %v25042_v5  ;;  %9963 = vmatprep.subr.bf16.mxu0 %v25047_v28  ;;  %v25087_v5 = vld [vmem:[%s36108_s8 + $0x1018] ss:$76 sps:$4 sm:$0xff]   ;;  %v25090_v28 = vld [vmem:[%s36108_s8 + $0x1020] ss:$76 sps:$4 sm:$0xff]  }
 0x91f   :  { %10045 = vmatprep.subr.bf16.mxu1 %v25050_v3  ;;  %v25095_v3 = vld [vmem:[%s36108_s8 + $0x10b4] ss:$76 sps:$4 sm:$0xff]  }
 0x921   :  { %9964 = vmatpush1.bf16.msra.mxu0 %v25045_v4  ;;  %v25098_v4 = vld [vmem:[%s36108_s8 + $0x10bc] ss:$76 sps:$4 sm:$0xff]  }
 0x922   :  { %10046 = vmatpush1.bf16.msra.mxu1 %v25048_v6  ;;  %9965 = vmatprep.subr.bf16.mxu0 %v25053_v61  ;;  %v25093_v6 = vld [vmem:[%s36108_s8 + $0x10b0] ss:$76 sps:$4 sm:$0xff]   ;;  %v25096_v61 = vld [vmem:[%s36108_s8 + $0x10b8] ss:$76 sps:$4 sm:$0xff]  }
 0x923   :  { %10047 = vmatprep.subr.bf16.mxu1 %v25056_v18  ;;  %v25101_v18 = vld [vmem:[%s36108_s8 + $0x114c] ss:$76 sps:$4 sm:$0xff]  }
 0x925   :  { %9966 = vmatpush1.bf16.msra.mxu0 %v25051_v21  ;;  %v25104_v21 = vld [vmem:[%s36108_s8 + $0x1154] ss:$76 sps:$4 sm:$0xff]  }
 0x926   :  { %10048 = vmatpush1.bf16.msra.mxu1 %v25054_v23  ;;  %9967 = vmatprep.subr.bf16.mxu0 %v25059_v29  ;;  %v25099_v23 = vld [vmem:[%s36108_s8 + $0x1148] ss:$76 sps:$4 sm:$0xff]   ;;  %v25102_v29 = vld [vmem:[%s36108_s8 + $0x1150] ss:$76 sps:$4 sm:$0xff]  }
 0x927   :  { %10049 = vmatprep.subr.bf16.mxu1 %v25062_v50  ;;  %v25107_v50 = vld [vmem:[%s36108_s8 + $0x11e4] ss:$76 sps:$4 sm:$0xff]  }
 0x929   :  { %9968 = vmatpush1.bf16.msra.mxu0 %v25057_v32  ;;  %v25110_v32 = vld [vmem:[%s36108_s8 + $0x11ec] ss:$76 sps:$4 sm:$0xff]  }
 0x92a   :  { %10050 = vmatpush1.bf16.msra.mxu1 %v25060_v1  ;;  %9969 = vmatprep.subr.bf16.mxu0 %v25065_v36  ;;  %v25105_v1 = vld [vmem:[%s36108_s8 + $0x11e0] ss:$76 sps:$4 sm:$0xff]   ;;  %v25108_v36 = vld [vmem:[%s36108_s8 + $0x11e8] ss:$76 sps:$4 sm:$0xff]  }
 0x92b   :  { %10051 = vmatprep.subr.bf16.mxu1 %v25068_v37  ;;  %v25113_v37 = vld [vmem:[%s36108_s8 + $0x127c] ss:$76 sps:$4 sm:$0xff]  }
 0x92d   :  { %9970 = vmatpush1.bf16.msra.mxu0 %v25063_v40  ;;  %v25116_v40 = vld [vmem:[%s36108_s8 + $0x1284] ss:$76 sps:$4 sm:$0xff]  }
 0x92e   :  { %10052 = vmatpush1.bf16.msra.mxu1 %v25066_v44  ;;  %9971 = vmatprep.subr.bf16.mxu0 %v25071_v11  ;;  %v25111_v44 = vld [vmem:[%s36108_s8 + $0x1278] ss:$76 sps:$4 sm:$0xff]   ;;  %v25114_v11 = vld [vmem:[%s36108_s8 + $0x1280] ss:$76 sps:$4 sm:$0xff]  }
 0x92f   :  { %10053 = vmatprep.subr.bf16.mxu1 %v25074_v46  ;;  %v25119_v46 = vld [vmem:[%s36108_s8 + $0x24] ss:$76 sps:$4 sm:$0xff]  }
 0x931   :  { %9972 = vmatpush1.bf16.msra.mxu0 %v25069_v48  ;;  %v25122_v48 = vld [vmem:[%s36108_s8 + $0x2c] ss:$76 sps:$4 sm:$0xff]  }
 0x932   :  { %10054 = vmatpush1.bf16.msra.mxu1 %v25072_v27  ;;  %9973 = vmatprep.subr.bf16.mxu0 %v25077_v15  ;;  %v25117_v27 = vld [vmem:[%s36108_s8 + $0x20] ss:$76 sps:$4 sm:$0xff]   ;;  %v25120_v15 = vld [vmem:[%s36108_s8 + $0x28] ss:$76 sps:$4 sm:$0xff]  }
 0x933   :  { %10055 = vmatprep.subr.bf16.mxu1 %v25080_v51  ;;  %v25125_v51 = vld [vmem:[%s36108_s8 + $0xbc] ss:$76 sps:$4 sm:$0xff]  }
 0x935   :  { %9974 = vmatpush1.bf16.msra.mxu0 %v25075_v54  ;;  %v25128_v54 = vld [vmem:[%s36108_s8 + $0xc4] ss:$76 sps:$4 sm:$0xff]  }
 0x936   :  { %10056 = vmatpush1.bf16.msra.mxu1 %v25078_v52  ;;  %9975 = vmatprep.subr.bf16.mxu0 %v25083_v57  ;;  %v25123_v52 = vld [vmem:[%s36108_s8 + $0xb8] ss:$76 sps:$4 sm:$0xff]   ;;  %v25126_v57 = vld [vmem:[%s36108_s8 + $0xc0] ss:$76 sps:$4 sm:$0xff]  }
 0x937   :  { %10057 = vmatprep.subr.bf16.mxu1 %v25086_v58  ;;  %v25131_v58 = vld [vmem:[%s36108_s8 + $0x154] ss:$76 sps:$4 sm:$0xff]  }
 0x939   :  { %9976 = vmatpush1.bf16.msra.mxu0 %v25081_v62  ;;  %v25134_v62 = vld [vmem:[%s36108_s8 + $0x15c] ss:$76 sps:$4 sm:$0xff]  }
 0x93a   :  { %10058 = vmatpush1.bf16.msra.mxu1 %v25084_v22  ;;  %9977 = vmatprep.subr.bf16.mxu0 %v25089_v14  ;;  %v25129_v22 = vld [vmem:[%s36108_s8 + $0x150] ss:$76 sps:$4 sm:$0xff]   ;;  %v25132_v14 = vld [vmem:[%s36108_s8 + $0x158] ss:$76 sps:$4 sm:$0xff]  }
 0x93b   :  { %10059 = vmatprep.subr.bf16.mxu1 %v25092_v0  ;;  %v25137_v0 = vld [vmem:[%s36108_s8 + $0x1ec] ss:$76 sps:$4 sm:$0xff]  }
 0x93d   :  { %9978 = vmatpush1.bf16.msra.mxu0 %v25087_v5  ;;  %v25140_v5 = vld [vmem:[%s36108_s8 + $0x1f4] ss:$76 sps:$4 sm:$0xff]  }
 0x93e   :  { %10060 = vmatpush1.bf16.msra.mxu1 %v25090_v28  ;;  %9979 = vmatprep.subr.bf16.mxu0 %v25095_v3  ;;  %v25135_v28 = vld [vmem:[%s36108_s8 + $0x1e8] ss:$76 sps:$4 sm:$0xff]   ;;  %v25138_v3 = vld [vmem:[%s36108_s8 + $0x1f0] ss:$76 sps:$4 sm:$0xff]  }
 0x93f   :  { %10061 = vmatprep.subr.bf16.mxu1 %v25098_v4  ;;  %v25143_v4 = vld [vmem:[%s36108_s8 + $0x284] ss:$76 sps:$4 sm:$0xff]  }
 0x941   :  { %9980 = vmatpush1.bf16.msra.mxu0 %v25093_v6  ;;  %v25146_v6 = vld [vmem:[%s36108_s8 + $0x28c] ss:$76 sps:$4 sm:$0xff]  }
 0x942   :  { %10062 = vmatpush1.bf16.msra.mxu1 %v25096_v61  ;;  %9981 = vmatprep.subr.bf16.mxu0 %v25101_v18  ;;  %v25141_v61 = vld [vmem:[%s36108_s8 + $0x280] ss:$76 sps:$4 sm:$0xff]   ;;  %v25144_v18 = vld [vmem:[%s36108_s8 + $0x288] ss:$76 sps:$4 sm:$0xff]  }
 0x943   :  { %10063 = vmatprep.subr.bf16.mxu1 %v25104_v21  ;;  %v25149_v21 = vld [vmem:[%s36108_s8 + $0x31c] ss:$76 sps:$4 sm:$0xff]  }
 0x945   :  { %9982 = vmatpush1.bf16.msra.mxu0 %v25099_v23  ;;  %v25152_v23 = vld [vmem:[%s36108_s8 + $0x324] ss:$76 sps:$4 sm:$0xff]  }
 0x946   :  { %10064 = vmatpush1.bf16.msra.mxu1 %v25102_v29  ;;  %9983 = vmatprep.subr.bf16.mxu0 %v25107_v50  ;;  %v25147_v29 = vld [vmem:[%s36108_s8 + $0x318] ss:$76 sps:$4 sm:$0xff]   ;;  %v25150_v50 = vld [vmem:[%s36108_s8 + $0x320] ss:$76 sps:$4 sm:$0xff]  }
 0x947   :  { %10065 = vmatprep.subr.bf16.mxu1 %v25110_v32  ;;  %v25155_v32 = vld [vmem:[%s36108_s8 + $0x3b4] ss:$76 sps:$4 sm:$0xff]  }
 0x949   :  { %9984 = vmatpush1.bf16.msra.mxu0 %v25105_v1  ;;  %v25158_v1 = vld [vmem:[%s36108_s8 + $0x3bc] ss:$76 sps:$4 sm:$0xff]  }
 0x94a   :  { %10066 = vmatpush1.bf16.msra.mxu1 %v25108_v36  ;;  %9985 = vmatprep.subr.bf16.mxu0 %v25113_v37  ;;  %v25153_v36 = vld [vmem:[%s36108_s8 + $0x3b0] ss:$76 sps:$4 sm:$0xff]   ;;  %v25156_v37 = vld [vmem:[%s36108_s8 + $0x3b8] ss:$76 sps:$4 sm:$0xff]  }
 0x94b   :  { %10067 = vmatprep.subr.bf16.mxu1 %v25116_v40  ;;  %v25161_v40 = vld [vmem:[%s36108_s8 + $0x44c] ss:$76 sps:$4 sm:$0xff]  }
 0x94d   :  { %9986 = vmatpush1.bf16.msra.mxu0 %v25111_v44  ;;  %v25164_v44 = vld [vmem:[%s36108_s8 + $0x454] ss:$76 sps:$4 sm:$0xff]  }
 0x94e   :  { %10068 = vmatpush1.bf16.msra.mxu1 %v25114_v11  ;;  %10078 = vmatprep.subr.bf16.mxu0 %v25119_v46  ;;  %v25159_v11 = vld [vmem:[%s36108_s8 + $0x448] ss:$76 sps:$4 sm:$0xff]   ;;  %v25162_v46 = vld [vmem:[%s36108_s8 + $0x450] ss:$76 sps:$4 sm:$0xff]  }
 0x94f   :  { %10160 = vmatprep.subr.bf16.mxu1 %v25122_v48  ;;  %v25167_v48 = vld [vmem:[%s36108_s8 + $0x4e4] ss:$76 sps:$4 sm:$0xff]  }
 0x950   :  { %9988 = vmatmul.mubr.bf16.vlgmr.msra.gmra.mrb[12].mxu0 %v30628_v45 }
 0x951   :  { %10070 = vmatmul.mubr.bf16.vlgmr.msra.gmra.mrb[24].mxu1 %v30628_v45  ;;  %10079 = vmatpush1.bf16.msra.mxu0 %v25117_v27  ;;  %v25170_v27 = vld [vmem:[%s36108_s8 + $0x4ec] ss:$76 sps:$4 sm:$0xff]  }
 0x952   :  { %10110 = vmatprep.mubr.bf16.mxu0 %v30419_v19  ;;  %10161 = vmatpush1.bf16.msra.mxu1 %v25120_v15  ;;  %v25165_v15 = vld [vmem:[%s36108_s8 + $0x4e0] ss:$76 sps:$4 sm:$0xff]  }
 0x953   :  { %10192 = vmatprep.mubr.bf16.mxu1 %v30419_v19  ;;  %10080 = vmatprep.subr.bf16.mxu0 %v25125_v51  ;;  %v25168_v51 = vld [vmem:[%s36108_s8 + $0x4e8] ss:$76 sps:$4 sm:$0xff]  }
 0x954   :  { %10162 = vmatprep.subr.bf16.mxu1 %v25128_v54  ;;  %v25173_v54 = vld [vmem:[%s36108_s8 + $0x57c] ss:$76 sps:$4 sm:$0xff]  }
 0x955   :  { %10081 = vmatpush1.bf16.msra.mxu0 %v25123_v52  ;;  %v25176_v52 = vld [vmem:[%s36108_s8 + $0x584] ss:$76 sps:$4 sm:$0xff]  }
 0x956   :  { %10163 = vmatpush1.bf16.msra.mxu1 %v25126_v57  ;;  %10082 = vmatprep.subr.bf16.mxu0 %v25131_v58  ;;  %v25171_v57 = vld [vmem:[%s36108_s8 + $0x578] ss:$76 sps:$4 sm:$0xff]   ;;  %v25174_v58 = vld [vmem:[%s36108_s8 + $0x580] ss:$76 sps:$4 sm:$0xff]  }
 0x957   :  { %10164 = vmatprep.subr.bf16.mxu1 %v25134_v62  ;;  %v25179_v62 = vld [vmem:[%s36108_s8 + $0x614] ss:$76 sps:$4 sm:$0xff]  }
 0x959   :  { %10083 = vmatpush1.bf16.msra.mxu0 %v25129_v22  ;;  %v25182_v22 = vld [vmem:[%s36108_s8 + $0x61c] ss:$76 sps:$4 sm:$0xff]  }
 0x95a   :  { %10165 = vmatpush1.bf16.msra.mxu1 %v25132_v14  ;;  %10084 = vmatprep.subr.bf16.mxu0 %v25137_v0  ;;  %v25177_v14 = vld [vmem:[%s36108_s8 + $0x610] ss:$76 sps:$4 sm:$0xff]   ;;  %v25180_v0 = vld [vmem:[%s36108_s8 + $0x618] ss:$76 sps:$4 sm:$0xff]  }
 0x95b   :  { %10166 = vmatprep.subr.bf16.mxu1 %v25140_v5  ;;  %v25185_v5 = vld [vmem:[%s36108_s8 + $0x6ac] ss:$76 sps:$4 sm:$0xff]  }
 0x95d   :  { %10085 = vmatpush1.bf16.msra.mxu0 %v25135_v28  ;;  %v25188_v28 = vld [vmem:[%s36108_s8 + $0x6b4] ss:$76 sps:$4 sm:$0xff]  }
 0x95e   :  { %10167 = vmatpush1.bf16.msra.mxu1 %v25138_v3  ;;  %10086 = vmatprep.subr.bf16.mxu0 %v25143_v4  ;;  %v25183_v3 = vld [vmem:[%s36108_s8 + $0x6a8] ss:$76 sps:$4 sm:$0xff]   ;;  %v25186_v4 = vld [vmem:[%s36108_s8 + $0x6b0] ss:$76 sps:$4 sm:$0xff]  }
 0x95f   :  { %10168 = vmatprep.subr.bf16.mxu1 %v25146_v6  ;;  %v25191_v6 = vld [vmem:[%s36108_s8 + $0x744] ss:$76 sps:$4 sm:$0xff]  }
 0x961   :  { %10087 = vmatpush1.bf16.msra.mxu0 %v25141_v61  ;;  %v25194_v61 = vld [vmem:[%s36108_s8 + $0x74c] ss:$76 sps:$4 sm:$0xff]  }
 0x962   :  { %10169 = vmatpush1.bf16.msra.mxu1 %v25144_v18  ;;  %10088 = vmatprep.subr.bf16.mxu0 %v25149_v21  ;;  %v25189_v18 = vld [vmem:[%s36108_s8 + $0x740] ss:$76 sps:$4 sm:$0xff]   ;;  %v25192_v21 = vld [vmem:[%s36108_s8 + $0x748] ss:$76 sps:$4 sm:$0xff]  }
 0x963   :  { %10170 = vmatprep.subr.bf16.mxu1 %v25152_v23  ;;  %v25197_v23 = vld [vmem:[%s36108_s8 + $0x7dc] ss:$76 sps:$4 sm:$0xff]  }
 0x965   :  { %10089 = vmatpush1.bf16.msra.mxu0 %v25147_v29  ;;  %v25200_v29 = vld [vmem:[%s36108_s8 + $0x7e4] ss:$76 sps:$4 sm:$0xff]  }
 0x966   :  { %10171 = vmatpush1.bf16.msra.mxu1 %v25150_v50  ;;  %10090 = vmatprep.subr.bf16.mxu0 %v25155_v32  ;;  %v25195_v50 = vld [vmem:[%s36108_s8 + $0x7d8] ss:$76 sps:$4 sm:$0xff]   ;;  %v25198_v32 = vld [vmem:[%s36108_s8 + $0x7e0] ss:$76 sps:$4 sm:$0xff]  }
 0x967   :  { %10172 = vmatprep.subr.bf16.mxu1 %v25158_v1  ;;  %v25203_v1 = vld [vmem:[%s36108_s8 + $0x874] ss:$76 sps:$4 sm:$0xff]  }
 0x969   :  { %10091 = vmatpush1.bf16.msra.mxu0 %v25153_v36  ;;  %v25206_v36 = vld [vmem:[%s36108_s8 + $0x87c] ss:$76 sps:$4 sm:$0xff]  }
 0x96a   :  { %10173 = vmatpush1.bf16.msra.mxu1 %v25156_v37  ;;  %10092 = vmatprep.subr.bf16.mxu0 %v25161_v40  ;;  %v25201_v37 = vld [vmem:[%s36108_s8 + $0x870] ss:$76 sps:$4 sm:$0xff]   ;;  %v25204_v40 = vld [vmem:[%s36108_s8 + $0x878] ss:$76 sps:$4 sm:$0xff]  }
 0x96b   :  { %10174 = vmatprep.subr.bf16.mxu1 %v25164_v44  ;;  %v25209_v44 = vld [vmem:[%s36108_s8 + $0x90c] ss:$76 sps:$4 sm:$0xff]  }
 0x96d   :  { %10093 = vmatpush1.bf16.msra.mxu0 %v25159_v11  ;;  %v25212_v11 = vld [vmem:[%s36108_s8 + $0x914] ss:$76 sps:$4 sm:$0xff]  }
 0x96e   :  { %10175 = vmatpush1.bf16.msra.mxu1 %v25162_v46  ;;  %10094 = vmatprep.subr.bf16.mxu0 %v25167_v48  ;;  %v25207_v46 = vld [vmem:[%s36108_s8 + $0x908] ss:$76 sps:$4 sm:$0xff]   ;;  %v25210_v48 = vld [vmem:[%s36108_s8 + $0x910] ss:$76 sps:$4 sm:$0xff]  }
 0x96f   :  { %10176 = vmatprep.subr.bf16.mxu1 %v25170_v27  ;;  %v25215_v27 = vld [vmem:[%s36108_s8 + $0x9a4] ss:$76 sps:$4 sm:$0xff]  }
 0x971   :  { %10095 = vmatpush1.bf16.msra.mxu0 %v25165_v15  ;;  %v25218_v15 = vld [vmem:[%s36108_s8 + $0x9ac] ss:$76 sps:$4 sm:$0xff]  }
 0x972   :  { %10177 = vmatpush1.bf16.msra.mxu1 %v25168_v51  ;;  %10096 = vmatprep.subr.bf16.mxu0 %v25173_v54  ;;  %v25213_v51 = vld [vmem:[%s36108_s8 + $0x9a0] ss:$76 sps:$4 sm:$0xff]   ;;  %v25216_v54 = vld [vmem:[%s36108_s8 + $0x9a8] ss:$76 sps:$4 sm:$0xff]  }
 0x973   :  { %10178 = vmatprep.subr.bf16.mxu1 %v25176_v52  ;;  %v25221_v52 = vld [vmem:[%s36108_s8 + $0xa3c] ss:$76 sps:$4 sm:$0xff]  }
 0x975   :  { %10097 = vmatpush1.bf16.msra.mxu0 %v25171_v57  ;;  %v25224_v57 = vld [vmem:[%s36108_s8 + $0xa44] ss:$76 sps:$4 sm:$0xff]  }
 0x976   :  { %10179 = vmatpush1.bf16.msra.mxu1 %v25174_v58  ;;  %10098 = vmatprep.subr.bf16.mxu0 %v25179_v62  ;;  %v25219_v58 = vld [vmem:[%s36108_s8 + $0xa38] ss:$76 sps:$4 sm:$0xff]   ;;  %v25222_v62 = vld [vmem:[%s36108_s8 + $0xa40] ss:$76 sps:$4 sm:$0xff]  }
 0x977   :  { %10180 = vmatprep.subr.bf16.mxu1 %v25182_v22  ;;  %v25227_v22 = vld [vmem:[%s36108_s8 + $0xad4] ss:$76 sps:$4 sm:$0xff]  }
 0x979   :  { %10099 = vmatpush1.bf16.msra.mxu0 %v25177_v14  ;;  %v25230_v14 = vld [vmem:[%s36108_s8 + $0xadc] ss:$76 sps:$4 sm:$0xff]  }
 0x97a   :  { %10181 = vmatpush1.bf16.msra.mxu1 %v25180_v0  ;;  %10100 = vmatprep.subr.bf16.mxu0 %v25185_v5  ;;  %v25225_v0 = vld [vmem:[%s36108_s8 + $0xad0] ss:$76 sps:$4 sm:$0xff]   ;;  %v25228_v5 = vld [vmem:[%s36108_s8 + $0xad8] ss:$76 sps:$4 sm:$0xff]  }
 0x97b   :  { %10182 = vmatprep.subr.bf16.mxu1 %v25188_v28  ;;  %v25233_v28 = vld [vmem:[%s36108_s8 + $0xb6c] ss:$76 sps:$4 sm:$0xff]  }
 0x97d   :  { %10101 = vmatpush1.bf16.msra.mxu0 %v25183_v3  ;;  %v25236_v3 = vld [vmem:[%s36108_s8 + $0xb74] ss:$76 sps:$4 sm:$0xff]  }
 0x97e   :  { %10183 = vmatpush1.bf16.msra.mxu1 %v25186_v4  ;;  %10102 = vmatprep.subr.bf16.mxu0 %v25191_v6  ;;  %v25231_v4 = vld [vmem:[%s36108_s8 + $0xb68] ss:$76 sps:$4 sm:$0xff]   ;;  %v25234_v6 = vld [vmem:[%s36108_s8 + $0xb70] ss:$76 sps:$4 sm:$0xff]  }
 0x97f   :  { %10184 = vmatprep.subr.bf16.mxu1 %v25194_v61  ;;  %v25239_v61 = vld [vmem:[%s36108_s8 + $0xc04] ss:$76 sps:$4 sm:$0xff]  }
 0x981   :  { %10103 = vmatpush1.bf16.msra.mxu0 %v25189_v18  ;;  %v25242_v18 = vld [vmem:[%s36108_s8 + $0xc0c] ss:$76 sps:$4 sm:$0xff]  }
 0x982   :  { %10185 = vmatpush1.bf16.msra.mxu1 %v25192_v21  ;;  %10104 = vmatprep.subr.bf16.mxu0 %v25197_v23  ;;  %v25237_v21 = vld [vmem:[%s36108_s8 + $0xc00] ss:$76 sps:$4 sm:$0xff]  }
 0x983   :  { %10186 = vmatprep.subr.bf16.mxu1 %v25200_v29  ;;  %v31275_v23 = vld [vmem:[%s36113_s13 + $0xd] sm:$0xff] }
 0x984   :  { %v25240_v29 = vld [vmem:[%s36108_s8 + $0xc08] ss:$76 sps:$4 sm:$0xff]  }
 0x985   :  { %10105 = vmatpush1.bf16.msra.mxu0 %v25195_v50  ;;  %v25245_v50 = vld [vmem:[%s36108_s8 + $0xc9c] ss:$76 sps:$4 sm:$0xff]  }
 0x986   :  { %10187 = vmatpush1.bf16.msra.mxu1 %v25198_v32  ;;  %10106 = vmatprep.subr.bf16.mxu0 %v25203_v1  ;;  %v25248_v32 = vld [vmem:[%s36108_s8 + $0xca4] ss:$76 sps:$4 sm:$0xff]   ;;  %v6586_v1 = vrot.slane %v31275_v23, %v29821_v47 }
 0x987   :  { %10188 = vmatprep.subr.bf16.mxu1 %v25206_v36  ;;  %v6594_v36 = vrot.slane %v31275_v23, %v29916_v33 }
 0x989   :  { %10107 = vmatpush1.bf16.msra.mxu0 %v25201_v37  ;;  %v6590_v37 = vrot.slane %v31275_v23, %v29824_v13 }
 0x98a   :  { %10189 = vmatpush1.bf16.msra.mxu1 %v25204_v40  ;;  %10108 = vmatprep.subr.bf16.mxu0 %v25209_v44  ;;  %v6598_v40 = vrot.slane %v31275_v23, %v29827_v17  ;;  %v25243_v44 = vld [vmem:[%s36108_s8 + $0xc98] ss:$76 sps:$4 sm:$0xff]  }
 0x98b   :  { %10190 = vmatprep.subr.bf16.mxu1 %v25212_v11  ;;  %v25246_v11 = vld [vmem:[%s36108_s8 + $0xca0] ss:$76 sps:$4 sm:$0xff]  }
 0x98d   :  { %10109 = vmatpush1.bf16.msra.mxu0 %v25207_v46  ;;  %v25251_v46 = vld [vmem:[%s36108_s8 + $0xd34] ss:$76 sps:$4 sm:$0xff]  }
 0x98e   :  { %10191 = vmatpush1.bf16.msra.mxu1 %v25210_v48  ;;  %10119 = vmatprep.subr.bf16.mxu0 %v25215_v27 }
 0x98f   :  { %10201 = vmatprep.subr.bf16.mxu1 %v25218_v15  ;;  %v25254_v15 = vld [vmem:[%s36108_s8 + $0xd3c] ss:$76 sps:$4 sm:$0xff]  }
 0x990   :  { %10111 = vmatmul.mubr.bf16.vlgmr.msra.gmra.mrb[16].mxu0 %v30427_v9 }
 0x991   :  { %10193 = vmatmul.mubr.bf16.vlgmr.msra.gmra.mrb[28].mxu1 %v30427_v9  ;;  %10120 = vmatpush1.bf16.msra.mxu0 %v25213_v51 }
 0x992   :  { %10151 = vmatprep.mubr.bf16.mxu0 %v30623_v41  ;;  %10202 = vmatpush1.bf16.msra.mxu1 %v25216_v54 }
 0x993   :  { %10233 = vmatprep.mubr.bf16.mxu1 %v30623_v41  ;;  %10121 = vmatprep.subr.bf16.mxu0 %v25221_v52 }
 0x994   :  { %10203 = vmatprep.subr.bf16.mxu1 %v25224_v57 }
 0x995   :  { %10122 = vmatpush1.bf16.msra.mxu0 %v25219_v58  ;;  %v25249_v58 = vld [vmem:[%s36108_s8 + $0xd30] ss:$76 sps:$4 sm:$0xff]  }
 0x996   :  { %10204 = vmatpush1.bf16.msra.mxu1 %v25222_v62  ;;  %10123 = vmatprep.subr.bf16.mxu0 %v25227_v22 }
 0x997   :  { %10205 = vmatprep.subr.bf16.mxu1 %v25230_v14 }
 0x999   :  { %10124 = vmatpush1.bf16.msra.mxu0 %v25225_v0 }
 0x99a   :  { %10206 = vmatpush1.bf16.msra.mxu1 %v25228_v5  ;;  %10125 = vmatprep.subr.bf16.mxu0 %v25233_v28  ;;  %v25252_v5 = vld [vmem:[%s36108_s8 + $0xd38] ss:$76 sps:$4 sm:$0xff]  }
 0x99b   :  { %10207 = vmatprep.subr.bf16.mxu1 %v25236_v3  ;;  %v25257_v28 = vld [vmem:[%s36108_s8 + $0xdcc] ss:$76 sps:$4 sm:$0xff]  }
 0x99d   :  { %10126 = vmatpush1.bf16.msra.mxu0 %v25231_v4 }
 0x99e   :  { %10208 = vmatpush1.bf16.msra.mxu1 %v25234_v6  ;;  %10127 = vmatprep.subr.bf16.mxu0 %v25239_v61 }
 0x99f   :  { %10209 = vmatprep.subr.bf16.mxu1 %v25242_v18 }
 0x9a1   :  { %10128 = vmatpush1.bf16.msra.mxu0 %v25237_v21 }
 0x9a2   :  { %10210 = vmatpush1.bf16.msra.mxu1 %v25240_v29  ;;  %10129 = vmatprep.subr.bf16.mxu0 %v25245_v50  ;;  %v25260_v29 = vld [vmem:[%s36108_s8 + $0xdd4] ss:$76 sps:$4 sm:$0xff]  }
 0x9a3   :  { %v9825_v48 = vpop.f32.mrb[8].mxu0  ;;  %v9907_v27 = vpop.f32.mrb[20].mxu1  ;;  %10211 = vmatprep.subr.bf16.mxu1 %v25248_v32  ;;  %v25255_v50 = vld [vmem:[%s36108_s8 + $0xdc8] ss:$76 sps:$4 sm:$0xff]   ;;  %v25258_v32 = vld [vmem:[%s36108_s8 + $0xdd0] ss:$76 sps:$4 sm:$0xff]  }
 0x9a4   :  { %v23358_v51 = vadd.f32 %v9825_v48, %v6586_v1  ;;  %v23360_v54 = vadd.f32 %v9907_v27, %v6594_v36  ;;  %v9827_v52 = vpop.f32.mrb[9].mxu0  ;;  %v9909_v57 = vpop.f32.mrb[21].mxu1  ;;  %v25263_v1 = vld [vmem:[%s36108_s8 + $0xe64] ss:$76 sps:$4 sm:$0xff]   ;;  %v25266_v36 = vld [vmem:[%s36108_s8 + $0xe6c] ss:$76 sps:$4 sm:$0xff]  }
 0x9a5   :  { %v23359_v62 = vadd.f32 %v9827_v52, %v6590_v37  ;;  %v23361_v22 = vadd.f32 %v9909_v57, %v6598_v40  ;;  %v9829_v14 = vpop.f32.mrb[10].mxu0  ;;  %v9911_v0 = vpop.f32.mrb[22].mxu1  ;;  %10130 = vmatpush1.bf16.msra.mxu0 %v25243_v44  ;;  %v25261_v37 = vld [vmem:[%s36108_s8 + $0xe60] ss:$76 sps:$4 sm:$0xff]   ;;  %v25264_v40 = vld [vmem:[%s36108_s8 + $0xe68] ss:$76 sps:$4 sm:$0xff]  }
 0x9a6   :  { %v21924_v3 = vmul.f32 -1.442695, %v23358_v51  ;;  %v21926_v4 = vmul.f32 -1.442695, %v23360_v54  ;;  %10212 = vmatpush1.bf16.msra.mxu1 %v25246_v11  ;;  %v9830_v6 = vpop.f32.mrb[11].mxu0  ;;  %v9912_v61 = vpop.f32.mrb[23].mxu1  ;;  %10131 = vmatprep.subr.bf16.mxu0 %v25251_v46 }
 0x9a7   :  { %v21925_v18 = vmul.f32 -1.442695, %v23359_v62  ;;  %v21927_v21 = vmul.f32 -1.442695, %v23361_v22  ;;  %10213 = vmatprep.subr.bf16.mxu1 %v25254_v15  ;;  %v25269_v44 = vld [vmem:[%s36108_s8 + $0xefc] ss:$76 sps:$4 sm:$0xff]  }
 0x9a8   :  { %27457 = vpow2.f32 %v21924_v3  ;;  %v25272_v11 = vld [vmem:[%s36108_s8 + $0xf04] ss:$76 sps:$4 sm:$0xff]   ;;  %v25270_v27 = vld [vmem:[%s36108_s8 + $0xf00] ss:$76 sps:$4 sm:$0xff]   ;;  %v25278_v52 = vld [vmem:[%s36108_s8 + $0xf9c] ss:$76 sps:$4 sm:$0xff]  }
 0x9a9   :  { %27459 = vpow2.f32 %v21926_v4  ;;  %10132 = vmatpush1.bf16.msra.mxu0 %v25249_v58  ;;  %v25267_v46 = vld [vmem:[%s36108_s8 + $0xef8] ss:$76 sps:$4 sm:$0xff]   ;;  %v25275_v15 = vld [vmem:[%s36108_s8 + $0xf94] ss:$76 sps:$4 sm:$0xff]   ;;  %v25273_v14 = vld [vmem:[%s36108_s8 + $0xf90] ss:$76 sps:$4 sm:$0xff]  }
 0x9aa   :  { %27461 = vpow2.f32 %v21925_v18  ;;  %10214 = vmatpush1.bf16.msra.mxu1 %v25252_v5  ;;  %10133 = vmatprep.subr.bf16.mxu0 %v25257_v28  ;;  %v25276_v5 = vld [vmem:[%s36108_s8 + $0xf98] ss:$76 sps:$4 sm:$0xff]   ;;  %v25284_v3 = vld [vmem:[%s36108_s8 + $0x1034] ss:$76 sps:$4 sm:$0xff]   ;;  %v25282_v6 = vld [vmem:[%s36108_s8 + $0x1030] ss:$76 sps:$4 sm:$0xff]  }
 0x9ab   :  { %27463 = vpow2.f32 %v21927_v21  ;;  %10215 = vmatprep.subr.bf16.mxu1 %v25260_v29  ;;  %v25281_v28 = vld [vmem:[%s36108_s8 + $0x102c] ss:$76 sps:$4 sm:$0xff]   ;;  %v25279_v4 = vld [vmem:[%s36108_s8 + $0x1028] ss:$76 sps:$4 sm:$0xff]   ;;  %v25287_v61 = vld [vmem:[%s36108_s8 + $0x10c4] ss:$76 sps:$4 sm:$0xff]  }
 0x9ac   :  { %v25290_v18 = vld [vmem:[%s36108_s8 + $0x10cc] ss:$76 sps:$4 sm:$0xff]   ;;  %v25288_v29 = vld [vmem:[%s36108_s8 + $0x10c8] ss:$76 sps:$4 sm:$0xff]  }
 0x9ad   :  { %10134 = vmatpush1.bf16.msra.mxu0 %v25255_v50  ;;  %v25285_v21 = vld [vmem:[%s36108_s8 + $0x10c0] ss:$76 sps:$4 sm:$0xff]   ;;  %v25293_v50 = vld [vmem:[%s36108_s8 + $0x115c] ss:$76 sps:$4 sm:$0xff]  }
 0x9ae   :  { %10216 = vmatpush1.bf16.msra.mxu1 %v25258_v32  ;;  %10135 = vmatprep.subr.bf16.mxu0 %v25263_v1  ;;  %v25296_v1 = vld [vmem:[%s36108_s8 + $0x1164] ss:$76 sps:$4 sm:$0xff]  }
 0x9af   :  { %10217 = vmatprep.subr.bf16.mxu1 %v25266_v36 }
 0x9b1   :  { %10136 = vmatpush1.bf16.msra.mxu0 %v25261_v37 }
 0x9b2   :  { %v27458_v48 = vpop.eup %27457  ;;  %10218 = vmatpush1.bf16.msra.mxu1 %v25264_v40  ;;  %10137 = vmatprep.subr.bf16.mxu0 %v25269_v44  ;;  %v25291_v40 = vld [vmem:[%s36108_s8 + $0x1158] ss:$76 sps:$4 sm:$0xff]  }
 0x9b3   :  { %v27460_v51 = vpop.eup %27459  ;;  %v10625_v54 = vadd.f32 1.0, %v27458_v48  ;;  %10219 = vmatprep.subr.bf16.mxu1 %v25272_v11  ;;  %v25299_v48 = vld [vmem:[%s36108_s8 + $0x11f4] ss:$76 sps:$4 sm:$0xff]  }
 0x9b4   :  { %v27462_v57 = vpop.eup %27461  ;;  %v10627_v58 = vadd.f32 1.0, %v27460_v51 }
 0x9b5   :  { %v27464_v62 = vpop.eup %27463  ;;  %27465 = vrcp.f32 %v10625_v54  ;;  %v10626_v22 = vadd.f32 1.0, %v27462_v57  ;;  %10138 = vmatpush1.bf16.msra.mxu0 %v25267_v46  ;;  %v25294_v46 = vld [vmem:[%s36108_s8 + $0x1160] ss:$76 sps:$4 sm:$0xff]   ;;  %v25297_v54 = vld [vmem:[%s36108_s8 + $0x11f0] ss:$76 sps:$4 sm:$0xff]  }
 0x9b6   :  { %27467 = vrcp.f32 %v10627_v58  ;;  %v10628_v0 = vadd.f32 1.0, %v27464_v62  ;;  %10220 = vmatpush1.bf16.msra.mxu1 %v25270_v27  ;;  %10139 = vmatprep.subr.bf16.mxu0 %v25275_v15  ;;  %v25302_v15 = vld [vmem:[%s36108_s8 + $0x11fc] ss:$76 sps:$4 sm:$0xff]   ;;  %v25300_v57 = vld [vmem:[%s36108_s8 + $0x11f8] ss:$76 sps:$4 sm:$0xff]  }
 0x9b7   :  { %27469 = vrcp.f32 %v10626_v22  ;;  %10221 = vmatprep.subr.bf16.mxu1 %v25278_v52  ;;  %v25305_v58 = vld [vmem:[%s36108_s8 + $0x128c] ss:$76 sps:$4 sm:$0xff]   ;;  %v25308_v62 = vld [vmem:[%s36108_s8 + $0x1294] ss:$76 sps:$4 sm:$0xff]  }
 0x9b8   :  { %27471 = vrcp.f32 %v10628_v0  ;;  %v25306_v0 = vld [vmem:[%s36108_s8 + $0x1290] ss:$76 sps:$4 sm:$0xff]  }
 0x9b9   :  { %10140 = vmatpush1.bf16.msra.mxu0 %v25273_v14  ;;  %v25303_v14 = vld [vmem:[%s36108_s8 + $0x1288] ss:$76 sps:$4 sm:$0xff]  }
 0x9ba   :  { %10222 = vmatpush1.bf16.msra.mxu1 %v25276_v5  ;;  %10141 = vmatprep.subr.bf16.mxu0 %v25281_v28  ;;  %v25311_v5 = vld [vmem:[%s36108_s8 + $0x34] ss:$76 sps:$4 sm:$0xff]   ;;  %v25314_v28 = vld [vmem:[%s36108_s8 + $0x3c] ss:$76 sps:$4 sm:$0xff]  }
 0x9bb   :  { %10223 = vmatprep.subr.bf16.mxu1 %v25284_v3  ;;  %v25309_v3 = vld [vmem:[%s36108_s8 + $0x30] ss:$76 sps:$4 sm:$0xff]  }
 0x9bd   :  { %10142 = vmatpush1.bf16.msra.mxu0 %v25279_v4  ;;  %v25312_v4 = vld [vmem:[%s36108_s8 + $0x38] ss:$76 sps:$4 sm:$0xff]  }
 0x9be   :  { %10224 = vmatpush1.bf16.msra.mxu1 %v25282_v6  ;;  %10143 = vmatprep.subr.bf16.mxu0 %v25287_v61  ;;  %v25317_v6 = vld [vmem:[%s36108_s8 + $0xcc] ss:$76 sps:$4 sm:$0xff]   ;;  %v25320_v61 = vld [vmem:[%s36108_s8 + $0xd4] ss:$76 sps:$4 sm:$0xff]  }
 0x9bf   :  { %v27466_v32 = vpop.eup %27465  ;;  %10225 = vmatprep.subr.bf16.mxu1 %v25290_v18  ;;  %v25315_v18 = vld [vmem:[%s36108_s8 + $0xc8] ss:$76 sps:$4 sm:$0xff]  }
 0x9c0   :  { %v27468_v36 = vpop.eup %27467 }
 0x9c1   :  { %v27470_v37 = vpop.eup %27469  ;;  %10144 = vmatpush1.bf16.msra.mxu0 %v25285_v21  ;;  %v25318_v21 = vld [vmem:[%s36108_s8 + $0xd0] ss:$76 sps:$4 sm:$0xff]  }
 0x9c2   :  { %v27472_v44 = vpop.eup %27471  ;;  %v10701_v11 = vcombine.low %v27466_v32, %v27470_v37  ;;  %10226 = vmatpush1.bf16.msra.mxu1 %v25288_v29  ;;  %10145 = vmatprep.subr.bf16.mxu0 %v25293_v50  ;;  %v25323_v29 = vld [vmem:[%s36108_s8 + $0x164] ss:$76 sps:$4 sm:$0xff]   ;;  %v25326_v50 = vld [vmem:[%s36108_s8 + $0x16c] ss:$76 sps:$4 sm:$0xff]  }
 0x9c3   :  { %v10702_v27 = vcombine.low %v27468_v36, %v27472_v44  ;;  %10227 = vmatprep.subr.bf16.mxu1 %v25296_v1  ;;  %v25321_v32 = vld [vmem:[%s36108_s8 + $0x160] ss:$76 sps:$4 sm:$0xff]   ;;  %v25324_v1 = vld [vmem:[%s36108_s8 + $0x168] ss:$76 sps:$4 sm:$0xff]   ;;  %v25332_v37 = vld [vmem:[%s36108_s8 + $0x204] ss:$76 sps:$4 sm:$0xff]  }
 0x9c4   :  { %v10709_v51 = vrot.slane %v10701_v11, %v27873_v49  ;;  %v25329_v36 = vld [vmem:[%s36108_s8 + $0x1fc] ss:$76 sps:$4 sm:$0xff]   ;;  %v25330_v44 = vld [vmem:[%s36108_s8 + $0x200] ss:$76 sps:$4 sm:$0xff]  }
 0x9c5   :  { %10146 = vmatpush1.bf16.msra.mxu0 %v25291_v40  ;;  %v10716_v52 = vrot.slane %v10702_v27, %v27873_v49  ;;  %v25327_v40 = vld [vmem:[%s36108_s8 + $0x1f8] ss:$76 sps:$4 sm:$0xff]   ;;  %v25335_v11 = vld [vmem:[%s36108_s8 + $0x294] ss:$76 sps:$4 sm:$0xff]  }
 0x9c6   :  { %10228 = vmatpush1.bf16.msra.mxu1 %v25294_v46  ;;  %10147 = vmatprep.subr.bf16.mxu0 %v25299_v48  ;;  %v25338_v46 = vld [vmem:[%s36108_s8 + $0x29c] ss:$76 sps:$4 sm:$0xff]   ;;  %v25336_v27 = vld [vmem:[%s36108_s8 + $0x298] ss:$76 sps:$4 sm:$0xff]  }
 0x9c7   :  { %10229 = vmatprep.subr.bf16.mxu1 %v25302_v15  ;;  %v10717_v22 = vcombine.low %v10709_v51, %v10716_v52  ;;  %v25333_v48 = vld [vmem:[%s36108_s8 + $0x290] ss:$76 sps:$4 sm:$0xff]   ;;  %v25341_v15 = vld [vmem:[%s36108_s8 + $0x32c] ss:$76 sps:$4 sm:$0xff]   ;;  %v25344_v51 = vld [vmem:[%s36108_s8 + $0x334] ss:$76 sps:$4 sm:$0xff]  }
 0x9c8   :  { %v25342_v52 = vld [vmem:[%s36108_s8 + $0x330] ss:$76 sps:$4 sm:$0xff]  }
 0x9c9   :  { %10148 = vmatpush1.bf16.msra.mxu0 %v25297_v54  ;;  %10790 = vst [vmem:[#allocation2] sm:$0xff] %v10717_v22  ;;  %v25339_v54 = vld [vmem:[%s36108_s8 + $0x328] ss:$76 sps:$4 sm:$0xff]  }
 0x9ca   :  { %10230 = vmatpush1.bf16.msra.mxu1 %v25300_v57  ;;  %10149 = vmatprep.subr.bf16.mxu0 %v25305_v58  ;;  %v25347_v57 = vld [vmem:[%s36108_s8 + $0x3c4] ss:$76 sps:$4 sm:$0xff]   ;;  %v25350_v58 = vld [vmem:[%s36108_s8 + $0x3cc] ss:$76 sps:$4 sm:$0xff]   ;;  %v25348_v22 = vld [vmem:[%s36108_s8 + $0x3c8] ss:$76 sps:$4 sm:$0xff]  }
 0x9cb   :  { %10231 = vmatprep.subr.bf16.mxu1 %v25308_v62  ;;  %v25345_v62 = vld [vmem:[%s36108_s8 + $0x3c0] ss:$76 sps:$4 sm:$0xff]  }
 0x9cd   :  { %10150 = vmatpush1.bf16.msra.mxu0 %v25303_v14  ;;  %v25353_v14 = vld [vmem:[%s36108_s8 + $0x45c] ss:$76 sps:$4 sm:$0xff]  }
 0x9ce   :  { %10232 = vmatpush1.bf16.msra.mxu1 %v25306_v0  ;;  %10242 = vmatprep.subr.bf16.mxu0 %v25311_v5  ;;  %v25356_v0 = vld [vmem:[%s36108_s8 + $0x464] ss:$76 sps:$4 sm:$0xff]  }
 0x9cf   :  { %10324 = vmatprep.subr.bf16.mxu1 %v25314_v28  ;;  %v25351_v5 = vld [vmem:[%s36108_s8 + $0x458] ss:$76 sps:$4 sm:$0xff]   ;;  %v25354_v28 = vld [vmem:[%s36108_s8 + $0x460] ss:$76 sps:$4 sm:$0xff]  }
 0x9d0   :  { %10152 = vmatmul.mubr.bf16.vlgmr.msra.gmra.mrb[16].mxu0 %v30628_v45 }
 0x9d1   :  { %10234 = vmatmul.mubr.bf16.vlgmr.msra.gmra.mrb[28].mxu1 %v30628_v45  ;;  %10243 = vmatpush1.bf16.msra.mxu0 %v25309_v3  ;;  %v25359_v3 = vld [vmem:[%s36108_s8 + $0x4f4] ss:$76 sps:$4 sm:$0xff]  }
 0x9d2   :  { %10274 = vmatprep.mubr.bf16.mxu0 %v30419_v19  ;;  %10325 = vmatpush1.bf16.msra.mxu1 %v25312_v4  ;;  %v25362_v4 = vld [vmem:[%s36108_s8 + $0x4fc] ss:$76 sps:$4 sm:$0xff]  }
 0x9d3   :  { %10356 = vmatprep.mubr.bf16.mxu1 %v30419_v19  ;;  %10244 = vmatprep.subr.bf16.mxu0 %v25317_v6  ;;  %v25357_v6 = vld [vmem:[%s36108_s8 + $0x4f0] ss:$76 sps:$4 sm:$0xff]  }
 0x9d4   :  { %10326 = vmatprep.subr.bf16.mxu1 %v25320_v61  ;;  %v25360_v61 = vld [vmem:[%s36108_s8 + $0x4f8] ss:$76 sps:$4 sm:$0xff]  }
 0x9d5   :  { %10245 = vmatpush1.bf16.msra.mxu0 %v25315_v18  ;;  %v25365_v18 = vld [vmem:[%s36108_s8 + $0x58c] ss:$76 sps:$4 sm:$0xff]  }
 0x9d6   :  { %10327 = vmatpush1.bf16.msra.mxu1 %v25318_v21  ;;  %10246 = vmatprep.subr.bf16.mxu0 %v25323_v29  ;;  %v25368_v21 = vld [vmem:[%s36108_s8 + $0x594] ss:$76 sps:$4 sm:$0xff]  }
 0x9d7   :  { %10328 = vmatprep.subr.bf16.mxu1 %v25326_v50  ;;  %v25363_v29 = vld [vmem:[%s36108_s8 + $0x588] ss:$76 sps:$4 sm:$0xff]   ;;  %v25366_v50 = vld [vmem:[%s36108_s8 + $0x590] ss:$76 sps:$4 sm:$0xff]  }
 0x9d9   :  { %10247 = vmatpush1.bf16.msra.mxu0 %v25321_v32  ;;  %v25371_v32 = vld [vmem:[%s36108_s8 + $0x624] ss:$76 sps:$4 sm:$0xff]  }
 0x9da   :  { %10329 = vmatpush1.bf16.msra.mxu1 %v25324_v1  ;;  %10248 = vmatprep.subr.bf16.mxu0 %v25329_v36  ;;  %v25374_v1 = vld [vmem:[%s36108_s8 + $0x62c] ss:$76 sps:$4 sm:$0xff]  }
 0x9db   :  { %10330 = vmatprep.subr.bf16.mxu1 %v25332_v37  ;;  %v25369_v36 = vld [vmem:[%s36108_s8 + $0x620] ss:$76 sps:$4 sm:$0xff]   ;;  %v25372_v37 = vld [vmem:[%s36108_s8 + $0x628] ss:$76 sps:$4 sm:$0xff]  }
 0x9dd   :  { %10249 = vmatpush1.bf16.msra.mxu0 %v25327_v40  ;;  %v25377_v40 = vld [vmem:[%s36108_s8 + $0x6bc] ss:$76 sps:$4 sm:$0xff]  }
 0x9de   :  { %10331 = vmatpush1.bf16.msra.mxu1 %v25330_v44  ;;  %10250 = vmatprep.subr.bf16.mxu0 %v25335_v11  ;;  %v25380_v44 = vld [vmem:[%s36108_s8 + $0x6c4] ss:$76 sps:$4 sm:$0xff]  }
 0x9df   :  { %10332 = vmatprep.subr.bf16.mxu1 %v25338_v46  ;;  %v25375_v11 = vld [vmem:[%s36108_s8 + $0x6b8] ss:$76 sps:$4 sm:$0xff]   ;;  %v25378_v46 = vld [vmem:[%s36108_s8 + $0x6c0] ss:$76 sps:$4 sm:$0xff]  }
 0x9e1   :  { %10251 = vmatpush1.bf16.msra.mxu0 %v25333_v48  ;;  %v25383_v48 = vld [vmem:[%s36108_s8 + $0x754] ss:$76 sps:$4 sm:$0xff]  }
 0x9e2   :  { %10333 = vmatpush1.bf16.msra.mxu1 %v25336_v27  ;;  %10252 = vmatprep.subr.bf16.mxu0 %v25341_v15  ;;  %v25386_v27 = vld [vmem:[%s36108_s8 + $0x75c] ss:$76 sps:$4 sm:$0xff]  }
 0x9e3   :  { %10334 = vmatprep.subr.bf16.mxu1 %v25344_v51  ;;  %v25381_v15 = vld [vmem:[%s36108_s8 + $0x750] ss:$76 sps:$4 sm:$0xff]   ;;  %v25384_v51 = vld [vmem:[%s36108_s8 + $0x758] ss:$76 sps:$4 sm:$0xff]  }
 0x9e5   :  { %10253 = vmatpush1.bf16.msra.mxu0 %v25339_v54  ;;  %v25389_v54 = vld [vmem:[%s36108_s8 + $0x7ec] ss:$76 sps:$4 sm:$0xff]  }
 0x9e6   :  { %10335 = vmatpush1.bf16.msra.mxu1 %v25342_v52  ;;  %10254 = vmatprep.subr.bf16.mxu0 %v25347_v57  ;;  %v25392_v52 = vld [vmem:[%s36108_s8 + $0x7f4] ss:$76 sps:$4 sm:$0xff]  }
 0x9e7   :  { %10336 = vmatprep.subr.bf16.mxu1 %v25350_v58  ;;  %v25387_v57 = vld [vmem:[%s36108_s8 + $0x7e8] ss:$76 sps:$4 sm:$0xff]   ;;  %v25390_v58 = vld [vmem:[%s36108_s8 + $0x7f0] ss:$76 sps:$4 sm:$0xff]  }
 0x9e9   :  { %10255 = vmatpush1.bf16.msra.mxu0 %v25345_v62  ;;  %v25395_v62 = vld [vmem:[%s36108_s8 + $0x884] ss:$76 sps:$4 sm:$0xff]  }
 0x9ea   :  { %10337 = vmatpush1.bf16.msra.mxu1 %v25348_v22  ;;  %10256 = vmatprep.subr.bf16.mxu0 %v25353_v14  ;;  %v25398_v22 = vld [vmem:[%s36108_s8 + $0x88c] ss:$76 sps:$4 sm:$0xff]  }
 0x9eb   :  { %10338 = vmatprep.subr.bf16.mxu1 %v25356_v0  ;;  %v25393_v14 = vld [vmem:[%s36108_s8 + $0x880] ss:$76 sps:$4 sm:$0xff]   ;;  %v25396_v0 = vld [vmem:[%s36108_s8 + $0x888] ss:$76 sps:$4 sm:$0xff]  }
 0x9ed   :  { %10257 = vmatpush1.bf16.msra.mxu0 %v25351_v5  ;;  %v25401_v5 = vld [vmem:[%s36108_s8 + $0x91c] ss:$76 sps:$4 sm:$0xff]  }
 0x9ee   :  { %10339 = vmatpush1.bf16.msra.mxu1 %v25354_v28  ;;  %10258 = vmatprep.subr.bf16.mxu0 %v25359_v3  ;;  %v25404_v28 = vld [vmem:[%s36108_s8 + $0x924] ss:$76 sps:$4 sm:$0xff]  }
 0x9ef   :  { %10340 = vmatprep.subr.bf16.mxu1 %v25362_v4  ;;  %v25399_v3 = vld [vmem:[%s36108_s8 + $0x918] ss:$76 sps:$4 sm:$0xff]   ;;  %v25402_v4 = vld [vmem:[%s36108_s8 + $0x920] ss:$76 sps:$4 sm:$0xff]  }
 0x9f1   :  { %10259 = vmatpush1.bf16.msra.mxu0 %v25357_v6  ;;  %v25407_v6 = vld [vmem:[%s36108_s8 + $0x9b4] ss:$76 sps:$4 sm:$0xff]  }
 0x9f2   :  { %10341 = vmatpush1.bf16.msra.mxu1 %v25360_v61  ;;  %10260 = vmatprep.subr.bf16.mxu0 %v25365_v18  ;;  %v25410_v61 = vld [vmem:[%s36108_s8 + $0x9bc] ss:$76 sps:$4 sm:$0xff]  }
 0x9f3   :  { %10342 = vmatprep.subr.bf16.mxu1 %v25368_v21  ;;  %v25405_v18 = vld [vmem:[%s36108_s8 + $0x9b0] ss:$76 sps:$4 sm:$0xff]   ;;  %v25408_v21 = vld [vmem:[%s36108_s8 + $0x9b8] ss:$76 sps:$4 sm:$0xff]  }
 0x9f5   :  { %10261 = vmatpush1.bf16.msra.mxu0 %v25363_v29  ;;  %v25413_v29 = vld [vmem:[%s36108_s8 + $0xa4c] ss:$76 sps:$4 sm:$0xff]  }
 0x9f6   :  { %10343 = vmatpush1.bf16.msra.mxu1 %v25366_v50  ;;  %10262 = vmatprep.subr.bf16.mxu0 %v25371_v32  ;;  %v25416_v50 = vld [vmem:[%s36108_s8 + $0xa54] ss:$76 sps:$4 sm:$0xff]  }
 0x9f7   :  { %10344 = vmatprep.subr.bf16.mxu1 %v25374_v1  ;;  %v25411_v32 = vld [vmem:[%s36108_s8 + $0xa48] ss:$76 sps:$4 sm:$0xff]   ;;  %v25414_v1 = vld [vmem:[%s36108_s8 + $0xa50] ss:$76 sps:$4 sm:$0xff]  }
 0x9f9   :  { %10263 = vmatpush1.bf16.msra.mxu0 %v25369_v36  ;;  %v25419_v36 = vld [vmem:[%s36108_s8 + $0xae4] ss:$76 sps:$4 sm:$0xff]  }
 0x9fa   :  { %10345 = vmatpush1.bf16.msra.mxu1 %v25372_v37  ;;  %10264 = vmatprep.subr.bf16.mxu0 %v25377_v40  ;;  %v25422_v37 = vld [vmem:[%s36108_s8 + $0xaec] ss:$76 sps:$4 sm:$0xff]  }
 0x9fb   :  { %10346 = vmatprep.subr.bf16.mxu1 %v25380_v44  ;;  %v25417_v40 = vld [vmem:[%s36108_s8 + $0xae0] ss:$76 sps:$4 sm:$0xff]   ;;  %v25420_v44 = vld [vmem:[%s36108_s8 + $0xae8] ss:$76 sps:$4 sm:$0xff]  }
 0x9fd   :  { %10265 = vmatpush1.bf16.msra.mxu0 %v25375_v11  ;;  %v25425_v11 = vld [vmem:[%s36108_s8 + $0xb7c] ss:$76 sps:$4 sm:$0xff]  }
 0x9fe   :  { %10347 = vmatpush1.bf16.msra.mxu1 %v25378_v46  ;;  %10266 = vmatprep.subr.bf16.mxu0 %v25383_v48  ;;  %v25428_v46 = vld [vmem:[%s36108_s8 + $0xb84] ss:$76 sps:$4 sm:$0xff]  }
 0x9ff   :  { %10348 = vmatprep.subr.bf16.mxu1 %v25386_v27  ;;  %v25423_v48 = vld [vmem:[%s36108_s8 + $0xb78] ss:$76 sps:$4 sm:$0xff]   ;;  %v25426_v27 = vld [vmem:[%s36108_s8 + $0xb80] ss:$76 sps:$4 sm:$0xff]  }
 0xa01   :  { %10267 = vmatpush1.bf16.msra.mxu0 %v25381_v15  ;;  %v25431_v15 = vld [vmem:[%s36108_s8 + $0xc14] ss:$76 sps:$4 sm:$0xff]  }
 0xa02   :  { %10349 = vmatpush1.bf16.msra.mxu1 %v25384_v51  ;;  %10268 = vmatprep.subr.bf16.mxu0 %v25389_v54  ;;  %v25434_v51 = vld [vmem:[%s36108_s8 + $0xc1c] ss:$76 sps:$4 sm:$0xff]   ;;  %v31677_v54 = vsub.s32 4, %v27855_v43 }
 0xa03   :  { %10350 = vmatprep.subr.bf16.mxu1 %v25392_v52  ;;  %v25429_v52 = vld [vmem:[%s36108_s8 + $0xc10] ss:$76 sps:$4 sm:$0xff]  }
 0xa05   :  { %10269 = vmatpush1.bf16.msra.mxu0 %v25387_v57  ;;  %v31683_v57 = vsub.s32 6, %v27855_v43 }
 0xa06   :  { %10351 = vmatpush1.bf16.msra.mxu1 %v25390_v58  ;;  %10270 = vmatprep.subr.bf16.mxu0 %v25395_v62  ;;  %v31686_v58 = vsub.s32 5, %v27855_v43  ;;  %v25432_v62 = vld [vmem:[%s36108_s8 + $0xc18] ss:$76 sps:$4 sm:$0xff]  }
 0xa07   :  { %10352 = vmatprep.subr.bf16.mxu1 %v25398_v22  ;;  %v31692_v22 = vsub.s32 7, %v27855_v43 }
 0xa09   :  { %10271 = vmatpush1.bf16.msra.mxu0 %v25393_v14  ;;  %v25437_v14 = vld [vmem:[%s36108_s8 + $0xcac] ss:$76 sps:$4 sm:$0xff]  }
 0xa0a   :  { %10353 = vmatpush1.bf16.msra.mxu1 %v25396_v0  ;;  %10272 = vmatprep.subr.bf16.mxu0 %v25401_v5  ;;  %v25440_v0 = vld [vmem:[%s36108_s8 + $0xcb4] ss:$76 sps:$4 sm:$0xff]   ;;  %v6602_v5 = vrot.slane %v31275_v23, %v31677_v54 }
 0xa0b   :  { %10354 = vmatprep.subr.bf16.mxu1 %v25404_v28  ;;  %v6610_v28 = vrot.slane %v31275_v23, %v31683_v57 }
 0xa0d   :  { %10273 = vmatpush1.bf16.msra.mxu0 %v25399_v3  ;;  %v6606_v3 = vrot.slane %v31275_v23, %v31686_v58 }
 0xa0e   :  { %10355 = vmatpush1.bf16.msra.mxu1 %v25402_v4  ;;  %10283 = vmatprep.subr.bf16.mxu0 %v25407_v6  ;;  %v25435_v4 = vld [vmem:[%s36108_s8 + $0xca8] ss:$76 sps:$4 sm:$0xff]   ;;  %v6614_v6 = vrot.slane %v31275_v23, %v31692_v22  ;;  %v25441_v23 = vld [vmem:[%s36108_s8 + $0xd40] ss:$76 sps:$4 sm:$0xff]  }
 0xa0f   :  { %10365 = vmatprep.subr.bf16.mxu1 %v25410_v61  ;;  %v25438_v61 = vld [vmem:[%s36108_s8 + $0xcb0] ss:$76 sps:$4 sm:$0xff]  }
 0xa10   :  { %10275 = vmatmul.mubr.bf16.vlgmr.msra.gmra.mrb[20].mxu0 %v30427_v9 }
 0xa11   :  { %10357 = vmatmul.mubr.bf16.vlgmr.msra.gmra.mrb[32].mxu1 %v30427_v9  ;;  %10284 = vmatpush1.bf16.msra.mxu0 %v25405_v18  ;;  %v25443_v18 = vld [vmem:[%s36108_s8 + $0xd44] ss:$76 sps:$4 sm:$0xff]  }
 0xa12   :  { %10315 = vmatprep.mubr.bf16.mxu0 %v30623_v41  ;;  %10366 = vmatpush1.bf16.msra.mxu1 %v25408_v21 }
 0xa13   :  { %10397 = vmatprep.mubr.bf16.mxu1 %v30623_v41  ;;  %10285 = vmatprep.subr.bf16.mxu0 %v25413_v29  ;;  %v25446_v29 = vld [vmem:[%s36108_s8 + $0xd4c] ss:$76 sps:$4 sm:$0xff]  }
 0xa14   :  { %10367 = vmatprep.subr.bf16.mxu1 %v25416_v50 }
 0xa15   :  { %10286 = vmatpush1.bf16.msra.mxu0 %v25411_v32 }
 0xa16   :  { %10368 = vmatpush1.bf16.msra.mxu1 %v25414_v1  ;;  %10287 = vmatprep.subr.bf16.mxu0 %v25419_v36 }
 0xa17   :  { %10369 = vmatprep.subr.bf16.mxu1 %v25422_v37 }
 0xa19   :  { %10288 = vmatpush1.bf16.msra.mxu0 %v25417_v40 }
 0xa1a   :  { %10370 = vmatpush1.bf16.msra.mxu1 %v25420_v44  ;;  %10289 = vmatprep.subr.bf16.mxu0 %v25425_v11  ;;  %v25444_v11 = vld [vmem:[%s36108_s8 + $0xd48] ss:$76 sps:$4 sm:$0xff]  }
 0xa1b   :  { %10371 = vmatprep.subr.bf16.mxu1 %v25428_v46  ;;  %v25449_v46 = vld [vmem:[%s36108_s8 + $0xddc] ss:$76 sps:$4 sm:$0xff]  }
 0xa1d   :  { %10290 = vmatpush1.bf16.msra.mxu0 %v25423_v48 }
 0xa1e   :  { %10372 = vmatpush1.bf16.msra.mxu1 %v25426_v27  ;;  %10291 = vmatprep.subr.bf16.mxu0 %v25431_v15 }
 0xa1f   :  { %10373 = vmatprep.subr.bf16.mxu1 %v25434_v51 }
 0xa21   :  { %10292 = vmatpush1.bf16.msra.mxu0 %v25429_v52  ;;  %v25452_v52 = vld [vmem:[%s36108_s8 + $0xde4] ss:$76 sps:$4 sm:$0xff]  }
 0xa22   :  { %10374 = vmatpush1.bf16.msra.mxu1 %v25432_v62  ;;  %10293 = vmatprep.subr.bf16.mxu0 %v25437_v14 }
 0xa23   :  { %v9989_v21 = vpop.f32.mrb[12].mxu0  ;;  %10375 = vmatprep.subr.bf16.mxu1 %v25440_v0 }
 0xa24   :  { %v23362_v50 = vadd.f32 %v9989_v21, %v6602_v5  ;;  %v10071_v32 = vpop.f32.mrb[24].mxu1  ;;  %v9991_v1 = vpop.f32.mrb[13].mxu0  ;;  %v25461_v21 = vld [vmem:[%s36108_s8 + $0xf0c] ss:$76 sps:$4 sm:$0xff]  }
 0xa25   :  { %v23364_v36 = vadd.f32 %v10071_v32, %v6610_v28  ;;  %v23363_v37 = vadd.f32 %v9991_v1, %v6606_v3  ;;  %v10073_v40 = vpop.f32.mrb[25].mxu1  ;;  %v9993_v44 = vpop.f32.mrb[14].mxu0  ;;  %10294 = vmatpush1.bf16.msra.mxu0 %v25435_v4  ;;  %v25447_v28 = vld [vmem:[%s36108_s8 + $0xdd8] ss:$76 sps:$4 sm:$0xff]   ;;  %v25450_v3 = vld [vmem:[%s36108_s8 + $0xde0] ss:$76 sps:$4 sm:$0xff]  }
 0xa26   :  { %v21928_v48 = vmul.f32 -1.442695, %v23362_v50  ;;  %v23365_v27 = vadd.f32 %v10073_v40, %v6614_v6  ;;  %v10075_v15 = vpop.f32.mrb[26].mxu1  ;;  %10376 = vmatpush1.bf16.msra.mxu1 %v25438_v61  ;;  %v9994_v51 = vpop.f32.mrb[15].mxu0  ;;  %10295 = vmatprep.subr.bf16.mxu0 %v25443_v18  ;;  %v25455_v4 = vld [vmem:[%s36108_s8 + $0xe74] ss:$76 sps:$4 sm:$0xff]  }
 0xa27   :  { %v21930_v62 = vmul.f32 -1.442695, %v23364_v36  ;;  %v21929_v14 = vmul.f32 -1.442695, %v23363_v37  ;;  %v10076_v0 = vpop.f32.mrb[27].mxu1  ;;  %10377 = vmatprep.subr.bf16.mxu1 %v25446_v29 }
 0xa28   :  { %27473 = vpow2.f32 %v21928_v48  ;;  %v21931_v5 = vmul.f32 -1.442695, %v23365_v27  ;;  %v25458_v6 = vld [vmem:[%s36108_s8 + $0xe7c] ss:$76 sps:$4 sm:$0xff]   ;;  %v25456_v18 = vld [vmem:[%s36108_s8 + $0xe78] ss:$76 sps:$4 sm:$0xff]  }
 0xa29   :  { %27475 = vpow2.f32 %v21930_v62  ;;  %10296 = vmatpush1.bf16.msra.mxu0 %v25441_v23  ;;  %v25453_v61 = vld [vmem:[%s36108_s8 + $0xe70] ss:$76 sps:$4 sm:$0xff]   ;;  %v25464_v29 = vld [vmem:[%s36108_s8 + $0xf14] ss:$76 sps:$4 sm:$0xff]   ;;  %v25470_v40 = vld [vmem:[%s36108_s8 + $0xfac] ss:$76 sps:$4 sm:$0xff]  }
 0xa2a   :  { %27477 = vpow2.f32 %v21929_v14  ;;  %10378 = vmatpush1.bf16.msra.mxu1 %v25444_v11  ;;  %10297 = vmatprep.subr.bf16.mxu0 %v25449_v46  ;;  %v25459_v50 = vld [vmem:[%s36108_s8 + $0xf08] ss:$76 sps:$4 sm:$0xff]   ;;  %v25462_v1 = vld [vmem:[%s36108_s8 + $0xf10] ss:$76 sps:$4 sm:$0xff]   ;;  %v25465_v27 = vld [vmem:[%s36108_s8 + $0xfa0] ss:$76 sps:$4 sm:$0xff]  }
 0xa2b   :  { %27479 = vpow2.f32 %v21931_v5  ;;  %10379 = vmatprep.subr.bf16.mxu1 %v25452_v52  ;;  %v25467_v23 = vld [vmem:[%s36108_s8 + $0xfa4] ss:$76 sps:$4 sm:$0xff]   ;;  %v25468_v51 = vld [vmem:[%s36108_s8 + $0xfa8] ss:$76 sps:$4 sm:$0xff]   ;;  %v25474_v0 = vld [vmem:[%s36108_s8 + $0x1040] ss:$76 sps:$4 sm:$0xff]  }
 0xa2c   :  { %v25473_v52 = vld [vmem:[%s36108_s8 + $0x103c] ss:$76 sps:$4 sm:$0xff]   ;;  %v25476_v62 = vld [vmem:[%s36108_s8 + $0x1044] ss:$76 sps:$4 sm:$0xff]   ;;  %v25479_v5 = vld [vmem:[%s36108_s8 + $0x10d4] ss:$76 sps:$4 sm:$0xff]  }
 0xa2d   :  { %10298 = vmatpush1.bf16.msra.mxu0 %v25447_v28  ;;  %v25471_v14 = vld [vmem:[%s36108_s8 + $0x1038] ss:$76 sps:$4 sm:$0xff]   ;;  %v25482_v28 = vld [vmem:[%s36108_s8 + $0x10dc] ss:$76 sps:$4 sm:$0xff]  }
 0xa2e   :  { %10380 = vmatpush1.bf16.msra.mxu1 %v25450_v3  ;;  %10299 = vmatprep.subr.bf16.mxu0 %v25455_v4  ;;  %v25477_v3 = vld [vmem:[%s36108_s8 + $0x10d0] ss:$76 sps:$4 sm:$0xff]   ;;  %v25480_v4 = vld [vmem:[%s36108_s8 + $0x10d8] ss:$76 sps:$4 sm:$0xff]  }
 0xa2f   :  { %10381 = vmatprep.subr.bf16.mxu1 %v25458_v6  ;;  %v25485_v6 = vld [vmem:[%s36108_s8 + $0x116c] ss:$76 sps:$4 sm:$0xff]  }
 0xa31   :  { %10300 = vmatpush1.bf16.msra.mxu0 %v25453_v61 }
 0xa32   :  { %v27474_v32 = vpop.eup %27473  ;;  %10382 = vmatpush1.bf16.msra.mxu1 %v25456_v18  ;;  %10301 = vmatprep.subr.bf16.mxu0 %v25461_v21  ;;  %v25488_v18 = vld [vmem:[%s36108_s8 + $0x1174] ss:$76 sps:$4 sm:$0xff]  }
 0xa33   :  { %v27476_v36 = vpop.eup %27475  ;;  %v10629_v37 = vadd.f32 1.0, %v27474_v32  ;;  %10383 = vmatprep.subr.bf16.mxu1 %v25464_v29 }
 0xa34   :  { %v27478_v44 = vpop.eup %27477  ;;  %v10631_v11 = vadd.f32 1.0, %v27476_v36  ;;  %v25491_v36 = vld [vmem:[%s36108_s8 + $0x1204] ss:$76 sps:$4 sm:$0xff]  }
 0xa35   :  { %v27480_v46 = vpop.eup %27479  ;;  %27481 = vrcp.f32 %v10629_v37  ;;  %v10630_v48 = vadd.f32 1.0, %v27478_v44  ;;  %10302 = vmatpush1.bf16.msra.mxu0 %v25459_v50  ;;  %v25483_v50 = vld [vmem:[%s36108_s8 + $0x1168] ss:$76 sps:$4 sm:$0xff]  }
 0xa36   :  { %27483 = vrcp.f32 %v10631_v11  ;;  %v10632_v15 = vadd.f32 1.0, %v27480_v46  ;;  %10384 = vmatpush1.bf16.msra.mxu1 %v25462_v1  ;;  %10303 = vmatprep.subr.bf16.mxu0 %v25467_v23  ;;  %v25486_v23 = vld [vmem:[%s36108_s8 + $0x1170] ss:$76 sps:$4 sm:$0xff]   ;;  %v25489_v11 = vld [vmem:[%s36108_s8 + $0x1200] ss:$76 sps:$4 sm:$0xff]  }
 0xa37   :  { %27485 = vrcp.f32 %v10630_v48  ;;  %10385 = vmatprep.subr.bf16.mxu1 %v25470_v40  ;;  %v25494_v40 = vld [vmem:[%s36108_s8 + $0x120c] ss:$76 sps:$4 sm:$0xff]   ;;  %v25492_v48 = vld [vmem:[%s36108_s8 + $0x1208] ss:$76 sps:$4 sm:$0xff]  }
 0xa38   :  { %27487 = vrcp.f32 %v10632_v15  ;;  %v25500_v15 = vld [vmem:[%s36108_s8 + $0x12a4] ss:$76 sps:$4 sm:$0xff]  }
 0xa39   :  { %10304 = vmatpush1.bf16.msra.mxu0 %v25465_v27  ;;  %v25497_v27 = vld [vmem:[%s36108_s8 + $0x129c] ss:$76 sps:$4 sm:$0xff]  }
 0xa3a   :  { %10386 = vmatpush1.bf16.msra.mxu1 %v25468_v51  ;;  %10305 = vmatprep.subr.bf16.mxu0 %v25473_v52  ;;  %v25495_v52 = vld [vmem:[%s36108_s8 + $0x1298] ss:$76 sps:$4 sm:$0xff]  }
 0xa3b   :  { %10387 = vmatprep.subr.bf16.mxu1 %v25476_v62  ;;  %v25498_v62 = vld [vmem:[%s36108_s8 + $0x12a0] ss:$76 sps:$4 sm:$0xff]  }
 0xa3d   :  { %10306 = vmatpush1.bf16.msra.mxu0 %v25471_v14  ;;  %v25503_v14 = vld [vmem:[%s36108_s8 + $0x44] ss:$76 sps:$4 sm:$0xff]  }
 0xa3e   :  { %10388 = vmatpush1.bf16.msra.mxu1 %v25474_v0  ;;  %10307 = vmatprep.subr.bf16.mxu0 %v25479_v5  ;;  %v25504_v0 = vld [vmem:[%s36108_s8 + $0x508] ss:$76 sps:$4 sm:$0xff]   ;;  %v25501_v5 = vld [vmem:[%s36108_s8 + $0x40] ss:$76 sps:$4 sm:$0xff]  }
 0xa3f   :  { %v27482_v61 = vpop.eup %27481  ;;  %10389 = vmatprep.subr.bf16.mxu1 %v25482_v28  ;;  %v25505_v28 = vld [vmem:[%s36108_s8 + $0x48] ss:$76 sps:$4 sm:$0xff]  }
 0xa40   :  { %v27484_v21 = vpop.eup %27483 }
 0xa41   :  { %v27486_v29 = vpop.eup %27485  ;;  %10308 = vmatpush1.bf16.msra.mxu0 %v25477_v3  ;;  %v25508_v3 = vld [vmem:[%s36108_s8 + $0xdc] ss:$76 sps:$4 sm:$0xff]  }
 0xa42   :  { %v27488_v32 = vpop.eup %27487  ;;  %v10718_v1 = vcombine.low %v27482_v61, %v27486_v29  ;;  %10390 = vmatpush1.bf16.msra.mxu1 %v25480_v4  ;;  %10309 = vmatprep.subr.bf16.mxu0 %v25485_v6  ;;  %v25509_v4 = vld [vmem:[%s36108_s8 + $0x5a0] ss:$76 sps:$4 sm:$0xff]   ;;  %v25506_v6 = vld [vmem:[%s36108_s8 + $0xd8] ss:$76 sps:$4 sm:$0xff]   ;;  %v25511_v29 = vld [vmem:[%s36108_s8 + $0x170] ss:$76 sps:$4 sm:$0xff]  }
 0xa43   :  { %v10719_v37 = vcombine.low %v27484_v21, %v27488_v32  ;;  %10391 = vmatprep.subr.bf16.mxu1 %v25488_v18  ;;  %v25510_v61 = vld [vmem:[%s36108_s8 + $0xe0] ss:$76 sps:$4 sm:$0xff]   ;;  %v25514_v21 = vld [vmem:[%s36108_s8 + $0x638] ss:$76 sps:$4 sm:$0xff]   ;;  %v25519_v32 = vld [vmem:[%s36108_s8 + $0x6d0] ss:$76 sps:$4 sm:$0xff]  }
 0xa44   :  { %v10726_v44 = vrot.slane %v10718_v1, %v27873_v49  ;;  %v25513_v18 = vld [vmem:[%s36108_s8 + $0x174] ss:$76 sps:$4 sm:$0xff]  }
 0xa45   :  { %10310 = vmatpush1.bf16.msra.mxu0 %v25483_v50  ;;  %v10733_v46 = vrot.slane %v10719_v37, %v27873_v49  ;;  %v25515_v50 = vld [vmem:[%s36108_s8 + $0x178] ss:$76 sps:$4 sm:$0xff]   ;;  %v25516_v1 = vld [vmem:[%s36108_s8 + $0x208] ss:$76 sps:$4 sm:$0xff]  }
 0xa46   :  { %10392 = vmatpush1.bf16.msra.mxu1 %v25486_v23  ;;  %10311 = vmatprep.subr.bf16.mxu0 %v25491_v36  ;;  %v25520_v23 = vld [vmem:[%s36108_s8 + $0x210] ss:$76 sps:$4 sm:$0xff]   ;;  %v25524_v37 = vld [vmem:[%s36108_s8 + $0x768] ss:$76 sps:$4 sm:$0xff]  }
 0xa47   :  { %10393 = vmatprep.subr.bf16.mxu1 %v25494_v40  ;;  %v10734_v51 = vcombine.low %v10726_v44, %v10733_v46  ;;  %v25523_v36 = vld [vmem:[%s36108_s8 + $0x2a4] ss:$76 sps:$4 sm:$0xff]   ;;  %v25521_v40 = vld [vmem:[%s36108_s8 + $0x2a0] ss:$76 sps:$4 sm:$0xff]   ;;  %v25525_v44 = vld [vmem:[%s36108_s8 + $0x2a8] ss:$76 sps:$4 sm:$0xff]  }
 0xa48   :  { %v25529_v46 = vld [vmem:[%s36108_s8 + $0x800] ss:$76 sps:$4 sm:$0xff]  }
 0xa49   :  { %10312 = vmatpush1.bf16.msra.mxu0 %v25489_v11  ;;  %10791 = vst [vmem:[#allocation2 + $0x8] sm:$0xff] %v10734_v51  ;;  %v25528_v11 = vld [vmem:[%s36108_s8 + $0x33c] ss:$76 sps:$4 sm:$0xff]   ;;  %v25534_v51 = vld [vmem:[%s36108_s8 + $0x898] ss:$76 sps:$4 sm:$0xff]  }
 0xa4a   :  { %10394 = vmatpush1.bf16.msra.mxu1 %v25492_v48  ;;  %10313 = vmatprep.subr.bf16.mxu0 %v25497_v27  ;;  %v25526_v48 = vld [vmem:[%s36108_s8 + $0x338] ss:$76 sps:$4 sm:$0xff]   ;;  %v25530_v27 = vld [vmem:[%s36108_s8 + $0x340] ss:$76 sps:$4 sm:$0xff]  }
 0xa4b   :  { %10395 = vmatprep.subr.bf16.mxu1 %v25500_v15  ;;  %v25533_v15 = vld [vmem:[%s36108_s8 + $0x3d4] ss:$76 sps:$4 sm:$0xff]  }
 0xa4d   :  { %10314 = vmatpush1.bf16.msra.mxu0 %v25495_v52  ;;  %v25531_v52 = vld [vmem:[%s36108_s8 + $0x3d0] ss:$76 sps:$4 sm:$0xff]  }
 0xa4e   :  { %10396 = vmatpush1.bf16.msra.mxu1 %v25498_v62  ;;  %10406 = vmatprep.subr.bf16.mxu0 %v25503_v14  ;;  %v25535_v62 = vld [vmem:[%s36108_s8 + $0x3d8] ss:$76 sps:$4 sm:$0xff]  }
 0xa4f   :  { %23220 = vmatprep.subr.bf16.mxu1 %v25504_v0  ;;  %v25538_v14 = vld [vmem:[%s36108_s8 + $0x46c] ss:$76 sps:$4 sm:$0xff]   ;;  %v25539_v0 = vld [vmem:[%s36108_s8 + $0x930] ss:$76 sps:$4 sm:$0xff]  }
 0xa50   :  { %10316 = vmatmul.mubr.bf16.vlgmr.msra.gmra.mrb[20].mxu0 %v30628_v45 }
 0xa51   :  { %10398 = vmatmul.mubr.bf16.vlgmr.msra.gmra.mrb[32].mxu1 %v30628_v45  ;;  %10407 = vmatpush1.bf16.msra.mxu0 %v25501_v5  ;;  %v25536_v5 = vld [vmem:[%s36108_s8 + $0x468] ss:$76 sps:$4 sm:$0xff]  }
 0xa52   :  { %10438 = vmatprep.mubr.bf16.mxu0 %v30419_v19  ;;  %23221 = vmatpush3.bf16.msra.mxu1 %v25505_v28  ;;  %v25540_v28 = vld [vmem:[%s36108_s8 + $0x470] ss:$76 sps:$4 sm:$0xff]  }
 0xa53   :  { %10520 = vmatprep.mubr.bf16.mxu1 %v30419_v19  ;;  %10408 = vmatprep.subr.bf16.mxu0 %v25508_v3  ;;  %v25518_v19 = vld [vmem:[%s36108_s8 + $0x20c] ss:$76 sps:$4 sm:$0xff]   ;;  %v25543_v3 = vld [vmem:[%s36108_s8 + $0x504] ss:$76 sps:$4 sm:$0xff]  }
 0xa54   :  { %23222 = vmatprep.subr.bf16.mxu1 %v25509_v4  ;;  %v25544_v4 = vld [vmem:[%s36108_s8 + $0xe88] ss:$76 sps:$4 sm:$0xff]  }
 0xa55   :  { %10409 = vmatpush1.bf16.msra.mxu0 %v25506_v6  ;;  %v25541_v6 = vld [vmem:[%s36108_s8 + $0x500] ss:$76 sps:$4 sm:$0xff]  }
 0xa56   :  { %23223 = vmatpush3.bf16.msra.mxu1 %v25510_v61  ;;  %10410 = vmatprep.subr.bf16.mxu0 %v25513_v18  ;;  %v25545_v61 = vld [vmem:[%s36108_s8 + $0x9c8] ss:$76 sps:$4 sm:$0xff]  }
 0xa57   :  { %23224 = vmatprep.subr.bf16.mxu1 %v25514_v21  ;;  %v25548_v18 = vld [vmem:[%s36108_s8 + $0x59c] ss:$76 sps:$4 sm:$0xff]   ;;  %v25549_v21 = vld [vmem:[%s36108_s8 + $0xf20] ss:$76 sps:$4 sm:$0xff]  }
 0xa59   :  { %10411 = vmatpush1.bf16.msra.mxu0 %v25511_v29  ;;  %v25546_v29 = vld [vmem:[%s36108_s8 + $0x598] ss:$76 sps:$4 sm:$0xff]  }
 0xa5a   :  { %23225 = vmatpush3.bf16.msra.mxu1 %v25515_v50  ;;  %10412 = vmatprep.subr.bf16.mxu0 %v25518_v19  ;;  %v25550_v50 = vld [vmem:[%s36108_s8 + $0xa60] ss:$76 sps:$4 sm:$0xff]  }
 0xa5b   :  { %23226 = vmatprep.subr.bf16.mxu1 %v25519_v32  ;;  %v25553_v19 = vld [vmem:[%s36108_s8 + $0x634] ss:$76 sps:$4 sm:$0xff]   ;;  %v25554_v32 = vld [vmem:[%s36108_s8 + $0xfb8] ss:$76 sps:$4 sm:$0xff]  }
 0xa5d   :  { %10413 = vmatpush1.bf16.msra.mxu0 %v25516_v1  ;;  %v25551_v1 = vld [vmem:[%s36108_s8 + $0x630] ss:$76 sps:$4 sm:$0xff]  }
 0xa5e   :  { %23227 = vmatpush3.bf16.msra.mxu1 %v25520_v23  ;;  %10414 = vmatprep.subr.bf16.mxu0 %v25523_v36  ;;  %v25555_v23 = vld [vmem:[%s36108_s8 + $0xaf8] ss:$76 sps:$4 sm:$0xff]  }
 0xa5f   :  { %23228 = vmatprep.subr.bf16.mxu1 %v25524_v37  ;;  %v25558_v36 = vld [vmem:[%s36108_s8 + $0x6cc] ss:$76 sps:$4 sm:$0xff]   ;;  %v25559_v37 = vld [vmem:[%s36108_s8 + $0x1050] ss:$76 sps:$4 sm:$0xff]  }
 0xa61   :  { %10415 = vmatpush1.bf16.msra.mxu0 %v25521_v40  ;;  %v25556_v40 = vld [vmem:[%s36108_s8 + $0x6c8] ss:$76 sps:$4 sm:$0xff]  }
 0xa62   :  { %23229 = vmatpush3.bf16.msra.mxu1 %v25525_v44  ;;  %10416 = vmatprep.subr.bf16.mxu0 %v25528_v11  ;;  %v25560_v44 = vld [vmem:[%s36108_s8 + $0xb90] ss:$76 sps:$4 sm:$0xff]  }
 0xa63   :  { %23230 = vmatprep.subr.bf16.mxu1 %v25529_v46  ;;  %v25563_v11 = vld [vmem:[%s36108_s8 + $0x764] ss:$76 sps:$4 sm:$0xff]   ;;  %v25564_v46 = vld [vmem:[%s36108_s8 + $0x10e8] ss:$76 sps:$4 sm:$0xff]  }
 0xa65   :  { %10417 = vmatpush1.bf16.msra.mxu0 %v25526_v48  ;;  %v25561_v48 = vld [vmem:[%s36108_s8 + $0x760] ss:$76 sps:$4 sm:$0xff]  }
 0xa66   :  { %23231 = vmatpush3.bf16.msra.mxu1 %v25530_v27  ;;  %10418 = vmatprep.subr.bf16.mxu0 %v25533_v15  ;;  %v25565_v27 = vld [vmem:[%s36108_s8 + $0xc28] ss:$76 sps:$4 sm:$0xff]  }
 0xa67   :  { %23232 = vmatprep.subr.bf16.mxu1 %v25534_v51  ;;  %v25568_v15 = vld [vmem:[%s36108_s8 + $0x7fc] ss:$76 sps:$4 sm:$0xff]   ;;  %v25569_v51 = vld [vmem:[%s36108_s8 + $0x1180] ss:$76 sps:$4 sm:$0xff]  }
 0xa69   :  { %10419 = vmatpush1.bf16.msra.mxu0 %v25531_v52  ;;  %v25566_v52 = vld [vmem:[%s36108_s8 + $0x7f8] ss:$76 sps:$4 sm:$0xff]  }
 0xa6a   :  { %23233 = vmatpush3.bf16.msra.mxu1 %v25535_v62  ;;  %10420 = vmatprep.subr.bf16.mxu0 %v25538_v14  ;;  %v25570_v62 = vld [vmem:[%s36108_s8 + $0xcc0] ss:$76 sps:$4 sm:$0xff]  }
 0xa6b   :  { %23234 = vmatprep.subr.bf16.mxu1 %v25539_v0  ;;  %v25573_v14 = vld [vmem:[%s36108_s8 + $0x894] ss:$76 sps:$4 sm:$0xff]   ;;  %v25574_v0 = vld [vmem:[%s36108_s8 + $0x1218] ss:$76 sps:$4 sm:$0xff]  }
 0xa6d   :  { %10421 = vmatpush1.bf16.msra.mxu0 %v25536_v5  ;;  %v25571_v5 = vld [vmem:[%s36108_s8 + $0x890] ss:$76 sps:$4 sm:$0xff]  }
 0xa6e   :  { %23235 = vmatpush3.bf16.msra.mxu1 %v25540_v28  ;;  %10422 = vmatprep.subr.bf16.mxu0 %v25543_v3  ;;  %v25575_v28 = vld [vmem:[%s36108_s8 + $0xd58] ss:$76 sps:$4 sm:$0xff]  }
 0xa6f   :  { %23242 = vmatprep.subr.bf16.mxu1 %v25544_v4  ;;  %v25578_v3 = vld [vmem:[%s36108_s8 + $0x92c] ss:$76 sps:$4 sm:$0xff]   ;;  %v25579_v4 = vld [vmem:[%s36108_s8 + $0x12b0] ss:$76 sps:$4 sm:$0xff]  }
 0xa71   :  { %10521 = vmatmul.mubr.bf16.vlgmr.msra.gmra.mrb[36].mxu1 %v30427_v9  ;;  %10423 = vmatpush1.bf16.msra.mxu0 %v25541_v6  ;;  %v25576_v6 = vld [vmem:[%s36108_s8 + $0x928] ss:$76 sps:$4 sm:$0xff]  }
 0xa72   :  { %23243 = vmatpush3.bf16.msra.mxu1 %v25545_v61  ;;  %10560 = vmatprep.mubr.bf16.mxu1 %v30623_v41  ;;  %v25580_v61 = vld [vmem:[%s36108_s8 + $0xdf0] ss:$76 sps:$4 sm:$0xff]  }
 0xa73   :  { %10424 = vmatprep.subr.bf16.mxu0 %v25548_v18  ;;  %23244 = vmatprep.subr.bf16.mxu1 %v25549_v21  ;;  %v25583_v18 = vld [vmem:[%s36108_s8 + $0x9c4] ss:$76 sps:$4 sm:$0xff]  }
 0xa74   :  { %v25586_v21 = vld [vmem:[%s36109_s9 + $0x4] ss:$16 sps:$4 sm:$0xff]  }
 0xa75   :  { %10425 = vmatpush1.bf16.msra.mxu0 %v25546_v29  ;;  %v25581_v29 = vld [vmem:[%s36108_s8 + $0x9c0] ss:$76 sps:$4 sm:$0xff]  }
 0xa76   :  { %23245 = vmatpush3.bf16.msra.mxu1 %v25550_v50  ;;  %10426 = vmatprep.subr.bf16.mxu0 %v25553_v19  ;;  %v25584_v50 = vld [vmem:[%s36109_s9] ss:$16 sps:$4 sm:$0xff]   ;;  %v25589_v19 = vld [vmem:[%s36108_s8 + $0xa5c] ss:$76 sps:$4 sm:$0xff]  }
 0xa77   :  { %23246 = vmatprep.subr.bf16.mxu1 %v25554_v32  ;;  %v25592_v32 = vld [vmem:[%s36109_s9 + $0x24] ss:$16 sps:$4 sm:$0xff]  }
 0xa79   :  { %10427 = vmatpush1.bf16.msra.mxu0 %v25551_v1  ;;  %v25587_v1 = vld [vmem:[%s36108_s8 + $0xa58] ss:$76 sps:$4 sm:$0xff]  }
 0xa7a   :  { %23247 = vmatpush3.bf16.msra.mxu1 %v25555_v23  ;;  %10428 = vmatprep.subr.bf16.mxu0 %v25558_v36  ;;  %v25590_v23 = vld [vmem:[%s36109_s9 + $0x20] ss:$16 sps:$4 sm:$0xff]  }
 0xa7b   :  { %23248 = vmatprep.subr.bf16.mxu1 %v25559_v37  ;;  %v25595_v36 = vld [vmem:[%s36108_s8 + $0xaf4] ss:$76 sps:$4 sm:$0xff]  }
 0xa7c   :  { %v25596_v37 = vld [vmem:[%s36109_s9 + $0x40] ss:$16 sps:$4 sm:$0xff]  }
 0xa7d   :  { %10429 = vmatpush1.bf16.msra.mxu0 %v25556_v40  ;;  %v25601_v40 = vld [vmem:[%s36108_s8 + $0xb8c] ss:$76 sps:$4 sm:$0xff]  }
 0xa7e   :  { %23249 = vmatpush3.bf16.msra.mxu1 %v25560_v44  ;;  %10430 = vmatprep.subr.bf16.mxu0 %v25563_v11  ;;  %v25604_v44 = vld [vmem:[%s36109_s9 + $0x64] ss:$16 sps:$4 sm:$0xff]  }
 0xa7f   :  { %23250 = vmatprep.subr.bf16.mxu1 %v25564_v46  ;;  %v25599_v11 = vld [vmem:[%s36108_s8 + $0xb88] ss:$76 sps:$4 sm:$0xff]   ;;  %v25602_v46 = vld [vmem:[%s36109_s9 + $0x60] ss:$16 sps:$4 sm:$0xff]  }
 0xa81   :  { %10431 = vmatpush1.bf16.msra.mxu0 %v25561_v48  ;;  %v25607_v48 = vld [vmem:[%s36108_s8 + $0xc24] ss:$76 sps:$4 sm:$0xff]  }
 0xa82   :  { %23251 = vmatpush3.bf16.msra.mxu1 %v25565_v27  ;;  %10432 = vmatprep.subr.bf16.mxu0 %v25568_v15  ;;  %v25610_v27 = vld [vmem:[%s36109_s9 + $0x84] ss:$16 sps:$4 sm:$0xff]   ;;  %v25605_v15 = vld [vmem:[%s36108_s8 + $0xc20] ss:$76 sps:$4 sm:$0xff]  }
 0xa83   :  { %23252 = vmatprep.subr.bf16.mxu1 %v25569_v51  ;;  %v32098_v51 = vld [vmem:[%s36113_s13 + $0x15] sm:$0xff] }
 0xa85   :  { %10433 = vmatpush1.bf16.msra.mxu0 %v25566_v52  ;;  %v25608_v52 = vld [vmem:[%s36109_s9 + $0x80] ss:$16 sps:$4 sm:$0xff]  }
 0xa86   :  { %23253 = vmatpush3.bf16.msra.mxu1 %v25570_v62  ;;  %10434 = vmatprep.subr.bf16.mxu0 %v25573_v14  ;;  %v25613_v62 = vld [vmem:[%s36108_s8 + $0xcbc] ss:$76 sps:$4 sm:$0xff]   ;;  %v25616_v14 = vld [vmem:[%s36109_s9 + $0xa4] ss:$16 sps:$4 sm:$0xff]  }
 0xa87   :  { %23254 = vmatprep.subr.bf16.mxu1 %v25574_v0  ;;  %v6618_v0 = vrot.slane %v32098_v51, %v29821_v47 }
 0xa89   :  { %10435 = vmatpush1.bf16.msra.mxu0 %v25571_v5  ;;  %v6626_v5 = vrot.slane %v32098_v51, %v29916_v33 }
 0xa8a   :  { %23255 = vmatpush3.bf16.msra.mxu1 %v25575_v28  ;;  %10436 = vmatprep.subr.bf16.mxu0 %v25578_v3  ;;  %v6622_v28 = vrot.slane %v32098_v51, %v29824_v13  ;;  %v25611_v3 = vld [vmem:[%s36108_s8 + $0xcb8] ss:$76 sps:$4 sm:$0xff]  }
 0xa8b   :  { %23256 = vmatprep.subr.bf16.mxu1 %v25579_v4  ;;  %v6630_v4 = vrot.slane %v32098_v51, %v29827_v17 }
 0xa8d   :  { %10437 = vmatpush1.bf16.msra.mxu0 %v25576_v6  ;;  %v25614_v6 = vld [vmem:[%s36109_s9 + $0xa0] ss:$16 sps:$4 sm:$0xff]  }
 0xa8e   :  { %23257 = vmatpush3.bf16.msra.mxu1 %v25580_v61  ;;  %10447 = vmatprep.subr.bf16.mxu0 %v25583_v18  ;;  %v25619_v61 = vld [vmem:[%s36108_s8 + $0xd54] ss:$76 sps:$4 sm:$0xff]  }
 0xa8f   :  { %14350 = vmatprep.subr.bf16.mxu1 %v25586_v21  ;;  %v25622_v21 = vld [vmem:[%s36109_s9 + $0xc4] ss:$16 sps:$4 sm:$0xff]  }
 0xa90   :  { %10439 = vmatmul.mubr.bf16.vlgmr.msra.gmra.mrb[24].mxu0 %v30427_v9  ;;  %v25598_v9 = vld [vmem:[%s36109_s9 + $0x44] ss:$16 sps:$4 sm:$0xff]  }
 0xa91   :  { %10561 = vmatmul.mubr.bf16.vlgmr.msra.gmra.mrb[40].mxu1 %v30628_v45  ;;  %10448 = vmatpush1.bf16.msra.mxu0 %v25581_v29 }
 0xa92   :  { %10479 = vmatprep.mubr.bf16.mxu0 %v30623_v41  ;;  %14351 = vmatpush1.bf16.msra.mxu1 %v25584_v50  ;;  %v25593_v41 = vld [vmem:[%s36108_s8 + $0xaf0] ss:$76 sps:$4 sm:$0xff]  }
 0xa93   :  { %10449 = vmatprep.subr.bf16.mxu0 %v25589_v19  ;;  %14352 = vmatprep.subr.bf16.mxu1 %v25592_v32  ;;  %v25617_v32 = vld [vmem:[%s36108_s8 + $0xd50] ss:$76 sps:$4 sm:$0xff]  }
 0xa94   :  { %14382 = vmatprep.mubr.bf16.mxu1 %v27900_v60 }
 0xa95   :  { %10450 = vmatpush1.bf16.msra.mxu0 %v25587_v1 }
 0xa96   :  { %14353 = vmatpush1.bf16.msra.mxu1 %v25590_v23  ;;  %10451 = vmatprep.subr.bf16.mxu0 %v25595_v36 }
 0xa97   :  { %14354 = vmatprep.subr.bf16.mxu1 %v25598_v9 }
 0xa99   :  { %10452 = vmatpush1.bf16.msra.mxu0 %v25593_v41  ;;  %v25620_v41 = vld [vmem:[%s36109_s9 + $0xc0] ss:$16 sps:$4 sm:$0xff]  }
 0xa9a   :  { %14355 = vmatpush1.bf16.msra.mxu1 %v25596_v37  ;;  %10453 = vmatprep.subr.bf16.mxu0 %v25601_v40  ;;  %v25625_v37 = vld [vmem:[%s36108_s8 + $0xdec] ss:$76 sps:$4 sm:$0xff]  }
 0xa9b   :  { %14356 = vmatprep.subr.bf16.mxu1 %v25604_v44 }
 0xa9d   :  { %10454 = vmatpush1.bf16.msra.mxu0 %v25599_v11 }
 0xa9e   :  { %14357 = vmatpush1.bf16.msra.mxu1 %v25602_v46  ;;  %10455 = vmatprep.subr.bf16.mxu0 %v25607_v48  ;;  %v25628_v48 = vld [vmem:[%s36109_s9 + $0xe4] ss:$16 sps:$4 sm:$0xff]  }
 0xa9f   :  { %14358 = vmatprep.subr.bf16.mxu1 %v25610_v27 }
 0xaa1   :  { %10456 = vmatpush1.bf16.msra.mxu0 %v25605_v15 }
 0xaa2   :  { %14359 = vmatpush1.bf16.msra.mxu1 %v25608_v52  ;;  %10457 = vmatprep.subr.bf16.mxu0 %v25613_v62 }
 0xaa3   :  { %v10153_v18 = vpop.f32.mrb[16].mxu0  ;;  %14360 = vmatprep.subr.bf16.mxu1 %v25616_v14  ;;  %v25623_v14 = vld [vmem:[%s36108_s8 + $0xde8] ss:$76 sps:$4 sm:$0xff]  }
 0xaa4   :  { %v23366_v29 = vadd.f32 %v10153_v18, %v6618_v0  ;;  %v10235_v50 = vpop.f32.mrb[28].mxu1  ;;  %v10155_v19 = vpop.f32.mrb[17].mxu0  ;;  %v25626_v0 = vld [vmem:[%s36109_s9 + $0xe0] ss:$16 sps:$4 sm:$0xff]   ;;  %v25635_v18 = vld [vmem:[%s36108_s8 + $0xf18] ss:$76 sps:$4 sm:$0xff]  }
 0xaa5   :  { %v23368_v1 = vadd.f32 %v10235_v50, %v6626_v5  ;;  %v23367_v23 = vadd.f32 %v10155_v19, %v6622_v28  ;;  %v10237_v36 = vpop.f32.mrb[29].mxu1  ;;  %v10157_v9 = vpop.f32.mrb[18].mxu0  ;;  %10458 = vmatpush1.bf16.msra.mxu0 %v25611_v3  ;;  %v25631_v5 = vld [vmem:[%s36108_s8 + $0xe84] ss:$76 sps:$4 sm:$0xff]   ;;  %v25629_v3 = vld [vmem:[%s36108_s8 + $0xe80] ss:$76 sps:$4 sm:$0xff]  }
 0xaa6   :  { %v21932_v40 = vmul.f32 -1.442695, %v23366_v29  ;;  %v23369_v44 = vadd.f32 %v10237_v36, %v6630_v4  ;;  %v10239_v11 = vpop.f32.mrb[30].mxu1  ;;  %14361 = vmatpush1.bf16.msra.mxu1 %v25614_v6  ;;  %v10158_v46 = vpop.f32.mrb[19].mxu0  ;;  %10459 = vmatprep.subr.bf16.mxu0 %v25619_v61  ;;  %v25634_v28 = vld [vmem:[%s36109_s9 + $0x104] ss:$16 sps:$4 sm:$0xff]  }
 0xaa7   :  { %v21934_v27 = vmul.f32 -1.442695, %v23368_v1  ;;  %v21933_v15 = vmul.f32 -1.442695, %v23367_v23  ;;  %v10240_v52 = vpop.f32.mrb[31].mxu1  ;;  %14362 = vmatprep.subr.bf16.mxu1 %v25622_v21 }
 0xaa8   :  { %27489 = vpow2.f32 %v21932_v40  ;;  %v21935_v62 = vmul.f32 -1.442695, %v23369_v44  ;;  %v25632_v4 = vld [vmem:[%s36109_s9 + $0x100] ss:$16 sps:$4 sm:$0xff]   ;;  %v25637_v6 = vld [vmem:[%s36108_s8 + $0xf1c] ss:$76 sps:$4 sm:$0xff]  }
 0xaa9   :  { %27491 = vpow2.f32 %v21934_v27  ;;  %10460 = vmatpush1.bf16.msra.mxu0 %v25617_v32  ;;  %v25640_v61 = vld [vmem:[%s36109_s9 + $0x124] ss:$16 sps:$4 sm:$0xff]   ;;  %v25638_v29 = vld [vmem:[%s36109_s9 + $0x120] ss:$16 sps:$4 sm:$0xff]   ;;  %v25649_v11 = vld [vmem:[%s36108_s8 + $0x104c] ss:$76 sps:$4 sm:$0xff]  }
 0xaaa   :  { %27493 = vpow2.f32 %v21933_v15  ;;  %14363 = vmatpush1.bf16.msra.mxu1 %v25620_v41  ;;  %10461 = vmatprep.subr.bf16.mxu0 %v25625_v37  ;;  %v25643_v50 = vld [vmem:[%s36108_s8 + $0xfb4] ss:$76 sps:$4 sm:$0xff]   ;;  %v25641_v37 = vld [vmem:[%s36108_s8 + $0xfb0] ss:$76 sps:$4 sm:$0xff]  }
 0xaab   :  { %27495 = vpow2.f32 %v21935_v62  ;;  %14364 = vmatprep.subr.bf16.mxu1 %v25628_v48  ;;  %v25646_v1 = vld [vmem:[%s36109_s9 + $0x144] ss:$16 sps:$4 sm:$0xff]   ;;  %v25644_v44 = vld [vmem:[%s36109_s9 + $0x140] ss:$16 sps:$4 sm:$0xff]  }
 0xaac   :  { %v25652_v46 = vld [vmem:[%s36109_s9 + $0x164] ss:$16 sps:$4 sm:$0xff]   ;;  %v25650_v27 = vld [vmem:[%s36109_s9 + $0x160] ss:$16 sps:$4 sm:$0xff]  }
 0xaad   :  { %10462 = vmatpush1.bf16.msra.mxu0 %v25623_v14  ;;  %v25647_v48 = vld [vmem:[%s36108_s8 + $0x1048] ss:$76 sps:$4 sm:$0xff]   ;;  %v25655_v15 = vld [vmem:[%s36108_s8 + $0x10e4] ss:$76 sps:$4 sm:$0xff]   ;;  %v25653_v62 = vld [vmem:[%s36108_s8 + $0x10e0] ss:$76 sps:$4 sm:$0xff]  }
 0xaae   :  { %14365 = vmatpush1.bf16.msra.mxu1 %v25626_v0  ;;  %10463 = vmatprep.subr.bf16.mxu0 %v25631_v5  ;;  %v25658_v52 = vld [vmem:[%s36109_s9 + $0x184] ss:$16 sps:$4 sm:$0xff]   ;;  %v25656_v14 = vld [vmem:[%s36109_s9 + $0x180] ss:$16 sps:$4 sm:$0xff]   ;;  %v25661_v0 = vld [vmem:[%s36108_s8 + $0x117c] ss:$76 sps:$4 sm:$0xff]  }
 0xaaf   :  { %14366 = vmatprep.subr.bf16.mxu1 %v25634_v28  ;;  %v25664_v28 = vld [vmem:[%s36109_s9 + $0x1a4] ss:$16 sps:$4 sm:$0xff]  }
 0xab1   :  { %10464 = vmatpush1.bf16.msra.mxu0 %v25629_v3 }
 0xab2   :  { %v27490_v21 = vpop.eup %27489  ;;  %14367 = vmatpush1.bf16.msra.mxu1 %v25632_v4  ;;  %10465 = vmatprep.subr.bf16.mxu0 %v25637_v6  ;;  %v25659_v6 = vld [vmem:[%s36108_s8 + $0x1178] ss:$76 sps:$4 sm:$0xff]  }
 0xab3   :  { %v27492_v19 = vpop.eup %27491  ;;  %v10633_v32 = vadd.f32 1.0, %v27490_v21  ;;  %14368 = vmatprep.subr.bf16.mxu1 %v25640_v61  ;;  %v25662_v21 = vld [vmem:[%s36109_s9 + $0x1a0] ss:$16 sps:$4 sm:$0xff]  }
 0xab4   :  { %v27494_v23 = vpop.eup %27493  ;;  %v10635_v36 = vadd.f32 1.0, %v27492_v19  ;;  %v25670_v19 = vld [vmem:[%s36109_s9 + $0x1c4] ss:$16 sps:$4 sm:$0xff]  }
 0xab5   :  { %v27496_v9 = vpop.eup %27495  ;;  %27497 = vrcp.f32 %v10633_v32  ;;  %v10634_v41 = vadd.f32 1.0, %v27494_v23  ;;  %10466 = vmatpush1.bf16.msra.mxu0 %v25635_v18 }
 0xab6   :  { %27499 = vrcp.f32 %v10635_v36  ;;  %v10636_v40 = vadd.f32 1.0, %v27496_v9  ;;  %14369 = vmatpush1.bf16.msra.mxu1 %v25638_v29  ;;  %10467 = vmatprep.subr.bf16.mxu0 %v25643_v50  ;;  %v25667_v29 = vld [vmem:[%s36108_s8 + $0x1214] ss:$76 sps:$4 sm:$0xff]   ;;  %v25673_v9 = vld [vmem:[%s36108_s8 + $0x12ac] ss:$76 sps:$4 sm:$0xff]  }
 0xab7   :  { %27501 = vrcp.f32 %v10634_v41  ;;  %14370 = vmatprep.subr.bf16.mxu1 %v25646_v1  ;;  %v25665_v1 = vld [vmem:[%s36108_s8 + $0x1210] ss:$76 sps:$4 sm:$0xff]   ;;  %v25676_v41 = vld [vmem:[%s36109_s9 + $0x1e4] ss:$16 sps:$4 sm:$0xff]  }
 0xab8   :  { %27503 = vrcp.f32 %v10636_v40  ;;  %v25668_v36 = vld [vmem:[%s36109_s9 + $0x1c0] ss:$16 sps:$4 sm:$0xff]   ;;  %v25671_v40 = vld [vmem:[%s36108_s8 + $0x12a8] ss:$76 sps:$4 sm:$0xff]  }
 0xab9   :  { %10468 = vmatpush1.bf16.msra.mxu0 %v25641_v37 }
 0xaba   :  { %14371 = vmatpush1.bf16.msra.mxu1 %v25644_v44  ;;  %10469 = vmatprep.subr.bf16.mxu0 %v25649_v11  ;;  %v25674_v44 = vld [vmem:[%s36109_s9 + $0x1e0] ss:$16 sps:$4 sm:$0xff]   ;;  %v25682_v11 = vld [vmem:[%s36109_s9 + $0xc] ss:$16 sps:$4 sm:$0xff]  }
 0xabb   :  { %14372 = vmatprep.subr.bf16.mxu1 %v25652_v46  ;;  %v25679_v46 = vld [vmem:[%s36109_s9 + $0x204] ss:$16 sps:$4 sm:$0xff]  }
 0xabd   :  { %10470 = vmatpush1.bf16.msra.mxu0 %v25647_v48  ;;  %v25680_v48 = vld [vmem:[%s36109_s9 + $0x8] ss:$16 sps:$4 sm:$0xff]  }
 0xabe   :  { %14373 = vmatpush1.bf16.msra.mxu1 %v25650_v27  ;;  %10471 = vmatprep.subr.bf16.mxu0 %v25655_v15  ;;  %v25677_v27 = vld [vmem:[%s36109_s9 + $0x200] ss:$16 sps:$4 sm:$0xff]   ;;  %v25688_v15 = vld [vmem:[%s36109_s9 + $0x2c] ss:$16 sps:$4 sm:$0xff]  }
 0xabf   :  { %v27498_v5 = vpop.eup %27497  ;;  %14374 = vmatprep.subr.bf16.mxu1 %v25658_v52  ;;  %v25685_v52 = vld [vmem:[%s36109_s9 + $0x224] ss:$16 sps:$4 sm:$0xff]  }
 0xac0   :  { %v27500_v3 = vpop.eup %27499 }
 0xac1   :  { %v27502_v4 = vpop.eup %27501  ;;  %10472 = vmatpush1.bf16.msra.mxu0 %v25653_v62  ;;  %v25686_v62 = vld [vmem:[%s36109_s9 + $0x28] ss:$16 sps:$4 sm:$0xff]  }
 0xac2   :  { %v27504_v61 = vpop.eup %27503  ;;  %v10735_v18 = vcombine.low %v27498_v5, %v27502_v4  ;;  %14375 = vmatpush1.bf16.msra.mxu1 %v25656_v14  ;;  %10473 = vmatprep.subr.bf16.mxu0 %v25661_v0  ;;  %v25683_v14 = vld [vmem:[%s36109_s9 + $0x220] ss:$16 sps:$4 sm:$0xff]   ;;  %v25694_v0 = vld [vmem:[%s36109_s9 + $0x4c] ss:$16 sps:$4 sm:$0xff]   ;;  %v25692_v5 = vld [vmem:[%s36109_s9 + $0x48] ss:$16 sps:$4 sm:$0xff]  }
 0xac3   :  { %v10736_v50 = vcombine.low %v27500_v3, %v27504_v61  ;;  %14376 = vmatprep.subr.bf16.mxu1 %v25664_v28  ;;  %v25689_v28 = vld [vmem:[%s36109_s9 + $0x240] ss:$16 sps:$4 sm:$0xff]   ;;  %v25700_v3 = vld [vmem:[%s36109_s9 + $0x6c] ss:$16 sps:$4 sm:$0xff]   ;;  %v25698_v4 = vld [vmem:[%s36109_s9 + $0x68] ss:$16 sps:$4 sm:$0xff]  }
 0xac4   :  { %v10743_v32 = vrot.slane %v10735_v18, %v27873_v49  ;;  %v25706_v61 = vld [vmem:[%s36109_s9 + $0x8c] ss:$16 sps:$4 sm:$0xff]   ;;  %v25703_v18 = vld [vmem:[%s36109_s9 + $0x284] ss:$16 sps:$4 sm:$0xff]  }
 0xac5   :  { %10474 = vmatpush1.bf16.msra.mxu0 %v25659_v6  ;;  %v10750_v23 = vrot.slane %v10736_v50, %v27873_v49  ;;  %v25695_v6 = vld [vmem:[%s36109_s9 + $0x260] ss:$16 sps:$4 sm:$0xff]   ;;  %v25712_v50 = vld [vmem:[%s36109_s9 + $0xac] ss:$16 sps:$4 sm:$0xff]  }
 0xac6   :  { %14377 = vmatpush1.bf16.msra.mxu1 %v25662_v21  ;;  %10475 = vmatprep.subr.bf16.mxu0 %v25667_v29  ;;  %v25704_v21 = vld [vmem:[%s36109_s9 + $0x88] ss:$16 sps:$4 sm:$0xff]   ;;  %v25701_v29 = vld [vmem:[%s36109_s9 + $0x280] ss:$16 sps:$4 sm:$0xff]  }
 0xac7   :  { %14378 = vmatprep.subr.bf16.mxu1 %v25670_v19  ;;  %v10751_v37 = vcombine.low %v10743_v32, %v10750_v23  ;;  %v25709_v19 = vld [vmem:[%s36109_s9 + $0x2a4] ss:$16 sps:$4 sm:$0xff]   ;;  %v25710_v32 = vld [vmem:[%s36109_s9 + $0xa8] ss:$16 sps:$4 sm:$0xff]   ;;  %v25718_v23 = vld [vmem:[%s36109_s9 + $0xcc] ss:$16 sps:$4 sm:$0xff]  }
 0xac9   :  { %10476 = vmatpush1.bf16.msra.mxu0 %v25665_v1  ;;  %10792 = vst [vmem:[#allocation2 + $0x10] sm:$0xff] %v10751_v37  ;;  %v25707_v1 = vld [vmem:[%s36109_s9 + $0x2a0] ss:$16 sps:$4 sm:$0xff]   ;;  %v25724_v37 = vld [vmem:[%s36109_s9 + $0xec] ss:$16 sps:$4 sm:$0xff]  }
 0xaca   :  { %14379 = vmatpush1.bf16.msra.mxu1 %v25668_v36  ;;  %10477 = vmatprep.subr.bf16.mxu0 %v25673_v9  ;;  %v25715_v36 = vld [vmem:[%s36109_s9 + $0x2c4] ss:$16 sps:$4 sm:$0xff]   ;;  %v25716_v9 = vld [vmem:[%s36109_s9 + $0xc8] ss:$16 sps:$4 sm:$0xff]  }
 0xacb   :  { %14380 = vmatprep.subr.bf16.mxu1 %v25676_v41  ;;  %v25713_v41 = vld [vmem:[%s36109_s9 + $0x2c0] ss:$16 sps:$4 sm:$0xff]  }
 0xacd   :  { %10478 = vmatpush1.bf16.msra.mxu0 %v25671_v40  ;;  %v25721_v40 = vld [vmem:[%s36109_s9 + $0x2e4] ss:$16 sps:$4 sm:$0xff]  }
 0xace   :  { %14381 = vmatpush1.bf16.msra.mxu1 %v25674_v44  ;;  %14760 = vmatprep.subr.bf16.mxu0 %v25682_v11  ;;  %v25722_v44 = vld [vmem:[%s36109_s9 + $0xe8] ss:$16 sps:$4 sm:$0xff]   ;;  %v25719_v11 = vld [vmem:[%s36109_s9 + $0x2e0] ss:$16 sps:$4 sm:$0xff]  }
 0xacf   :  { %14391 = vmatprep.subr.bf16.mxu1 %v25679_v46  ;;  %v25730_v46 = vld [vmem:[%s36109_s9 + $0x10c] ss:$16 sps:$4 sm:$0xff]  }
 0xad0   :  { %10480 = vmatmul.mubr.bf16.vlgmr.msra.gmra.mrb[24].mxu0 %v30628_v45  ;;  %v25691_v45 = vld [vmem:[%s36109_s9 + $0x244] ss:$16 sps:$4 sm:$0xff]  }
 0xad1   :  { %14383 = vmatmul.mubr.bf16.vlgmr.msra.gmra.mrb[44].mxu1 %v27957_v16  ;;  %14761 = vmatpush1.bf16.msra.mxu0 %v25680_v48  ;;  %v25727_v48 = vld [vmem:[%s36109_s9 + $0x304] ss:$16 sps:$4 sm:$0xff]  }
 0xad2   :  { %14392 = vmatpush1.bf16.msra.mxu1 %v25677_v27  ;;  %14762 = vmatprep.subr.bf16.mxu0 %v25688_v15  ;;  %v25728_v27 = vld [vmem:[%s36109_s9 + $0x108] ss:$16 sps:$4 sm:$0xff]   ;;  %v25725_v15 = vld [vmem:[%s36109_s9 + $0x300] ss:$16 sps:$4 sm:$0xff]  }
 0xad3   :  { %14393 = vmatprep.subr.bf16.mxu1 %v25685_v52  ;;  %14423 = vmatprep.mubr.bf16.mxu1 %v27968_v20  ;;  %v25736_v52 = vld [vmem:[%s36109_s9 + $0x12c] ss:$16 sps:$4 sm:$0xff]  }
 0xad4   :  { %14792 = vmatprep.mubr.bf16.mxu0 %v27900_v60  ;;  %v25697_v60 = vld [vmem:[%s36109_s9 + $0x264] ss:$16 sps:$4 sm:$0xff]  }
 0xad5   :  { %14763 = vmatpush1.bf16.msra.mxu0 %v25686_v62  ;;  %v25733_v62 = vld [vmem:[%s36109_s9 + $0x324] ss:$16 sps:$4 sm:$0xff]  }
 0xad6   :  { %14394 = vmatpush1.bf16.msra.mxu1 %v25683_v14  ;;  %14764 = vmatprep.subr.bf16.mxu0 %v25694_v0  ;;  %v25734_v14 = vld [vmem:[%s36109_s9 + $0x128] ss:$16 sps:$4 sm:$0xff]   ;;  %v25731_v0 = vld [vmem:[%s36109_s9 + $0x320] ss:$16 sps:$4 sm:$0xff]  }
 0xad7   :  { %14395 = vmatprep.subr.bf16.mxu1 %v25691_v45  ;;  %v25742_v45 = vld [vmem:[%s36109_s9 + $0x14c] ss:$16 sps:$4 sm:$0xff]  }
 0xad9   :  { %14765 = vmatpush1.bf16.msra.mxu0 %v25692_v5  ;;  %v25739_v5 = vld [vmem:[%s36109_s9 + $0x344] ss:$16 sps:$4 sm:$0xff]  }
 0xada   :  { %14396 = vmatpush1.bf16.msra.mxu1 %v25689_v28  ;;  %14766 = vmatprep.subr.bf16.mxu0 %v25700_v3  ;;  %v25740_v28 = vld [vmem:[%s36109_s9 + $0x148] ss:$16 sps:$4 sm:$0xff]   ;;  %v25737_v3 = vld [vmem:[%s36109_s9 + $0x340] ss:$16 sps:$4 sm:$0xff]  }
 0xadb   :  { %14397 = vmatprep.subr.bf16.mxu1 %v25697_v60  ;;  %v25748_v60 = vld [vmem:[%s36109_s9 + $0x16c] ss:$16 sps:$4 sm:$0xff]  }
 0xadd   :  { %14767 = vmatpush1.bf16.msra.mxu0 %v25698_v4  ;;  %v25745_v4 = vld [vmem:[%s36109_s9 + $0x364] ss:$16 sps:$4 sm:$0xff]  }
 0xade   :  { %14398 = vmatpush1.bf16.msra.mxu1 %v25695_v6  ;;  %14768 = vmatprep.subr.bf16.mxu0 %v25706_v61  ;;  %v25746_v6 = vld [vmem:[%s36109_s9 + $0x168] ss:$16 sps:$4 sm:$0xff]   ;;  %v25743_v61 = vld [vmem:[%s36109_s9 + $0x360] ss:$16 sps:$4 sm:$0xff]  }
 0xadf   :  { %14399 = vmatprep.subr.bf16.mxu1 %v25703_v18  ;;  %v25754_v18 = vld [vmem:[%s36109_s9 + $0x18c] ss:$16 sps:$4 sm:$0xff]  }
 0xae1   :  { %14769 = vmatpush1.bf16.msra.mxu0 %v25704_v21  ;;  %v25751_v21 = vld [vmem:[%s36109_s9 + $0x384] ss:$16 sps:$4 sm:$0xff]  }
 0xae2   :  { %14400 = vmatpush1.bf16.msra.mxu1 %v25701_v29  ;;  %14770 = vmatprep.subr.bf16.mxu0 %v25712_v50  ;;  %v25752_v29 = vld [vmem:[%s36109_s9 + $0x188] ss:$16 sps:$4 sm:$0xff]   ;;  %v25749_v50 = vld [vmem:[%s36109_s9 + $0x380] ss:$16 sps:$4 sm:$0xff]  }
 0xae3   :  { %14401 = vmatprep.subr.bf16.mxu1 %v25709_v19  ;;  %v25760_v19 = vld [vmem:[%s36109_s9 + $0x1ac] ss:$16 sps:$4 sm:$0xff]  }
 0xae5   :  { %14771 = vmatpush1.bf16.msra.mxu0 %v25710_v32  ;;  %v25757_v32 = vld [vmem:[%s36109_s9 + $0x3a4] ss:$16 sps:$4 sm:$0xff]  }
 0xae6   :  { %14402 = vmatpush1.bf16.msra.mxu1 %v25707_v1  ;;  %14772 = vmatprep.subr.bf16.mxu0 %v25718_v23  ;;  %v25758_v1 = vld [vmem:[%s36109_s9 + $0x1a8] ss:$16 sps:$4 sm:$0xff]   ;;  %v25755_v23 = vld [vmem:[%s36109_s9 + $0x3a0] ss:$16 sps:$4 sm:$0xff]  }
 0xae7   :  { %14403 = vmatprep.subr.bf16.mxu1 %v25715_v36  ;;  %v25766_v36 = vld [vmem:[%s36109_s9 + $0x1cc] ss:$16 sps:$4 sm:$0xff]  }
 0xae9   :  { %14773 = vmatpush1.bf16.msra.mxu0 %v25716_v9  ;;  %v25763_v9 = vld [vmem:[%s36109_s9 + $0x3c4] ss:$16 sps:$4 sm:$0xff]  }
 0xaea   :  { %14404 = vmatpush1.bf16.msra.mxu1 %v25713_v41  ;;  %14774 = vmatprep.subr.bf16.mxu0 %v25724_v37  ;;  %v25764_v41 = vld [vmem:[%s36109_s9 + $0x1c8] ss:$16 sps:$4 sm:$0xff]   ;;  %v25761_v37 = vld [vmem:[%s36109_s9 + $0x3c0] ss:$16 sps:$4 sm:$0xff]  }
 0xaeb   :  { %14405 = vmatprep.subr.bf16.mxu1 %v25721_v40  ;;  %v25772_v40 = vld [vmem:[%s36109_s9 + $0x1ec] ss:$16 sps:$4 sm:$0xff]  }
 0xaed   :  { %14775 = vmatpush1.bf16.msra.mxu0 %v25722_v44  ;;  %v25769_v44 = vld [vmem:[%s36109_s9 + $0x3e4] ss:$16 sps:$4 sm:$0xff]  }
 0xaee   :  { %14406 = vmatpush1.bf16.msra.mxu1 %v25719_v11  ;;  %14776 = vmatprep.subr.bf16.mxu0 %v25730_v46  ;;  %v25770_v11 = vld [vmem:[%s36109_s9 + $0x1e8] ss:$16 sps:$4 sm:$0xff]   ;;  %v25767_v46 = vld [vmem:[%s36109_s9 + $0x3e0] ss:$16 sps:$4 sm:$0xff]  }
 0xaef   :  { %14407 = vmatprep.subr.bf16.mxu1 %v25727_v48  ;;  %v25778_v48 = vld [vmem:[%s36109_s9 + $0x20c] ss:$16 sps:$4 sm:$0xff]  }
 0xaf1   :  { %14777 = vmatpush1.bf16.msra.mxu0 %v25728_v27  ;;  %v25775_v27 = vld [vmem:[%s36109_s9 + $0x404] ss:$16 sps:$4 sm:$0xff]  }
 0xaf2   :  { %14408 = vmatpush1.bf16.msra.mxu1 %v25725_v15  ;;  %14778 = vmatprep.subr.bf16.mxu0 %v25736_v52  ;;  %v25776_v15 = vld [vmem:[%s36109_s9 + $0x208] ss:$16 sps:$4 sm:$0xff]   ;;  %v25773_v52 = vld [vmem:[%s36109_s9 + $0x400] ss:$16 sps:$4 sm:$0xff]  }
 0xaf3   :  { %14409 = vmatprep.subr.bf16.mxu1 %v25733_v62  ;;  %v25784_v62 = vld [vmem:[%s36109_s9 + $0x22c] ss:$16 sps:$4 sm:$0xff]  }
 0xaf5   :  { %14779 = vmatpush1.bf16.msra.mxu0 %v25734_v14  ;;  %v25781_v14 = vld [vmem:[%s36109_s9 + $0x424] ss:$16 sps:$4 sm:$0xff]  }
 0xaf6   :  { %14410 = vmatpush1.bf16.msra.mxu1 %v25731_v0  ;;  %14780 = vmatprep.subr.bf16.mxu0 %v25742_v45  ;;  %v25782_v0 = vld [vmem:[%s36109_s9 + $0x228] ss:$16 sps:$4 sm:$0xff]   ;;  %v25779_v45 = vld [vmem:[%s36109_s9 + $0x420] ss:$16 sps:$4 sm:$0xff]  }
 0xaf7   :  { %14411 = vmatprep.subr.bf16.mxu1 %v25739_v5  ;;  %v25790_v5 = vld [vmem:[%s36109_s9 + $0x24c] ss:$16 sps:$4 sm:$0xff]  }
 0xaf9   :  { %14781 = vmatpush1.bf16.msra.mxu0 %v25740_v28  ;;  %v25788_v28 = vld [vmem:[%s36109_s9 + $0x248] ss:$16 sps:$4 sm:$0xff]  }
 0xafa   :  { %14412 = vmatpush1.bf16.msra.mxu1 %v25737_v3  ;;  %14782 = vmatprep.subr.bf16.mxu0 %v25748_v60  ;;  %v25785_v3 = vld [vmem:[%s36109_s9 + $0x440] ss:$16 sps:$4 sm:$0xff]   ;;  %v25796_v60 = vld [vmem:[%s36109_s9 + $0x26c] ss:$16 sps:$4 sm:$0xff]  }
 0xafb   :  { %14413 = vmatprep.subr.bf16.mxu1 %v25745_v4  ;;  %v25794_v4 = vld [vmem:[%s36109_s9 + $0x268] ss:$16 sps:$4 sm:$0xff]  }
 0xafd   :  { %14783 = vmatpush1.bf16.msra.mxu0 %v25746_v6  ;;  %v25791_v6 = vld [vmem:[%s36109_s9 + $0x460] ss:$16 sps:$4 sm:$0xff]  }
 0xafe   :  { %14414 = vmatpush1.bf16.msra.mxu1 %v25743_v61  ;;  %14784 = vmatprep.subr.bf16.mxu0 %v25754_v18  ;;  %v25802_v61 = vld [vmem:[%s36109_s9 + $0x28c] ss:$16 sps:$4 sm:$0xff]   ;;  %v25799_v18 = vld [vmem:[%s36109_s9 + $0x484] ss:$16 sps:$4 sm:$0xff]  }
 0xaff   :  { %14415 = vmatprep.subr.bf16.mxu1 %v25751_v21  ;;  %v25800_v21 = vld [vmem:[%s36109_s9 + $0x288] ss:$16 sps:$4 sm:$0xff]  }
 0xb01   :  { %14785 = vmatpush1.bf16.msra.mxu0 %v25752_v29  ;;  %v25797_v29 = vld [vmem:[%s36109_s9 + $0x480] ss:$16 sps:$4 sm:$0xff]  }
 0xb02   :  { %14416 = vmatpush1.bf16.msra.mxu1 %v25749_v50  ;;  %14786 = vmatprep.subr.bf16.mxu0 %v25760_v19  ;;  %v25808_v50 = vld [vmem:[%s36109_s9 + $0x2ac] ss:$16 sps:$4 sm:$0xff]   ;;  %v25805_v19 = vld [vmem:[%s36109_s9 + $0x4a4] ss:$16 sps:$4 sm:$0xff]  }
 0xb03   :  { %14417 = vmatprep.subr.bf16.mxu1 %v25757_v32  ;;  %v6634_v32 = vrot.slane %v32098_v51, %v31677_v54 }
 0xb05   :  { %14787 = vmatpush1.bf16.msra.mxu0 %v25758_v1  ;;  %v6642_v1 = vrot.slane %v32098_v51, %v31683_v57 }
 0xb06   :  { %14418 = vmatpush1.bf16.msra.mxu1 %v25755_v23  ;;  %14788 = vmatprep.subr.bf16.mxu0 %v25766_v36  ;;  %v6638_v23 = vrot.slane %v32098_v51, %v31686_v58  ;;  %v25806_v36 = vld [vmem:[%s36109_s9 + $0x2a8] ss:$16 sps:$4 sm:$0xff]  }
 0xb07   :  { %14419 = vmatprep.subr.bf16.mxu1 %v25763_v9  ;;  %v6646_v9 = vrot.slane %v32098_v51, %v31692_v22  ;;  %v25809_v51 = vld [vmem:[%s36109_s9 + $0x4c0] ss:$16 sps:$4 sm:$0xff]  }
 0xb09   :  { %14789 = vmatpush1.bf16.msra.mxu0 %v25764_v41  ;;  %v25803_v41 = vld [vmem:[%s36109_s9 + $0x4a0] ss:$16 sps:$4 sm:$0xff]  }
 0xb0a   :  { %14420 = vmatpush1.bf16.msra.mxu1 %v25761_v37  ;;  %14790 = vmatprep.subr.bf16.mxu0 %v25772_v40  ;;  %v25814_v37 = vld [vmem:[%s36109_s9 + $0x2cc] ss:$16 sps:$4 sm:$0xff]  }
 0xb0b   :  { %14421 = vmatprep.subr.bf16.mxu1 %v25769_v44  ;;  %v25811_v44 = vld [vmem:[%s36109_s9 + $0x4c4] ss:$16 sps:$4 sm:$0xff]  }
 0xb0d   :  { %14791 = vmatpush1.bf16.msra.mxu0 %v25770_v11 }
 0xb0e   :  { %14422 = vmatpush1.bf16.msra.mxu1 %v25767_v46  ;;  %14801 = vmatprep.subr.bf16.mxu0 %v25778_v48 }
 0xb0f   :  { %14432 = vmatprep.subr.bf16.mxu1 %v25775_v27 }
 0xb10   :  { %14793 = vmatmul.mubr.bf16.vlgmr.msra.gmra.mrb[28].mxu0 %v27957_v16  ;;  %v25787_v16 = vld [vmem:[%s36109_s9 + $0x444] ss:$16 sps:$4 sm:$0xff]  }
 0xb11   :  { %14424 = vmatmul.mubr.bf16.vlgmr.msra.gmra.mrb[44].mxu1 %v28159_v24  ;;  %14802 = vmatpush1.bf16.msra.mxu0 %v25776_v15 }
 0xb12   :  { %14433 = vmatpush1.bf16.msra.mxu1 %v25773_v52  ;;  %14803 = vmatprep.subr.bf16.mxu0 %v25784_v62 }
 0xb13   :  { %14434 = vmatprep.subr.bf16.mxu1 %v25781_v14  ;;  %14464 = vmatprep.mubr.bf16.mxu1 %v28195_v34  ;;  %v25812_v14 = vld [vmem:[%s36109_s9 + $0x2c8] ss:$16 sps:$4 sm:$0xff]  }
 0xb14   :  { %14833 = vmatprep.mubr.bf16.mxu0 %v27968_v20  ;;  %v25793_v20 = vld [vmem:[%s36109_s9 + $0x464] ss:$16 sps:$4 sm:$0xff]  }
 0xb15   :  { %14804 = vmatpush1.bf16.msra.mxu0 %v25782_v0  ;;  %v25817_v0 = vld [vmem:[%s36109_s9 + $0x4e4] ss:$16 sps:$4 sm:$0xff]  }
 0xb16   :  { %14435 = vmatpush1.bf16.msra.mxu1 %v25779_v45  ;;  %14805 = vmatprep.subr.bf16.mxu0 %v25790_v5 }
 0xb17   :  { %14436 = vmatprep.subr.bf16.mxu1 %v25787_v16 }
 0xb19   :  { %14806 = vmatpush1.bf16.msra.mxu0 %v25788_v28 }
 0xb1a   :  { %14437 = vmatpush1.bf16.msra.mxu1 %v25785_v3  ;;  %14807 = vmatprep.subr.bf16.mxu0 %v25796_v60  ;;  %v25820_v3 = vld [vmem:[%s36109_s9 + $0x2ec] ss:$16 sps:$4 sm:$0xff]  }
 0xb1b   :  { %14438 = vmatprep.subr.bf16.mxu1 %v25793_v20 }
 0xb1d   :  { %14808 = vmatpush1.bf16.msra.mxu0 %v25794_v4 }
 0xb1e   :  { %14439 = vmatpush1.bf16.msra.mxu1 %v25791_v6  ;;  %14809 = vmatprep.subr.bf16.mxu0 %v25802_v61  ;;  %v25818_v61 = vld [vmem:[%s36109_s9 + $0x2e8] ss:$16 sps:$4 sm:$0xff]  }
 0xb1f   :  { %14440 = vmatprep.subr.bf16.mxu1 %v25799_v18  ;;  %v25815_v18 = vld [vmem:[%s36109_s9 + $0x4e0] ss:$16 sps:$4 sm:$0xff]  }
 0xb21   :  { %14810 = vmatpush1.bf16.msra.mxu0 %v25800_v21  ;;  %v25826_v21 = vld [vmem:[%s36109_s9 + $0x30c] ss:$16 sps:$4 sm:$0xff]  }
 0xb22   :  { %14441 = vmatpush1.bf16.msra.mxu1 %v25797_v29  ;;  %14811 = vmatprep.subr.bf16.mxu0 %v25808_v50  ;;  %v25823_v29 = vld [vmem:[%s36109_s9 + $0x504] ss:$16 sps:$4 sm:$0xff]   ;;  %v25824_v50 = vld [vmem:[%s36109_s9 + $0x308] ss:$16 sps:$4 sm:$0xff]  }
 0xb23   :  { %v10317_v40 = vpop.f32.mrb[20].mxu0  ;;  %14442 = vmatprep.subr.bf16.mxu1 %v25805_v19  ;;  %v25821_v19 = vld [vmem:[%s36109_s9 + $0x500] ss:$16 sps:$4 sm:$0xff]  }
 0xb24   :  { %v23370_v11 = vadd.f32 %v10317_v40, %v6634_v32  ;;  %v10399_v46 = vpop.f32.mrb[32].mxu1  ;;  %v10319_v48 = vpop.f32.mrb[21].mxu0  ;;  %v25832_v32 = vld [vmem:[%s36109_s9 + $0x32c] ss:$16 sps:$4 sm:$0xff]  }
 0xb25   :  { %v23372_v27 = vadd.f32 %v10399_v46, %v6642_v1  ;;  %v23371_v15 = vadd.f32 %v10319_v48, %v6638_v23  ;;  %v10401_v52 = vpop.f32.mrb[33].mxu1  ;;  %v10321_v62 = vpop.f32.mrb[22].mxu0  ;;  %14812 = vmatpush1.bf16.msra.mxu0 %v25806_v36  ;;  %v25829_v1 = vld [vmem:[%s36109_s9 + $0x524] ss:$16 sps:$4 sm:$0xff]   ;;  %v25830_v23 = vld [vmem:[%s36109_s9 + $0x328] ss:$16 sps:$4 sm:$0xff]  }
 0xb26   :  { %v21936_v45 = vmul.f32 -1.442695, %v23370_v11  ;;  %v23373_v5 = vadd.f32 %v10401_v52, %v6646_v9  ;;  %v10403_v16 = vpop.f32.mrb[34].mxu1  ;;  %14443 = vmatpush1.bf16.msra.mxu1 %v25803_v41  ;;  %v10322_v28 = vpop.f32.mrb[23].mxu0  ;;  %14813 = vmatprep.subr.bf16.mxu0 %v25814_v37  ;;  %v25827_v9 = vld [vmem:[%s36109_s9 + $0x520] ss:$16 sps:$4 sm:$0xff]  }
 0xb27   :  { %v21938_v60 = vmul.f32 -1.442695, %v23372_v27  ;;  %v21937_v20 = vmul.f32 -1.442695, %v23371_v15  ;;  %v10404_v4 = vpop.f32.mrb[35].mxu1  ;;  %14444 = vmatprep.subr.bf16.mxu1 %v25811_v44 }
 0xb28   :  { %27505 = vpow2.f32 %v21936_v45  ;;  %v21939_v6 = vmul.f32 -1.442695, %v23373_v5  ;;  %v25838_v41 = vld [vmem:[%s36109_s9 + $0x34c] ss:$16 sps:$4 sm:$0xff]   ;;  %v25835_v44 = vld [vmem:[%s36109_s9 + $0x544] ss:$16 sps:$4 sm:$0xff]  }
 0xb29   :  { %27507 = vpow2.f32 %v21938_v60  ;;  %14814 = vmatpush1.bf16.msra.mxu0 %v25812_v14  ;;  %v25836_v27 = vld [vmem:[%s36109_s9 + $0x348] ss:$16 sps:$4 sm:$0xff]   ;;  %v25833_v52 = vld [vmem:[%s36109_s9 + $0x540] ss:$16 sps:$4 sm:$0xff]   ;;  %v25844_v62 = vld [vmem:[%s36109_s9 + $0x36c] ss:$16 sps:$4 sm:$0xff]  }
 0xb2a   :  { %27509 = vpow2.f32 %v21937_v20  ;;  %14445 = vmatpush1.bf16.msra.mxu1 %v25809_v51  ;;  %14815 = vmatprep.subr.bf16.mxu0 %v25820_v3  ;;  %v25841_v14 = vld [vmem:[%s36109_s9 + $0x564] ss:$16 sps:$4 sm:$0xff]   ;;  %v25839_v45 = vld [vmem:[%s36109_s9 + $0x560] ss:$16 sps:$4 sm:$0xff]   ;;  %v25850_v5 = vld [vmem:[%s36109_s9 + $0x38c] ss:$16 sps:$4 sm:$0xff]  }
 0xb2b   :  { %27511 = vpow2.f32 %v21939_v6  ;;  %14446 = vmatprep.subr.bf16.mxu1 %v25817_v0  ;;  %v25842_v0 = vld [vmem:[%s36109_s9 + $0x368] ss:$16 sps:$4 sm:$0xff]   ;;  %v25847_v16 = vld [vmem:[%s36109_s9 + $0x584] ss:$16 sps:$4 sm:$0xff]   ;;  %v25845_v3 = vld [vmem:[%s36109_s9 + $0x580] ss:$16 sps:$4 sm:$0xff]  }
 0xb2c   :  { %v25848_v28 = vld [vmem:[%s36109_s9 + $0x388] ss:$16 sps:$4 sm:$0xff]   ;;  %v25856_v60 = vld [vmem:[%s36109_s9 + $0x3ac] ss:$16 sps:$4 sm:$0xff]   ;;  %v25853_v4 = vld [vmem:[%s36109_s9 + $0x5a4] ss:$16 sps:$4 sm:$0xff]  }
 0xb2d   :  { %14816 = vmatpush1.bf16.msra.mxu0 %v25818_v61 }
 0xb2e   :  { %14447 = vmatpush1.bf16.msra.mxu1 %v25815_v18  ;;  %14817 = vmatprep.subr.bf16.mxu0 %v25826_v21  ;;  %v25854_v18 = vld [vmem:[%s36109_s9 + $0x3a8] ss:$16 sps:$4 sm:$0xff]  }
 0xb2f   :  { %14448 = vmatprep.subr.bf16.mxu1 %v25823_v29 }
 0xb31   :  { %14818 = vmatpush1.bf16.msra.mxu0 %v25824_v50  ;;  %v25851_v50 = vld [vmem:[%s36109_s9 + $0x5a0] ss:$16 sps:$4 sm:$0xff]  }
 0xb32   :  { %v27506_v36 = vpop.eup %27505  ;;  %14449 = vmatpush1.bf16.msra.mxu1 %v25821_v19  ;;  %14819 = vmatprep.subr.bf16.mxu0 %v25832_v32  ;;  %v25862_v19 = vld [vmem:[%s36109_s9 + $0x3cc] ss:$16 sps:$4 sm:$0xff]  }
 0xb33   :  { %v27508_v37 = vpop.eup %27507  ;;  %v10637_v40 = vadd.f32 1.0, %v27506_v36  ;;  %14450 = vmatprep.subr.bf16.mxu1 %v25829_v1  ;;  %v25859_v1 = vld [vmem:[%s36109_s9 + $0x5c4] ss:$16 sps:$4 sm:$0xff]  }
 0xb34   :  { %v27510_v11 = vpop.eup %27509  ;;  %v10639_v46 = vadd.f32 1.0, %v27508_v37 }
 0xb35   :  { %v27512_v48 = vpop.eup %27511  ;;  %27513 = vrcp.f32 %v10637_v40  ;;  %v10638_v51 = vadd.f32 1.0, %v27510_v11  ;;  %14820 = vmatpush1.bf16.msra.mxu0 %v25830_v23  ;;  %v25857_v11 = vld [vmem:[%s36109_s9 + $0x5c0] ss:$16 sps:$4 sm:$0xff]  }
 0xb36   :  { %27515 = vrcp.f32 %v10639_v46  ;;  %v10640_v15 = vadd.f32 1.0, %v27512_v48  ;;  %14451 = vmatpush1.bf16.msra.mxu1 %v25827_v9  ;;  %14821 = vmatprep.subr.bf16.mxu0 %v25838_v41  ;;  %v25860_v41 = vld [vmem:[%s36109_s9 + $0x3c8] ss:$16 sps:$4 sm:$0xff]   ;;  %v25868_v46 = vld [vmem:[%s36109_s9 + $0x3ec] ss:$16 sps:$4 sm:$0xff]  }
 0xb37   :  { %27517 = vrcp.f32 %v10638_v51  ;;  %14452 = vmatprep.subr.bf16.mxu1 %v25835_v44  ;;  %v25865_v51 = vld [vmem:[%s36109_s9 + $0x5e4] ss:$16 sps:$4 sm:$0xff]  }
 0xb38   :  { %27519 = vrcp.f32 %v10640_v15  ;;  %v25866_v15 = vld [vmem:[%s36109_s9 + $0x3e8] ss:$16 sps:$4 sm:$0xff]  }
 0xb39   :  { %14822 = vmatpush1.bf16.msra.mxu0 %v25836_v27 }
 0xb3a   :  { %14453 = vmatpush1.bf16.msra.mxu1 %v25833_v52  ;;  %14823 = vmatprep.subr.bf16.mxu0 %v25844_v62  ;;  %v25863_v52 = vld [vmem:[%s36109_s9 + $0x5e0] ss:$16 sps:$4 sm:$0xff]   ;;  %v25874_v62 = vld [vmem:[%s36109_s9 + $0x40c] ss:$16 sps:$4 sm:$0xff]  }
 0xb3b   :  { %14454 = vmatprep.subr.bf16.mxu1 %v25841_v14  ;;  %v25871_v14 = vld [vmem:[%s36109_s9 + $0x604] ss:$16 sps:$4 sm:$0xff]  }
 0xb3d   :  { %14824 = vmatpush1.bf16.msra.mxu0 %v25842_v0  ;;  %v25872_v0 = vld [vmem:[%s36109_s9 + $0x408] ss:$16 sps:$4 sm:$0xff]  }
 0xb3e   :  { %14455 = vmatpush1.bf16.msra.mxu1 %v25839_v45  ;;  %14825 = vmatprep.subr.bf16.mxu0 %v25850_v5  ;;  %v25869_v45 = vld [vmem:[%s36109_s9 + $0x600] ss:$16 sps:$4 sm:$0xff]   ;;  %v25880_v5 = vld [vmem:[%s36109_s9 + $0x42c] ss:$16 sps:$4 sm:$0xff]  }
 0xb3f   :  { %v27514_v20 = vpop.eup %27513  ;;  %14456 = vmatprep.subr.bf16.mxu1 %v25847_v16  ;;  %v25877_v16 = vld [vmem:[%s36109_s9 + $0x624] ss:$16 sps:$4 sm:$0xff]  }
 0xb40   :  { %v27516_v6 = vpop.eup %27515 }
 0xb41   :  { %v27518_v61 = vpop.eup %27517  ;;  %14826 = vmatpush1.bf16.msra.mxu0 %v25848_v28  ;;  %v25878_v28 = vld [vmem:[%s36109_s9 + $0x428] ss:$16 sps:$4 sm:$0xff]  }
 0xb42   :  { %v27520_v21 = vpop.eup %27519  ;;  %v10752_v29 = vcombine.low %v27514_v20, %v27518_v61  ;;  %14457 = vmatpush1.bf16.msra.mxu1 %v25845_v3  ;;  %14827 = vmatprep.subr.bf16.mxu0 %v25856_v60  ;;  %v25875_v3 = vld [vmem:[%s36109_s9 + $0x620] ss:$16 sps:$4 sm:$0xff]   ;;  %v25886_v60 = vld [vmem:[%s36109_s9 + $0x44c] ss:$16 sps:$4 sm:$0xff]   ;;  %v25884_v20 = vld [vmem:[%s36109_s9 + $0x448] ss:$16 sps:$4 sm:$0xff]  }
 0xb43   :  { %v10753_v32 = vcombine.low %v27516_v6, %v27520_v21  ;;  %14458 = vmatprep.subr.bf16.mxu1 %v25853_v4  ;;  %v25881_v4 = vld [vmem:[%s36109_s9 + $0x640] ss:$16 sps:$4 sm:$0xff]   ;;  %v25892_v6 = vld [vmem:[%s36109_s9 + $0x46c] ss:$16 sps:$4 sm:$0xff]   ;;  %v25890_v61 = vld [vmem:[%s36109_s9 + $0x468] ss:$16 sps:$4 sm:$0xff]  }
 0xb44   :  { %v23236_v23 = vpop.f32.mrb[36].mxu1  ;;  %v10760_v36 = vrot.slane %v10752_v29, %v27873_v49  ;;  %v25898_v21 = vld [vmem:[%s36109_s9 + $0x48c] ss:$16 sps:$4 sm:$0xff]   ;;  %v25895_v29 = vld [vmem:[%s36109_s9 + $0x684] ss:$16 sps:$4 sm:$0xff]  }
 0xb45   :  { %v23237_v9 = vpop.f32.mrb[37].mxu1  ;;  %14828 = vmatpush1.bf16.msra.mxu0 %v25854_v18  ;;  %v10767_v37 = vrot.slane %v10753_v32, %v27873_v49  ;;  %v25887_v18 = vld [vmem:[%s36109_s9 + $0x660] ss:$16 sps:$4 sm:$0xff]   ;;  %v25904_v32 = vld [vmem:[%s36109_s9 + $0x4ac] ss:$16 sps:$4 sm:$0xff]  }
 0xb46   :  { %v32632_v40 = vadd.f32 %v23237_v9, %v23236_v23  ;;  %v23239_v44 = vpop.f32.mrb[38].mxu1  ;;  %14459 = vmatpush1.bf16.msra.mxu1 %v25851_v50  ;;  %14829 = vmatprep.subr.bf16.mxu0 %v25862_v19  ;;  %v25896_v50 = vld [vmem:[%s36109_s9 + $0x488] ss:$16 sps:$4 sm:$0xff]   ;;  %v25893_v19 = vld [vmem:[%s36109_s9 + $0x680] ss:$16 sps:$4 sm:$0xff]  }
 0xb47   :  { %v23240_v48 = vpop.f32.mrb[39].mxu1  ;;  %14460 = vmatprep.subr.bf16.mxu1 %v25859_v1  ;;  %v10768_v27 = vcombine.low %v10760_v36, %v10767_v37  ;;  %v32719_v1 = vld [vmem:[%s36113_s13 + $0x1d] sm:$0x7]  ;;  %v25901_v23 = vld [vmem:[%s36109_s9 + $0x6a4] ss:$16 sps:$4 sm:$0xff]  }
 0xb48   :  { %v25902_v36 = vld [vmem:[%s36109_s9 + $0x4a8] ss:$16 sps:$4 sm:$0xff]   ;;  %v6658_v9 = vrot.slane %v32719_v1, %v29916_v33  ;;  %v25910_v37 = vld [vmem:[%s36109_s9 + $0x4cc] ss:$16 sps:$4 sm:$0xff]   ;;  %v25907_v44 = vld [vmem:[%s36109_s9 + $0x6c4] ss:$16 sps:$4 sm:$0xff]  }
 0xb49   :  { %14830 = vmatpush1.bf16.msra.mxu0 %v25860_v41  ;;  %10793 = vst [vmem:[#allocation2 + $0x18] sm:$0xff] %v10768_v27  ;;  %v25899_v41 = vld [vmem:[%s36109_s9 + $0x6a0] ss:$16 sps:$4 sm:$0xff]   ;;  %v25908_v48 = vld [vmem:[%s36109_s9 + $0x4c8] ss:$16 sps:$4 sm:$0xff]  }
 0xb4a   :  { %14461 = vmatpush1.bf16.msra.mxu1 %v25857_v11  ;;  %14831 = vmatprep.subr.bf16.mxu0 %v25868_v46 }
 0xb4b   :  { %14462 = vmatprep.subr.bf16.mxu1 %v25865_v51  ;;  %v10523_v51 = vadd.f32 %v32632_v40, %v6658_v9  ;;  %v25914_v40 = vld [vmem:[%s36109_s9 + $0x4e8] ss:$16 sps:$4 sm:$0xff]  }
 0xb4c   :  { %v25944_v9 = vld [vmem:[%s36109_s9 + $0x588] ss:$16 sps:$4 sm:$0xff]  }
 0xb4d   :  { %14832 = vmatpush1.bf16.msra.mxu0 %v25866_v15 }
 0xb4e   :  { %14463 = vmatpush1.bf16.msra.mxu1 %v25863_v52  ;;  %14842 = vmatprep.subr.bf16.mxu0 %v25874_v62  ;;  %v25905_v52 = vld [vmem:[%s36109_s9 + $0x6c0] ss:$16 sps:$4 sm:$0xff]   ;;  %v25916_v62 = vld [vmem:[%s36109_s9 + $0x4ec] ss:$16 sps:$4 sm:$0xff]  }
 0xb4f   :  { %14473 = vmatprep.subr.bf16.mxu1 %v25871_v14 }
 0xb50   :  { %14834 = vmatmul.mubr.bf16.vlgmr.msra.gmra.mrb[28].mxu0 %v28159_v24  ;;  %v25883_v24 = vld [vmem:[%s36109_s9 + $0x644] ss:$16 sps:$4 sm:$0xff]  }
 0xb51   :  { %14465 = vmatmul.mubr.bf16.vlgmr.msra.gmra.mrb[44].mxu1 %v28376_v38  ;;  %14843 = vmatpush1.bf16.msra.mxu0 %v25872_v0  ;;  %v25913_v0 = vld [vmem:[%s36109_s9 + $0x6e4] ss:$16 sps:$4 sm:$0xff]  }
 0xb52   :  { %14474 = vmatpush1.bf16.msra.mxu1 %v25869_v45  ;;  %14844 = vmatprep.subr.bf16.mxu0 %v25880_v5  ;;  %v25911_v5 = vld [vmem:[%s36109_s9 + $0x6e0] ss:$16 sps:$4 sm:$0xff]  }
 0xb53   :  { %14475 = vmatprep.subr.bf16.mxu1 %v25877_v16  ;;  %14505 = vmatprep.mubr.bf16.mxu1 %v28390_v42  ;;  %v25922_v16 = vld [vmem:[%s36109_s9 + $0x50c] ss:$16 sps:$4 sm:$0xff]  }
 0xb54   :  { %14874 = vmatprep.mubr.bf16.mxu0 %v28195_v34  ;;  %v25889_v34 = vld [vmem:[%s36109_s9 + $0x664] ss:$16 sps:$4 sm:$0xff]  }
 0xb55   :  { %14845 = vmatpush1.bf16.msra.mxu0 %v25878_v28  ;;  %v25919_v28 = vld [vmem:[%s36109_s9 + $0x704] ss:$16 sps:$4 sm:$0xff]  }
 0xb56   :  { %14476 = vmatpush1.bf16.msra.mxu1 %v25875_v3  ;;  %14846 = vmatprep.subr.bf16.mxu0 %v25886_v60  ;;  %v25920_v3 = vld [vmem:[%s36109_s9 + $0x508] ss:$16 sps:$4 sm:$0xff]   ;;  %v25917_v60 = vld [vmem:[%s36109_s9 + $0x700] ss:$16 sps:$4 sm:$0xff]  }
 0xb57   :  { %14477 = vmatprep.subr.bf16.mxu1 %v25883_v24  ;;  %v25928_v24 = vld [vmem:[%s36109_s9 + $0x52c] ss:$16 sps:$4 sm:$0xff]  }
 0xb59   :  { %14847 = vmatpush1.bf16.msra.mxu0 %v25884_v20  ;;  %v25925_v20 = vld [vmem:[%s36109_s9 + $0x724] ss:$16 sps:$4 sm:$0xff]  }
 0xb5a   :  { %14478 = vmatpush1.bf16.msra.mxu1 %v25881_v4  ;;  %14848 = vmatprep.subr.bf16.mxu0 %v25892_v6  ;;  %v25926_v4 = vld [vmem:[%s36109_s9 + $0x528] ss:$16 sps:$4 sm:$0xff]   ;;  %v25923_v6 = vld [vmem:[%s36109_s9 + $0x720] ss:$16 sps:$4 sm:$0xff]  }
 0xb5b   :  { %14479 = vmatprep.subr.bf16.mxu1 %v25889_v34  ;;  %v25934_v34 = vld [vmem:[%s36109_s9 + $0x54c] ss:$16 sps:$4 sm:$0xff]  }
 0xb5d   :  { %14849 = vmatpush1.bf16.msra.mxu0 %v25890_v61  ;;  %v25931_v61 = vld [vmem:[%s36109_s9 + $0x744] ss:$16 sps:$4 sm:$0xff]  }
 0xb5e   :  { %14480 = vmatpush1.bf16.msra.mxu1 %v25887_v18  ;;  %14850 = vmatprep.subr.bf16.mxu0 %v25898_v21  ;;  %v25932_v18 = vld [vmem:[%s36109_s9 + $0x548] ss:$16 sps:$4 sm:$0xff]   ;;  %v25929_v21 = vld [vmem:[%s36109_s9 + $0x740] ss:$16 sps:$4 sm:$0xff]  }
 0xb5f   :  { %14481 = vmatprep.subr.bf16.mxu1 %v25895_v29  ;;  %v25940_v29 = vld [vmem:[%s36109_s9 + $0x56c] ss:$16 sps:$4 sm:$0xff]  }
 0xb61   :  { %14851 = vmatpush1.bf16.msra.mxu0 %v25896_v50  ;;  %v25937_v50 = vld [vmem:[%s36109_s9 + $0x764] ss:$16 sps:$4 sm:$0xff]  }
 0xb62   :  { %14482 = vmatpush1.bf16.msra.mxu1 %v25893_v19  ;;  %14852 = vmatprep.subr.bf16.mxu0 %v25904_v32  ;;  %v25938_v19 = vld [vmem:[%s36109_s9 + $0x568] ss:$16 sps:$4 sm:$0xff]   ;;  %v25935_v32 = vld [vmem:[%s36109_s9 + $0x760] ss:$16 sps:$4 sm:$0xff]  }
 0xb63   :  { %14483 = vmatprep.subr.bf16.mxu1 %v25901_v23  ;;  %v25946_v23 = vld [vmem:[%s36109_s9 + $0x58c] ss:$16 sps:$4 sm:$0xff]  }
 0xb64   :  { %v23258_v11 = vpop.f32.mrb[40].mxu1 }
 0xb65   :  { %v23259_v46 = vpop.f32.mrb[41].mxu1  ;;  %14853 = vmatpush1.bf16.msra.mxu0 %v25902_v36  ;;  %v25943_v36 = vld [vmem:[%s36109_s9 + $0x784] ss:$16 sps:$4 sm:$0xff]  }
 0xb66   :  { %v23260_v27 = vadd.f32 %v23259_v46, %v23258_v11  ;;  %v23261_v15 = vpop.f32.mrb[42].mxu1  ;;  %14484 = vmatpush1.bf16.msra.mxu1 %v25899_v41  ;;  %14854 = vmatprep.subr.bf16.mxu0 %v25910_v37  ;;  %v25941_v41 = vld [vmem:[%s36109_s9 + $0x780] ss:$16 sps:$4 sm:$0xff]   ;;  %v25952_v37 = vld [vmem:[%s36109_s9 + $0x5ac] ss:$16 sps:$4 sm:$0xff]  }
 0xb67   :  { %v23262_v14 = vpop.f32.mrb[43].mxu1  ;;  %14485 = vmatprep.subr.bf16.mxu1 %v25907_v44  ;;  %v25949_v44 = vld [vmem:[%s36109_s9 + $0x7a4] ss:$16 sps:$4 sm:$0xff]   ;;  %v25950_v11 = vld [vmem:[%s36109_s9 + $0x5a8] ss:$16 sps:$4 sm:$0xff]  }
 0xb68   :  { %v32751_v45 = vadd.f32 %v23260_v27, %v10523_v51  ;;  %v25947_v46 = vld [vmem:[%s36109_s9 + $0x7a0] ss:$16 sps:$4 sm:$0xff]   ;;  %v25955_v51 = vld [vmem:[%s36109_s9 + $0x7c4] ss:$16 sps:$4 sm:$0xff]   ;;  %v25956_v27 = vld [vmem:[%s36109_s9 + $0x5c8] ss:$16 sps:$4 sm:$0xff]  }
 0xb69   :  { %14855 = vmatpush1.bf16.msra.mxu0 %v25908_v48  ;;  %v25958_v48 = vld [vmem:[%s36109_s9 + $0x5cc] ss:$16 sps:$4 sm:$0xff]   ;;  %v25953_v15 = vld [vmem:[%s36109_s9 + $0x7c0] ss:$16 sps:$4 sm:$0xff]   ;;  %v25962_v14 = vld [vmem:[%s36109_s9 + $0x5e8] ss:$16 sps:$4 sm:$0xff]  }
 0xb6a   :  { %14486 = vmatpush1.bf16.msra.mxu1 %v25905_v52  ;;  %14856 = vmatprep.subr.bf16.mxu0 %v25916_v62  ;;  %v25964_v52 = vld [vmem:[%s36109_s9 + $0x5ec] ss:$16 sps:$4 sm:$0xff]   ;;  %v25961_v62 = vld [vmem:[%s36109_s9 + $0x7e4] ss:$16 sps:$4 sm:$0xff]  }
 0xb6b   :  { %14487 = vmatprep.subr.bf16.mxu1 %v25913_v0  ;;  %v25959_v0 = vld [vmem:[%s36109_s9 + $0x7e0] ss:$16 sps:$4 sm:$0xff]  }
 0xb6d   :  { %14857 = vmatpush1.bf16.msra.mxu0 %v25914_v40  ;;  %v25970_v40 = vld [vmem:[%s36109_s9 + $0x60c] ss:$16 sps:$4 sm:$0xff]  }
 0xb6e   :  { %14488 = vmatpush1.bf16.msra.mxu1 %v25911_v5  ;;  %14858 = vmatprep.subr.bf16.mxu0 %v25922_v16  ;;  %v25967_v5 = vld [vmem:[%s36109_s9 + $0x804] ss:$16 sps:$4 sm:$0xff]   ;;  %v25968_v16 = vld [vmem:[%s36109_s9 + $0x608] ss:$16 sps:$4 sm:$0xff]  }
 0xb6f   :  { %14489 = vmatprep.subr.bf16.mxu1 %v25919_v28  ;;  %v25965_v28 = vld [vmem:[%s36109_s9 + $0x800] ss:$16 sps:$4 sm:$0xff]  }
 0xb71   :  { %14859 = vmatpush1.bf16.msra.mxu0 %v25920_v3  ;;  %v25976_v3 = vld [vmem:[%s36109_s9 + $0x62c] ss:$16 sps:$4 sm:$0xff]  }
 0xb72   :  { %14490 = vmatpush1.bf16.msra.mxu1 %v25917_v60  ;;  %14860 = vmatprep.subr.bf16.mxu0 %v25928_v24  ;;  %v25973_v60 = vld [vmem:[%s36109_s9 + $0x824] ss:$16 sps:$4 sm:$0xff]   ;;  %v25974_v24 = vld [vmem:[%s36109_s9 + $0x628] ss:$16 sps:$4 sm:$0xff]  }
 0xb73   :  { %14491 = vmatprep.subr.bf16.mxu1 %v25925_v20  ;;  %v25971_v20 = vld [vmem:[%s36109_s9 + $0x820] ss:$16 sps:$4 sm:$0xff]  }
 0xb75   :  { %14861 = vmatpush1.bf16.msra.mxu0 %v25926_v4  ;;  %v25982_v4 = vld [vmem:[%s36109_s9 + $0x64c] ss:$16 sps:$4 sm:$0xff]  }
 0xb76   :  { %14492 = vmatpush1.bf16.msra.mxu1 %v25923_v6  ;;  %14862 = vmatprep.subr.bf16.mxu0 %v25934_v34  ;;  %v25980_v6 = vld [vmem:[%s36109_s9 + $0x648] ss:$16 sps:$4 sm:$0xff]   ;;  %v25977_v34 = vld [vmem:[%s36109_s9 + $0x840] ss:$16 sps:$4 sm:$0xff]  }
 0xb77   :  { %14493 = vmatprep.subr.bf16.mxu1 %v25931_v61  ;;  %v25988_v61 = vld [vmem:[%s36109_s9 + $0x66c] ss:$16 sps:$4 sm:$0xff]  }
 0xb79   :  { %14863 = vmatpush1.bf16.msra.mxu0 %v25932_v18  ;;  %v25986_v18 = vld [vmem:[%s36109_s9 + $0x668] ss:$16 sps:$4 sm:$0xff]  }
 0xb7a   :  { %14494 = vmatpush1.bf16.msra.mxu1 %v25929_v21  ;;  %14864 = vmatprep.subr.bf16.mxu0 %v25940_v29  ;;  %v25983_v21 = vld [vmem:[%s36109_s9 + $0x860] ss:$16 sps:$4 sm:$0xff]   ;;  %v25994_v29 = vld [vmem:[%s36109_s9 + $0x68c] ss:$16 sps:$4 sm:$0xff]  }
 0xb7b   :  { %14495 = vmatprep.subr.bf16.mxu1 %v25937_v50  ;;  %v25991_v50 = vld [vmem:[%s36109_s9 + $0x884] ss:$16 sps:$4 sm:$0xff]  }
 0xb7d   :  { %14865 = vmatpush1.bf16.msra.mxu0 %v25938_v19  ;;  %v25992_v19 = vld [vmem:[%s36109_s9 + $0x688] ss:$16 sps:$4 sm:$0xff]  }
 0xb7e   :  { %14496 = vmatpush1.bf16.msra.mxu1 %v25935_v32  ;;  %14866 = vmatprep.subr.bf16.mxu0 %v25946_v23  ;;  %v25989_v32 = vld [vmem:[%s36109_s9 + $0x880] ss:$16 sps:$4 sm:$0xff]   ;;  %v26000_v23 = vld [vmem:[%s36109_s9 + $0x6ac] ss:$16 sps:$4 sm:$0xff]  }
 0xb7f   :  { %14497 = vmatprep.subr.bf16.mxu1 %v25943_v36  ;;  %v21942_v36 = vmul.f32 -1.442695, %v32751_v45  ;;  %v25995_v45 = vld [vmem:[%s36109_s9 + $0x8a0] ss:$16 sps:$4 sm:$0xff]  }
 0xb81   :  { %14867 = vmatpush1.bf16.msra.mxu0 %v25944_v9  ;;  %v25997_v9 = vld [vmem:[%s36109_s9 + $0x8a4] ss:$16 sps:$4 sm:$0xff]   ;;  %27521 = vpow2.f32 %v21942_v36  ;;  %v26028_v36 = vld [vmem:[%s36109_s9 + $0x748] ss:$16 sps:$4 sm:$0xff]  }
 0xb82   :  { %14498 = vmatpush1.bf16.msra.mxu1 %v25941_v41  ;;  %14868 = vmatprep.subr.bf16.mxu0 %v25952_v37  ;;  %v6650_v41 = vrot.slane %v32719_v1, %v29821_v47  ;;  %v6654_v37 = vrot.slane %v32719_v1, %v29824_v13  ;;  %v26003_v1 = vld [vmem:[%s36109_s9 + $0x8c4] ss:$16 sps:$4 sm:$0xff]  }
 0xb83   :  { %14499 = vmatprep.subr.bf16.mxu1 %v25949_v44  ;;  %v25998_v44 = vld [vmem:[%s36109_s9 + $0x6a8] ss:$16 sps:$4 sm:$0xff]  }
 0xb85   :  { %14869 = vmatpush1.bf16.msra.mxu0 %v25950_v11  ;;  %v26006_v11 = vld [vmem:[%s36109_s9 + $0x6cc] ss:$16 sps:$4 sm:$0xff]  }
 0xb86   :  { %14500 = vmatpush1.bf16.msra.mxu1 %v25947_v46  ;;  %14870 = vmatprep.subr.bf16.mxu0 %v25958_v48 }
 0xb87   :  { %14501 = vmatprep.subr.bf16.mxu1 %v25955_v51 }
 0xb89   :  { %14871 = vmatpush1.bf16.msra.mxu0 %v25956_v27 }
 0xb8a   :  { %14502 = vmatpush1.bf16.msra.mxu1 %v25953_v15  ;;  %14872 = vmatprep.subr.bf16.mxu0 %v25964_v52  ;;  %v26001_v52 = vld [vmem:[%s36109_s9 + $0x8c0] ss:$16 sps:$4 sm:$0xff]  }
 0xb8b   :  { %14503 = vmatprep.subr.bf16.mxu1 %v25961_v62  ;;  %v26004_v62 = vld [vmem:[%s36109_s9 + $0x6c8] ss:$16 sps:$4 sm:$0xff]  }
 0xb8d   :  { %14873 = vmatpush1.bf16.msra.mxu0 %v25962_v14 }
 0xb8e   :  { %14504 = vmatpush1.bf16.msra.mxu1 %v25959_v0  ;;  %14883 = vmatprep.subr.bf16.mxu0 %v25970_v40  ;;  %v26012_v40 = vld [vmem:[%s36109_s9 + $0x6ec] ss:$16 sps:$4 sm:$0xff]  }
 0xb8f   :  { %14514 = vmatprep.subr.bf16.mxu1 %v25967_v5 }
 0xb90   :  { %14875 = vmatmul.mubr.bf16.vlgmr.msra.gmra.mrb[28].mxu0 %v28376_v38  ;;  %v25979_v38 = vld [vmem:[%s36109_s9 + $0x844] ss:$16 sps:$4 sm:$0xff]  }
 0xb91   :  { %14506 = vmatmul.mubr.bf16.vlgmr.msra.gmra.mrb[44].mxu1 %v28592_v55  ;;  %14884 = vmatpush1.bf16.msra.mxu0 %v25968_v16  ;;  %v26009_v16 = vld [vmem:[%s36109_s9 + $0x8e4] ss:$16 sps:$4 sm:$0xff]  }
 0xb92   :  { %14515 = vmatpush1.bf16.msra.mxu1 %v25965_v28  ;;  %14885 = vmatprep.subr.bf16.mxu0 %v25976_v3  ;;  %v26010_v28 = vld [vmem:[%s36109_s9 + $0x6e8] ss:$16 sps:$4 sm:$0xff]   ;;  %v26007_v3 = vld [vmem:[%s36109_s9 + $0x8e0] ss:$16 sps:$4 sm:$0xff]  }
 0xb93   :  { %14516 = vmatprep.subr.bf16.mxu1 %v25973_v60  ;;  %14546 = vmatprep.mubr.bf16.mxu1 %v28603_v59  ;;  %v26018_v60 = vld [vmem:[%s36109_s9 + $0x70c] ss:$16 sps:$4 sm:$0xff]  }
 0xb94   :  { %14915 = vmatprep.mubr.bf16.mxu0 %v28390_v42  ;;  %v25985_v42 = vld [vmem:[%s36109_s9 + $0x864] ss:$16 sps:$4 sm:$0xff]  }
 0xb95   :  { %14886 = vmatpush1.bf16.msra.mxu0 %v25974_v24  ;;  %v26015_v24 = vld [vmem:[%s36109_s9 + $0x904] ss:$16 sps:$4 sm:$0xff]  }
 0xb96   :  { %14517 = vmatpush1.bf16.msra.mxu1 %v25971_v20  ;;  %14887 = vmatprep.subr.bf16.mxu0 %v25982_v4  ;;  %v27522_v20 = vpop.eup %27521  ;;  %v26016_v4 = vld [vmem:[%s36109_s9 + $0x708] ss:$16 sps:$4 sm:$0xff]  }
 0xb97   :  { %14518 = vmatprep.subr.bf16.mxu1 %v25979_v38  ;;  %v26013_v38 = vld [vmem:[%s36109_s9 + $0x900] ss:$16 sps:$4 sm:$0xff]  }
 0xb99   :  { %14888 = vmatpush1.bf16.msra.mxu0 %v25980_v6  ;;  %v26024_v6 = vld [vmem:[%s36109_s9 + $0x72c] ss:$16 sps:$4 sm:$0xff]  }
 0xb9a   :  { %14519 = vmatpush1.bf16.msra.mxu1 %v25977_v34  ;;  %14889 = vmatprep.subr.bf16.mxu0 %v25988_v61  ;;  %v26021_v34 = vld [vmem:[%s36109_s9 + $0x924] ss:$16 sps:$4 sm:$0xff]   ;;  %v10643_v61 = vadd.f32 1.0, %v27522_v20 }
 0xb9b   :  { %14520 = vmatprep.subr.bf16.mxu1 %v25985_v42  ;;  %v26022_v42 = vld [vmem:[%s36109_s9 + $0x728] ss:$16 sps:$4 sm:$0xff]  }
 0xb9d   :  { %14890 = vmatpush1.bf16.msra.mxu0 %v25986_v18 }
 0xb9e   :  { %14521 = vmatpush1.bf16.msra.mxu1 %v25983_v21  ;;  %14891 = vmatprep.subr.bf16.mxu0 %v25994_v29  ;;  %v26019_v21 = vld [vmem:[%s36109_s9 + $0x920] ss:$16 sps:$4 sm:$0xff]   ;;  %v26030_v29 = vld [vmem:[%s36109_s9 + $0x74c] ss:$16 sps:$4 sm:$0xff]  }
 0xb9f   :  { %14522 = vmatprep.subr.bf16.mxu1 %v25991_v50 }
 0xba1   :  { %14892 = vmatpush1.bf16.msra.mxu0 %v25992_v19 }
 0xba2   :  { %14523 = vmatpush1.bf16.msra.mxu1 %v25989_v32  ;;  %14893 = vmatprep.subr.bf16.mxu0 %v26000_v23  ;;  %v26027_v32 = vld [vmem:[%s36109_s9 + $0x944] ss:$16 sps:$4 sm:$0xff]  }
 0xba3   :  { %v10481_v46 = vpop.f32.mrb[24].mxu0  ;;  %14524 = vmatprep.subr.bf16.mxu1 %v25997_v9  ;;  %v26025_v9 = vld [vmem:[%s36109_s9 + $0x940] ss:$16 sps:$4 sm:$0xff]  }
 0xba4   :  { %v23374_v48 = vadd.f32 %v10481_v46, %v6650_v41  ;;  %v10483_v51 = vpop.f32.mrb[25].mxu0  ;;  %v26036_v41 = vld [vmem:[%s36109_s9 + $0x76c] ss:$16 sps:$4 sm:$0xff]   ;;  %v26039_v46 = vld [vmem:[%s36109_s9 + $0x984] ss:$16 sps:$4 sm:$0xff]  }
 0xba5   :  { %v23375_v27 = vadd.f32 %v10483_v51, %v6654_v37  ;;  %v10485_v15 = vpop.f32.mrb[26].mxu0  ;;  %14894 = vmatpush1.bf16.msra.mxu0 %v25998_v44  ;;  %v26033_v37 = vld [vmem:[%s36109_s9 + $0x964] ss:$16 sps:$4 sm:$0xff]   ;;  %v26034_v44 = vld [vmem:[%s36109_s9 + $0x768] ss:$16 sps:$4 sm:$0xff]  }
 0xba6   :  { %v21940_v14 = vmul.f32 -1.442695, %v23374_v48  ;;  %14525 = vmatpush1.bf16.msra.mxu1 %v25995_v45  ;;  %v10486_v0 = vpop.f32.mrb[27].mxu0  ;;  %14895 = vmatprep.subr.bf16.mxu0 %v26006_v11  ;;  %v26031_v45 = vld [vmem:[%s36109_s9 + $0x960] ss:$16 sps:$4 sm:$0xff]  }
 0xba7   :  { %v21941_v5 = vmul.f32 -1.442695, %v23375_v27  ;;  %14526 = vmatprep.subr.bf16.mxu1 %v26003_v1  ;;  %v26042_v11 = vld [vmem:[%s36109_s9 + $0x78c] ss:$16 sps:$4 sm:$0xff]   ;;  %v26040_v1 = vld [vmem:[%s36109_s9 + $0x788] ss:$16 sps:$4 sm:$0xff]  }
 0xba8   :  { %27523 = vpow2.f32 %v21940_v14  ;;  %v26037_v51 = vld [vmem:[%s36109_s9 + $0x980] ss:$16 sps:$4 sm:$0xff]   ;;  %v26048_v27 = vld [vmem:[%s36109_s9 + $0x7ac] ss:$16 sps:$4 sm:$0xff]   ;;  %v26046_v0 = vld [vmem:[%s36109_s9 + $0x7a8] ss:$16 sps:$4 sm:$0xff]  }
 0xba9   :  { %27525 = vpow2.f32 %v21941_v5  ;;  %14896 = vmatpush1.bf16.msra.mxu0 %v26004_v62  ;;  %v26054_v5 = vld [vmem:[%s36109_s9 + $0x7cc] ss:$16 sps:$4 sm:$0xff]  }
 0xbaa   :  { %14527 = vmatpush1.bf16.msra.mxu1 %v26001_v52  ;;  %14897 = vmatprep.subr.bf16.mxu0 %v26012_v40  ;;  %27527 = vrcp.f32 %v10643_v61  ;;  %v26045_v52 = vld [vmem:[%s36109_s9 + $0x9a4] ss:$16 sps:$4 sm:$0xff]   ;;  %v26043_v40 = vld [vmem:[%s36109_s9 + $0x9a0] ss:$16 sps:$4 sm:$0xff]  }
 0xbab   :  { %14528 = vmatprep.subr.bf16.mxu1 %v26009_v16  ;;  %v26051_v16 = vld [vmem:[%s36109_s9 + $0x9c4] ss:$16 sps:$4 sm:$0xff]   ;;  %v26055_v61 = vld [vmem:[%s36109_s9 + $0x9e0] ss:$16 sps:$4 sm:$0xff]  }
 0xbad   :  { %14898 = vmatpush1.bf16.msra.mxu0 %v26010_v28 }
 0xbae   :  { %14529 = vmatpush1.bf16.msra.mxu1 %v26007_v3  ;;  %14899 = vmatprep.subr.bf16.mxu0 %v26018_v60 }
 0xbaf   :  { %14530 = vmatprep.subr.bf16.mxu1 %v26015_v24  ;;  %v26052_v24 = vld [vmem:[%s36109_s9 + $0x7c8] ss:$16 sps:$4 sm:$0xff]  }
 0xbb1   :  { %14900 = vmatpush1.bf16.msra.mxu0 %v26016_v4  ;;  %v26049_v4 = vld [vmem:[%s36109_s9 + $0x9c0] ss:$16 sps:$4 sm:$0xff]  }
 0xbb2   :  { %v27524_v18 = vpop.eup %27523  ;;  %14531 = vmatpush1.bf16.msra.mxu1 %v26013_v38  ;;  %14901 = vmatprep.subr.bf16.mxu0 %v26024_v6  ;;  %v26060_v38 = vld [vmem:[%s36109_s9 + $0x7ec] ss:$16 sps:$4 sm:$0xff]   ;;  %v26057_v6 = vld [vmem:[%s36109_s9 + $0x9e4] ss:$16 sps:$4 sm:$0xff]  }
 0xbb3   :  { %v27526_v50 = vpop.eup %27525  ;;  %v10641_v19 = vadd.f32 1.0, %v27524_v18  ;;  %14532 = vmatprep.subr.bf16.mxu1 %v26021_v34  ;;  %v26058_v34 = vld [vmem:[%s36109_s9 + $0x7e8] ss:$16 sps:$4 sm:$0xff]   ;;  %v26063_v18 = vld [vmem:[%s36109_s9 + $0xa04] ss:$16 sps:$4 sm:$0xff]  }
 0xbb4   :  { %v10642_v23 = vadd.f32 1.0, %v27526_v50  ;;  %v27528_v48 = vpop.eup %27527  ;;  %v26072_v50 = vld [vmem:[%s36109_s9 + $0x82c] ss:$16 sps:$4 sm:$0xff]  }
 0xbb5   :  { %27529 = vrcp.f32 %v10641_v19  ;;  %14902 = vmatpush1.bf16.msra.mxu0 %v26022_v42  ;;  %v10783_v3 = vrot.slane %v27528_v48, %v27873_v49  ;;  %v26066_v42 = vld [vmem:[%s36109_s9 + $0x80c] ss:$16 sps:$4 sm:$0xff]   ;;  %v26069_v19 = vld [vmem:[%s36109_s9 + $0xa24] ss:$16 sps:$4 sm:$0xff]   ;;  %v26085_v48 = vld [vmem:[%s36109_s9 + $0xa80] ss:$16 sps:$4 sm:$0xff]  }
 0xbb6   :  { %27531 = vrcp.f32 %v10642_v23  ;;  %14533 = vmatpush1.bf16.msra.mxu1 %v26019_v21  ;;  %14903 = vmatprep.subr.bf16.mxu0 %v26030_v29  ;;  %v26064_v21 = vld [vmem:[%s36109_s9 + $0x808] ss:$16 sps:$4 sm:$0xff]   ;;  %v26061_v29 = vld [vmem:[%s36109_s9 + $0xa00] ss:$16 sps:$4 sm:$0xff]  }
 0xbb7   :  { %14534 = vmatprep.subr.bf16.mxu1 %v26027_v32  ;;  %v26070_v32 = vld [vmem:[%s36109_s9 + $0x828] ss:$16 sps:$4 sm:$0xff]   ;;  %v26067_v23 = vld [vmem:[%s36109_s9 + $0xa20] ss:$16 sps:$4 sm:$0xff]  }
 0xbb9   :  { %14904 = vmatpush1.bf16.msra.mxu0 %v26028_v36  ;;  %v26078_v36 = vld [vmem:[%s36109_s9 + $0x84c] ss:$16 sps:$4 sm:$0xff]  }
 0xbba   :  { %14535 = vmatpush1.bf16.msra.mxu1 %v26025_v9  ;;  %14905 = vmatprep.subr.bf16.mxu0 %v26036_v41  ;;  %v26076_v9 = vld [vmem:[%s36109_s9 + $0x848] ss:$16 sps:$4 sm:$0xff]   ;;  %v26073_v41 = vld [vmem:[%s36109_s9 + $0xa40] ss:$16 sps:$4 sm:$0xff]  }
 0xbbb   :  { %14536 = vmatprep.subr.bf16.mxu1 %v26033_v37  ;;  %v26084_v37 = vld [vmem:[%s36109_s9 + $0x86c] ss:$16 sps:$4 sm:$0xff]  }
 0xbbd   :  { %14906 = vmatpush1.bf16.msra.mxu0 %v26034_v44  ;;  %v26082_v44 = vld [vmem:[%s36109_s9 + $0x868] ss:$16 sps:$4 sm:$0xff]  }
 0xbbe   :  { %14537 = vmatpush1.bf16.msra.mxu1 %v26031_v45  ;;  %14907 = vmatprep.subr.bf16.mxu0 %v26042_v11  ;;  %v26079_v45 = vld [vmem:[%s36109_s9 + $0xa60] ss:$16 sps:$4 sm:$0xff]   ;;  %v26090_v11 = vld [vmem:[%s36109_s9 + $0x88c] ss:$16 sps:$4 sm:$0xff]  }
 0xbbf   :  { %v27530_v15 = vpop.eup %27529  ;;  %14538 = vmatprep.subr.bf16.mxu1 %v26039_v46  ;;  %v26087_v46 = vld [vmem:[%s36109_s9 + $0xa84] ss:$16 sps:$4 sm:$0xff]  }
 0xbc0   :  { %v27532_v62 = vpop.eup %27531 }
 0xbc1   :  { %v10769_v14 = vcombine.low %v27530_v15, %v27532_v62  ;;  %14908 = vmatpush1.bf16.msra.mxu0 %v26040_v1  ;;  %v26088_v1 = vld [vmem:[%s36109_s9 + $0x888] ss:$16 sps:$4 sm:$0xff]   ;;  %v26102_v62 = vld [vmem:[%s36109_s9 + $0x8cc] ss:$16 sps:$4 sm:$0xff]  }
 0xbc2   :  { %14539 = vmatpush1.bf16.msra.mxu1 %v26037_v51  ;;  %14909 = vmatprep.subr.bf16.mxu0 %v26048_v27  ;;  %v26096_v51 = vld [vmem:[%s36109_s9 + $0x8ac] ss:$16 sps:$4 sm:$0xff]   ;;  %v26093_v27 = vld [vmem:[%s36109_s9 + $0xaa4] ss:$16 sps:$4 sm:$0xff]   ;;  %v26094_v15 = vld [vmem:[%s36109_s9 + $0x8a8] ss:$16 sps:$4 sm:$0xff]  }
 0xbc3   :  { %14540 = vmatprep.subr.bf16.mxu1 %v26045_v52  ;;  %v10776_v28 = vrot.slane %v10769_v14, %v27873_v49  ;;  %v26091_v52 = vld [vmem:[%s36109_s9 + $0xaa0] ss:$16 sps:$4 sm:$0xff]   ;;  %v26099_v14 = vld [vmem:[%s36109_s9 + $0xac4] ss:$16 sps:$4 sm:$0xff]  }
 0xbc5   :  { %14910 = vmatpush1.bf16.msra.mxu0 %v26046_v0  ;;  %v10784_v20 = vcombine.low %v10776_v28, %v10783_v3  ;;  %v26100_v0 = vld [vmem:[%s36109_s9 + $0x8c8] ss:$16 sps:$4 sm:$0xff]   ;;  %v26103_v3 = vld [vmem:[%s36109_s9 + $0xae0] ss:$16 sps:$4 sm:$0xff]  }
 0xbc6   :  { %14541 = vmatpush1.bf16.msra.mxu1 %v26043_v40  ;;  %14911 = vmatprep.subr.bf16.mxu0 %v26054_v5  ;;  %v26097_v40 = vld [vmem:[%s36109_s9 + $0xac0] ss:$16 sps:$4 sm:$0xff]   ;;  %v26108_v5 = vld [vmem:[%s36109_s9 + $0x8ec] ss:$16 sps:$4 sm:$0xff]   ;;  %v26106_v28 = vld [vmem:[%s36109_s9 + $0x8e8] ss:$16 sps:$4 sm:$0xff]  }
 0xbc7   :  { %14542 = vmatprep.subr.bf16.mxu1 %v26051_v16  ;;  %10799 = vst.msk [vmem:[#allocation2 + $0x20] sm:$0x3f] %vm33040_vm12, %v10784_v20  ;;  %v26105_v16 = vld [vmem:[%s36109_s9 + $0xae4] ss:$16 sps:$4 sm:$0xff]  }
 0xbc8   :  { %v26111_v20 = vld [vmem:[%s36109_s9 + $0xb04] ss:$16 sps:$4 sm:$0xff]  }
 0xbc9   :  { %14912 = vmatpush1.bf16.msra.mxu0 %v26052_v24  ;;  %v26114_v24 = vld [vmem:[%s36109_s9 + $0x90c] ss:$16 sps:$4 sm:$0xff]  }
 0xbca   :  { %14543 = vmatpush1.bf16.msra.mxu1 %v26049_v4  ;;  %14913 = vmatprep.subr.bf16.mxu0 %v26060_v38  ;;  %v26112_v4 = vld [vmem:[%s36109_s9 + $0x908] ss:$16 sps:$4 sm:$0xff]   ;;  %v26109_v38 = vld [vmem:[%s36109_s9 + $0xb00] ss:$16 sps:$4 sm:$0xff]  }
 0xbcb   :  { %14544 = vmatprep.subr.bf16.mxu1 %v26057_v6  ;;  %v26120_v6 = vld [vmem:[%s36109_s9 + $0x92c] ss:$16 sps:$4 sm:$0xff]  }
 0xbcd   :  { %14914 = vmatpush1.bf16.msra.mxu0 %v26058_v34  ;;  %v26117_v34 = vld [vmem:[%s36109_s9 + $0xb24] ss:$16 sps:$4 sm:$0xff]  }
 0xbce   :  { %14545 = vmatpush1.bf16.msra.mxu1 %v26055_v61  ;;  %14924 = vmatprep.subr.bf16.mxu0 %v26066_v42  ;;  %v26118_v61 = vld [vmem:[%s36109_s9 + $0x928] ss:$16 sps:$4 sm:$0xff]   ;;  %v26115_v42 = vld [vmem:[%s36109_s9 + $0xb20] ss:$16 sps:$4 sm:$0xff]  }
 0xbcf   :  { %14555 = vmatprep.subr.bf16.mxu1 %v26063_v18  ;;  %v26126_v18 = vld [vmem:[%s36109_s9 + $0x94c] ss:$16 sps:$4 sm:$0xff]  }
 0xbd0   :  { %14916 = vmatmul.mubr.bf16.vlgmr.msra.gmra.mrb[28].mxu0 %v28592_v55  ;;  %v26075_v55 = vld [vmem:[%s36109_s9 + $0xa44] ss:$16 sps:$4 sm:$0xff]  }
 0xbd1   :  { %14547 = vmatmul.mubr.bf16.vlgmr.msra.gmra.mrb[44].mxu1 %v28798_v7  ;;  %14925 = vmatpush1.bf16.msra.mxu0 %v26064_v21  ;;  %v26123_v21 = vld [vmem:[%s36109_s9 + $0xb44] ss:$16 sps:$4 sm:$0xff]  }
 0xbd2   :  { %14556 = vmatpush1.bf16.msra.mxu1 %v26061_v29  ;;  %14926 = vmatprep.subr.bf16.mxu0 %v26072_v50  ;;  %v26124_v29 = vld [vmem:[%s36109_s9 + $0x948] ss:$16 sps:$4 sm:$0xff]   ;;  %v26121_v50 = vld [vmem:[%s36109_s9 + $0xb40] ss:$16 sps:$4 sm:$0xff]  }
 0xbd3   :  { %14557 = vmatprep.subr.bf16.mxu1 %v26069_v19  ;;  %14587 = vmatprep.mubr.bf16.mxu1 %v28812_v12  ;;  %v26132_v19 = vld [vmem:[%s36109_s9 + $0x96c] ss:$16 sps:$4 sm:$0xff]  }
 0xbd4   :  { %14956 = vmatprep.mubr.bf16.mxu0 %v28603_v59  ;;  %v26081_v59 = vld [vmem:[%s36109_s9 + $0xa64] ss:$16 sps:$4 sm:$0xff]  }
 0xbd5   :  { %14927 = vmatpush1.bf16.msra.mxu0 %v26070_v32  ;;  %v26129_v32 = vld [vmem:[%s36109_s9 + $0xb64] ss:$16 sps:$4 sm:$0xff]  }
 0xbd6   :  { %14558 = vmatpush1.bf16.msra.mxu1 %v26067_v23  ;;  %14928 = vmatprep.subr.bf16.mxu0 %v26078_v36  ;;  %v26130_v23 = vld [vmem:[%s36109_s9 + $0x968] ss:$16 sps:$4 sm:$0xff]   ;;  %v26127_v36 = vld [vmem:[%s36109_s9 + $0xb60] ss:$16 sps:$4 sm:$0xff]  }
 0xbd7   :  { %14559 = vmatprep.subr.bf16.mxu1 %v26075_v55  ;;  %v26138_v55 = vld [vmem:[%s36109_s9 + $0x98c] ss:$16 sps:$4 sm:$0xff]  }
 0xbd9   :  { %14929 = vmatpush1.bf16.msra.mxu0 %v26076_v9  ;;  %v26135_v9 = vld [vmem:[%s36109_s9 + $0xb84] ss:$16 sps:$4 sm:$0xff]  }
 0xbda   :  { %14560 = vmatpush1.bf16.msra.mxu1 %v26073_v41  ;;  %14930 = vmatprep.subr.bf16.mxu0 %v26084_v37  ;;  %v26136_v41 = vld [vmem:[%s36109_s9 + $0x988] ss:$16 sps:$4 sm:$0xff]   ;;  %v26133_v37 = vld [vmem:[%s36109_s9 + $0xb80] ss:$16 sps:$4 sm:$0xff]  }
 0xbdb   :  { %14561 = vmatprep.subr.bf16.mxu1 %v26081_v59  ;;  %v26144_v59 = vld [vmem:[%s36109_s9 + $0x9ac] ss:$16 sps:$4 sm:$0xff]  }
 0xbdd   :  { %14931 = vmatpush1.bf16.msra.mxu0 %v26082_v44  ;;  %v26141_v44 = vld [vmem:[%s36109_s9 + $0xba4] ss:$16 sps:$4 sm:$0xff]  }
 0xbde   :  { %14562 = vmatpush1.bf16.msra.mxu1 %v26079_v45  ;;  %14932 = vmatprep.subr.bf16.mxu0 %v26090_v11  ;;  %v26142_v45 = vld [vmem:[%s36109_s9 + $0x9a8] ss:$16 sps:$4 sm:$0xff]   ;;  %v26139_v11 = vld [vmem:[%s36109_s9 + $0xba0] ss:$16 sps:$4 sm:$0xff]  }
 0xbdf   :  { %14563 = vmatprep.subr.bf16.mxu1 %v26087_v46  ;;  %v26150_v46 = vld [vmem:[%s36109_s9 + $0x9cc] ss:$16 sps:$4 sm:$0xff]  }
 0xbe1   :  { %14933 = vmatpush1.bf16.msra.mxu0 %v26088_v1  ;;  %v26147_v1 = vld [vmem:[%s36109_s9 + $0xbc4] ss:$16 sps:$4 sm:$0xff]  }
 0xbe2   :  { %14564 = vmatpush1.bf16.msra.mxu1 %v26085_v48  ;;  %14934 = vmatprep.subr.bf16.mxu0 %v26096_v51  ;;  %v26148_v48 = vld [vmem:[%s36109_s9 + $0x9c8] ss:$16 sps:$4 sm:$0xff]   ;;  %v26145_v51 = vld [vmem:[%s36109_s9 + $0xbc0] ss:$16 sps:$4 sm:$0xff]  }
 0xbe3   :  { %14565 = vmatprep.subr.bf16.mxu1 %v26093_v27  ;;  %v26156_v27 = vld [vmem:[%s36109_s9 + $0x9ec] ss:$16 sps:$4 sm:$0xff]  }
 0xbe5   :  { %14935 = vmatpush1.bf16.msra.mxu0 %v26094_v15  ;;  %v26153_v15 = vld [vmem:[%s36109_s9 + $0xbe4] ss:$16 sps:$4 sm:$0xff]  }
 0xbe6   :  { %14566 = vmatpush1.bf16.msra.mxu1 %v26091_v52  ;;  %14936 = vmatprep.subr.bf16.mxu0 %v26102_v62  ;;  %v26154_v52 = vld [vmem:[%s36109_s9 + $0x9e8] ss:$16 sps:$4 sm:$0xff]   ;;  %v26151_v62 = vld [vmem:[%s36109_s9 + $0xbe0] ss:$16 sps:$4 sm:$0xff]  }
 0xbe7   :  { %14567 = vmatprep.subr.bf16.mxu1 %v26099_v14  ;;  %v26162_v14 = vld [vmem:[%s36109_s9 + $0xa0c] ss:$16 sps:$4 sm:$0xff]  }
 0xbe9   :  { %14937 = vmatpush1.bf16.msra.mxu0 %v26100_v0  ;;  %v26159_v0 = vld [vmem:[%s36109_s9 + $0xc04] ss:$16 sps:$4 sm:$0xff]  }
 0xbea   :  { %14568 = vmatpush1.bf16.msra.mxu1 %v26097_v40  ;;  %14938 = vmatprep.subr.bf16.mxu0 %v26108_v5  ;;  %v26160_v40 = vld [vmem:[%s36109_s9 + $0xa08] ss:$16 sps:$4 sm:$0xff]   ;;  %v26157_v5 = vld [vmem:[%s36109_s9 + $0xc00] ss:$16 sps:$4 sm:$0xff]  }
 0xbeb   :  { %14569 = vmatprep.subr.bf16.mxu1 %v26105_v16  ;;  %v26168_v16 = vld [vmem:[%s36109_s9 + $0xa2c] ss:$16 sps:$4 sm:$0xff]  }
 0xbed   :  { %14939 = vmatpush1.bf16.msra.mxu0 %v26106_v28  ;;  %v26165_v28 = vld [vmem:[%s36109_s9 + $0xc24] ss:$16 sps:$4 sm:$0xff]  }
 0xbee   :  { %14570 = vmatpush1.bf16.msra.mxu1 %v26103_v3  ;;  %14940 = vmatprep.subr.bf16.mxu0 %v26114_v24  ;;  %v26166_v3 = vld [vmem:[%s36109_s9 + $0xa28] ss:$16 sps:$4 sm:$0xff]   ;;  %v26163_v24 = vld [vmem:[%s36109_s9 + $0xc20] ss:$16 sps:$4 sm:$0xff]  }
 0xbef   :  { %14571 = vmatprep.subr.bf16.mxu1 %v26111_v20  ;;  %v26174_v20 = vld [vmem:[%s36109_s9 + $0xa4c] ss:$16 sps:$4 sm:$0xff]  }
 0xbf1   :  { %14941 = vmatpush1.bf16.msra.mxu0 %v26112_v4  ;;  %v26172_v4 = vld [vmem:[%s36109_s9 + $0xa48] ss:$16 sps:$4 sm:$0xff]  }
 0xbf2   :  { %14572 = vmatpush1.bf16.msra.mxu1 %v26109_v38  ;;  %14942 = vmatprep.subr.bf16.mxu0 %v26120_v6  ;;  %v26169_v38 = vld [vmem:[%s36109_s9 + $0xc40] ss:$16 sps:$4 sm:$0xff]   ;;  %v26180_v6 = vld [vmem:[%s36109_s9 + $0xa6c] ss:$16 sps:$4 sm:$0xff]  }
 0xbf3   :  { %14573 = vmatprep.subr.bf16.mxu1 %v26117_v34  ;;  %v26178_v34 = vld [vmem:[%s36109_s9 + $0xa68] ss:$16 sps:$4 sm:$0xff]  }
 0xbf5   :  { %14943 = vmatpush1.bf16.msra.mxu0 %v26118_v61  ;;  %v26175_v61 = vld [vmem:[%s36109_s9 + $0xc60] ss:$16 sps:$4 sm:$0xff]  }
 0xbf6   :  { %14574 = vmatpush1.bf16.msra.mxu1 %v26115_v42  ;;  %14944 = vmatprep.subr.bf16.mxu0 %v26126_v18  ;;  %v26186_v42 = vld [vmem:[%s36109_s9 + $0xa8c] ss:$16 sps:$4 sm:$0xff]   ;;  %v26183_v18 = vld [vmem:[%s36109_s9 + $0xc84] ss:$16 sps:$4 sm:$0xff]  }
 0xbf7   :  { %14575 = vmatprep.subr.bf16.mxu1 %v26123_v21  ;;  %v26184_v21 = vld [vmem:[%s36109_s9 + $0xa88] ss:$16 sps:$4 sm:$0xff]  }
 0xbf9   :  { %14945 = vmatpush1.bf16.msra.mxu0 %v26124_v29  ;;  %v26181_v29 = vld [vmem:[%s36109_s9 + $0xc80] ss:$16 sps:$4 sm:$0xff]  }
 0xbfa   :  { %14576 = vmatpush1.bf16.msra.mxu1 %v26121_v50  ;;  %14946 = vmatprep.subr.bf16.mxu0 %v26132_v19  ;;  %v26192_v50 = vld [vmem:[%s36109_s9 + $0xaac] ss:$16 sps:$4 sm:$0xff]   ;;  %v26189_v19 = vld [vmem:[%s36109_s9 + $0xca4] ss:$16 sps:$4 sm:$0xff]  }
 0xbfb   :  { %14577 = vmatprep.subr.bf16.mxu1 %v26129_v32  ;;  %v26190_v32 = vld [vmem:[%s36109_s9 + $0xaa8] ss:$16 sps:$4 sm:$0xff]  }
 0xbfd   :  { %14947 = vmatpush1.bf16.msra.mxu0 %v26130_v23  ;;  %v26187_v23 = vld [vmem:[%s36109_s9 + $0xca0] ss:$16 sps:$4 sm:$0xff]  }
 0xbfe   :  { %14578 = vmatpush1.bf16.msra.mxu1 %v26127_v36  ;;  %14948 = vmatprep.subr.bf16.mxu0 %v26138_v55  ;;  %v26198_v36 = vld [vmem:[%s36109_s9 + $0xacc] ss:$16 sps:$4 sm:$0xff]   ;;  %v26195_v55 = vld [vmem:[%s36109_s9 + $0xcc4] ss:$16 sps:$4 sm:$0xff]  }
 0xbff   :  { %14579 = vmatprep.subr.bf16.mxu1 %v26135_v9  ;;  %v26196_v9 = vld [vmem:[%s36109_s9 + $0xac8] ss:$16 sps:$4 sm:$0xff]  }
 0xc01   :  { %14949 = vmatpush1.bf16.msra.mxu0 %v26136_v41  ;;  %v26193_v41 = vld [vmem:[%s36109_s9 + $0xcc0] ss:$16 sps:$4 sm:$0xff]  }
 0xc02   :  { %14580 = vmatpush1.bf16.msra.mxu1 %v26133_v37  ;;  %14950 = vmatprep.subr.bf16.mxu0 %v26144_v59  ;;  %v26204_v37 = vld [vmem:[%s36109_s9 + $0xaec] ss:$16 sps:$4 sm:$0xff]   ;;  %v26201_v59 = vld [vmem:[%s36109_s9 + $0xce4] ss:$16 sps:$4 sm:$0xff]  }
 0xc03   :  { %14581 = vmatprep.subr.bf16.mxu1 %v26141_v44  ;;  %v26202_v44 = vld [vmem:[%s36109_s9 + $0xae8] ss:$16 sps:$4 sm:$0xff]  }
 0xc05   :  { %14951 = vmatpush1.bf16.msra.mxu0 %v26142_v45  ;;  %v26199_v45 = vld [vmem:[%s36109_s9 + $0xce0] ss:$16 sps:$4 sm:$0xff]  }
 0xc06   :  { %14582 = vmatpush1.bf16.msra.mxu1 %v26139_v11  ;;  %14952 = vmatprep.subr.bf16.mxu0 %v26150_v46  ;;  %v26210_v11 = vld [vmem:[%s36109_s9 + $0xb0c] ss:$16 sps:$4 sm:$0xff]   ;;  %v26207_v46 = vld [vmem:[%s36109_s9 + $0xd04] ss:$16 sps:$4 sm:$0xff]  }
 0xc07   :  { %14583 = vmatprep.subr.bf16.mxu1 %v26147_v1  ;;  %v26208_v1 = vld [vmem:[%s36109_s9 + $0xb08] ss:$16 sps:$4 sm:$0xff]  }
 0xc09   :  { %14953 = vmatpush1.bf16.msra.mxu0 %v26148_v48  ;;  %v26205_v48 = vld [vmem:[%s36109_s9 + $0xd00] ss:$16 sps:$4 sm:$0xff]  }
 0xc0a   :  { %14584 = vmatpush1.bf16.msra.mxu1 %v26145_v51  ;;  %14954 = vmatprep.subr.bf16.mxu0 %v26156_v27  ;;  %v26216_v51 = vld [vmem:[%s36109_s9 + $0xb2c] ss:$16 sps:$4 sm:$0xff]   ;;  %v26213_v27 = vld [vmem:[%s36109_s9 + $0xd24] ss:$16 sps:$4 sm:$0xff]  }
 0xc0b   :  { %14585 = vmatprep.subr.bf16.mxu1 %v26153_v15  ;;  %v26214_v15 = vld [vmem:[%s36109_s9 + $0xb28] ss:$16 sps:$4 sm:$0xff]  }
 0xc0d   :  { %14955 = vmatpush1.bf16.msra.mxu0 %v26154_v52  ;;  %v26211_v52 = vld [vmem:[%s36109_s9 + $0xd20] ss:$16 sps:$4 sm:$0xff]  }
 0xc0e   :  { %14586 = vmatpush1.bf16.msra.mxu1 %v26151_v62  ;;  %14965 = vmatprep.subr.bf16.mxu0 %v26162_v14  ;;  %v26222_v62 = vld [vmem:[%s36109_s9 + $0xb4c] ss:$16 sps:$4 sm:$0xff]   ;;  %v26219_v14 = vld [vmem:[%s36109_s9 + $0xd44] ss:$16 sps:$4 sm:$0xff]  }
 0xc0f   :  { %14596 = vmatprep.subr.bf16.mxu1 %v26159_v0  ;;  %v26220_v0 = vld [vmem:[%s36109_s9 + $0xb48] ss:$16 sps:$4 sm:$0xff]  }
 0xc10   :  { %14957 = vmatmul.mubr.bf16.vlgmr.msra.gmra.mrb[28].mxu0 %v28798_v7  ;;  %v26171_v7 = vld [vmem:[%s36109_s9 + $0xc44] ss:$16 sps:$4 sm:$0xff]  }
 0xc11   :  { %14588 = vmatmul.mubr.bf16.vlgmr.msra.gmra.mrb[44].mxu1 %v29011_v30  ;;  %14966 = vmatpush1.bf16.msra.mxu0 %v26160_v40  ;;  %v26217_v40 = vld [vmem:[%s36109_s9 + $0xd40] ss:$16 sps:$4 sm:$0xff]  }
 0xc12   :  { %14597 = vmatpush1.bf16.msra.mxu1 %v26157_v5  ;;  %14967 = vmatprep.subr.bf16.mxu0 %v26168_v16  ;;  %v26228_v5 = vld [vmem:[%s36109_s9 + $0xb6c] ss:$16 sps:$4 sm:$0xff]   ;;  %v26225_v16 = vld [vmem:[%s36109_s9 + $0xd64] ss:$16 sps:$4 sm:$0xff]  }
 0xc13   :  { %14598 = vmatprep.subr.bf16.mxu1 %v26165_v28  ;;  %14628 = vmatprep.mubr.bf16.mxu1 %v29025_v35  ;;  %v26226_v28 = vld [vmem:[%s36109_s9 + $0xb68] ss:$16 sps:$4 sm:$0xff]  }
 0xc14   :  { %14997 = vmatprep.mubr.bf16.mxu0 %v28812_v12  ;;  %v26177_v12 = vld [vmem:[%s36109_s9 + $0xc64] ss:$16 sps:$4 sm:$0xff]  }
 0xc15   :  { %14968 = vmatpush1.bf16.msra.mxu0 %v26166_v3  ;;  %v26223_v3 = vld [vmem:[%s36109_s9 + $0xd60] ss:$16 sps:$4 sm:$0xff]  }
 0xc16   :  { %14599 = vmatpush1.bf16.msra.mxu1 %v26163_v24  ;;  %14969 = vmatprep.subr.bf16.mxu0 %v26174_v20  ;;  %v26234_v24 = vld [vmem:[%s36109_s9 + $0xb8c] ss:$16 sps:$4 sm:$0xff]   ;;  %v26231_v20 = vld [vmem:[%s36109_s9 + $0xd84] ss:$16 sps:$4 sm:$0xff]  }
 0xc17   :  { %14600 = vmatprep.subr.bf16.mxu1 %v26171_v7  ;;  %v26232_v7 = vld [vmem:[%s36109_s9 + $0xb88] ss:$16 sps:$4 sm:$0xff]  }
 0xc19   :  { %14970 = vmatpush1.bf16.msra.mxu0 %v26172_v4  ;;  %v26229_v4 = vld [vmem:[%s36109_s9 + $0xd80] ss:$16 sps:$4 sm:$0xff]  }
 0xc1a   :  { %14601 = vmatpush1.bf16.msra.mxu1 %v26169_v38  ;;  %14971 = vmatprep.subr.bf16.mxu0 %v26180_v6  ;;  %v26240_v38 = vld [vmem:[%s36109_s9 + $0xbac] ss:$16 sps:$4 sm:$0xff]   ;;  %v26237_v6 = vld [vmem:[%s36109_s9 + $0xda4] ss:$16 sps:$4 sm:$0xff]  }
 0xc1b   :  { %14602 = vmatprep.subr.bf16.mxu1 %v26177_v12  ;;  %v26238_v12 = vld [vmem:[%s36109_s9 + $0xba8] ss:$16 sps:$4 sm:$0xff]  }
 0xc1d   :  { %14972 = vmatpush1.bf16.msra.mxu0 %v26178_v34  ;;  %v26235_v34 = vld [vmem:[%s36109_s9 + $0xda0] ss:$16 sps:$4 sm:$0xff]  }
 0xc1e   :  { %14603 = vmatpush1.bf16.msra.mxu1 %v26175_v61  ;;  %14973 = vmatprep.subr.bf16.mxu0 %v26186_v42  ;;  %v26246_v61 = vld [vmem:[%s36109_s9 + $0xbcc] ss:$16 sps:$4 sm:$0xff]   ;;  %v26243_v42 = vld [vmem:[%s36109_s9 + $0xdc4] ss:$16 sps:$4 sm:$0xff]  }
 0xc1f   :  { %14604 = vmatprep.subr.bf16.mxu1 %v26183_v18  ;;  %v26244_v18 = vld [vmem:[%s36109_s9 + $0xbc8] ss:$16 sps:$4 sm:$0xff]  }
 0xc21   :  { %14974 = vmatpush1.bf16.msra.mxu0 %v26184_v21  ;;  %v26241_v21 = vld [vmem:[%s36109_s9 + $0xdc0] ss:$16 sps:$4 sm:$0xff]  }
 0xc22   :  { %14605 = vmatpush1.bf16.msra.mxu1 %v26181_v29  ;;  %14975 = vmatprep.subr.bf16.mxu0 %v26192_v50  ;;  %v26252_v29 = vld [vmem:[%s36109_s9 + $0xbec] ss:$16 sps:$4 sm:$0xff]   ;;  %v26249_v50 = vld [vmem:[%s36109_s9 + $0xde4] ss:$16 sps:$4 sm:$0xff]  }
 0xc23   :  { %14606 = vmatprep.subr.bf16.mxu1 %v26189_v19  ;;  %v26250_v19 = vld [vmem:[%s36109_s9 + $0xbe8] ss:$16 sps:$4 sm:$0xff]  }
 0xc25   :  { %14976 = vmatpush1.bf16.msra.mxu0 %v26190_v32  ;;  %v26247_v32 = vld [vmem:[%s36109_s9 + $0xde0] ss:$16 sps:$4 sm:$0xff]  }
 0xc26   :  { %14607 = vmatpush1.bf16.msra.mxu1 %v26187_v23  ;;  %14977 = vmatprep.subr.bf16.mxu0 %v26198_v36  ;;  %v26258_v23 = vld [vmem:[%s36109_s9 + $0xc0c] ss:$16 sps:$4 sm:$0xff]   ;;  %v26255_v36 = vld [vmem:[%s36109_s9 + $0xe04] ss:$16 sps:$4 sm:$0xff]  }
 0xc27   :  { %14608 = vmatprep.subr.bf16.mxu1 %v26195_v55  ;;  %v26256_v55 = vld [vmem:[%s36109_s9 + $0xc08] ss:$16 sps:$4 sm:$0xff]  }
 0xc29   :  { %14978 = vmatpush1.bf16.msra.mxu0 %v26196_v9  ;;  %v26253_v9 = vld [vmem:[%s36109_s9 + $0xe00] ss:$16 sps:$4 sm:$0xff]  }
 0xc2a   :  { %14609 = vmatpush1.bf16.msra.mxu1 %v26193_v41  ;;  %14979 = vmatprep.subr.bf16.mxu0 %v26204_v37  ;;  %v26264_v41 = vld [vmem:[%s36109_s9 + $0xc2c] ss:$16 sps:$4 sm:$0xff]   ;;  %v26261_v37 = vld [vmem:[%s36109_s9 + $0xe24] ss:$16 sps:$4 sm:$0xff]  }
 0xc2b   :  { %14610 = vmatprep.subr.bf16.mxu1 %v26201_v59  ;;  %v26262_v59 = vld [vmem:[%s36109_s9 + $0xc28] ss:$16 sps:$4 sm:$0xff]  }
 0xc2d   :  { %14980 = vmatpush1.bf16.msra.mxu0 %v26202_v44  ;;  %v26259_v44 = vld [vmem:[%s36109_s9 + $0xe20] ss:$16 sps:$4 sm:$0xff]  }
 0xc2e   :  { %14611 = vmatpush1.bf16.msra.mxu1 %v26199_v45  ;;  %14981 = vmatprep.subr.bf16.mxu0 %v26210_v11  ;;  %v26270_v45 = vld [vmem:[%s36109_s9 + $0xc4c] ss:$16 sps:$4 sm:$0xff]   ;;  %v26268_v11 = vld [vmem:[%s36109_s9 + $0xc48] ss:$16 sps:$4 sm:$0xff]  }
 0xc2f   :  { %14612 = vmatprep.subr.bf16.mxu1 %v26207_v46  ;;  %v26265_v46 = vld [vmem:[%s36109_s9 + $0xe40] ss:$16 sps:$4 sm:$0xff]  }
 0xc31   :  { %14982 = vmatpush1.bf16.msra.mxu0 %v26208_v1  ;;  %v26276_v1 = vld [vmem:[%s36109_s9 + $0xc6c] ss:$16 sps:$4 sm:$0xff]  }
 0xc32   :  { %14613 = vmatpush1.bf16.msra.mxu1 %v26205_v48  ;;  %14983 = vmatprep.subr.bf16.mxu0 %v26216_v51  ;;  %v26274_v48 = vld [vmem:[%s36109_s9 + $0xc68] ss:$16 sps:$4 sm:$0xff]   ;;  %v26271_v51 = vld [vmem:[%s36109_s9 + $0xe60] ss:$16 sps:$4 sm:$0xff]  }
 0xc33   :  { %14614 = vmatprep.subr.bf16.mxu1 %v26213_v27  ;;  %v26282_v27 = vld [vmem:[%s36109_s9 + $0xc8c] ss:$16 sps:$4 sm:$0xff]  }
 0xc35   :  { %14984 = vmatpush1.bf16.msra.mxu0 %v26214_v15  ;;  %v26279_v15 = vld [vmem:[%s36109_s9 + $0xe84] ss:$16 sps:$4 sm:$0xff]  }
 0xc36   :  { %14615 = vmatpush1.bf16.msra.mxu1 %v26211_v52  ;;  %14985 = vmatprep.subr.bf16.mxu0 %v26222_v62  ;;  %v26280_v52 = vld [vmem:[%s36109_s9 + $0xc88] ss:$16 sps:$4 sm:$0xff]   ;;  %v26277_v62 = vld [vmem:[%s36109_s9 + $0xe80] ss:$16 sps:$4 sm:$0xff]  }
 0xc37   :  { %14616 = vmatprep.subr.bf16.mxu1 %v26219_v14  ;;  %v26288_v14 = vld [vmem:[%s36109_s9 + $0xcac] ss:$16 sps:$4 sm:$0xff]  }
 0xc39   :  { %14986 = vmatpush1.bf16.msra.mxu0 %v26220_v0  ;;  %v26285_v0 = vld [vmem:[%s36109_s9 + $0xea4] ss:$16 sps:$4 sm:$0xff]  }
 0xc3a   :  { %14617 = vmatpush1.bf16.msra.mxu1 %v26217_v40  ;;  %14987 = vmatprep.subr.bf16.mxu0 %v26228_v5  ;;  %v26286_v40 = vld [vmem:[%s36109_s9 + $0xca8] ss:$16 sps:$4 sm:$0xff]   ;;  %v26283_v5 = vld [vmem:[%s36109_s9 + $0xea0] ss:$16 sps:$4 sm:$0xff]  }
 0xc3b   :  { %14618 = vmatprep.subr.bf16.mxu1 %v26225_v16  ;;  %v26294_v16 = vld [vmem:[%s36109_s9 + $0xccc] ss:$16 sps:$4 sm:$0xff]  }
 0xc3d   :  { %14988 = vmatpush1.bf16.msra.mxu0 %v26226_v28  ;;  %v26291_v28 = vld [vmem:[%s36109_s9 + $0xec4] ss:$16 sps:$4 sm:$0xff]  }
 0xc3e   :  { %14619 = vmatpush1.bf16.msra.mxu1 %v26223_v3  ;;  %14989 = vmatprep.subr.bf16.mxu0 %v26234_v24  ;;  %v26292_v3 = vld [vmem:[%s36109_s9 + $0xcc8] ss:$16 sps:$4 sm:$0xff]   ;;  %v26289_v24 = vld [vmem:[%s36109_s9 + $0xec0] ss:$16 sps:$4 sm:$0xff]  }
 0xc3f   :  { %14620 = vmatprep.subr.bf16.mxu1 %v26231_v20  ;;  %v26300_v20 = vld [vmem:[%s36109_s9 + $0xcec] ss:$16 sps:$4 sm:$0xff]  }
 0xc41   :  { %14990 = vmatpush1.bf16.msra.mxu0 %v26232_v7  ;;  %v26297_v7 = vld [vmem:[%s36109_s9 + $0xee4] ss:$16 sps:$4 sm:$0xff]  }
 0xc42   :  { %14621 = vmatpush1.bf16.msra.mxu1 %v26229_v4  ;;  %14991 = vmatprep.subr.bf16.mxu0 %v26240_v38  ;;  %v26298_v4 = vld [vmem:[%s36109_s9 + $0xce8] ss:$16 sps:$4 sm:$0xff]   ;;  %v26295_v38 = vld [vmem:[%s36109_s9 + $0xee0] ss:$16 sps:$4 sm:$0xff]  }
 0xc43   :  { %14622 = vmatprep.subr.bf16.mxu1 %v26237_v6  ;;  %v26306_v6 = vld [vmem:[%s36109_s9 + $0xd0c] ss:$16 sps:$4 sm:$0xff]  }
 0xc45   :  { %14992 = vmatpush1.bf16.msra.mxu0 %v26238_v12  ;;  %v26303_v12 = vld [vmem:[%s36109_s9 + $0xf04] ss:$16 sps:$4 sm:$0xff]  }
 0xc46   :  { %14623 = vmatpush1.bf16.msra.mxu1 %v26235_v34  ;;  %14993 = vmatprep.subr.bf16.mxu0 %v26246_v61  ;;  %v26304_v34 = vld [vmem:[%s36109_s9 + $0xd08] ss:$16 sps:$4 sm:$0xff]   ;;  %v26301_v61 = vld [vmem:[%s36109_s9 + $0xf00] ss:$16 sps:$4 sm:$0xff]  }
 0xc47   :  { %14624 = vmatprep.subr.bf16.mxu1 %v26243_v42  ;;  %v26312_v42 = vld [vmem:[%s36109_s9 + $0xd2c] ss:$16 sps:$4 sm:$0xff]  }
 0xc49   :  { %14994 = vmatpush1.bf16.msra.mxu0 %v26244_v18  ;;  %v26309_v18 = vld [vmem:[%s36109_s9 + $0xf24] ss:$16 sps:$4 sm:$0xff]  }
 0xc4a   :  { %14625 = vmatpush1.bf16.msra.mxu1 %v26241_v21  ;;  %14995 = vmatprep.subr.bf16.mxu0 %v26252_v29  ;;  %v26310_v21 = vld [vmem:[%s36109_s9 + $0xd28] ss:$16 sps:$4 sm:$0xff]   ;;  %v26307_v29 = vld [vmem:[%s36109_s9 + $0xf20] ss:$16 sps:$4 sm:$0xff]  }
 0xc4b   :  { %14626 = vmatprep.subr.bf16.mxu1 %v26249_v50  ;;  %v26318_v50 = vld [vmem:[%s36109_s9 + $0xd4c] ss:$16 sps:$4 sm:$0xff]  }
 0xc4d   :  { %14996 = vmatpush1.bf16.msra.mxu0 %v26250_v19  ;;  %v26315_v19 = vld [vmem:[%s36109_s9 + $0xf44] ss:$16 sps:$4 sm:$0xff]  }
 0xc4e   :  { %14627 = vmatpush1.bf16.msra.mxu1 %v26247_v32  ;;  %15006 = vmatprep.subr.bf16.mxu0 %v26258_v23  ;;  %v26316_v32 = vld [vmem:[%s36109_s9 + $0xd48] ss:$16 sps:$4 sm:$0xff]   ;;  %v26313_v23 = vld [vmem:[%s36109_s9 + $0xf40] ss:$16 sps:$4 sm:$0xff]  }
 0xc4f   :  { %14637 = vmatprep.subr.bf16.mxu1 %v26255_v36  ;;  %v26324_v36 = vld [vmem:[%s36109_s9 + $0xd6c] ss:$16 sps:$4 sm:$0xff]  }
 0xc50   :  { %14998 = vmatmul.mubr.bf16.vlgmr.msra.gmra.mrb[28].mxu0 %v29011_v30  ;;  %v26267_v30 = vld [vmem:[%s36109_s9 + $0xe44] ss:$16 sps:$4 sm:$0xff]  }
 0xc51   :  { %14629 = vmatmul.mubr.bf16.vlgmr.msra.gmra.mrb[44].mxu1 %v29226_v31  ;;  %15007 = vmatpush1.bf16.msra.mxu0 %v26256_v55  ;;  %v26321_v55 = vld [vmem:[%s36109_s9 + $0xf64] ss:$16 sps:$4 sm:$0xff]  }
 0xc52   :  { %14638 = vmatpush1.bf16.msra.mxu1 %v26253_v9  ;;  %15008 = vmatprep.subr.bf16.mxu0 %v26264_v41  ;;  %v26322_v9 = vld [vmem:[%s36109_s9 + $0xd68] ss:$16 sps:$4 sm:$0xff]   ;;  %v26319_v41 = vld [vmem:[%s36109_s9 + $0xf60] ss:$16 sps:$4 sm:$0xff]  }
 0xc53   :  { %14639 = vmatprep.subr.bf16.mxu1 %v26261_v37  ;;  %14669 = vmatprep.mubr.bf16.mxu1 %v29234_v63  ;;  %v26330_v37 = vld [vmem:[%s36109_s9 + $0xd8c] ss:$16 sps:$4 sm:$0xff]  }
 0xc54   :  { %15038 = vmatprep.mubr.bf16.mxu0 %v29025_v35  ;;  %v26273_v35 = vld [vmem:[%s36109_s9 + $0xe64] ss:$16 sps:$4 sm:$0xff]  }
 0xc55   :  { %15009 = vmatpush1.bf16.msra.mxu0 %v26262_v59  ;;  %v26327_v59 = vld [vmem:[%s36109_s9 + $0xf84] ss:$16 sps:$4 sm:$0xff]  }
 0xc56   :  { %14640 = vmatpush1.bf16.msra.mxu1 %v26259_v44  ;;  %15010 = vmatprep.subr.bf16.mxu0 %v26270_v45  ;;  %v26328_v44 = vld [vmem:[%s36109_s9 + $0xd88] ss:$16 sps:$4 sm:$0xff]   ;;  %v26325_v45 = vld [vmem:[%s36109_s9 + $0xf80] ss:$16 sps:$4 sm:$0xff]  }
 0xc57   :  { %14641 = vmatprep.subr.bf16.mxu1 %v26267_v30  ;;  %v26336_v30 = vld [vmem:[%s36109_s9 + $0xdac] ss:$16 sps:$4 sm:$0xff]  }
 0xc59   :  { %15011 = vmatpush1.bf16.msra.mxu0 %v26268_v11  ;;  %v26333_v11 = vld [vmem:[%s36109_s9 + $0xfa4] ss:$16 sps:$4 sm:$0xff]  }
 0xc5a   :  { %14642 = vmatpush1.bf16.msra.mxu1 %v26265_v46  ;;  %15012 = vmatprep.subr.bf16.mxu0 %v26276_v1  ;;  %v26334_v46 = vld [vmem:[%s36109_s9 + $0xda8] ss:$16 sps:$4 sm:$0xff]   ;;  %v26331_v1 = vld [vmem:[%s36109_s9 + $0xfa0] ss:$16 sps:$4 sm:$0xff]  }
 0xc5b   :  { %14643 = vmatprep.subr.bf16.mxu1 %v26273_v35  ;;  %v26342_v35 = vld [vmem:[%s36109_s9 + $0xdcc] ss:$16 sps:$4 sm:$0xff]  }
 0xc5d   :  { %15013 = vmatpush1.bf16.msra.mxu0 %v26274_v48  ;;  %v26339_v48 = vld [vmem:[%s36109_s9 + $0xfc4] ss:$16 sps:$4 sm:$0xff]  }
 0xc5e   :  { %14644 = vmatpush1.bf16.msra.mxu1 %v26271_v51  ;;  %15014 = vmatprep.subr.bf16.mxu0 %v26282_v27  ;;  %v26340_v51 = vld [vmem:[%s36109_s9 + $0xdc8] ss:$16 sps:$4 sm:$0xff]   ;;  %v26337_v27 = vld [vmem:[%s36109_s9 + $0xfc0] ss:$16 sps:$4 sm:$0xff]  }
 0xc5f   :  { %14645 = vmatprep.subr.bf16.mxu1 %v26279_v15  ;;  %v26348_v15 = vld [vmem:[%s36109_s9 + $0xdec] ss:$16 sps:$4 sm:$0xff]  }
 0xc61   :  { %15015 = vmatpush1.bf16.msra.mxu0 %v26280_v52  ;;  %v26345_v52 = vld [vmem:[%s36109_s9 + $0xfe4] ss:$16 sps:$4 sm:$0xff]  }
 0xc62   :  { %14646 = vmatpush1.bf16.msra.mxu1 %v26277_v62  ;;  %15016 = vmatprep.subr.bf16.mxu0 %v26288_v14  ;;  %v26346_v62 = vld [vmem:[%s36109_s9 + $0xde8] ss:$16 sps:$4 sm:$0xff]   ;;  %v26343_v14 = vld [vmem:[%s36109_s9 + $0xfe0] ss:$16 sps:$4 sm:$0xff]  }
 0xc63   :  { %14647 = vmatprep.subr.bf16.mxu1 %v26285_v0  ;;  %v26354_v0 = vld [vmem:[%s36109_s9 + $0xe0c] ss:$16 sps:$4 sm:$0xff]  }
 0xc65   :  { %15017 = vmatpush1.bf16.msra.mxu0 %v26286_v40  ;;  %v26351_v40 = vld [vmem:[%s36109_s9 + $0x1004] ss:$16 sps:$4 sm:$0xff]  }
 0xc66   :  { %14648 = vmatpush1.bf16.msra.mxu1 %v26283_v5  ;;  %15018 = vmatprep.subr.bf16.mxu0 %v26294_v16  ;;  %v26352_v5 = vld [vmem:[%s36109_s9 + $0xe08] ss:$16 sps:$4 sm:$0xff]   ;;  %v26349_v16 = vld [vmem:[%s36109_s9 + $0x1000] ss:$16 sps:$4 sm:$0xff]  }
 0xc67   :  { %14649 = vmatprep.subr.bf16.mxu1 %v26291_v28  ;;  %v26360_v28 = vld [vmem:[%s36109_s9 + $0xe2c] ss:$16 sps:$4 sm:$0xff]  }
 0xc69   :  { %15019 = vmatpush1.bf16.msra.mxu0 %v26292_v3  ;;  %v26357_v3 = vld [vmem:[%s36109_s9 + $0x1024] ss:$16 sps:$4 sm:$0xff]  }
 0xc6a   :  { %14650 = vmatpush1.bf16.msra.mxu1 %v26289_v24  ;;  %15020 = vmatprep.subr.bf16.mxu0 %v26300_v20  ;;  %v26358_v24 = vld [vmem:[%s36109_s9 + $0xe28] ss:$16 sps:$4 sm:$0xff]   ;;  %v26355_v20 = vld [vmem:[%s36109_s9 + $0x1020] ss:$16 sps:$4 sm:$0xff]  }
 0xc6b   :  { %14651 = vmatprep.subr.bf16.mxu1 %v26297_v7  ;;  %v26366_v7 = vld [vmem:[%s36109_s9 + $0xe4c] ss:$16 sps:$4 sm:$0xff]  }
 0xc6d   :  { %15021 = vmatpush1.bf16.msra.mxu0 %v26298_v4  ;;  %v26364_v4 = vld [vmem:[%s36109_s9 + $0xe48] ss:$16 sps:$4 sm:$0xff]  }
 0xc6e   :  { %14652 = vmatpush1.bf16.msra.mxu1 %v26295_v38  ;;  %15022 = vmatprep.subr.bf16.mxu0 %v26306_v6  ;;  %v26361_v38 = vld [vmem:[%s36109_s9 + $0x1040] ss:$16 sps:$4 sm:$0xff]   ;;  %v26372_v6 = vld [vmem:[%s36109_s9 + $0xe6c] ss:$16 sps:$4 sm:$0xff]  }
 0xc6f   :  { %14653 = vmatprep.subr.bf16.mxu1 %v26303_v12  ;;  %v26370_v12 = vld [vmem:[%s36109_s9 + $0xe68] ss:$16 sps:$4 sm:$0xff]  }
 0xc71   :  { %15023 = vmatpush1.bf16.msra.mxu0 %v26304_v34  ;;  %v26367_v34 = vld [vmem:[%s36109_s9 + $0x1060] ss:$16 sps:$4 sm:$0xff]  }
 0xc72   :  { %14654 = vmatpush1.bf16.msra.mxu1 %v26301_v61  ;;  %15024 = vmatprep.subr.bf16.mxu0 %v26312_v42  ;;  %v26378_v61 = vld [vmem:[%s36109_s9 + $0xe8c] ss:$16 sps:$4 sm:$0xff]   ;;  %v26375_v42 = vld [vmem:[%s36109_s9 + $0x1084] ss:$16 sps:$4 sm:$0xff]  }
 0xc73   :  { %14655 = vmatprep.subr.bf16.mxu1 %v26309_v18  ;;  %v26376_v18 = vld [vmem:[%s36109_s9 + $0xe88] ss:$16 sps:$4 sm:$0xff]  }
 0xc75   :  { %15025 = vmatpush1.bf16.msra.mxu0 %v26310_v21  ;;  %v26373_v21 = vld [vmem:[%s36109_s9 + $0x1080] ss:$16 sps:$4 sm:$0xff]  }
 0xc76   :  { %14656 = vmatpush1.bf16.msra.mxu1 %v26307_v29  ;;  %15026 = vmatprep.subr.bf16.mxu0 %v26318_v50  ;;  %v26384_v29 = vld [vmem:[%s36109_s9 + $0xeac] ss:$16 sps:$4 sm:$0xff]   ;;  %v26381_v50 = vld [vmem:[%s36109_s9 + $0x10a4] ss:$16 sps:$4 sm:$0xff]  }
 0xc77   :  { %14657 = vmatprep.subr.bf16.mxu1 %v26315_v19  ;;  %v26382_v19 = vld [vmem:[%s36109_s9 + $0xea8] ss:$16 sps:$4 sm:$0xff]  }
 0xc79   :  { %15027 = vmatpush1.bf16.msra.mxu0 %v26316_v32  ;;  %v26379_v32 = vld [vmem:[%s36109_s9 + $0x10a0] ss:$16 sps:$4 sm:$0xff]  }
 0xc7a   :  { %14658 = vmatpush1.bf16.msra.mxu1 %v26313_v23  ;;  %15028 = vmatprep.subr.bf16.mxu0 %v26324_v36  ;;  %v26390_v23 = vld [vmem:[%s36109_s9 + $0xecc] ss:$16 sps:$4 sm:$0xff]   ;;  %v26387_v36 = vld [vmem:[%s36109_s9 + $0x10c4] ss:$16 sps:$4 sm:$0xff]  }
 0xc7b   :  { %14659 = vmatprep.subr.bf16.mxu1 %v26321_v55  ;;  %v26388_v55 = vld [vmem:[%s36109_s9 + $0xec8] ss:$16 sps:$4 sm:$0xff]  }
 0xc7d   :  { %15029 = vmatpush1.bf16.msra.mxu0 %v26322_v9  ;;  %v26385_v9 = vld [vmem:[%s36109_s9 + $0x10c0] ss:$16 sps:$4 sm:$0xff]  }
 0xc7e   :  { %14660 = vmatpush1.bf16.msra.mxu1 %v26319_v41  ;;  %15030 = vmatprep.subr.bf16.mxu0 %v26330_v37  ;;  %v26396_v41 = vld [vmem:[%s36109_s9 + $0xeec] ss:$16 sps:$4 sm:$0xff]   ;;  %v26393_v37 = vld [vmem:[%s36109_s9 + $0x10e4] ss:$16 sps:$4 sm:$0xff]  }
 0xc7f   :  { %14661 = vmatprep.subr.bf16.mxu1 %v26327_v59  ;;  %v26394_v59 = vld [vmem:[%s36109_s9 + $0xee8] ss:$16 sps:$4 sm:$0xff]  }
 0xc81   :  { %15031 = vmatpush1.bf16.msra.mxu0 %v26328_v44  ;;  %v26391_v44 = vld [vmem:[%s36109_s9 + $0x10e0] ss:$16 sps:$4 sm:$0xff]  }
 0xc82   :  { %14662 = vmatpush1.bf16.msra.mxu1 %v26325_v45  ;;  %15032 = vmatprep.subr.bf16.mxu0 %v26336_v30  ;;  %v26402_v45 = vld [vmem:[%s36109_s9 + $0xf0c] ss:$16 sps:$4 sm:$0xff]   ;;  %v26399_v30 = vld [vmem:[%s36109_s9 + $0x1104] ss:$16 sps:$4 sm:$0xff]  }
 0xc83   :  { %14663 = vmatprep.subr.bf16.mxu1 %v26333_v11  ;;  %v26400_v11 = vld [vmem:[%s36109_s9 + $0xf08] ss:$16 sps:$4 sm:$0xff]  }
 0xc85   :  { %15033 = vmatpush1.bf16.msra.mxu0 %v26334_v46  ;;  %v26397_v46 = vld [vmem:[%s36109_s9 + $0x1100] ss:$16 sps:$4 sm:$0xff]  }
 0xc86   :  { %14664 = vmatpush1.bf16.msra.mxu1 %v26331_v1  ;;  %15034 = vmatprep.subr.bf16.mxu0 %v26342_v35  ;;  %v26408_v1 = vld [vmem:[%s36109_s9 + $0xf2c] ss:$16 sps:$4 sm:$0xff]   ;;  %v26405_v35 = vld [vmem:[%s36109_s9 + $0x1124] ss:$16 sps:$4 sm:$0xff]  }
 0xc87   :  { %14665 = vmatprep.subr.bf16.mxu1 %v26339_v48  ;;  %v26406_v48 = vld [vmem:[%s36109_s9 + $0xf28] ss:$16 sps:$4 sm:$0xff]  }
 0xc89   :  { %15035 = vmatpush1.bf16.msra.mxu0 %v26340_v51  ;;  %v26403_v51 = vld [vmem:[%s36109_s9 + $0x1120] ss:$16 sps:$4 sm:$0xff]  }
 0xc8a   :  { %14666 = vmatpush1.bf16.msra.mxu1 %v26337_v27  ;;  %15036 = vmatprep.subr.bf16.mxu0 %v26348_v15  ;;  %v26414_v27 = vld [vmem:[%s36109_s9 + $0xf4c] ss:$16 sps:$4 sm:$0xff]   ;;  %v26411_v15 = vld [vmem:[%s36109_s9 + $0x1144] ss:$16 sps:$4 sm:$0xff]  }
 0xc8b   :  { %14667 = vmatprep.subr.bf16.mxu1 %v26345_v52  ;;  %v26412_v52 = vld [vmem:[%s36109_s9 + $0xf48] ss:$16 sps:$4 sm:$0xff]  }
 0xc8d   :  { %15037 = vmatpush1.bf16.msra.mxu0 %v26346_v62  ;;  %v26409_v62 = vld [vmem:[%s36109_s9 + $0x1140] ss:$16 sps:$4 sm:$0xff]  }
 0xc8e   :  { %14668 = vmatpush1.bf16.msra.mxu1 %v26343_v14  ;;  %15047 = vmatprep.subr.bf16.mxu0 %v26354_v0  ;;  %v26420_v14 = vld [vmem:[%s36109_s9 + $0xf6c] ss:$16 sps:$4 sm:$0xff]   ;;  %v26417_v0 = vld [vmem:[%s36109_s9 + $0x1164] ss:$16 sps:$4 sm:$0xff]  }
 0xc8f   :  { %14678 = vmatprep.subr.bf16.mxu1 %v26351_v40  ;;  %v26418_v40 = vld [vmem:[%s36109_s9 + $0xf68] ss:$16 sps:$4 sm:$0xff]  }
 0xc90   :  { %15039 = vmatmul.mubr.bf16.vlgmr.msra.gmra.mrb[28].mxu0 %v29226_v31  ;;  %v26363_v31 = vld [vmem:[%s36109_s9 + $0x1044] ss:$16 sps:$4 sm:$0xff]  }
 0xc91   :  { %14670 = vmatmul.mubr.bf16.vlgmr.msra.gmra.mrb[44].mxu1 %v29439_v25  ;;  %15048 = vmatpush1.bf16.msra.mxu0 %v26352_v5  ;;  %v26415_v5 = vld [vmem:[%s36109_s9 + $0x1160] ss:$16 sps:$4 sm:$0xff]  }
 0xc92   :  { %14679 = vmatpush1.bf16.msra.mxu1 %v26349_v16  ;;  %15049 = vmatprep.subr.bf16.mxu0 %v26360_v28  ;;  %v26426_v16 = vld [vmem:[%s36109_s9 + $0xf8c] ss:$16 sps:$4 sm:$0xff]   ;;  %v26423_v28 = vld [vmem:[%s36109_s9 + $0x1184] ss:$16 sps:$4 sm:$0xff]  }
 0xc93   :  { %14680 = vmatprep.subr.bf16.mxu1 %v26357_v3  ;;  %14710 = vmatprep.mubr.bf16.mxu1 %v29453_v26  ;;  %v26424_v3 = vld [vmem:[%s36109_s9 + $0xf88] ss:$16 sps:$4 sm:$0xff]  }
 0xc94   :  { %15079 = vmatprep.mubr.bf16.mxu0 %v29234_v63  ;;  %v26369_v63 = vld [vmem:[%s36109_s9 + $0x1064] ss:$16 sps:$4 sm:$0xff]  }
 0xc95   :  { %15050 = vmatpush1.bf16.msra.mxu0 %v26358_v24  ;;  %v26421_v24 = vld [vmem:[%s36109_s9 + $0x1180] ss:$16 sps:$4 sm:$0xff]  }
 0xc96   :  { %14681 = vmatpush1.bf16.msra.mxu1 %v26355_v20  ;;  %15051 = vmatprep.subr.bf16.mxu0 %v26366_v7  ;;  %v26432_v20 = vld [vmem:[%s36109_s9 + $0xfac] ss:$16 sps:$4 sm:$0xff]   ;;  %v26429_v7 = vld [vmem:[%s36109_s9 + $0x11a4] ss:$16 sps:$4 sm:$0xff]  }
 0xc97   :  { %14682 = vmatprep.subr.bf16.mxu1 %v26363_v31  ;;  %v26430_v31 = vld [vmem:[%s36109_s9 + $0xfa8] ss:$16 sps:$4 sm:$0xff]  }
 0xc99   :  { %15052 = vmatpush1.bf16.msra.mxu0 %v26364_v4  ;;  %v26427_v4 = vld [vmem:[%s36109_s9 + $0x11a0] ss:$16 sps:$4 sm:$0xff]  }
 0xc9a   :  { %14683 = vmatpush1.bf16.msra.mxu1 %v26361_v38  ;;  %15053 = vmatprep.subr.bf16.mxu0 %v26372_v6  ;;  %v26438_v38 = vld [vmem:[%s36109_s9 + $0xfcc] ss:$16 sps:$4 sm:$0xff]   ;;  %v26435_v6 = vld [vmem:[%s36109_s9 + $0x11c4] ss:$16 sps:$4 sm:$0xff]  }
 0xc9b   :  { %14684 = vmatprep.subr.bf16.mxu1 %v26369_v63  ;;  %v26436_v63 = vld [vmem:[%s36109_s9 + $0xfc8] ss:$16 sps:$4 sm:$0xff]  }
 0xc9d   :  { %15054 = vmatpush1.bf16.msra.mxu0 %v26370_v12  ;;  %v26433_v12 = vld [vmem:[%s36109_s9 + $0x11c0] ss:$16 sps:$4 sm:$0xff]  }
 0xc9e   :  { %14685 = vmatpush1.bf16.msra.mxu1 %v26367_v34  ;;  %15055 = vmatprep.subr.bf16.mxu0 %v26378_v61  ;;  %v26444_v34 = vld [vmem:[%s36109_s9 + $0xfec] ss:$16 sps:$4 sm:$0xff]   ;;  %v26441_v61 = vld [vmem:[%s36109_s9 + $0x11e4] ss:$16 sps:$4 sm:$0xff]  }
 0xc9f   :  { %14686 = vmatprep.subr.bf16.mxu1 %v26375_v42  ;;  %v26442_v42 = vld [vmem:[%s36109_s9 + $0xfe8] ss:$16 sps:$4 sm:$0xff]  }
 0xca1   :  { %15056 = vmatpush1.bf16.msra.mxu0 %v26376_v18  ;;  %v26439_v18 = vld [vmem:[%s36109_s9 + $0x11e0] ss:$16 sps:$4 sm:$0xff]  }
 0xca2   :  { %14687 = vmatpush1.bf16.msra.mxu1 %v26373_v21  ;;  %15057 = vmatprep.subr.bf16.mxu0 %v26384_v29  ;;  %v26450_v21 = vld [vmem:[%s36109_s9 + $0x100c] ss:$16 sps:$4 sm:$0xff]   ;;  %v26447_v29 = vld [vmem:[%s36109_s9 + $0x1204] ss:$16 sps:$4 sm:$0xff]  }
 0xca3   :  { %14688 = vmatprep.subr.bf16.mxu1 %v26381_v50  ;;  %v26448_v50 = vld [vmem:[%s36109_s9 + $0x1008] ss:$16 sps:$4 sm:$0xff]  }
 0xca5   :  { %15058 = vmatpush1.bf16.msra.mxu0 %v26382_v19  ;;  %v26445_v19 = vld [vmem:[%s36109_s9 + $0x1200] ss:$16 sps:$4 sm:$0xff]  }
 0xca6   :  { %14689 = vmatpush1.bf16.msra.mxu1 %v26379_v32  ;;  %15059 = vmatprep.subr.bf16.mxu0 %v26390_v23  ;;  %v26456_v32 = vld [vmem:[%s36109_s9 + $0x102c] ss:$16 sps:$4 sm:$0xff]   ;;  %v26453_v23 = vld [vmem:[%s36109_s9 + $0x1224] ss:$16 sps:$4 sm:$0xff]  }
 0xca7   :  { %14690 = vmatprep.subr.bf16.mxu1 %v26387_v36  ;;  %v26454_v36 = vld [vmem:[%s36109_s9 + $0x1028] ss:$16 sps:$4 sm:$0xff]  }
 0xca9   :  { %15060 = vmatpush1.bf16.msra.mxu0 %v26388_v55  ;;  %v26451_v55 = vld [vmem:[%s36109_s9 + $0x1220] ss:$16 sps:$4 sm:$0xff]  }
 0xcaa   :  { %14691 = vmatpush1.bf16.msra.mxu1 %v26385_v9  ;;  %15061 = vmatprep.subr.bf16.mxu0 %v26396_v41  ;;  %v26462_v9 = vld [vmem:[%s36109_s9 + $0x104c] ss:$16 sps:$4 sm:$0xff]   ;;  %v26460_v41 = vld [vmem:[%s36109_s9 + $0x1048] ss:$16 sps:$4 sm:$0xff]  }
 0xcab   :  { %14692 = vmatprep.subr.bf16.mxu1 %v26393_v37  ;;  %v26457_v37 = vld [vmem:[%s36109_s9 + $0x1240] ss:$16 sps:$4 sm:$0xff]  }
 0xcad   :  { %15062 = vmatpush1.bf16.msra.mxu0 %v26394_v59  ;;  %v26465_v59 = vld [vmem:[%s36109_s9 + $0x106c] ss:$16 sps:$4 sm:$0xff]  }
 0xcae   :  { %14693 = vmatpush1.bf16.msra.mxu1 %v26391_v44  ;;  %15063 = vmatprep.subr.bf16.mxu0 %v26402_v45  ;;  %v26463_v44 = vld [vmem:[%s36109_s9 + $0x1068] ss:$16 sps:$4 sm:$0xff]   ;;  %v26468_v45 = vld [vmem:[%s36109_s9 + $0x108c] ss:$16 sps:$4 sm:$0xff]  }
 0xcaf   :  { %14694 = vmatprep.subr.bf16.mxu1 %v26399_v30  ;;  %v26512_v30 = vld [vmem:[%s36110_s10] sm:$0xff]  }
 0xcb1   :  { %15064 = vmatpush1.bf16.msra.mxu0 %v26400_v11  ;;  %v26513_v11 = vld [vmem:[%s36110_s10 + $0x48] sm:$0xff]  }
 0xcb2   :  { %14695 = vmatpush1.bf16.msra.mxu1 %v26397_v46  ;;  %15065 = vmatprep.subr.bf16.mxu0 %v26408_v1  ;;  %v26466_v46 = vld [vmem:[%s36109_s9 + $0x1088] ss:$16 sps:$4 sm:$0xff]   ;;  %v26471_v1 = vld [vmem:[%s36109_s9 + $0x10ac] ss:$16 sps:$4 sm:$0xff]  }
 0xcb3   :  { %14696 = vmatprep.subr.bf16.mxu1 %v26405_v35  ;;  %v26514_v35 = vld [vmem:[%s36110_s10 + $0x8] sm:$0xff]  }
 0xcb5   :  { %15066 = vmatpush1.bf16.msra.mxu0 %v26406_v48  ;;  %v26515_v48 = vld [vmem:[%s36110_s10 + $0x50] sm:$0xff]  }
 0xcb6   :  { %14697 = vmatpush1.bf16.msra.mxu1 %v26403_v51  ;;  %15067 = vmatprep.subr.bf16.mxu0 %v26414_v27  ;;  %v26469_v51 = vld [vmem:[%s36109_s9 + $0x10a8] ss:$16 sps:$4 sm:$0xff]   ;;  %v26474_v27 = vld [vmem:[%s36109_s9 + $0x10cc] ss:$16 sps:$4 sm:$0xff]  }
 0xcb7   :  { %14698 = vmatprep.subr.bf16.mxu1 %v26411_v15  ;;  %v26516_v15 = vld [vmem:[%s36110_s10 + $0x10] sm:$0xff]  }
 0xcb9   :  { %15068 = vmatpush1.bf16.msra.mxu0 %v26412_v52  ;;  %v26517_v52 = vld [vmem:[%s36110_s10 + $0x58] sm:$0xff]  }
 0xcba   :  { %14699 = vmatpush1.bf16.msra.mxu1 %v26409_v62  ;;  %15069 = vmatprep.subr.bf16.mxu0 %v26420_v14  ;;  %v26472_v62 = vld [vmem:[%s36109_s9 + $0x10c8] ss:$16 sps:$4 sm:$0xff]   ;;  %v26477_v14 = vld [vmem:[%s36109_s9 + $0x10ec] ss:$16 sps:$4 sm:$0xff]  }
 0xcbb   :  { %14700 = vmatprep.subr.bf16.mxu1 %v26417_v0  ;;  %v26518_v0 = vld [vmem:[%s36110_s10 + $0x18] sm:$0xff]  }
 0xcbd   :  { %15070 = vmatpush1.bf16.msra.mxu0 %v26418_v40  ;;  %v26519_v40 = vld [vmem:[%s36110_s10 + $0x60] sm:$0xff]  }
 0xcbe   :  { %14701 = vmatpush1.bf16.msra.mxu1 %v26415_v5  ;;  %15071 = vmatprep.subr.bf16.mxu0 %v26426_v16  ;;  %v26475_v5 = vld [vmem:[%s36109_s9 + $0x10e8] ss:$16 sps:$4 sm:$0xff]   ;;  %v26480_v16 = vld [vmem:[%s36109_s9 + $0x110c] ss:$16 sps:$4 sm:$0xff]  }
 0xcbf   :  { %14702 = vmatprep.subr.bf16.mxu1 %v26423_v28  ;;  %v26520_v28 = vld [vmem:[%s36110_s10 + $0x20] sm:$0xff]  }
 0xcc1   :  { %15072 = vmatpush1.bf16.msra.mxu0 %v26424_v3  ;;  %v26521_v3 = vld [vmem:[%s36110_s10 + $0x68] sm:$0xff]  }
 0xcc2   :  { %14703 = vmatpush1.bf16.msra.mxu1 %v26421_v24  ;;  %15073 = vmatprep.subr.bf16.mxu0 %v26432_v20  ;;  %v26478_v24 = vld [vmem:[%s36109_s9 + $0x1108] ss:$16 sps:$4 sm:$0xff]   ;;  %v26483_v20 = vld [vmem:[%s36109_s9 + $0x112c] ss:$16 sps:$4 sm:$0xff]  }
 0xcc3   :  { %14704 = vmatprep.subr.bf16.mxu1 %v26429_v7  ;;  %v26522_v7 = vld [vmem:[%s36110_s10 + $0x28] sm:$0xff]  }
 0xcc5   :  { %15074 = vmatpush1.bf16.msra.mxu0 %v26430_v31  ;;  %v26481_v31 = vld [vmem:[%s36109_s9 + $0x1128] ss:$16 sps:$4 sm:$0xff]  }
 0xcc6   :  { %14705 = vmatpush1.bf16.msra.mxu1 %v26427_v4  ;;  %15075 = vmatprep.subr.bf16.mxu0 %v26438_v38  ;;  %v26486_v4 = vld [vmem:[%s36109_s9 + $0x114c] ss:$16 sps:$4 sm:$0xff]   ;;  %v26484_v38 = vld [vmem:[%s36109_s9 + $0x1148] ss:$16 sps:$4 sm:$0xff]  }
 0xcc7   :  { %14706 = vmatprep.subr.bf16.mxu1 %v26435_v6  ;;  %v26489_v6 = vld [vmem:[%s36109_s9 + $0x116c] ss:$16 sps:$4 sm:$0xff]  }
 0xcc9   :  { %15076 = vmatpush1.bf16.msra.mxu0 %v26436_v63  ;;  %v26487_v63 = vld [vmem:[%s36109_s9 + $0x1168] ss:$16 sps:$4 sm:$0xff]  }
 0xcca   :  { %14707 = vmatpush1.bf16.msra.mxu1 %v26433_v12  ;;  %15077 = vmatprep.subr.bf16.mxu0 %v26444_v34  ;;  %v26492_v12 = vld [vmem:[%s36109_s9 + $0x118c] ss:$16 sps:$4 sm:$0xff]   ;;  %v26490_v34 = vld [vmem:[%s36109_s9 + $0x1188] ss:$16 sps:$4 sm:$0xff]  }
 0xccb   :  { %14708 = vmatprep.subr.bf16.mxu1 %v26441_v61  ;;  %v26495_v61 = vld [vmem:[%s36109_s9 + $0x11ac] ss:$16 sps:$4 sm:$0xff]  }
 0xccd   :  { %15078 = vmatpush1.bf16.msra.mxu0 %v26442_v42  ;;  %v26493_v42 = vld [vmem:[%s36109_s9 + $0x11a8] ss:$16 sps:$4 sm:$0xff]  }
 0xcce   :  { %14709 = vmatpush1.bf16.msra.mxu1 %v26439_v18  ;;  %15088 = vmatprep.subr.bf16.mxu0 %v26450_v21  ;;  %v26498_v18 = vld [vmem:[%s36109_s9 + $0x11cc] ss:$16 sps:$4 sm:$0xff]   ;;  %v26496_v21 = vld [vmem:[%s36109_s9 + $0x11c8] ss:$16 sps:$4 sm:$0xff]  }
 0xccf   :  { %14719 = vmatprep.subr.bf16.mxu1 %v26447_v29  ;;  %v26501_v29 = vld [vmem:[%s36109_s9 + $0x11ec] ss:$16 sps:$4 sm:$0xff]  }
 0xcd0   :  { %15080 = vmatmul.mubr.bf16.vlgmr.msra.gmra.mrb[28].mxu0 %v29439_v25  ;;  %v26459_v25 = vld [vmem:[%s36109_s9 + $0x1244] ss:$16 sps:$4 sm:$0xff]  }
 0xcd1   :  { %14711 = vmatmul.mubr.bf16.vlgmr.msra.gmra.mrb[44].mxu1 %v29641_v56  ;;  %15089 = vmatpush1.bf16.msra.mxu0 %v26448_v50  ;;  %v26499_v50 = vld [vmem:[%s36109_s9 + $0x11e8] ss:$16 sps:$4 sm:$0xff]  }
 0xcd2   :  { %14720 = vmatpush1.bf16.msra.mxu1 %v26445_v19  ;;  %15090 = vmatprep.subr.bf16.mxu0 %v26456_v32  ;;  %v26504_v19 = vld [vmem:[%s36109_s9 + $0x120c] ss:$16 sps:$4 sm:$0xff]   ;;  %v26502_v32 = vld [vmem:[%s36109_s9 + $0x1208] ss:$16 sps:$4 sm:$0xff]  }
 0xcd3   :  { %14721 = vmatprep.subr.bf16.mxu1 %v26453_v23  ;;  %14751 = vmatprep.mubr.bf16.mxu1 %v27646_v2  ;;  %v26507_v23 = vld [vmem:[%s36109_s9 + $0x122c] ss:$16 sps:$4 sm:$0xff]  }
 0xcd4   :  { %15120 = vmatprep.mubr.bf16.mxu0 %v29453_v26  ;;  %v26511_v26 = vld [vmem:[%s36110_s10 + $0x40] sm:$0xff]  }
 0xcd5   :  { %15091 = vmatpush1.bf16.msra.mxu0 %v26454_v36  ;;  %v26505_v36 = vld [vmem:[%s36109_s9 + $0x1228] ss:$16 sps:$4 sm:$0xff]  }
 0xcd6   :  { %14722 = vmatpush1.bf16.msra.mxu1 %v26451_v55  ;;  %15092 = vmatprep.subr.bf16.mxu0 %v26462_v9  ;;  %v26510_v55 = vld [vmem:[%s36109_s9 + $0x124c] ss:$16 sps:$4 sm:$0xff]   ;;  %v26508_v9 = vld [vmem:[%s36109_s9 + $0x1248] ss:$16 sps:$4 sm:$0xff]  }
 0xcd7   :  { %14723 = vmatprep.subr.bf16.mxu1 %v26459_v25  ;;  %v26524_v25 = vld [vmem:[%s36110_s10 + $0x30] sm:$0xff]  }
 0xcd9   :  { %15093 = vmatpush1.bf16.msra.mxu0 %v26460_v41  ;;  %v26525_v41 = vld [vmem:[%s36110_s10 + $0x78] sm:$0xff]  }
 0xcda   :  { %14724 = vmatpush1.bf16.msra.mxu1 %v26457_v37  ;;  %15094 = vmatprep.subr.bf16.mxu0 %v26465_v59  ;;  %v26526_v37 = vld [vmem:[%s36110_s10 + $0x38] sm:$0xff]   ;;  %v11388_v59 = vld [vmem:[%s36113_s13 + $0x20] sm:$0xf] }
 0xcdb   :  { %23264 = vmatprep.subr.bf16.mxu1 %v26511_v26  ;;  %v11393_v26 = vrot.slane %v11388_v59, %v29821_v47 }
 0xcdd   :  { %22531 = vmatmul.mubr.msk.bf16.vlgmr.msra.gmra.mrb[44].mxu1 %vm3734_vm0, %v29680_v8  ;;  %15095 = vmatpush1.bf16.msra.mxu0 %v26463_v44  ;;  %v11397_v44 = vrot.slane %v11388_v59, %v29824_v13 }
 0xcde   :  { %15096 = vmatprep.subr.bf16.mxu0 %v26468_v45  ;;  %23265 = vmatpush3.bf16.msra.mxu1 %v26512_v30 }
 0xcdf   :  { %23266 = vmatprep.subr.bf16.mxu1 %v26513_v11 }
 0xce1   :  { %15097 = vmatpush1.bf16.msra.mxu0 %v26466_v46 }
 0xce2   :  { %15098 = vmatprep.subr.bf16.mxu0 %v26471_v1  ;;  %23267 = vmatpush3.bf16.msra.mxu1 %v26514_v35 }
 0xce3   :  { %23268 = vmatprep.subr.bf16.mxu1 %v26515_v48 }
 0xce5   :  { %15099 = vmatpush1.bf16.msra.mxu0 %v26469_v51 }
 0xce6   :  { %15100 = vmatprep.subr.bf16.mxu0 %v26474_v27  ;;  %23269 = vmatpush3.bf16.msra.mxu1 %v26516_v15  ;;  %v26528_v15 = vld [vmem:[%s36110_s10 + $0x80] sm:$0xff]  }
 0xce7   :  { %23270 = vmatprep.subr.bf16.mxu1 %v26517_v52 }
 0xce9   :  { %15101 = vmatpush1.bf16.msra.mxu0 %v26472_v62  ;;  %v26529_v62 = vld [vmem:[%s36110_s10 + $0xc8] sm:$0xff]  }
 0xcea   :  { %15102 = vmatprep.subr.bf16.mxu0 %v26477_v14  ;;  %23271 = vmatpush3.bf16.msra.mxu1 %v26518_v0  ;;  %v26530_v14 = vld [vmem:[%s36110_s10 + $0x88] sm:$0xff]   ;;  %v26531_v0 = vld [vmem:[%s36110_s10 + $0xd0] sm:$0xff]  }
 0xceb   :  { %23272 = vmatprep.subr.bf16.mxu1 %v26519_v40  ;;  %v26532_v40 = vld [vmem:[%s36110_s10 + $0x90] sm:$0xff]  }
 0xced   :  { %15103 = vmatpush1.bf16.msra.mxu0 %v26475_v5  ;;  %v26533_v5 = vld [vmem:[%s36110_s10 + $0xd8] sm:$0xff]  }
 0xcee   :  { %15104 = vmatprep.subr.bf16.mxu0 %v26480_v16  ;;  %23273 = vmatpush3.bf16.msra.mxu1 %v26520_v28  ;;  %v26534_v16 = vld [vmem:[%s36110_s10 + $0x98] sm:$0xff]   ;;  %v26535_v28 = vld [vmem:[%s36110_s10 + $0xe0] sm:$0xff]  }
 0xcef   :  { %23274 = vmatprep.subr.bf16.mxu1 %v26521_v3  ;;  %v26536_v3 = vld [vmem:[%s36110_s10 + $0xa0] sm:$0xff]  }
 0xcf1   :  { %15105 = vmatpush1.bf16.msra.mxu0 %v26478_v24  ;;  %v26537_v24 = vld [vmem:[%s36110_s10 + $0xe8] sm:$0xff]  }
 0xcf2   :  { %15106 = vmatprep.subr.bf16.mxu0 %v26483_v20  ;;  %23275 = vmatpush3.bf16.msra.mxu1 %v26522_v7  ;;  %v26538_v20 = vld [vmem:[%s36110_s10 + $0xa8] sm:$0xff]   ;;  %v26539_v7 = vld [vmem:[%s36110_s10 + $0xf0] sm:$0xff]  }
 0xcf5   :  { %15107 = vmatpush1.bf16.msra.mxu0 %v26481_v31  ;;  %v26540_v31 = vld [vmem:[%s36110_s10 + $0xb0] sm:$0xff]  }
 0xcf6   :  { %15108 = vmatprep.subr.bf16.mxu0 %v26486_v4  ;;  %v26541_v4 = vld [vmem:[%s36110_s10 + $0xf8] sm:$0xff]  }
 0xcf9   :  { %15109 = vmatpush1.bf16.msra.mxu0 %v26484_v38  ;;  %v26542_v38 = vld [vmem:[%s36110_s10 + $0xb8] sm:$0xff]  }
 0xcfa   :  { %15110 = vmatprep.subr.bf16.mxu0 %v26489_v6  ;;  %v11401_v6 = vrot.slane %v11388_v59, %v29916_v33 }
 0xcfd   :  { %15111 = vmatpush1.bf16.msra.mxu0 %v26487_v63  ;;  %v11405_v63 = vrot.slane %v11388_v59, %v29827_v17 }
 0xcfe   :  { %15112 = vmatprep.subr.bf16.mxu0 %v26492_v12 }
 0xd01   :  { %15113 = vmatpush1.bf16.msra.mxu0 %v26490_v34 }
 0xd02   :  { %15114 = vmatprep.subr.bf16.mxu0 %v26495_v61 }
 0xd05   :  { %15115 = vmatpush1.bf16.msra.mxu0 %v26493_v42 }
 0xd06   :  { %15116 = vmatprep.subr.bf16.mxu0 %v26498_v18 }
 0xd09   :  { %15117 = vmatpush1.bf16.msra.mxu0 %v26496_v21 }
 0xd0a   :  { %15118 = vmatprep.subr.bf16.mxu0 %v26501_v29 }
 0xd0d   :  { %15119 = vmatpush1.bf16.msra.mxu0 %v26499_v50 }
 0xd0e   :  { %15129 = vmatprep.subr.bf16.mxu0 %v26504_v19 }
 0xd10   :  { %15121 = vmatmul.mubr.bf16.vlgmr.msra.gmra.mrb[28].mxu0 %v29641_v56  ;;  %v26523_v56 = vld [vmem:[%s36110_s10 + $0x70] sm:$0xff]  }
 0xd11   :  { %15130 = vmatpush1.bf16.msra.mxu0 %v26502_v32  ;;  %15161 = vmatprep.mubr.bf16.mxu0 %v27646_v2 }
 0xd12   :  { %15131 = vmatprep.subr.bf16.mxu0 %v26507_v23  ;;  %23276 = vmatprep.subr.bf16.mxu1 %v26523_v56  ;;  %v22566_v23 = vld.sshfl [vmem:[%s36111_s11] sm:$0x33 pattern:$0x75316420] }
 0xd13   :  { %23277 = vmatpush3.bf16.msra.mxu1 %v26524_v25 }
 0xd14   :  { %23278 = vmatprep.subr.bf16.mxu1 %v26525_v41 }
 0xd15   :  { %15132 = vmatpush1.bf16.msra.mxu0 %v26505_v36  ;;  %v27650_v36 = vmov 1966171168  }
 0xd16   :  { %15133 = vmatprep.subr.bf16.mxu0 %v26510_v55  ;;  %v15569_v55 = vunpack.c.l.s4 %v27650_v36  ;;  %v26558_v36 = vld [vmem:[%s36112_s12 + $0x138] ss:$76 sps:$4 sm:$0xff]  }
 0xd17   :  { %23279 = vmatpush3.bf16.msra.mxu1 %v26526_v37 }
 0xd18   :  { %v15570_v56 = vunpack.c.0.s8 %v15569_v55  ;;  %v26566_v55 = vld [vmem:[%s36112_s12 + $0x1d4] ss:$76 sps:$4 sm:$0xff]  }
 0xd19   :  { %15134 = vmatpush1.bf16.msra.mxu0 %v26508_v9  ;;  %v15567_v9 = vcombine.high %v22566_v23, %v22566_v23 }
 0xd1a   :  { %v15573_v25 = vsub.s32 %v15570_v56, %v27855_v43  ;;  %v26593_v56 = vld [vmem:[%s36112_s12 + $0x4c4] ss:$76 sps:$4 sm:$0xff]  }
 0xd1c   :  { %22532 = vmatmul.mubr.msk.bf16.vlgmr.msra.gmra.mrb[28].mxu0 %vm3734_vm0, %v29680_v8  ;;  %v26527_v8 = vld [vmem:[%s36110_s10 + $0xc0] sm:$0xff]   ;;  %v15574_v59 = vrot.slane %v22566_v23, %v15573_v25  ;;  %v26587_v23 = vld [vmem:[%s36112_s12 + $0x42c] ss:$76 sps:$4 sm:$0xff]  }
 0xd1d   :  { %23286 = vmatprep.subr.bf16.mxu1 %v26527_v8  ;;  %v15581_v8 = vrot.slane %v15567_v9, %v15573_v25  ;;  %v26585_v9 = vld [vmem:[%s36112_s12 + $0x428] ss:$76 sps:$4 sm:$0xff]   ;;  %v26564_v25 = vld [vmem:[%s36112_s12 + $0x1d0] ss:$76 sps:$4 sm:$0xff]  }
 0xdb0   :  { %v14753_v45 = vpop.f32.mrb[44].mxu1 }
 0xdb1   :  { %v23376_v30 = vadd.f32 %v14753_v45, %v11393_v26  ;;  %v14755_v11 = vpop.f32.mrb[45].mxu1 }
 0xdb2   :  { %v23377_v46 = vadd.f32 %v14755_v11, %v11397_v44  ;;  %v14757_v1 = vpop.f32.mrb[46].mxu1  ;;  %v22533_v11 = vld [vmem:[%s36113_s13 + $0x24] ss:$0 sm:$0xff] }
 0xdb3   :  { %v15170_v35 = vmax.f32 %v23376_v30, 0.0  ;;  %v14758_v48 = vpop.f32.mrb[47].mxu1  ;;  %v15590_v30 = vsel %vm15588_vm13, %v15574_v59, 0 }
 0xdb4   :  { %v15171_v51 = vmax.f32 %v23377_v46, 0.0 }
 0xdb5   :  { %v15174_v52 = vpack.c.bf16 %v15170_v35, %v15170_v35 }
 0xdb6   :  { %v15175_v27 = vpack.c.bf16 %v15171_v51, %v15171_v51 }
 0xdb8   :  { %15473 = vmatprep.mubr.bf16.mxu1 %v15175_v27 }
 0xdb9   :  { %15474 = vmatmul.mubr.bf16.vlgmr.msra.gmra.mrb[48].mxu1 %v15174_v52 }
 0xdba   :  { %23287 = vmatpush3.bf16.msra.mxu1 %v26528_v15 }
 0xdbb   :  { %23288 = vmatprep.subr.bf16.mxu1 %v26529_v62  ;;  %v15583_v62 = vcombine.high %v15581_v8, %v15581_v8 }
 0xdbe   :  { %23289 = vmatpush3.bf16.msra.mxu1 %v26530_v14 }
 0xdbf   :  { %23290 = vmatprep.subr.bf16.mxu1 %v26531_v0 }
 0xdc2   :  { %23291 = vmatpush3.bf16.msra.mxu1 %v26532_v40  ;;  %v5272_v40 = vsel %vm5256_vm1, %v29960_v39, -inf }
 0xdc3   :  { %23292 = vmatprep.subr.bf16.mxu1 %v26533_v5  ;;  %v26543_v5 = vld [vmem:[%s36112_s12] ss:$76 sps:$4 sm:$0xff]  }
 0xdc6   :  { %23293 = vmatpush3.bf16.msra.mxu1 %v26534_v16  ;;  %v26545_v16 = vld [vmem:[%s36112_s12 + $0x4] ss:$76 sps:$4 sm:$0xff]  }
 0xdc7   :  { %23294 = vmatprep.subr.bf16.mxu1 %v26535_v28  ;;  %v26551_v28 = vld [vmem:[%s36112_s12 + $0x9c] ss:$76 sps:$4 sm:$0xff]   ;;  %19504 = vmatprep.subr.bf16.mxu0 %v26545_v16  ;;  %v26614_v16 = vld [vmem:[%s36112_s12 + $0x694] ss:$76 sps:$4 sm:$0xff]  }
 0xdc8   :  { %19505 = vmatpush1.bf16.msra.mxu0 %v26543_v5  ;;  %v26611_v5 = vld [vmem:[%s36112_s12 + $0x68c] ss:$76 sps:$4 sm:$0xff]  }
 0xdc9   :  { %19506 = vmatprep.subr.bf16.mxu0 %v26551_v28  ;;  %v26609_v28 = vld [vmem:[%s36112_s12 + $0x688] ss:$76 sps:$4 sm:$0xff]  }
 0xdca   :  { %23295 = vmatpush3.bf16.msra.mxu1 %v26536_v3  ;;  %v26557_v3 = vld [vmem:[%s36112_s12 + $0x134] ss:$76 sps:$4 sm:$0xff]  }
 0xdcb   :  { %23296 = vmatprep.subr.bf16.mxu1 %v26537_v24  ;;  %v26555_v24 = vld [vmem:[%s36112_s12 + $0x130] ss:$76 sps:$4 sm:$0xff]  }
 0xdce   :  { %23297 = vmatpush3.bf16.msra.mxu1 %v26538_v20  ;;  %v15582_v20 = vcombine.high %v15574_v59, %v15574_v59  ;;  %v26578_v59 = vld [vmem:[%s36112_s12 + $0x304] ss:$76 sps:$4 sm:$0xff]  }
 0xdcf   :  { %23298 = vmatprep.subr.bf16.mxu1 %v26539_v7  ;;  %v26563_v7 = vld [vmem:[%s36112_s12 + $0x1cc] ss:$76 sps:$4 sm:$0xff]  }
 0xdd2   :  { %23299 = vmatpush3.bf16.msra.mxu1 %v26540_v31 }
 0xdd3   :  { %23300 = vmatprep.subr.bf16.mxu1 %v26541_v4 }
 0xdd6   :  { %23301 = vmatpush3.bf16.msra.mxu1 %v26542_v38 }
 0xdd7   :  { %22567 = vmatprep.subr.msk.bf16.mxu1 %vm15588_vm13, %v15581_v8  ;;  %v26570_v8 = vld [vmem:[%s36112_s12 + $0x268] ss:$76 sps:$4 sm:$0xff]  }
 0xdef   :  { %v15163_v12 = vpop.f32.mrb[28].mxu0 }
 0xdf0   :  { %v23378_v34 = vadd.f32 %v15163_v12, %v11401_v6  ;;  %v15165_v61 = vpop.f32.mrb[29].mxu0  ;;  %v15596_v6 = vsel %vm15588_vm13, %v15582_v20, 0  ;;  %v26561_v12 = vld [vmem:[%s36112_s12 + $0x1c8] ss:$76 sps:$4 sm:$0xff]  }
 0xdf1   :  { %v23379_v42 = vadd.f32 %v15165_v61, %v11405_v63  ;;  %v15167_v18 = vpop.f32.mrb[30].mxu0  ;;  %v26548_v63 = vld [vmem:[%s36112_s12 + $0xc] ss:$76 sps:$4 sm:$0xff]  }
 0xdf2   :  { %v15172_v21 = vmax.f32 %v23378_v34, 0.0  ;;  %v15168_v29 = vpop.f32.mrb[31].mxu0  ;;  %v26569_v34 = vld [vmem:[%s36112_s12 + $0x264] ss:$76 sps:$4 sm:$0xff]   ;;  %v26567_v61 = vld [vmem:[%s36112_s12 + $0x260] ss:$76 sps:$4 sm:$0xff]  }
 0xdf3   :  { %v15173_v50 = vmax.f32 %v23379_v42, 0.0  ;;  %v26575_v42 = vld [vmem:[%s36112_s12 + $0x2fc] ss:$76 sps:$4 sm:$0xff]   ;;  %v26581_v29 = vld [vmem:[%s36112_s12 + $0x394] ss:$76 sps:$4 sm:$0xff]  }
 0xdf4   :  { %v15176_v32 = vpack.c.bf16 %v15172_v21, %v15172_v21  ;;  %v26546_v18 = vld [vmem:[%s36112_s12 + $0x8] ss:$76 sps:$4 sm:$0xff]   ;;  %v26554_v21 = vld [vmem:[%s36112_s12 + $0xa4] ss:$76 sps:$4 sm:$0xff]  }
 0xdf5   :  { %v15177_v19 = vpack.c.bf16 %v15173_v50, %v15173_v50  ;;  %v26552_v50 = vld [vmem:[%s36112_s12 + $0xa0] ss:$76 sps:$4 sm:$0xff]  }
 0xdf7   :  { %15513 = vmatprep.mubr.bf16.mxu1 %v15177_v19  ;;  %v26560_v19 = vld [vmem:[%s36112_s12 + $0x13c] ss:$76 sps:$4 sm:$0xff]  }
 0xdf8   :  { %15514 = vmatmul.mubr.bf16.vlgmr.msra.gmra.mrb[52].mxu1 %v15176_v32  ;;  %v26579_v32 = vld [vmem:[%s36112_s12 + $0x390] ss:$76 sps:$4 sm:$0xff]  }
 0xdf9   :  { %15633 = vmatprep.mubr.bf16.mxu1 %v27646_v2  ;;  %15602 = vmatpush1.bf16.msra.mxu1 %v15590_v30  ;;  %v26590_v30 = vld [vmem:[%s36112_s12 + $0x434] ss:$76 sps:$4 sm:$0xff]  }
 0xdfa   :  { %22569 = vmatprep.subr.msk.bf16.mxu1 %vm15588_vm13, %v15583_v62  ;;  %v26605_v62 = vld [vmem:[%s36112_s12 + $0x5f4] ss:$76 sps:$4 sm:$0xff]  }
 0xe8c   :  { %v23280_v41 = vpop.f32.mrb[48].mxu1 }
 0xe8d   :  { %v23281_v37 = vpop.f32.mrb[49].mxu1 }
 0xe8e   :  { %v23282_v26 = vadd.f32 %v23281_v37, %v23280_v41  ;;  %v23283_v44 = vpop.f32.mrb[50].mxu1  ;;  %v26572_v41 = vld [vmem:[%s36112_s12 + $0x26c] ss:$76 sps:$4 sm:$0xff]  }
 0xe8f   :  { %v23284_v45 = vpop.f32.mrb[51].mxu1  ;;  %v26591_v37 = vld [vmem:[%s36112_s12 + $0x4c0] ss:$76 sps:$4 sm:$0xff]   ;;  %v26584_v44 = vld [vmem:[%s36112_s12 + $0x39c] ss:$76 sps:$4 sm:$0xff]  }
 0xe90   :  { %v15476_v43 = vadd.f32 %v23282_v26, %v22533_v11  ;;  %v26576_v26 = vld [vmem:[%s36112_s12 + $0x300] ss:$76 sps:$4 sm:$0xff]   ;;  %v26582_v45 = vld [vmem:[%s36112_s12 + $0x398] ss:$76 sps:$4 sm:$0xff]   ;;  %v26588_v11 = vld [vmem:[%s36112_s12 + $0x430] ss:$76 sps:$4 sm:$0xff]  }
 0xecb   :  { %v23302_v46 = vpop.f32.mrb[52].mxu1 }
 0xecc   :  { %v23303_v1 = vpop.f32.mrb[53].mxu1 }
 0xecd   :  { %v23304_v35 = vadd.f32 %v23303_v1, %v23302_v46  ;;  %v23305_v48 = vpop.f32.mrb[54].mxu1  ;;  %v26596_v46 = vld [vmem:[%s36112_s12 + $0x4cc] ss:$76 sps:$4 sm:$0xff]   ;;  %v26594_v1 = vld [vmem:[%s36112_s12 + $0x4c8] ss:$76 sps:$4 sm:$0xff]  }
 0xece   :  { %v23306_v51 = vpop.f32.mrb[55].mxu1 }
 0xecf   :  { %v15516_v27 = vadd.f32 %v23304_v35, %v15476_v43  ;;  %v26597_v51 = vld [vmem:[%s36112_s12 + $0x558] ss:$76 sps:$4 sm:$0xff]  }
 0xed1   :  { %v15521_v15 = vmul.f32 0.5, %v15516_v27 }
 0xed3   :  { %v15522_v52 = vmul.f32 1.442695, %v15521_v15  ;;  %v26600_v15 = vld [vmem:[%s36112_s12 + $0x560] ss:$76 sps:$4 sm:$0xff]  }
 0xed5   :  { %27533 = vpow2.f32 %v15522_v52  ;;  %v26602_v52 = vld [vmem:[%s36112_s12 + $0x564] ss:$76 sps:$4 sm:$0xff]  }
 0xedf   :  { %v27534_v14 = vpop.eup %27533 }
 0xee0   :  { %v15529_v0 = vmul.f32 %v27534_v14, %v30016_v53  ;;  %v26549_v53 = vld [vmem:[%s36112_s12 + $0x98] ss:$76 sps:$4 sm:$0xff]   ;;  %v26608_v14 = vld [vmem:[%s36112_s12 + $0x5fc] ss:$76 sps:$4 sm:$0xff]  }
 0xee1   :  { %19507 = vmatpush1.bf16.msra.mxu0 %v26549_v53  ;;  %v26612_v53 = vld [vmem:[%s36112_s12 + $0x690] ss:$76 sps:$4 sm:$0xff]  }
 0xee2   :  { %15531 = vrot.lane.b32.xlu1 %v15529_v0, %s27651_s30  ;;  %19508 = vmatprep.subr.bf16.mxu0 %v26557_v3  ;;  %v26603_v0 = vld [vmem:[%s36112_s12 + $0x5f0] ss:$76 sps:$4 sm:$0xff]  }
 0xee3   :  { %v26617_v3 = vld [vmem:[%s36112_s12 + $0x724] ss:$76 sps:$4 sm:$0xff]  }
 0xee5   :  { %19509 = vmatpush1.bf16.msra.mxu0 %v26555_v24  ;;  %v26620_v24 = vld [vmem:[%s36112_s12 + $0x72c] ss:$76 sps:$4 sm:$0xff]  }
 0xee6   :  { %19510 = vmatprep.subr.bf16.mxu0 %v26563_v7  ;;  %v26615_v7 = vld [vmem:[%s36112_s12 + $0x720] ss:$76 sps:$4 sm:$0xff]  }
 0xee9   :  { %19511 = vmatpush1.bf16.msra.mxu0 %v26561_v12  ;;  %v26629_v12 = vld [vmem:[%s36112_s12 + $0x854] ss:$76 sps:$4 sm:$0xff]  }
 0xeea   :  { %19512 = vmatprep.subr.bf16.mxu0 %v26569_v34  ;;  %v26632_v34 = vld [vmem:[%s36112_s12 + $0x85c] ss:$76 sps:$4 sm:$0xff]  }
 0xeed   :  { %19513 = vmatpush1.bf16.msra.mxu0 %v26567_v61  ;;  %v26627_v61 = vld [vmem:[%s36112_s12 + $0x850] ss:$76 sps:$4 sm:$0xff]  }
 0xeee   :  { %19514 = vmatprep.subr.bf16.mxu0 %v26575_v42  ;;  %v26630_v42 = vld [vmem:[%s36112_s12 + $0x858] ss:$76 sps:$4 sm:$0xff]  }
 0xf06   :  { %5273 = vmax.xlane.f32.xlu1 %v5272_v40  ;;  %v26606_v40 = vld [vmem:[%s36112_s12 + $0x5f8] ss:$76 sps:$4 sm:$0xff]  }
 0xf54   :  { %v15532_v31 = vpop.permute.xlu1 %15531 }
 0xf55   :  { %v15534_v4 = vadd.f32 %v15532_v31, %v15516_v27  ;;  %v26599_v27 = vld [vmem:[%s36112_s12 + $0x55c] ss:$76 sps:$4 sm:$0xff]  }
 0xf56   :  { %v26618_v31 = vld [vmem:[%s36112_s12 + $0x728] ss:$76 sps:$4 sm:$0xff]  }
 0xf57   :  { %v15535_v38 = vpack.c.bf16 %v15534_v4, %v15534_v4  ;;  %v26623_v4 = vld [vmem:[%s36112_s12 + $0x7bc] ss:$76 sps:$4 sm:$0xff]  }
 0xf59   :  { %22568 = vmatmul.mubr.msk.bf16.vlgmr.msra.gmra.mrb[56].mxu1 %vm15584_vm14, %v15535_v38 }
 0xf5a   :  { %15643 = vmatpush1.bf16.msra.mxu1 %v15596_v6  ;;  %15674 = vmatprep.mubr.bf16.mxu1 %v27646_v2  ;;  %v26573_v2 = vld [vmem:[%s36112_s12 + $0x2f8] ss:$76 sps:$4 sm:$0xff]  }
 0xf5b   :  { %19586 = vmatprep.subr.bf16.mxu1 %v26548_v63  ;;  %19515 = vmatpush1.bf16.msra.mxu0 %v26573_v2  ;;  %v26621_v6 = vld [vmem:[%s36112_s12 + $0x7b8] ss:$76 sps:$4 sm:$0xff]   ;;  %v26624_v63 = vld [vmem:[%s36112_s12 + $0x7c0] ss:$76 sps:$4 sm:$0xff]  }
 0xf5c   :  { %19516 = vmatprep.subr.bf16.mxu0 %v26581_v29  ;;  %v26638_v2 = vld [vmem:[%s36112_s12 + $0x8f4] ss:$76 sps:$4 sm:$0xff]  }
 0xf5f   :  { %19517 = vmatpush1.bf16.msra.mxu0 %v26579_v32  ;;  %v26641_v32 = vld [vmem:[%s36112_s12 + $0x984] ss:$76 sps:$4 sm:$0xff]  }
 0xf60   :  { %19518 = vmatprep.subr.bf16.mxu0 %v26587_v23 }
 0xf61   :  { %22570 = vmatmul.mubr.msk.bf16.vlgmr.msra.gmra.mrb[60].mxu1 %vm15584_vm14, %v15535_v38  ;;  %v26626_v38 = vld [vmem:[%s36112_s12 + $0x7c4] ss:$76 sps:$4 sm:$0xff]  }
 0xf62   :  { %19587 = vmatpush1.bf16.msra.mxu1 %v26546_v18  ;;  %v5247_v18 = vpop.xlane.xlu0 %5246 }
 0xf63   :  { %19588 = vmatprep.subr.bf16.mxu1 %v26554_v21  ;;  %19519 = vmatpush1.bf16.msra.mxu0 %v26585_v9  ;;  %v26635_v21 = vld [vmem:[%s36112_s12 + $0x8ec] ss:$76 sps:$4 sm:$0xff]   ;;  %v5248_v29 = vsub.f32 %v29960_v39, %v5247_v18  ;;  %v26665_v18 = vld [vmem:[%s36112_s12 + $0xbe4] ss:$76 sps:$4 sm:$0xff]  }
 0xf64   :  { %19520 = vmatprep.subr.bf16.mxu0 %v26593_v56 }
 0xf65   :  { %v5249_v23 = vmul.f32 1.442695, %v5248_v29  ;;  %v26666_v29 = vld [vmem:[%s36112_s12 + $0xbe8] ss:$76 sps:$4 sm:$0xff]  }
 0xf66   :  { %19589 = vmatpush1.bf16.msra.mxu1 %v26552_v50  ;;  %v26633_v50 = vld [vmem:[%s36112_s12 + $0x8e8] ss:$76 sps:$4 sm:$0xff]   ;;  %v5311_v9 = vpop.permute.xlu0 %5310 }
 0xf67   :  { %19590 = vmatprep.subr.bf16.mxu1 %v26560_v19  ;;  %19521 = vmatpush1.bf16.msra.mxu0 %v26591_v37  ;;  %v26636_v19 = vld [vmem:[%s36112_s12 + $0x8f0] ss:$76 sps:$4 sm:$0xff]   ;;  %v5313_v56 = vsel %vm5233_vm2, %v5311_v9, 0.0  ;;  %v15537_v37 = vld [vmem:[%s36113_s13 + $0x25] sm:$0xf] }
 0xf68   :  { %19522 = vmatprep.subr.bf16.mxu0 %v26599_v27  ;;  %v26642_v27 = vld [vmem:[%s36112_s12 + $0x988] ss:$76 sps:$4 sm:$0xff]   ;;  %v26675_v9 = vld [vmem:[%s36112_s12 + $0xd10] ss:$76 sps:$4 sm:$0xff]  }
 0xf6a   :  { %19591 = vmatpush1.bf16.msra.mxu1 %v26558_v36 }
 0xf6b   :  { %19592 = vmatprep.subr.bf16.mxu1 %v26566_v55  ;;  %19523 = vmatpush1.bf16.msra.mxu0 %v26597_v51  ;;  %v26639_v51 = vld [vmem:[%s36112_s12 + $0x980] ss:$76 sps:$4 sm:$0xff]  }
 0xf6c   :  { %19524 = vmatprep.subr.bf16.mxu0 %v26605_v62  ;;  %v26647_v62 = vld [vmem:[%s36112_s12 + $0xa1c] ss:$76 sps:$4 sm:$0xff]  }
 0xf6e   :  { %19593 = vmatpush1.bf16.msra.mxu1 %v26564_v25 }
 0xf6f   :  { %19594 = vmatprep.subr.bf16.mxu1 %v26572_v41  ;;  %19525 = vmatpush1.bf16.msra.mxu0 %v26603_v0 }
 0xf70   :  { %19526 = vmatprep.subr.bf16.mxu0 %v26611_v5 }
 0xf72   :  { %19595 = vmatpush1.bf16.msra.mxu1 %v26570_v8  ;;  %v15542_v8 = vrot.slane %v15537_v37, %v29821_v47 }
 0xf73   :  { %19596 = vmatprep.subr.bf16.mxu1 %v26578_v59  ;;  %19527 = vmatpush1.bf16.msra.mxu0 %v26609_v28  ;;  %v15546_v59 = vrot.slane %v15537_v37, %v29824_v13 }
 0xf74   :  { %19528 = vmatprep.subr.bf16.mxu0 %v26617_v3  ;;  %v26648_v3 = vld [vmem:[%s36112_s12 + $0xa20] ss:$76 sps:$4 sm:$0xff]  }
 0xf76   :  { %19597 = vmatpush1.bf16.msra.mxu1 %v26576_v26 }
 0xf77   :  { %19598 = vmatprep.subr.bf16.mxu1 %v26584_v44  ;;  %19529 = vmatpush1.bf16.msra.mxu0 %v26615_v7  ;;  %v26653_v7 = vld [vmem:[%s36112_s12 + $0xab4] ss:$76 sps:$4 sm:$0xff]  }
 0xf78   :  { %19530 = vmatprep.subr.bf16.mxu0 %v26623_v4 }
 0xf7a   :  { %19599 = vmatpush1.bf16.msra.mxu1 %v26582_v45 }
 0xf7b   :  { %19600 = vmatprep.subr.bf16.mxu1 %v26590_v30  ;;  %19531 = vmatpush1.bf16.msra.mxu0 %v26621_v6  ;;  %v26651_v6 = vld [vmem:[%s36112_s12 + $0xab0] ss:$76 sps:$4 sm:$0xff]  }
 0xf7c   :  { %19532 = vmatprep.subr.bf16.mxu0 %v26629_v12  ;;  %v26659_v12 = vld [vmem:[%s36112_s12 + $0xb4c] ss:$76 sps:$4 sm:$0xff]  }
 0xf7e   :  { %19601 = vmatpush1.bf16.msra.mxu1 %v26588_v11 }
 0xf7f   :  { %19602 = vmatprep.subr.bf16.mxu1 %v26596_v46  ;;  %19533 = vmatpush1.bf16.msra.mxu0 %v26627_v61  ;;  %v26657_v61 = vld [vmem:[%s36112_s12 + $0xb48] ss:$76 sps:$4 sm:$0xff]  }
 0xf80   :  { %19534 = vmatprep.subr.bf16.mxu0 %v26635_v21  ;;  %v26668_v21 = vld [vmem:[%s36112_s12 + $0xbec] ss:$76 sps:$4 sm:$0xff]  }
 0xf82   :  { %19603 = vmatpush1.bf16.msra.mxu1 %v26594_v1 }
 0xf83   :  { %19604 = vmatprep.subr.bf16.mxu1 %v26602_v52  ;;  %19535 = vmatpush1.bf16.msra.mxu0 %v26633_v50  ;;  %v26671_v50 = vld [vmem:[%s36112_s12 + $0xc7c] ss:$76 sps:$4 sm:$0xff]  }
 0xf84   :  { %19545 = vmatprep.subr.bf16.mxu0 %v26641_v32  ;;  %v26669_v32 = vld [vmem:[%s36112_s12 + $0xc78] ss:$76 sps:$4 sm:$0xff]  }
 0xf86   :  { %19605 = vmatpush1.bf16.msra.mxu1 %v26600_v15  ;;  %v15554_v15 = vrot.slane %v15537_v37, %v29827_v17 }
 0xf87   :  { %19606 = vmatprep.subr.bf16.mxu1 %v26608_v14  ;;  %v26650_v14 = vld [vmem:[%s36112_s12 + $0xa24] ss:$76 sps:$4 sm:$0xff]  }
 0xf8a   :  { %19607 = vmatpush1.bf16.msra.mxu1 %v26606_v40 }
 0xf8b   :  { %19608 = vmatprep.subr.bf16.mxu1 %v26614_v16 }
 0xf8e   :  { %19609 = vmatpush1.bf16.msra.mxu1 %v26612_v53  ;;  %v26645_v53 = vld [vmem:[%s36112_s12 + $0xa18] ss:$76 sps:$4 sm:$0xff]  }
 0xf8f   :  { %19610 = vmatprep.subr.bf16.mxu1 %v26620_v24 }
 0xf92   :  { %19611 = vmatpush1.bf16.msra.mxu1 %v26618_v31  ;;  %v26656_v31 = vld [vmem:[%s36112_s12 + $0xabc] ss:$76 sps:$4 sm:$0xff]  }
 0xf93   :  { %v5274_v43 = vpop.xlane.xlu1 %5273  ;;  %19612 = vmatprep.subr.bf16.mxu1 %v26626_v38 }
 0xf94   :  { %v5275_v35 = vsub.f32 %v29960_v39, %v5274_v43  ;;  %v26644_v39 = vld [vmem:[%s36112_s12 + $0x98c] ss:$76 sps:$4 sm:$0xff]  }
 0xf96   :  { %v5276_v48 = vmul.f32 1.442695, %v5275_v35  ;;  %19613 = vmatpush1.bf16.msra.mxu1 %v26624_v63  ;;  %v15550_v35 = vrot.slane %v15537_v37, %v29916_v33  ;;  %v26654_v63 = vld [vmem:[%s36112_s12 + $0xab8] ss:$76 sps:$4 sm:$0xff]   ;;  %v26681_v37 = vld [vmem:[%s36112_s12 + $0xda8] ss:$76 sps:$4 sm:$0xff]  }
 0xf97   :  { %19614 = vmatprep.subr.bf16.mxu1 %v26632_v34  ;;  %v26662_v34 = vld [vmem:[%s36112_s12 + $0xb54] ss:$76 sps:$4 sm:$0xff]  }
 0xf98   :  { %27535 = vpow2.f32 %v5276_v48 }
 0xf99   :  { %27537 = vpow2.f32 %v5249_v23  ;;  %v26677_v23 = vld [vmem:[%s36112_s12 + $0xd14] ss:$76 sps:$4 sm:$0xff]  }
 0xf9a   :  { %19615 = vmatpush1.bf16.msra.mxu1 %v26630_v42  ;;  %v26660_v42 = vld [vmem:[%s36112_s12 + $0xb50] ss:$76 sps:$4 sm:$0xff]  }
 0xf9b   :  { %19616 = vmatprep.subr.bf16.mxu1 %v26638_v2  ;;  %v26663_v2 = vld [vmem:[%s36112_s12 + $0xbe0] ss:$76 sps:$4 sm:$0xff]  }
 0xf9e   :  { %19617 = vmatpush1.bf16.msra.mxu1 %v26636_v19  ;;  %v26674_v19 = vld [vmem:[%s36112_s12 + $0xc84] ss:$76 sps:$4 sm:$0xff]  }
 0xf9f   :  { %19627 = vmatprep.subr.bf16.mxu1 %v26644_v39  ;;  %v26672_v39 = vld [vmem:[%s36112_s12 + $0xc80] ss:$76 sps:$4 sm:$0xff]  }
 0xfa2   :  { %v34262_v20 = vpop.eup %27535 }
 0xfa3   :  { %5279 = vrot.lane.b32.xlu1 %v34262_v20, %s27647_s1  ;;  %v34315_v36 = vpop.eup %27537 }
 0xfa4   :  { %v5251_v55 = vsel %vm5233_vm2, %v34315_v36, 0.0 }
 0xfc7   :  { %5252 = vadd.xlane.f32.xlu1 %v5251_v55  ;;  %v26680_v55 = vld [vmem:[%s36112_s12 + $0xd1c] ss:$76 sps:$4 sm:$0xff]  }
 0xfcb   :  { %5314 = vadd.xlane.f32.xlu1 %v5313_v56  ;;  %v26678_v56 = vld [vmem:[%s36112_s12 + $0xd18] ss:$76 sps:$4 sm:$0xff]  }
0x1015   :  { %v5280_v25 = vpop.permute.xlu1 %5279 }
0x1016   :  { %v5282_v41 = vsel %vm5233_vm2, %v5280_v25, 0.0  ;;  %v26683_v25 = vld [vmem:[%s36112_s12 + $0xdac] ss:$76 sps:$4 sm:$0xff]  }
0x1017   :  { %5283 = vadd.xlane.f32.xlu0 %v5282_v41  ;;  %v26686_v41 = vld [vmem:[%s36112_s12 + $0xdb4] ss:$76 sps:$4 sm:$0xff]  }
0x102c   :  { %v15635_v26 = vpop.f32.mrb[56].mxu1 }
0x102d   :  { %v15636_v44 = vadd.f32 %v15635_v26, %v15542_v8  ;;  %v15637_v45 = vpop.f32.mrb[57].mxu1  ;;  %v26684_v8 = vld [vmem:[%s36112_s12 + $0xdb0] ss:$76 sps:$4 sm:$0xff]   ;;  %v26692_v26 = vld [vmem:[%s36112_s12 + $0xe4c] ss:$76 sps:$4 sm:$0xff]  }
0x102e   :  { %v15638_v30 = vadd.f32 %v15637_v45, %v15546_v59  ;;  %v15639_v11 = vpop.f32.mrb[58].mxu1  ;;  %v26689_v59 = vld [vmem:[%s36112_s12 + $0xe44] ss:$76 sps:$4 sm:$0xff]   ;;  %v26690_v45 = vld [vmem:[%s36112_s12 + $0xe48] ss:$76 sps:$4 sm:$0xff]  }
0x102f   :  { %v15683_v46 = vmax.f32 %v15636_v44, 0.0  ;;  %v15640_v1 = vpop.f32.mrb[59].mxu1  ;;  %v26687_v44 = vld [vmem:[%s36112_s12 + $0xe40] ss:$76 sps:$4 sm:$0xff]   ;;  %v26698_v11 = vld [vmem:[%s36112_s12 + $0xee4] ss:$76 sps:$4 sm:$0xff]  }
0x1030   :  { %v15684_v43 = vmax.f32 %v15638_v30, 0.0  ;;  %v26695_v30 = vld [vmem:[%s36112_s12 + $0xedc] ss:$76 sps:$4 sm:$0xff]   ;;  %v26696_v1 = vld [vmem:[%s36112_s12 + $0xee0] ss:$76 sps:$4 sm:$0xff]  }
0x1031   :  { %v34336_v52 = vpack.c.bf16 %v15683_v46, %v15683_v46  ;;  %v26693_v46 = vld [vmem:[%s36112_s12 + $0xed8] ss:$76 sps:$4 sm:$0xff]  }
0x1032   :  { %v34327_v48 = vpack.c.bf16 %v15684_v43, %v15684_v43  ;;  %v26701_v43 = vld [vmem:[%s36112_s12 + $0xf74] ss:$76 sps:$4 sm:$0xff]  }
0x1034   :  { %v15676_v0 = vpop.f32.mrb[60].mxu1  ;;  %19536 = vmatprep.mubr.bf16.mxu0 %v34327_v48  ;;  %19618 = vmatprep.mubr.bf16.mxu1 %v34327_v48 }
0x1035   :  { %v34346_v40 = vadd.f32 %v15676_v0, %v15550_v35  ;;  %v15678_v5 = vpop.f32.mrb[61].mxu1  ;;  %19537 = vmatmul.mubr.bf16.vlgmr.msra.gmra.mrb[32].mxu0 %v34336_v52  ;;  %19619 = vmatmul.mubr.bf16.vlgmr.msra.gmra.mrb[64].mxu1 %v34336_v52  ;;  %v26704_v35 = vld [vmem:[%s36112_s12 + $0xf7c] ss:$76 sps:$4 sm:$0xff]  }
0x1036   :  { %v15679_v16 = vadd.f32 %v15678_v5, %v15554_v15  ;;  %19546 = vmatpush1.bf16.msra.mxu0 %v26639_v51  ;;  %19628 = vmatpush1.bf16.msra.mxu1 %v26642_v27  ;;  %v15680_v28 = vpop.f32.mrb[62].mxu1  ;;  %v26699_v51 = vld [vmem:[%s36112_s12 + $0xf70] ss:$76 sps:$4 sm:$0xff]   ;;  %v26702_v27 = vld [vmem:[%s36112_s12 + $0xf78] ss:$76 sps:$4 sm:$0xff]  }
0x1037   :  { %v15681_v24 = vpop.f32.mrb[63].mxu1  ;;  %19547 = vmatprep.subr.bf16.mxu0 %v26647_v62  ;;  %19629 = vmatprep.subr.bf16.mxu1 %v26650_v14  ;;  %v26707_v15 = vld [vmem:[%s36112_s12 + $0x100c] ss:$76 sps:$4 sm:$0xff]   ;;  %v26710_v62 = vld [vmem:[%s36112_s12 + $0x1014] ss:$76 sps:$4 sm:$0xff]  }
0x1038   :  { %v15686_v4 = vmax.f32 %v15679_v16, 0.0  ;;  %v26705_v14 = vld [vmem:[%s36112_s12 + $0x1008] ss:$76 sps:$4 sm:$0xff]   ;;  %v26708_v0 = vld [vmem:[%s36112_s12 + $0x1010] ss:$76 sps:$4 sm:$0xff]  }
0x1039   :  { %v26713_v5 = vld [vmem:[%s36112_s12 + $0x10a4] ss:$76 sps:$4 sm:$0xff]   ;;  %v26716_v16 = vld [vmem:[%s36112_s12 + $0x10ac] ss:$76 sps:$4 sm:$0xff]  }
0x103a   :  { %v34362_v38 = vpack.c.bf16 %v15686_v4, %v15686_v4  ;;  %19548 = vmatpush1.bf16.msra.mxu0 %v26645_v53  ;;  %19630 = vmatpush1.bf16.msra.mxu1 %v26648_v3  ;;  %v26711_v28 = vld [vmem:[%s36112_s12 + $0x10a0] ss:$76 sps:$4 sm:$0xff]   ;;  %v26714_v53 = vld [vmem:[%s36112_s12 + $0x10a8] ss:$76 sps:$4 sm:$0xff]   ;;  %v26722_v24 = vld [vmem:[%s36112_s12 + $0x1144] ss:$76 sps:$4 sm:$0xff]  }
0x103b   :  { %19549 = vmatprep.subr.bf16.mxu0 %v26653_v7  ;;  %19631 = vmatprep.subr.bf16.mxu1 %v26656_v31  ;;  %v26719_v3 = vld [vmem:[%s36112_s12 + $0x113c] ss:$76 sps:$4 sm:$0xff]   ;;  %v26717_v7 = vld [vmem:[%s36112_s12 + $0x1138] ss:$76 sps:$4 sm:$0xff]   ;;  %v26720_v31 = vld [vmem:[%s36112_s12 + $0x1140] ss:$76 sps:$4 sm:$0xff]  }
0x103c   :  { %19577 = vmatprep.mubr.bf16.mxu0 %v34362_v38  ;;  %19659 = vmatprep.mubr.bf16.mxu1 %v34362_v38  ;;  %v26725_v4 = vld [vmem:[%s36112_s12 + $0x11d4] ss:$76 sps:$4 sm:$0xff]  }
0x103e   :  { %19550 = vmatpush1.bf16.msra.mxu0 %v26651_v6  ;;  %19632 = vmatpush1.bf16.msra.mxu1 %v26654_v63  ;;  %v26728_v6 = vld [vmem:[%s36112_s12 + $0x11dc] ss:$76 sps:$4 sm:$0xff]  }
0x103f   :  { %19551 = vmatprep.subr.bf16.mxu0 %v26659_v12  ;;  %19633 = vmatprep.subr.bf16.mxu1 %v26662_v34  ;;  %v26723_v63 = vld [vmem:[%s36112_s12 + $0x11d0] ss:$76 sps:$4 sm:$0xff]   ;;  %v26726_v12 = vld [vmem:[%s36112_s12 + $0x11d8] ss:$76 sps:$4 sm:$0xff]  }
0x1040   :  { %v26731_v34 = vld [vmem:[%s36112_s12 + $0x126c] ss:$76 sps:$4 sm:$0xff]  }
0x1042   :  { %19552 = vmatpush1.bf16.msra.mxu0 %v26657_v61  ;;  %19634 = vmatpush1.bf16.msra.mxu1 %v26660_v42  ;;  %v26734_v61 = vld [vmem:[%s36112_s12 + $0x1274] ss:$76 sps:$4 sm:$0xff]  }
0x1043   :  { %19553 = vmatprep.subr.bf16.mxu0 %v26665_v18  ;;  %19635 = vmatprep.subr.bf16.mxu1 %v26668_v21  ;;  %v26729_v42 = vld [vmem:[%s36112_s12 + $0x1268] ss:$76 sps:$4 sm:$0xff]   ;;  %v26732_v18 = vld [vmem:[%s36112_s12 + $0x1270] ss:$76 sps:$4 sm:$0xff]   ;;  %v15685_v21 = vmax.f32 %v34346_v40, 0.0 }
0x1044   :  { %v26738_v40 = vld [vmem:[%s36112_s12 + $0x18] ss:$76 sps:$4 sm:$0xff]  }
0x1046   :  { %19554 = vmatpush1.bf16.msra.mxu0 %v26663_v2  ;;  %19636 = vmatpush1.bf16.msra.mxu1 %v26666_v29  ;;  %v26737_v2 = vld [vmem:[%s36112_s12 + $0x14] ss:$76 sps:$4 sm:$0xff]   ;;  %v26740_v29 = vld [vmem:[%s36112_s12 + $0x1c] ss:$76 sps:$4 sm:$0xff]  }
0x1047   :  { %19555 = vmatprep.subr.bf16.mxu0 %v26671_v50  ;;  %19637 = vmatprep.subr.bf16.mxu1 %v26674_v19  ;;  %v26735_v50 = vld [vmem:[%s36112_s12 + $0x10] ss:$76 sps:$4 sm:$0xff]   ;;  %v34538_v19 = vpack.c.bf16 %v15685_v21, %v15685_v21 }
0x1048   :  { %v26806_v21 = vld [vmem:[%s36112_s12 + $0x6a4] ss:$76 sps:$4 sm:$0xff]  }
0x104a   :  { %19556 = vmatpush1.bf16.msra.mxu0 %v26669_v32  ;;  %19638 = vmatpush1.bf16.msra.mxu1 %v26672_v39  ;;  %v26743_v32 = vld [vmem:[%s36112_s12 + $0xac] ss:$76 sps:$4 sm:$0xff]   ;;  %v26746_v39 = vld [vmem:[%s36112_s12 + $0xb4] ss:$76 sps:$4 sm:$0xff]  }
0x104b   :  { %19557 = vmatprep.subr.bf16.mxu0 %v26677_v23  ;;  %19639 = vmatprep.subr.bf16.mxu1 %v26680_v55  ;;  %v26741_v23 = vld [vmem:[%s36112_s12 + $0xa8] ss:$76 sps:$4 sm:$0xff]   ;;  %v26744_v55 = vld [vmem:[%s36112_s12 + $0xb0] ss:$76 sps:$4 sm:$0xff]  }
0x104e   :  { %19558 = vmatpush1.bf16.msra.mxu0 %v26675_v9  ;;  %19640 = vmatpush1.bf16.msra.mxu1 %v26678_v56  ;;  %v26749_v9 = vld [vmem:[%s36112_s12 + $0x144] ss:$76 sps:$4 sm:$0xff]   ;;  %v26752_v56 = vld [vmem:[%s36112_s12 + $0x14c] ss:$76 sps:$4 sm:$0xff]  }
0x104f   :  { %19559 = vmatprep.subr.bf16.mxu0 %v26683_v25  ;;  %19641 = vmatprep.subr.bf16.mxu1 %v26686_v41  ;;  %v26747_v25 = vld [vmem:[%s36112_s12 + $0x140] ss:$76 sps:$4 sm:$0xff]   ;;  %v26750_v41 = vld [vmem:[%s36112_s12 + $0x148] ss:$76 sps:$4 sm:$0xff]  }
0x1052   :  { %19560 = vmatpush1.bf16.msra.mxu0 %v26681_v37  ;;  %19642 = vmatpush1.bf16.msra.mxu1 %v26684_v8  ;;  %v26755_v37 = vld [vmem:[%s36112_s12 + $0x1dc] ss:$76 sps:$4 sm:$0xff]   ;;  %v26758_v8 = vld [vmem:[%s36112_s12 + $0x1e4] ss:$76 sps:$4 sm:$0xff]  }
0x1053   :  { %19561 = vmatprep.subr.bf16.mxu0 %v26689_v59  ;;  %19643 = vmatprep.subr.bf16.mxu1 %v26692_v26  ;;  %v26753_v59 = vld [vmem:[%s36112_s12 + $0x1d8] ss:$76 sps:$4 sm:$0xff]   ;;  %v26756_v26 = vld [vmem:[%s36112_s12 + $0x1e0] ss:$76 sps:$4 sm:$0xff]  }
0x1056   :  { %19562 = vmatpush1.bf16.msra.mxu0 %v26687_v44  ;;  %19644 = vmatpush1.bf16.msra.mxu1 %v26690_v45  ;;  %v26761_v44 = vld [vmem:[%s36112_s12 + $0x274] ss:$76 sps:$4 sm:$0xff]   ;;  %v26764_v45 = vld [vmem:[%s36112_s12 + $0x27c] ss:$76 sps:$4 sm:$0xff]  }
0x1057   :  { %19563 = vmatprep.subr.bf16.mxu0 %v26695_v30  ;;  %19645 = vmatprep.subr.bf16.mxu1 %v26698_v11  ;;  %v26759_v30 = vld [vmem:[%s36112_s12 + $0x270] ss:$76 sps:$4 sm:$0xff]   ;;  %v26762_v11 = vld [vmem:[%s36112_s12 + $0x278] ss:$76 sps:$4 sm:$0xff]  }
0x105a   :  { %19564 = vmatpush1.bf16.msra.mxu0 %v26693_v46  ;;  %19646 = vmatpush1.bf16.msra.mxu1 %v26696_v1  ;;  %v26767_v46 = vld [vmem:[%s36112_s12 + $0x30c] ss:$76 sps:$4 sm:$0xff]   ;;  %v26770_v1 = vld [vmem:[%s36112_s12 + $0x314] ss:$76 sps:$4 sm:$0xff]  }
0x105b   :  { %19565 = vmatprep.subr.bf16.mxu0 %v26701_v43  ;;  %19647 = vmatprep.subr.bf16.mxu1 %v26704_v35  ;;  %v26765_v43 = vld [vmem:[%s36112_s12 + $0x308] ss:$76 sps:$4 sm:$0xff]   ;;  %v26768_v35 = vld [vmem:[%s36112_s12 + $0x310] ss:$76 sps:$4 sm:$0xff]  }
0x105e   :  { %19566 = vmatpush1.bf16.msra.mxu0 %v26699_v51  ;;  %19648 = vmatpush1.bf16.msra.mxu1 %v26702_v27  ;;  %v26773_v51 = vld [vmem:[%s36112_s12 + $0x3a4] ss:$76 sps:$4 sm:$0xff]   ;;  %v26776_v27 = vld [vmem:[%s36112_s12 + $0x3ac] ss:$76 sps:$4 sm:$0xff]  }
0x105f   :  { %19567 = vmatprep.subr.bf16.mxu0 %v26707_v15  ;;  %19649 = vmatprep.subr.bf16.mxu1 %v26710_v62  ;;  %v26771_v15 = vld [vmem:[%s36112_s12 + $0x3a0] ss:$76 sps:$4 sm:$0xff]   ;;  %v26774_v62 = vld [vmem:[%s36112_s12 + $0x3a8] ss:$76 sps:$4 sm:$0xff]  }
0x1062   :  { %19568 = vmatpush1.bf16.msra.mxu0 %v26705_v14  ;;  %19650 = vmatpush1.bf16.msra.mxu1 %v26708_v0  ;;  %v26779_v14 = vld [vmem:[%s36112_s12 + $0x43c] ss:$76 sps:$4 sm:$0xff]   ;;  %v26782_v0 = vld [vmem:[%s36112_s12 + $0x444] ss:$76 sps:$4 sm:$0xff]  }
0x1063   :  { %19569 = vmatprep.subr.bf16.mxu0 %v26713_v5  ;;  %19651 = vmatprep.subr.bf16.mxu1 %v26716_v16  ;;  %v26777_v5 = vld [vmem:[%s36112_s12 + $0x438] ss:$76 sps:$4 sm:$0xff]   ;;  %v26780_v16 = vld [vmem:[%s36112_s12 + $0x440] ss:$76 sps:$4 sm:$0xff]  }
0x1066   :  { %19570 = vmatpush1.bf16.msra.mxu0 %v26711_v28  ;;  %19652 = vmatpush1.bf16.msra.mxu1 %v26714_v53  ;;  %v26785_v28 = vld [vmem:[%s36112_s12 + $0x4d4] ss:$76 sps:$4 sm:$0xff]   ;;  %v26788_v53 = vld [vmem:[%s36112_s12 + $0x4dc] ss:$76 sps:$4 sm:$0xff]  }
0x1067   :  { %19571 = vmatprep.subr.bf16.mxu0 %v26719_v3  ;;  %19653 = vmatprep.subr.bf16.mxu1 %v26722_v24  ;;  %v26783_v3 = vld [vmem:[%s36112_s12 + $0x4d0] ss:$76 sps:$4 sm:$0xff]   ;;  %v26786_v24 = vld [vmem:[%s36112_s12 + $0x4d8] ss:$76 sps:$4 sm:$0xff]  }
0x106a   :  { %19572 = vmatpush1.bf16.msra.mxu0 %v26717_v7  ;;  %19654 = vmatpush1.bf16.msra.mxu1 %v26720_v31  ;;  %v26791_v7 = vld [vmem:[%s36112_s12 + $0x56c] ss:$76 sps:$4 sm:$0xff]   ;;  %v26794_v31 = vld [vmem:[%s36112_s12 + $0x574] ss:$76 sps:$4 sm:$0xff]  }
0x106b   :  { %19573 = vmatprep.subr.bf16.mxu0 %v26725_v4  ;;  %19655 = vmatprep.subr.bf16.mxu1 %v26728_v6  ;;  %v26789_v4 = vld [vmem:[%s36112_s12 + $0x568] ss:$76 sps:$4 sm:$0xff]   ;;  %v26792_v6 = vld [vmem:[%s36112_s12 + $0x570] ss:$76 sps:$4 sm:$0xff]  }
0x106e   :  { %19574 = vmatpush1.bf16.msra.mxu0 %v26723_v63  ;;  %19656 = vmatpush1.bf16.msra.mxu1 %v26726_v12  ;;  %v26797_v63 = vld [vmem:[%s36112_s12 + $0x604] ss:$76 sps:$4 sm:$0xff]   ;;  %v26800_v12 = vld [vmem:[%s36112_s12 + $0x60c] ss:$76 sps:$4 sm:$0xff]  }
0x106f   :  { %19575 = vmatprep.subr.bf16.mxu0 %v26731_v34  ;;  %19657 = vmatprep.subr.bf16.mxu1 %v26734_v61  ;;  %v26795_v34 = vld [vmem:[%s36112_s12 + $0x600] ss:$76 sps:$4 sm:$0xff]   ;;  %v5253_v61 = vpop.xlane.xlu1 %5252 }
0x1070   :  { %27539 = vrcp.f32 %v5253_v61  ;;  %v26855_v61 = vld [vmem:[%s36112_s12 + $0xbf0] ss:$76 sps:$4 sm:$0xff]  }
0x1072   :  { %19576 = vmatpush1.bf16.msra.mxu0 %v26729_v42  ;;  %19658 = vmatpush1.bf16.msra.mxu1 %v26732_v18  ;;  %v26798_v42 = vld [vmem:[%s36112_s12 + $0x608] ss:$76 sps:$4 sm:$0xff]  }
0x1073   :  { %19668 = vmatprep.subr.bf16.mxu0 %v26737_v2  ;;  %19750 = vmatprep.subr.bf16.mxu1 %v26740_v29  ;;  %v26803_v18 = vld [vmem:[%s36112_s12 + $0x69c] ss:$76 sps:$4 sm:$0xff]   ;;  %v26801_v2 = vld [vmem:[%s36112_s12 + $0x698] ss:$76 sps:$4 sm:$0xff]   ;;  %v26804_v29 = vld [vmem:[%s36112_s12 + $0x6a0] ss:$76 sps:$4 sm:$0xff]  }
0x1075   :  { %19578 = vmatmul.mubr.bf16.vlgmr.msra.gmra.mrb[32].mxu0 %v34538_v19  ;;  %19660 = vmatmul.mubr.bf16.vlgmr.msra.gmra.mrb[64].mxu1 %v34538_v19 }
0x1076   :  { %19669 = vmatpush1.bf16.msra.mxu0 %v26735_v50  ;;  %19700 = vmatprep.mubr.bf16.mxu0 %v34327_v48  ;;  %v26809_v50 = vld [vmem:[%s36112_s12 + $0x734] ss:$76 sps:$4 sm:$0xff]  }
0x1077   :  { %19751 = vmatpush1.bf16.msra.mxu1 %v26738_v40  ;;  %19782 = vmatprep.mubr.bf16.mxu1 %v34327_v48  ;;  %v26812_v40 = vld [vmem:[%s36112_s12 + $0x73c] ss:$76 sps:$4 sm:$0xff]  }
0x1078   :  { %19670 = vmatprep.subr.bf16.mxu0 %v26743_v32  ;;  %19752 = vmatprep.subr.bf16.mxu1 %v26746_v39  ;;  %v5315_v32 = vpop.xlane.xlu1 %5314  ;;  %v26807_v39 = vld [vmem:[%s36112_s12 + $0x730] ss:$76 sps:$4 sm:$0xff]  }
0x1079   :  { %27541 = vrcp.f32 %v5315_v32  ;;  %v26867_v32 = vld [vmem:[%s36112_s12 + $0xd20] ss:$76 sps:$4 sm:$0xff]  }
0x107a   :  { %19671 = vmatpush1.bf16.msra.mxu0 %v26741_v23  ;;  %v26810_v23 = vld [vmem:[%s36112_s12 + $0x738] ss:$76 sps:$4 sm:$0xff]  }
0x107b   :  { %19753 = vmatpush1.bf16.msra.mxu1 %v26744_v55  ;;  %19672 = vmatprep.subr.bf16.mxu0 %v26749_v9  ;;  %v26815_v55 = vld [vmem:[%s36112_s12 + $0x7cc] ss:$76 sps:$4 sm:$0xff]  }
0x107c   :  { %19754 = vmatprep.subr.bf16.mxu1 %v26752_v56  ;;  %v26818_v56 = vld [vmem:[%s36112_s12 + $0x7d4] ss:$76 sps:$4 sm:$0xff]  }
0x107e   :  { %19673 = vmatpush1.bf16.msra.mxu0 %v26747_v25  ;;  %v26813_v25 = vld [vmem:[%s36112_s12 + $0x7c8] ss:$76 sps:$4 sm:$0xff]  }
0x107f   :  { %19755 = vmatpush1.bf16.msra.mxu1 %v26750_v41  ;;  %19674 = vmatprep.subr.bf16.mxu0 %v26755_v37  ;;  %v26816_v41 = vld [vmem:[%s36112_s12 + $0x7d0] ss:$76 sps:$4 sm:$0xff]  }
0x1080   :  { %19756 = vmatprep.subr.bf16.mxu1 %v26758_v8  ;;  %v26821_v37 = vld [vmem:[%s36112_s12 + $0x864] ss:$76 sps:$4 sm:$0xff]   ;;  %v26824_v8 = vld [vmem:[%s36112_s12 + $0x86c] ss:$76 sps:$4 sm:$0xff]  }
0x1082   :  { %19675 = vmatpush1.bf16.msra.mxu0 %v26753_v59  ;;  %v26819_v59 = vld [vmem:[%s36112_s12 + $0x860] ss:$76 sps:$4 sm:$0xff]  }
0x1083   :  { %19757 = vmatpush1.bf16.msra.mxu1 %v26756_v26  ;;  %19676 = vmatprep.subr.bf16.mxu0 %v26761_v44  ;;  %v26822_v26 = vld [vmem:[%s36112_s12 + $0x868] ss:$76 sps:$4 sm:$0xff]  }
0x1084   :  { %19758 = vmatprep.subr.bf16.mxu1 %v26764_v45  ;;  %v26827_v44 = vld [vmem:[%s36112_s12 + $0x8fc] ss:$76 sps:$4 sm:$0xff]   ;;  %v26830_v45 = vld [vmem:[%s36112_s12 + $0x904] ss:$76 sps:$4 sm:$0xff]  }
0x1086   :  { %19677 = vmatpush1.bf16.msra.mxu0 %v26759_v30  ;;  %v27540_v30 = vpop.eup %27539 }
0x1087   :  { %19759 = vmatpush1.bf16.msra.mxu1 %v26762_v11  ;;  %19678 = vmatprep.subr.bf16.mxu0 %v26767_v46  ;;  %v27542_v11 = vpop.eup %27541  ;;  %v26825_v46 = vld [vmem:[%s36112_s12 + $0x8f8] ss:$76 sps:$4 sm:$0xff]  }
0x1088   :  { %19760 = vmatprep.subr.bf16.mxu1 %v26770_v1 }
0x108a   :  { %19679 = vmatpush1.bf16.msra.mxu0 %v26765_v43  ;;  %v26828_v43 = vld [vmem:[%s36112_s12 + $0x900] ss:$76 sps:$4 sm:$0xff]  }
0x108b   :  { %19761 = vmatpush1.bf16.msra.mxu1 %v26768_v35  ;;  %19680 = vmatprep.subr.bf16.mxu0 %v26773_v51  ;;  %v26833_v35 = vld [vmem:[%s36112_s12 + $0x994] ss:$76 sps:$4 sm:$0xff]   ;;  %v5255_v51 = vmul.f32 %v27540_v30, %v34315_v36  ;;  %v26893_v30 = vld [vmem:[%s36112_s12 + $0xf84] ss:$76 sps:$4 sm:$0xff]  }
0x108c   :  { %19762 = vmatprep.subr.bf16.mxu1 %v26776_v27  ;;  %v26842_v36 = vld [vmem:[%s36112_s12 + $0xa34] ss:$76 sps:$4 sm:$0xff]  }
0x108e   :  { %19681 = vmatpush1.bf16.msra.mxu0 %v26771_v15  ;;  %v26836_v15 = vld [vmem:[%s36112_s12 + $0x99c] ss:$76 sps:$4 sm:$0xff]  }
0x108f   :  { %19763 = vmatpush1.bf16.msra.mxu1 %v26774_v62  ;;  %19682 = vmatprep.subr.bf16.mxu0 %v26779_v14  ;;  %v5317_v62 = vmul.f32 %v27542_v11, %v30046_v10  ;;  %v26839_v10 = vld [vmem:[%s36112_s12 + $0xa2c] ss:$76 sps:$4 sm:$0xff]  }
0x1090   :  { %19764 = vmatprep.subr.bf16.mxu1 %v26782_v0  ;;  %v26831_v0 = vld [vmem:[%s36112_s12 + $0x990] ss:$76 sps:$4 sm:$0xff]   ;;  %v26896_v11 = vld [vmem:[%s36112_s12 + $0xf8c] ss:$76 sps:$4 sm:$0xff]  }
0x1092   :  { %19683 = vmatpush1.bf16.msra.mxu0 %v26777_v5 }
0x1093   :  { %19765 = vmatpush1.bf16.msra.mxu1 %v26780_v16  ;;  %19684 = vmatprep.subr.bf16.mxu0 %v26785_v28  ;;  %v26837_v16 = vld [vmem:[%s36112_s12 + $0xa28] ss:$76 sps:$4 sm:$0xff]   ;;  %v26840_v28 = vld [vmem:[%s36112_s12 + $0xa30] ss:$76 sps:$4 sm:$0xff]  }
0x1094   :  { %19766 = vmatprep.subr.bf16.mxu1 %v26788_v53  ;;  %v26845_v53 = vld [vmem:[%s36112_s12 + $0xac4] ss:$76 sps:$4 sm:$0xff]  }
0x1096   :  { %19685 = vmatpush1.bf16.msra.mxu0 %v26783_v3  ;;  %v26848_v3 = vld [vmem:[%s36112_s12 + $0xacc] ss:$76 sps:$4 sm:$0xff]  }
0x1097   :  { %19767 = vmatpush1.bf16.msra.mxu1 %v26786_v24  ;;  %19686 = vmatprep.subr.bf16.mxu0 %v26791_v7  ;;  %v26843_v24 = vld [vmem:[%s36112_s12 + $0xac0] ss:$76 sps:$4 sm:$0xff]   ;;  %v26846_v7 = vld [vmem:[%s36112_s12 + $0xac8] ss:$76 sps:$4 sm:$0xff]  }
0x1098   :  { %19768 = vmatprep.subr.bf16.mxu1 %v26794_v31  ;;  %v26851_v31 = vld [vmem:[%s36112_s12 + $0xb5c] ss:$76 sps:$4 sm:$0xff]  }
0x109a   :  { %19687 = vmatpush1.bf16.msra.mxu0 %v26789_v4  ;;  %v26854_v4 = vld [vmem:[%s36112_s12 + $0xb64] ss:$76 sps:$4 sm:$0xff]  }
0x109b   :  { %19769 = vmatpush1.bf16.msra.mxu1 %v26792_v6  ;;  %19688 = vmatprep.subr.bf16.mxu0 %v26797_v63  ;;  %v26849_v6 = vld [vmem:[%s36112_s12 + $0xb58] ss:$76 sps:$4 sm:$0xff]   ;;  %v26852_v63 = vld [vmem:[%s36112_s12 + $0xb60] ss:$76 sps:$4 sm:$0xff]  }
0x109c   :  { %19770 = vmatprep.subr.bf16.mxu1 %v26800_v12  ;;  %v26857_v12 = vld [vmem:[%s36112_s12 + $0xbf4] ss:$76 sps:$4 sm:$0xff]  }
0x109e   :  { %19689 = vmatpush1.bf16.msra.mxu0 %v26795_v34  ;;  %v26860_v34 = vld [vmem:[%s36112_s12 + $0xbfc] ss:$76 sps:$4 sm:$0xff]  }
0x109f   :  { %19771 = vmatpush1.bf16.msra.mxu1 %v26798_v42  ;;  %19690 = vmatprep.subr.bf16.mxu0 %v26803_v18  ;;  %v26858_v42 = vld [vmem:[%s36112_s12 + $0xbf8] ss:$76 sps:$4 sm:$0xff]  }
0x10a0   :  { %19772 = vmatprep.subr.bf16.mxu1 %v26806_v21  ;;  %v26863_v18 = vld [vmem:[%s36112_s12 + $0xc8c] ss:$76 sps:$4 sm:$0xff]   ;;  %v26866_v21 = vld [vmem:[%s36112_s12 + $0xc94] ss:$76 sps:$4 sm:$0xff]  }
0x10a2   :  { %19691 = vmatpush1.bf16.msra.mxu0 %v26801_v2  ;;  %v26861_v2 = vld [vmem:[%s36112_s12 + $0xc88] ss:$76 sps:$4 sm:$0xff]  }
0x10a3   :  { %19773 = vmatpush1.bf16.msra.mxu1 %v26804_v29  ;;  %19692 = vmatprep.subr.bf16.mxu0 %v26809_v50  ;;  %v26864_v29 = vld [vmem:[%s36112_s12 + $0xc90] ss:$76 sps:$4 sm:$0xff]  }
0x10a4   :  { %19774 = vmatprep.subr.bf16.mxu1 %v26812_v40  ;;  %v5284_v9 = vpop.xlane.xlu0 %5283  ;;  %v26869_v50 = vld [vmem:[%s36112_s12 + $0xd24] ss:$76 sps:$4 sm:$0xff]   ;;  %v26872_v40 = vld [vmem:[%s36112_s12 + $0xd2c] ss:$76 sps:$4 sm:$0xff]  }
0x10a5   :  { %27543 = vrcp.f32 %v5284_v9  ;;  %v26873_v9 = vld [vmem:[%s36112_s12 + $0xdb8] ss:$76 sps:$4 sm:$0xff]  }
0x10a6   :  { %19693 = vmatpush1.bf16.msra.mxu0 %v26807_v39  ;;  %v26870_v39 = vld [vmem:[%s36112_s12 + $0xd28] ss:$76 sps:$4 sm:$0xff]  }
0x10a7   :  { %19775 = vmatpush1.bf16.msra.mxu1 %v26810_v23  ;;  %19694 = vmatprep.subr.bf16.mxu0 %v26815_v55  ;;  %v26875_v23 = vld [vmem:[%s36112_s12 + $0xdbc] ss:$76 sps:$4 sm:$0xff]   ;;  %v26878_v55 = vld [vmem:[%s36112_s12 + $0xdc4] ss:$76 sps:$4 sm:$0xff]  }
0x10a8   :  { %19776 = vmatprep.subr.bf16.mxu1 %v26818_v56  ;;  %v26876_v56 = vld [vmem:[%s36112_s12 + $0xdc0] ss:$76 sps:$4 sm:$0xff]  }
0x10aa   :  { %19695 = vmatpush1.bf16.msra.mxu0 %v26813_v25  ;;  %v26881_v25 = vld [vmem:[%s36112_s12 + $0xe54] ss:$76 sps:$4 sm:$0xff]  }
0x10ab   :  { %19777 = vmatpush1.bf16.msra.mxu1 %v26816_v41  ;;  %19696 = vmatprep.subr.bf16.mxu0 %v26821_v37  ;;  %v26884_v41 = vld [vmem:[%s36112_s12 + $0xe5c] ss:$76 sps:$4 sm:$0xff]  }
0x10ac   :  { %19778 = vmatprep.subr.bf16.mxu1 %v26824_v8  ;;  %v26879_v37 = vld [vmem:[%s36112_s12 + $0xe50] ss:$76 sps:$4 sm:$0xff]   ;;  %v26882_v8 = vld [vmem:[%s36112_s12 + $0xe58] ss:$76 sps:$4 sm:$0xff]  }
0x10ae   :  { %19697 = vmatpush1.bf16.msra.mxu0 %v26819_v59  ;;  %v26887_v59 = vld [vmem:[%s36112_s12 + $0xeec] ss:$76 sps:$4 sm:$0xff]  }
0x10af   :  { %v27544_v1 = vpop.eup %27543  ;;  %19779 = vmatpush1.bf16.msra.mxu1 %v26822_v26  ;;  %19698 = vmatprep.subr.bf16.mxu0 %v26827_v44  ;;  %v26890_v26 = vld [vmem:[%s36112_s12 + $0xef4] ss:$76 sps:$4 sm:$0xff]  }
0x10b0   :  { %v5286_v27 = vmul.f32 %v27544_v1, %v34262_v20  ;;  %19780 = vmatprep.subr.bf16.mxu1 %v26830_v45  ;;  %v26834_v20 = vld [vmem:[%s36112_s12 + $0x998] ss:$76 sps:$4 sm:$0xff]   ;;  %v26885_v44 = vld [vmem:[%s36112_s12 + $0xee8] ss:$76 sps:$4 sm:$0xff]   ;;  %v26888_v45 = vld [vmem:[%s36112_s12 + $0xef0] ss:$76 sps:$4 sm:$0xff]  }
0x10b1   :  { %v26894_v1 = vld [vmem:[%s36112_s12 + $0xf88] ss:$76 sps:$4 sm:$0xff]  }
0x10b2   :  { %v5322_v14 = vsel %vm5318_vm5, %v5255_v51, %v5286_v27  ;;  %19699 = vmatpush1.bf16.msra.mxu0 %v26825_v46  ;;  %v26891_v46 = vld [vmem:[%s36112_s12 + $0xf80] ss:$76 sps:$4 sm:$0xff]   ;;  %v26897_v51 = vld [vmem:[%s36112_s12 + $0x1018] ss:$76 sps:$4 sm:$0xff]  }
0x10b3   :  { %v5323_v5 = vsel %vm5320_vm6, %v5322_v14, %v5317_v62  ;;  %19781 = vmatpush1.bf16.msra.mxu1 %v26828_v43  ;;  %19709 = vmatprep.subr.bf16.mxu0 %v26833_v35  ;;  %v26899_v43 = vld [vmem:[%s36112_s12 + $0x101c] ss:$76 sps:$4 sm:$0xff]   ;;  %v26902_v35 = vld [vmem:[%s36112_s12 + $0x1024] ss:$76 sps:$4 sm:$0xff]   ;;  %v26900_v27 = vld [vmem:[%s36112_s12 + $0x1020] ss:$76 sps:$4 sm:$0xff]  }
0x10b4   :  { %5325 = vst.msk [vmem:[%s36115_s15] sm:$0x3] %vm5324_vm15, %v5323_v5  ;;  %19791 = vmatprep.subr.bf16.mxu1 %v26836_v15  ;;  %v26905_v15 = vld [vmem:[%s36112_s12 + $0x10b4] ss:$76 sps:$4 sm:$0xff]   ;;  %v26908_v62 = vld [vmem:[%s36112_s12 + $0x10bc] ss:$76 sps:$4 sm:$0xff]  }
0x10b5   :  { %19701 = vmatmul.mubr.bf16.vlgmr.msra.gmra.mrb[36].mxu0 %v34336_v52  ;;  %v26903_v14 = vld [vmem:[%s36112_s12 + $0x10b0] ss:$76 sps:$4 sm:$0xff]   ;;  %v26911_v5 = vld [vmem:[%s36112_s12 + $0x114c] ss:$76 sps:$4 sm:$0xff]  }
0x10b6   :  { %19783 = vmatmul.mubr.bf16.vlgmr.msra.gmra.mrb[68].mxu1 %v34336_v52  ;;  %19710 = vmatpush1.bf16.msra.mxu0 %v26831_v0  ;;  %v26906_v0 = vld [vmem:[%s36112_s12 + $0x10b8] ss:$76 sps:$4 sm:$0xff]  }
0x10b7   :  { %19741 = vmatprep.mubr.bf16.mxu0 %v34362_v38  ;;  %19792 = vmatpush1.bf16.msra.mxu1 %v26834_v20  ;;  %v26914_v20 = vld [vmem:[%s36112_s12 + $0x1154] ss:$76 sps:$4 sm:$0xff]  }
0x10b8   :  { %19823 = vmatprep.mubr.bf16.mxu1 %v34362_v38  ;;  %19711 = vmatprep.subr.bf16.mxu0 %v26839_v10  ;;  %v26909_v10 = vld [vmem:[%s36112_s12 + $0x1148] ss:$76 sps:$4 sm:$0xff]  }
0x10b9   :  { %19793 = vmatprep.subr.bf16.mxu1 %v26842_v36  ;;  %v26912_v36 = vld [vmem:[%s36112_s12 + $0x1150] ss:$76 sps:$4 sm:$0xff]  }
0x10ba   :  { %19712 = vmatpush1.bf16.msra.mxu0 %v26837_v16  ;;  %v26917_v16 = vld [vmem:[%s36112_s12 + $0x11e4] ss:$76 sps:$4 sm:$0xff]  }
0x10bb   :  { %19794 = vmatpush1.bf16.msra.mxu1 %v26840_v28  ;;  %19713 = vmatprep.subr.bf16.mxu0 %v26845_v53  ;;  %v26920_v28 = vld [vmem:[%s36112_s12 + $0x11ec] ss:$76 sps:$4 sm:$0xff]  }
0x10bc   :  { %19795 = vmatprep.subr.bf16.mxu1 %v26848_v3  ;;  %v26915_v53 = vld [vmem:[%s36112_s12 + $0x11e0] ss:$76 sps:$4 sm:$0xff]   ;;  %v26918_v3 = vld [vmem:[%s36112_s12 + $0x11e8] ss:$76 sps:$4 sm:$0xff]  }
0x10be   :  { %19714 = vmatpush1.bf16.msra.mxu0 %v26843_v24  ;;  %v26923_v24 = vld [vmem:[%s36112_s12 + $0x127c] ss:$76 sps:$4 sm:$0xff]  }
0x10bf   :  { %19796 = vmatpush1.bf16.msra.mxu1 %v26846_v7  ;;  %19715 = vmatprep.subr.bf16.mxu0 %v26851_v31  ;;  %v26926_v7 = vld [vmem:[%s36112_s12 + $0x1284] ss:$76 sps:$4 sm:$0xff]  }
0x10c0   :  { %19797 = vmatprep.subr.bf16.mxu1 %v26854_v4  ;;  %v26921_v31 = vld [vmem:[%s36112_s12 + $0x1278] ss:$76 sps:$4 sm:$0xff]   ;;  %v26924_v4 = vld [vmem:[%s36112_s12 + $0x1280] ss:$76 sps:$4 sm:$0xff]  }
0x10c2   :  { %19716 = vmatpush1.bf16.msra.mxu0 %v26849_v6  ;;  %v26929_v6 = vld [vmem:[%s36112_s12 + $0x24] ss:$76 sps:$4 sm:$0xff]  }
0x10c3   :  { %19798 = vmatpush1.bf16.msra.mxu1 %v26852_v63  ;;  %19717 = vmatprep.subr.bf16.mxu0 %v26857_v12  ;;  %v26932_v63 = vld [vmem:[%s36112_s12 + $0x2c] ss:$76 sps:$4 sm:$0xff]  }
0x10c4   :  { %19799 = vmatprep.subr.bf16.mxu1 %v26860_v34  ;;  %v26927_v12 = vld [vmem:[%s36112_s12 + $0x20] ss:$76 sps:$4 sm:$0xff]   ;;  %v26930_v34 = vld [vmem:[%s36112_s12 + $0x28] ss:$76 sps:$4 sm:$0xff]  }
0x10c6   :  { %19718 = vmatpush1.bf16.msra.mxu0 %v26855_v61  ;;  %v26935_v61 = vld [vmem:[%s36112_s12 + $0xbc] ss:$76 sps:$4 sm:$0xff]  }
0x10c7   :  { %19800 = vmatpush1.bf16.msra.mxu1 %v26858_v42  ;;  %19719 = vmatprep.subr.bf16.mxu0 %v26863_v18  ;;  %v26938_v42 = vld [vmem:[%s36112_s12 + $0xc4] ss:$76 sps:$4 sm:$0xff]  }
0x10c8   :  { %19801 = vmatprep.subr.bf16.mxu1 %v26866_v21  ;;  %v26933_v18 = vld [vmem:[%s36112_s12 + $0xb8] ss:$76 sps:$4 sm:$0xff]   ;;  %v26936_v21 = vld [vmem:[%s36112_s12 + $0xc0] ss:$76 sps:$4 sm:$0xff]  }
0x10ca   :  { %19720 = vmatpush1.bf16.msra.mxu0 %v26861_v2  ;;  %v26941_v2 = vld [vmem:[%s36112_s12 + $0x154] ss:$76 sps:$4 sm:$0xff]  }
0x10cb   :  { %19802 = vmatpush1.bf16.msra.mxu1 %v26864_v29  ;;  %19721 = vmatprep.subr.bf16.mxu0 %v26869_v50  ;;  %v26944_v29 = vld [vmem:[%s36112_s12 + $0x15c] ss:$76 sps:$4 sm:$0xff]  }
0x10cc   :  { %19803 = vmatprep.subr.bf16.mxu1 %v26872_v40  ;;  %v26939_v50 = vld [vmem:[%s36112_s12 + $0x150] ss:$76 sps:$4 sm:$0xff]   ;;  %v26942_v40 = vld [vmem:[%s36112_s12 + $0x158] ss:$76 sps:$4 sm:$0xff]  }
0x10ce   :  { %19722 = vmatpush1.bf16.msra.mxu0 %v26867_v32  ;;  %v26947_v32 = vld [vmem:[%s36112_s12 + $0x1ec] ss:$76 sps:$4 sm:$0xff]  }
0x10cf   :  { %19804 = vmatpush1.bf16.msra.mxu1 %v26870_v39  ;;  %19723 = vmatprep.subr.bf16.mxu0 %v26875_v23  ;;  %v26950_v39 = vld [vmem:[%s36112_s12 + $0x1f4] ss:$76 sps:$4 sm:$0xff]  }
0x10d0   :  { %19805 = vmatprep.subr.bf16.mxu1 %v26878_v55  ;;  %v26945_v23 = vld [vmem:[%s36112_s12 + $0x1e8] ss:$76 sps:$4 sm:$0xff]   ;;  %v26948_v55 = vld [vmem:[%s36112_s12 + $0x1f0] ss:$76 sps:$4 sm:$0xff]  }
0x10d2   :  { %19724 = vmatpush1.bf16.msra.mxu0 %v26873_v9  ;;  %v26953_v9 = vld [vmem:[%s36112_s12 + $0x284] ss:$76 sps:$4 sm:$0xff]  }
0x10d3   :  { %19806 = vmatpush1.bf16.msra.mxu1 %v26876_v56  ;;  %19725 = vmatprep.subr.bf16.mxu0 %v26881_v25  ;;  %v26956_v56 = vld [vmem:[%s36112_s12 + $0x28c] ss:$76 sps:$4 sm:$0xff]  }
0x10d4   :  { %19807 = vmatprep.subr.bf16.mxu1 %v26884_v41  ;;  %v26951_v25 = vld [vmem:[%s36112_s12 + $0x280] ss:$76 sps:$4 sm:$0xff]   ;;  %v26954_v41 = vld [vmem:[%s36112_s12 + $0x288] ss:$76 sps:$4 sm:$0xff]  }
0x10d6   :  { %19726 = vmatpush1.bf16.msra.mxu0 %v26879_v37  ;;  %v26959_v37 = vld [vmem:[%s36112_s12 + $0x31c] ss:$76 sps:$4 sm:$0xff]  }
0x10d7   :  { %19808 = vmatpush1.bf16.msra.mxu1 %v26882_v8  ;;  %19727 = vmatprep.subr.bf16.mxu0 %v26887_v59  ;;  %v26962_v8 = vld [vmem:[%s36112_s12 + $0x324] ss:$76 sps:$4 sm:$0xff]  }
0x10d8   :  { %19809 = vmatprep.subr.bf16.mxu1 %v26890_v26  ;;  %v26957_v59 = vld [vmem:[%s36112_s12 + $0x318] ss:$76 sps:$4 sm:$0xff]   ;;  %v26960_v26 = vld [vmem:[%s36112_s12 + $0x320] ss:$76 sps:$4 sm:$0xff]  }
0x10da   :  { %19728 = vmatpush1.bf16.msra.mxu0 %v26885_v44  ;;  %v26965_v44 = vld [vmem:[%s36112_s12 + $0x3b4] ss:$76 sps:$4 sm:$0xff]  }
0x10db   :  { %19810 = vmatpush1.bf16.msra.mxu1 %v26888_v45  ;;  %19729 = vmatprep.subr.bf16.mxu0 %v26893_v30  ;;  %v26968_v45 = vld [vmem:[%s36112_s12 + $0x3bc] ss:$76 sps:$4 sm:$0xff]  }
0x10dc   :  { %19811 = vmatprep.subr.bf16.mxu1 %v26896_v11  ;;  %v26963_v30 = vld [vmem:[%s36112_s12 + $0x3b0] ss:$76 sps:$4 sm:$0xff]   ;;  %v26966_v11 = vld [vmem:[%s36112_s12 + $0x3b8] ss:$76 sps:$4 sm:$0xff]  }
0x10de   :  { %19730 = vmatpush1.bf16.msra.mxu0 %v26891_v46  ;;  %v26971_v46 = vld [vmem:[%s36112_s12 + $0x44c] ss:$76 sps:$4 sm:$0xff]  }
0x10df   :  { %19812 = vmatpush1.bf16.msra.mxu1 %v26894_v1  ;;  %19731 = vmatprep.subr.bf16.mxu0 %v26899_v43  ;;  %v26974_v1 = vld [vmem:[%s36112_s12 + $0x454] ss:$76 sps:$4 sm:$0xff]  }
0x10e0   :  { %19813 = vmatprep.subr.bf16.mxu1 %v26902_v35  ;;  %v26969_v43 = vld [vmem:[%s36112_s12 + $0x448] ss:$76 sps:$4 sm:$0xff]   ;;  %v26972_v35 = vld [vmem:[%s36112_s12 + $0x450] ss:$76 sps:$4 sm:$0xff]  }
0x10e2   :  { %19732 = vmatpush1.bf16.msra.mxu0 %v26897_v51  ;;  %v26977_v51 = vld [vmem:[%s36112_s12 + $0x4e4] ss:$76 sps:$4 sm:$0xff]  }
0x10e3   :  { %19814 = vmatpush1.bf16.msra.mxu1 %v26900_v27  ;;  %19733 = vmatprep.subr.bf16.mxu0 %v26905_v15  ;;  %v26980_v27 = vld [vmem:[%s36112_s12 + $0x4ec] ss:$76 sps:$4 sm:$0xff]  }
0x10e4   :  { %19815 = vmatprep.subr.bf16.mxu1 %v26908_v62  ;;  %v26975_v15 = vld [vmem:[%s36112_s12 + $0x4e0] ss:$76 sps:$4 sm:$0xff]   ;;  %v26978_v62 = vld [vmem:[%s36112_s12 + $0x4e8] ss:$76 sps:$4 sm:$0xff]  }
0x10e6   :  { %19734 = vmatpush1.bf16.msra.mxu0 %v26903_v14  ;;  %v26983_v14 = vld [vmem:[%s36112_s12 + $0x57c] ss:$76 sps:$4 sm:$0xff]  }
0x10e7   :  { %19816 = vmatpush1.bf16.msra.mxu1 %v26906_v0  ;;  %19735 = vmatprep.subr.bf16.mxu0 %v26911_v5  ;;  %v26986_v0 = vld [vmem:[%s36112_s12 + $0x584] ss:$76 sps:$4 sm:$0xff]  }
0x10e8   :  { %19817 = vmatprep.subr.bf16.mxu1 %v26914_v20  ;;  %v26981_v5 = vld [vmem:[%s36112_s12 + $0x578] ss:$76 sps:$4 sm:$0xff]   ;;  %v26984_v20 = vld [vmem:[%s36112_s12 + $0x580] ss:$76 sps:$4 sm:$0xff]  }
0x10ea   :  { %19736 = vmatpush1.bf16.msra.mxu0 %v26909_v10  ;;  %v26989_v10 = vld [vmem:[%s36112_s12 + $0x614] ss:$76 sps:$4 sm:$0xff]  }
0x10eb   :  { %19818 = vmatpush1.bf16.msra.mxu1 %v26912_v36  ;;  %19737 = vmatprep.subr.bf16.mxu0 %v26917_v16  ;;  %v26992_v36 = vld [vmem:[%s36112_s12 + $0x61c] ss:$76 sps:$4 sm:$0xff]  }
0x10ec   :  { %19819 = vmatprep.subr.bf16.mxu1 %v26920_v28  ;;  %v26987_v16 = vld [vmem:[%s36112_s12 + $0x610] ss:$76 sps:$4 sm:$0xff]   ;;  %v26990_v28 = vld [vmem:[%s36112_s12 + $0x618] ss:$76 sps:$4 sm:$0xff]  }
0x10ee   :  { %19738 = vmatpush1.bf16.msra.mxu0 %v26915_v53  ;;  %v26995_v53 = vld [vmem:[%s36112_s12 + $0x6ac] ss:$76 sps:$4 sm:$0xff]  }
0x10ef   :  { %19820 = vmatpush1.bf16.msra.mxu1 %v26918_v3  ;;  %19739 = vmatprep.subr.bf16.mxu0 %v26923_v24  ;;  %v26998_v3 = vld [vmem:[%s36112_s12 + $0x6b4] ss:$76 sps:$4 sm:$0xff]  }
0x10f0   :  { %19821 = vmatprep.subr.bf16.mxu1 %v26926_v7  ;;  %v26993_v24 = vld [vmem:[%s36112_s12 + $0x6a8] ss:$76 sps:$4 sm:$0xff]   ;;  %v26996_v7 = vld [vmem:[%s36112_s12 + $0x6b0] ss:$76 sps:$4 sm:$0xff]  }
0x10f2   :  { %19740 = vmatpush1.bf16.msra.mxu0 %v26921_v31  ;;  %v27001_v31 = vld [vmem:[%s36112_s12 + $0x744] ss:$76 sps:$4 sm:$0xff]  }
0x10f3   :  { %19822 = vmatpush1.bf16.msra.mxu1 %v26924_v4  ;;  %19832 = vmatprep.subr.bf16.mxu0 %v26929_v6  ;;  %v27004_v4 = vld [vmem:[%s36112_s12 + $0x74c] ss:$76 sps:$4 sm:$0xff]  }
0x10f4   :  { %19914 = vmatprep.subr.bf16.mxu1 %v26932_v63  ;;  %v26999_v6 = vld [vmem:[%s36112_s12 + $0x740] ss:$76 sps:$4 sm:$0xff]   ;;  %v27002_v63 = vld [vmem:[%s36112_s12 + $0x748] ss:$76 sps:$4 sm:$0xff]  }
0x10f5   :  { %19742 = vmatmul.mubr.bf16.vlgmr.msra.gmra.mrb[36].mxu0 %v34538_v19 }
0x10f6   :  { %19824 = vmatmul.mubr.bf16.vlgmr.msra.gmra.mrb[68].mxu1 %v34538_v19  ;;  %19833 = vmatpush1.bf16.msra.mxu0 %v26927_v12  ;;  %v27007_v12 = vld [vmem:[%s36112_s12 + $0x7dc] ss:$76 sps:$4 sm:$0xff]  }
0x10f7   :  { %19864 = vmatprep.mubr.bf16.mxu0 %v34327_v48  ;;  %19915 = vmatpush1.bf16.msra.mxu1 %v26930_v34  ;;  %v27010_v34 = vld [vmem:[%s36112_s12 + $0x7e4] ss:$76 sps:$4 sm:$0xff]  }
0x10f8   :  { %19946 = vmatprep.mubr.bf16.mxu1 %v34327_v48  ;;  %19834 = vmatprep.subr.bf16.mxu0 %v26935_v61  ;;  %v27005_v61 = vld [vmem:[%s36112_s12 + $0x7d8] ss:$76 sps:$4 sm:$0xff]  }
0x10f9   :  { %19916 = vmatprep.subr.bf16.mxu1 %v26938_v42  ;;  %v27008_v42 = vld [vmem:[%s36112_s12 + $0x7e0] ss:$76 sps:$4 sm:$0xff]  }
0x10fa   :  { %19835 = vmatpush1.bf16.msra.mxu0 %v26933_v18  ;;  %v27013_v18 = vld [vmem:[%s36112_s12 + $0x874] ss:$76 sps:$4 sm:$0xff]  }
0x10fb   :  { %19917 = vmatpush1.bf16.msra.mxu1 %v26936_v21  ;;  %19836 = vmatprep.subr.bf16.mxu0 %v26941_v2  ;;  %v27016_v21 = vld [vmem:[%s36112_s12 + $0x87c] ss:$76 sps:$4 sm:$0xff]  }
0x10fc   :  { %19918 = vmatprep.subr.bf16.mxu1 %v26944_v29  ;;  %v27011_v2 = vld [vmem:[%s36112_s12 + $0x870] ss:$76 sps:$4 sm:$0xff]   ;;  %v27014_v29 = vld [vmem:[%s36112_s12 + $0x878] ss:$76 sps:$4 sm:$0xff]  }
0x10fe   :  { %19837 = vmatpush1.bf16.msra.mxu0 %v26939_v50  ;;  %v27019_v50 = vld [vmem:[%s36112_s12 + $0x90c] ss:$76 sps:$4 sm:$0xff]  }
0x10ff   :  { %19919 = vmatpush1.bf16.msra.mxu1 %v26942_v40  ;;  %19838 = vmatprep.subr.bf16.mxu0 %v26947_v32  ;;  %v27022_v40 = vld [vmem:[%s36112_s12 + $0x914] ss:$76 sps:$4 sm:$0xff]  }
0x1100   :  { %19920 = vmatprep.subr.bf16.mxu1 %v26950_v39  ;;  %v27017_v32 = vld [vmem:[%s36112_s12 + $0x908] ss:$76 sps:$4 sm:$0xff]   ;;  %v27020_v39 = vld [vmem:[%s36112_s12 + $0x910] ss:$76 sps:$4 sm:$0xff]  }
0x1102   :  { %19839 = vmatpush1.bf16.msra.mxu0 %v26945_v23  ;;  %v27025_v23 = vld [vmem:[%s36112_s12 + $0x9a4] ss:$76 sps:$4 sm:$0xff]  }
0x1103   :  { %19921 = vmatpush1.bf16.msra.mxu1 %v26948_v55  ;;  %19840 = vmatprep.subr.bf16.mxu0 %v26953_v9  ;;  %v27028_v55 = vld [vmem:[%s36112_s12 + $0x9ac] ss:$76 sps:$4 sm:$0xff]  }
0x1104   :  { %19922 = vmatprep.subr.bf16.mxu1 %v26956_v56  ;;  %v27023_v9 = vld [vmem:[%s36112_s12 + $0x9a0] ss:$76 sps:$4 sm:$0xff]   ;;  %v27026_v56 = vld [vmem:[%s36112_s12 + $0x9a8] ss:$76 sps:$4 sm:$0xff]  }
0x1106   :  { %19841 = vmatpush1.bf16.msra.mxu0 %v26951_v25  ;;  %v27031_v25 = vld [vmem:[%s36112_s12 + $0xa3c] ss:$76 sps:$4 sm:$0xff]  }
0x1107   :  { %19923 = vmatpush1.bf16.msra.mxu1 %v26954_v41  ;;  %19842 = vmatprep.subr.bf16.mxu0 %v26959_v37  ;;  %v27034_v41 = vld [vmem:[%s36112_s12 + $0xa44] ss:$76 sps:$4 sm:$0xff]  }
0x1108   :  { %19924 = vmatprep.subr.bf16.mxu1 %v26962_v8  ;;  %v27029_v37 = vld [vmem:[%s36112_s12 + $0xa38] ss:$76 sps:$4 sm:$0xff]   ;;  %v27032_v8 = vld [vmem:[%s36112_s12 + $0xa40] ss:$76 sps:$4 sm:$0xff]  }
0x110a   :  { %19843 = vmatpush1.bf16.msra.mxu0 %v26957_v59  ;;  %v27037_v59 = vld [vmem:[%s36112_s12 + $0xad4] ss:$76 sps:$4 sm:$0xff]  }
0x110b   :  { %19925 = vmatpush1.bf16.msra.mxu1 %v26960_v26  ;;  %19844 = vmatprep.subr.bf16.mxu0 %v26965_v44  ;;  %v27040_v26 = vld [vmem:[%s36112_s12 + $0xadc] ss:$76 sps:$4 sm:$0xff]  }
0x110c   :  { %19926 = vmatprep.subr.bf16.mxu1 %v26968_v45  ;;  %v27035_v44 = vld [vmem:[%s36112_s12 + $0xad0] ss:$76 sps:$4 sm:$0xff]   ;;  %v27038_v45 = vld [vmem:[%s36112_s12 + $0xad8] ss:$76 sps:$4 sm:$0xff]  }
0x110e   :  { %19845 = vmatpush1.bf16.msra.mxu0 %v26963_v30  ;;  %v27043_v30 = vld [vmem:[%s36112_s12 + $0xb6c] ss:$76 sps:$4 sm:$0xff]  }
0x110f   :  { %19927 = vmatpush1.bf16.msra.mxu1 %v26966_v11  ;;  %19846 = vmatprep.subr.bf16.mxu0 %v26971_v46  ;;  %v27046_v11 = vld [vmem:[%s36112_s12 + $0xb74] ss:$76 sps:$4 sm:$0xff]  }
0x1110   :  { %19928 = vmatprep.subr.bf16.mxu1 %v26974_v1  ;;  %v27041_v46 = vld [vmem:[%s36112_s12 + $0xb68] ss:$76 sps:$4 sm:$0xff]   ;;  %v27044_v1 = vld [vmem:[%s36112_s12 + $0xb70] ss:$76 sps:$4 sm:$0xff]  }
0x1112   :  { %19847 = vmatpush1.bf16.msra.mxu0 %v26969_v43  ;;  %v27049_v43 = vld [vmem:[%s36112_s12 + $0xc04] ss:$76 sps:$4 sm:$0xff]  }
0x1113   :  { %19929 = vmatpush1.bf16.msra.mxu1 %v26972_v35  ;;  %19848 = vmatprep.subr.bf16.mxu0 %v26977_v51  ;;  %v27052_v35 = vld [vmem:[%s36112_s12 + $0xc0c] ss:$76 sps:$4 sm:$0xff]  }
0x1114   :  { %19930 = vmatprep.subr.bf16.mxu1 %v26980_v27  ;;  %v27047_v51 = vld [vmem:[%s36112_s12 + $0xc00] ss:$76 sps:$4 sm:$0xff]  }
0x1115   :  { %v35191_v27 = vld [vmem:[%s36113_s13 + $0x29] sm:$0xff] }
0x1116   :  { %19849 = vmatpush1.bf16.msra.mxu0 %v26975_v15  ;;  %v27050_v15 = vld [vmem:[%s36112_s12 + $0xc08] ss:$76 sps:$4 sm:$0xff]  }
0x1117   :  { %19931 = vmatpush1.bf16.msra.mxu1 %v26978_v62  ;;  %19850 = vmatprep.subr.bf16.mxu0 %v26983_v14  ;;  %v27055_v62 = vld [vmem:[%s36112_s12 + $0xc9c] ss:$76 sps:$4 sm:$0xff]   ;;  %v27058_v14 = vld [vmem:[%s36112_s12 + $0xca4] ss:$76 sps:$4 sm:$0xff]  }
0x1118   :  { %19932 = vmatprep.subr.bf16.mxu1 %v26986_v0  ;;  %v16340_v0 = vrot.slane %v35191_v27, %v29821_v47 }
0x111a   :  { %19851 = vmatpush1.bf16.msra.mxu0 %v26981_v5  ;;  %v16348_v5 = vrot.slane %v35191_v27, %v29916_v33 }
0x111b   :  { %19933 = vmatpush1.bf16.msra.mxu1 %v26984_v20  ;;  %19852 = vmatprep.subr.bf16.mxu0 %v26989_v10  ;;  %v16344_v20 = vrot.slane %v35191_v27, %v29824_v13  ;;  %v16352_v10 = vrot.slane %v35191_v27, %v29827_v17 }
0x111c   :  { %19934 = vmatprep.subr.bf16.mxu1 %v26992_v36  ;;  %v27053_v36 = vld [vmem:[%s36112_s12 + $0xc98] ss:$76 sps:$4 sm:$0xff]  }
0x111e   :  { %19853 = vmatpush1.bf16.msra.mxu0 %v26987_v16  ;;  %v27056_v16 = vld [vmem:[%s36112_s12 + $0xca0] ss:$76 sps:$4 sm:$0xff]  }
0x111f   :  { %19935 = vmatpush1.bf16.msra.mxu1 %v26990_v28  ;;  %19854 = vmatprep.subr.bf16.mxu0 %v26995_v53  ;;  %v27061_v28 = vld [vmem:[%s36112_s12 + $0xd34] ss:$76 sps:$4 sm:$0xff]  }
0x1120   :  { %19936 = vmatprep.subr.bf16.mxu1 %v26998_v3 }
0x1122   :  { %19855 = vmatpush1.bf16.msra.mxu0 %v26993_v24  ;;  %v27064_v24 = vld [vmem:[%s36112_s12 + $0xd3c] ss:$76 sps:$4 sm:$0xff]  }
0x1123   :  { %19937 = vmatpush1.bf16.msra.mxu1 %v26996_v7  ;;  %19856 = vmatprep.subr.bf16.mxu0 %v27001_v31 }
0x1124   :  { %19938 = vmatprep.subr.bf16.mxu1 %v27004_v4 }
0x1126   :  { %19857 = vmatpush1.bf16.msra.mxu0 %v26999_v6 }
0x1127   :  { %19939 = vmatpush1.bf16.msra.mxu1 %v27002_v63  ;;  %19858 = vmatprep.subr.bf16.mxu0 %v27007_v12  ;;  %v27059_v63 = vld [vmem:[%s36112_s12 + $0xd30] ss:$76 sps:$4 sm:$0xff]  }
0x1128   :  { %19940 = vmatprep.subr.bf16.mxu1 %v27010_v34 }
0x112a   :  { %19859 = vmatpush1.bf16.msra.mxu0 %v27005_v61 }
0x112b   :  { %19941 = vmatpush1.bf16.msra.mxu1 %v27008_v42  ;;  %19860 = vmatprep.subr.bf16.mxu0 %v27013_v18  ;;  %v27062_v18 = vld [vmem:[%s36112_s12 + $0xd38] ss:$76 sps:$4 sm:$0xff]  }
0x112c   :  { %19942 = vmatprep.subr.bf16.mxu1 %v27016_v21  ;;  %v27067_v21 = vld [vmem:[%s36112_s12 + $0xdcc] ss:$76 sps:$4 sm:$0xff]  }
0x112e   :  { %19861 = vmatpush1.bf16.msra.mxu0 %v27011_v2 }
0x112f   :  { %19943 = vmatpush1.bf16.msra.mxu1 %v27014_v29  ;;  %19862 = vmatprep.subr.bf16.mxu0 %v27019_v50 }
0x1130   :  { %19944 = vmatprep.subr.bf16.mxu1 %v27022_v40 }
0x1132   :  { %19863 = vmatpush1.bf16.msra.mxu0 %v27017_v32 }
0x1133   :  { %19945 = vmatpush1.bf16.msra.mxu1 %v27020_v39  ;;  %19873 = vmatprep.subr.bf16.mxu0 %v27025_v23  ;;  %v27070_v23 = vld [vmem:[%s36112_s12 + $0xdd4] ss:$76 sps:$4 sm:$0xff]  }
0x1134   :  { %19955 = vmatprep.subr.bf16.mxu1 %v27028_v55  ;;  %v27065_v55 = vld [vmem:[%s36112_s12 + $0xdc8] ss:$76 sps:$4 sm:$0xff]  }
0x1135   :  { %19865 = vmatmul.mubr.bf16.vlgmr.msra.gmra.mrb[40].mxu0 %v34336_v52 }
0x1136   :  { %19947 = vmatmul.mubr.bf16.vlgmr.msra.gmra.mrb[72].mxu1 %v34336_v52  ;;  %19874 = vmatpush1.bf16.msra.mxu0 %v27023_v9  ;;  %v27068_v9 = vld [vmem:[%s36112_s12 + $0xdd0] ss:$76 sps:$4 sm:$0xff]  }
0x1137   :  { %19905 = vmatprep.mubr.bf16.mxu0 %v34362_v38  ;;  %19956 = vmatpush1.bf16.msra.mxu1 %v27026_v56  ;;  %v27073_v56 = vld [vmem:[%s36112_s12 + $0xe64] ss:$76 sps:$4 sm:$0xff]  }
0x1138   :  { %19987 = vmatprep.mubr.bf16.mxu1 %v34362_v38  ;;  %19875 = vmatprep.subr.bf16.mxu0 %v27031_v25  ;;  %v27076_v25 = vld [vmem:[%s36112_s12 + $0xe6c] ss:$76 sps:$4 sm:$0xff]  }
0x1139   :  { %19957 = vmatprep.subr.bf16.mxu1 %v27034_v41  ;;  %v27071_v41 = vld [vmem:[%s36112_s12 + $0xe60] ss:$76 sps:$4 sm:$0xff]  }
0x113a   :  { %19876 = vmatpush1.bf16.msra.mxu0 %v27029_v37  ;;  %v27074_v37 = vld [vmem:[%s36112_s12 + $0xe68] ss:$76 sps:$4 sm:$0xff]  }
0x113b   :  { %19958 = vmatpush1.bf16.msra.mxu1 %v27032_v8  ;;  %19877 = vmatprep.subr.bf16.mxu0 %v27037_v59  ;;  %v27079_v8 = vld [vmem:[%s36112_s12 + $0xefc] ss:$76 sps:$4 sm:$0xff]   ;;  %v27082_v59 = vld [vmem:[%s36112_s12 + $0xf04] ss:$76 sps:$4 sm:$0xff]  }
0x113c   :  { %19959 = vmatprep.subr.bf16.mxu1 %v27040_v26  ;;  %v27077_v26 = vld [vmem:[%s36112_s12 + $0xef8] ss:$76 sps:$4 sm:$0xff]  }
0x113e   :  { %19878 = vmatpush1.bf16.msra.mxu0 %v27035_v44 }
0x113f   :  { %19960 = vmatpush1.bf16.msra.mxu1 %v27038_v45  ;;  %19879 = vmatprep.subr.bf16.mxu0 %v27043_v30  ;;  %v27080_v45 = vld [vmem:[%s36112_s12 + $0xf00] ss:$76 sps:$4 sm:$0xff]  }
0x1140   :  { %19961 = vmatprep.subr.bf16.mxu1 %v27046_v11  ;;  %v27085_v30 = vld [vmem:[%s36112_s12 + $0xf94] ss:$76 sps:$4 sm:$0xff]  }
0x1142   :  { %19880 = vmatpush1.bf16.msra.mxu0 %v27041_v46 }
0x1143   :  { %19962 = vmatpush1.bf16.msra.mxu1 %v27044_v1  ;;  %19881 = vmatprep.subr.bf16.mxu0 %v27049_v43  ;;  %v27088_v1 = vld [vmem:[%s36112_s12 + $0xf9c] ss:$76 sps:$4 sm:$0xff]  }
0x1144   :  { %19963 = vmatprep.subr.bf16.mxu1 %v27052_v35 }
0x1146   :  { %19882 = vmatpush1.bf16.msra.mxu0 %v27047_v51 }
0x1147   :  { %19964 = vmatpush1.bf16.msra.mxu1 %v27050_v15  ;;  %19883 = vmatprep.subr.bf16.mxu0 %v27055_v62  ;;  %v27083_v62 = vld [vmem:[%s36112_s12 + $0xf90] ss:$76 sps:$4 sm:$0xff]  }
0x1148   :  { %v19579_v53 = vpop.f32.mrb[32].mxu0  ;;  %v19661_v3 = vpop.f32.mrb[64].mxu1  ;;  %19965 = vmatprep.subr.bf16.mxu1 %v27058_v14 }
0x1149   :  { %v23380_v7 = vadd.f32 %v19579_v53, %v16340_v0  ;;  %v23382_v31 = vadd.f32 %v19661_v3, %v16348_v5  ;;  %v19581_v4 = vpop.f32.mrb[33].mxu0  ;;  %v19663_v6 = vpop.f32.mrb[65].mxu1  ;;  %v27086_v0 = vld [vmem:[%s36112_s12 + $0xf98] ss:$76 sps:$4 sm:$0xff]   ;;  %v27095_v53 = vld [vmem:[%s36112_s12 + $0x10c0] ss:$76 sps:$4 sm:$0xff]  }
0x114a   :  { %v23381_v12 = vadd.f32 %v19581_v4, %v16344_v20  ;;  %v23383_v34 = vadd.f32 %v19663_v6, %v16352_v10  ;;  %v19583_v61 = vpop.f32.mrb[34].mxu0  ;;  %v19665_v42 = vpop.f32.mrb[66].mxu1  ;;  %19884 = vmatpush1.bf16.msra.mxu0 %v27053_v36  ;;  %v27091_v5 = vld [vmem:[%s36112_s12 + $0x102c] ss:$76 sps:$4 sm:$0xff]   ;;  %v27094_v20 = vld [vmem:[%s36112_s12 + $0x1034] ss:$76 sps:$4 sm:$0xff]  }
0x114b   :  { %v23179_v2 = vmul.f32 -1.442695, %v23380_v7  ;;  %v23181_v29 = vmul.f32 -1.442695, %v23382_v31  ;;  %19966 = vmatpush1.bf16.msra.mxu1 %v27056_v16  ;;  %v19584_v50 = vpop.f32.mrb[35].mxu0  ;;  %v19666_v40 = vpop.f32.mrb[67].mxu1  ;;  %19885 = vmatprep.subr.bf16.mxu0 %v27061_v28 }
0x114c   :  { %v23180_v32 = vmul.f32 -1.442695, %v23381_v12  ;;  %v23182_v39 = vmul.f32 -1.442695, %v23383_v34  ;;  %19967 = vmatprep.subr.bf16.mxu1 %v27064_v24  ;;  %v27089_v10 = vld [vmem:[%s36112_s12 + $0x1028] ss:$76 sps:$4 sm:$0xff]  }
0x114d   :  { %27545 = vpow2.f32 %v23179_v2  ;;  %v27092_v36 = vld [vmem:[%s36112_s12 + $0x1030] ss:$76 sps:$4 sm:$0xff]   ;;  %v27100_v28 = vld [vmem:[%s36112_s12 + $0x10cc] ss:$76 sps:$4 sm:$0xff]   ;;  %v27098_v3 = vld [vmem:[%s36112_s12 + $0x10c8] ss:$76 sps:$4 sm:$0xff]  }
0x114e   :  { %27547 = vpow2.f32 %v23181_v29  ;;  %19886 = vmatpush1.bf16.msra.mxu0 %v27059_v63  ;;  %v27097_v16 = vld [vmem:[%s36112_s12 + $0x10c4] ss:$76 sps:$4 sm:$0xff]   ;;  %v27103_v24 = vld [vmem:[%s36112_s12 + $0x115c] ss:$76 sps:$4 sm:$0xff]   ;;  %v27104_v61 = vld [vmem:[%s36112_s12 + $0x1160] ss:$76 sps:$4 sm:$0xff]  }
0x114f   :  { %27549 = vpow2.f32 %v23180_v32  ;;  %19968 = vmatpush1.bf16.msra.mxu1 %v27062_v18  ;;  %19887 = vmatprep.subr.bf16.mxu0 %v27067_v21  ;;  %v27106_v31 = vld [vmem:[%s36112_s12 + $0x1164] ss:$76 sps:$4 sm:$0xff]   ;;  %v27109_v42 = vld [vmem:[%s36112_s12 + $0x11f4] ss:$76 sps:$4 sm:$0xff]   ;;  %v27112_v21 = vld [vmem:[%s36112_s12 + $0x11fc] ss:$76 sps:$4 sm:$0xff]  }
0x1150   :  { %27551 = vpow2.f32 %v23182_v39  ;;  %19969 = vmatprep.subr.bf16.mxu1 %v27070_v23  ;;  %v27101_v63 = vld [vmem:[%s36112_s12 + $0x1158] ss:$76 sps:$4 sm:$0xff]   ;;  %v27107_v50 = vld [vmem:[%s36112_s12 + $0x11f0] ss:$76 sps:$4 sm:$0xff]   ;;  %v27118_v23 = vld [vmem:[%s36112_s12 + $0x1294] ss:$76 sps:$4 sm:$0xff]  }
0x1151   :  { %v27110_v40 = vld [vmem:[%s36112_s12 + $0x11f8] ss:$76 sps:$4 sm:$0xff]  }
0x1152   :  { %19888 = vmatpush1.bf16.msra.mxu0 %v27065_v55  ;;  %v27115_v32 = vld [vmem:[%s36112_s12 + $0x128c] ss:$76 sps:$4 sm:$0xff]   ;;  %v27113_v55 = vld [vmem:[%s36112_s12 + $0x1288] ss:$76 sps:$4 sm:$0xff]  }
0x1153   :  { %19970 = vmatpush1.bf16.msra.mxu1 %v27068_v9  ;;  %19889 = vmatprep.subr.bf16.mxu0 %v27073_v56  ;;  %v27116_v9 = vld [vmem:[%s36112_s12 + $0x1290] ss:$76 sps:$4 sm:$0xff]   ;;  %v27121_v56 = vld [vmem:[%s36112_s12 + $0x34] ss:$76 sps:$4 sm:$0xff]  }
0x1154   :  { %19971 = vmatprep.subr.bf16.mxu1 %v27076_v25  ;;  %v27124_v25 = vld [vmem:[%s36112_s12 + $0x3c] ss:$76 sps:$4 sm:$0xff]  }
0x1156   :  { %19890 = vmatpush1.bf16.msra.mxu0 %v27071_v41  ;;  %v27119_v41 = vld [vmem:[%s36112_s12 + $0x30] ss:$76 sps:$4 sm:$0xff]  }
0x1157   :  { %v27546_v44 = vpop.eup %27545  ;;  %19972 = vmatpush1.bf16.msra.mxu1 %v27074_v37  ;;  %19891 = vmatprep.subr.bf16.mxu0 %v27079_v8  ;;  %v27122_v37 = vld [vmem:[%s36112_s12 + $0x38] ss:$76 sps:$4 sm:$0xff]  }
0x1158   :  { %v27548_v11 = vpop.eup %27547  ;;  %v20379_v46 = vadd.f32 1.0, %v27546_v44  ;;  %19973 = vmatprep.subr.bf16.mxu1 %v27082_v59  ;;  %v27127_v8 = vld [vmem:[%s36112_s12 + $0xcc] ss:$76 sps:$4 sm:$0xff]   ;;  %v27130_v59 = vld [vmem:[%s36112_s12 + $0xd4] ss:$76 sps:$4 sm:$0xff]  }
0x1159   :  { %v27550_v43 = vpop.eup %27549  ;;  %v20381_v35 = vadd.f32 1.0, %v27548_v11  ;;  %v27128_v44 = vld [vmem:[%s36112_s12 + $0xd0] ss:$76 sps:$4 sm:$0xff]   ;;  %v27131_v11 = vld [vmem:[%s36112_s12 + $0x160] ss:$76 sps:$4 sm:$0xff]  }
0x115a   :  { %v27552_v51 = vpop.eup %27551  ;;  %27553 = vrcp.f32 %v20379_v46  ;;  %v20380_v15 = vadd.f32 1.0, %v27550_v43  ;;  %19892 = vmatpush1.bf16.msra.mxu0 %v27077_v26  ;;  %v27125_v26 = vld [vmem:[%s36112_s12 + $0xc8] ss:$76 sps:$4 sm:$0xff]   ;;  %v27142_v43 = vld [vmem:[%s36112_s12 + $0x204] ss:$76 sps:$4 sm:$0xff]  }
0x115b   :  { %27555 = vrcp.f32 %v20381_v35  ;;  %v20382_v14 = vadd.f32 1.0, %v27552_v51  ;;  %19974 = vmatpush1.bf16.msra.mxu1 %v27080_v45  ;;  %19893 = vmatprep.subr.bf16.mxu0 %v27085_v30  ;;  %v27133_v45 = vld [vmem:[%s36112_s12 + $0x164] ss:$76 sps:$4 sm:$0xff]   ;;  %v27136_v30 = vld [vmem:[%s36112_s12 + $0x16c] ss:$76 sps:$4 sm:$0xff]  }
0x115c   :  { %27557 = vrcp.f32 %v20380_v15  ;;  %19975 = vmatprep.subr.bf16.mxu1 %v27088_v1  ;;  %v27134_v46 = vld [vmem:[%s36112_s12 + $0x168] ss:$76 sps:$4 sm:$0xff]   ;;  %v27137_v35 = vld [vmem:[%s36112_s12 + $0x1f8] ss:$76 sps:$4 sm:$0xff]   ;;  %v27140_v51 = vld [vmem:[%s36112_s12 + $0x200] ss:$76 sps:$4 sm:$0xff]  }
0x115d   :  { %27559 = vrcp.f32 %v20382_v14  ;;  %v27139_v1 = vld [vmem:[%s36112_s12 + $0x1fc] ss:$76 sps:$4 sm:$0xff]   ;;  %v27145_v15 = vld [vmem:[%s36112_s12 + $0x294] ss:$76 sps:$4 sm:$0xff]  }
0x115e   :  { %19894 = vmatpush1.bf16.msra.mxu0 %v27083_v62  ;;  %v27148_v62 = vld [vmem:[%s36112_s12 + $0x29c] ss:$76 sps:$4 sm:$0xff]  }
0x115f   :  { %19976 = vmatpush1.bf16.msra.mxu1 %v27086_v0  ;;  %19895 = vmatprep.subr.bf16.mxu0 %v27091_v5  ;;  %v27143_v14 = vld [vmem:[%s36112_s12 + $0x290] ss:$76 sps:$4 sm:$0xff]   ;;  %v27146_v0 = vld [vmem:[%s36112_s12 + $0x298] ss:$76 sps:$4 sm:$0xff]  }
0x1160   :  { %19977 = vmatprep.subr.bf16.mxu1 %v27094_v20  ;;  %v27151_v5 = vld [vmem:[%s36112_s12 + $0x32c] ss:$76 sps:$4 sm:$0xff]   ;;  %v27154_v20 = vld [vmem:[%s36112_s12 + $0x334] ss:$76 sps:$4 sm:$0xff]  }
0x1162   :  { %19896 = vmatpush1.bf16.msra.mxu0 %v27089_v10  ;;  %v27149_v10 = vld [vmem:[%s36112_s12 + $0x328] ss:$76 sps:$4 sm:$0xff]  }
0x1163   :  { %19978 = vmatpush1.bf16.msra.mxu1 %v27092_v36  ;;  %19897 = vmatprep.subr.bf16.mxu0 %v27097_v16  ;;  %v27152_v36 = vld [vmem:[%s36112_s12 + $0x330] ss:$76 sps:$4 sm:$0xff]  }
0x1164   :  { %v27554_v7 = vpop.eup %27553  ;;  %19979 = vmatprep.subr.bf16.mxu1 %v27100_v28  ;;  %v27157_v16 = vld [vmem:[%s36112_s12 + $0x3c4] ss:$76 sps:$4 sm:$0xff]   ;;  %v27160_v28 = vld [vmem:[%s36112_s12 + $0x3cc] ss:$76 sps:$4 sm:$0xff]  }
0x1165   :  { %v27556_v4 = vpop.eup %27555 }
0x1166   :  { %v27558_v6 = vpop.eup %27557  ;;  %19898 = vmatpush1.bf16.msra.mxu0 %v27095_v53  ;;  %v27155_v53 = vld [vmem:[%s36112_s12 + $0x3c0] ss:$76 sps:$4 sm:$0xff]  }
0x1167   :  { %v27560_v12 = vpop.eup %27559  ;;  %v20455_v34 = vcombine.low %v27554_v7, %v27558_v6  ;;  %19980 = vmatpush1.bf16.msra.mxu1 %v27098_v3  ;;  %19899 = vmatprep.subr.bf16.mxu0 %v27103_v24  ;;  %v27158_v3 = vld [vmem:[%s36112_s12 + $0x3c8] ss:$76 sps:$4 sm:$0xff]   ;;  %v27166_v7 = vld [vmem:[%s36112_s12 + $0x464] ss:$76 sps:$4 sm:$0xff]  }
0x1168   :  { %v20456_v18 = vcombine.low %v27556_v4, %v27560_v12  ;;  %19981 = vmatprep.subr.bf16.mxu1 %v27106_v31  ;;  %v27163_v24 = vld [vmem:[%s36112_s12 + $0x45c] ss:$76 sps:$4 sm:$0xff]   ;;  %v27161_v31 = vld [vmem:[%s36112_s12 + $0x458] ss:$76 sps:$4 sm:$0xff]   ;;  %v27164_v4 = vld [vmem:[%s36112_s12 + $0x460] ss:$76 sps:$4 sm:$0xff]  }
0x1169   :  { %v20463_v2 = vrot.slane %v20455_v34, %v27873_v49  ;;  %v27169_v6 = vld [vmem:[%s36112_s12 + $0x4f4] ss:$76 sps:$4 sm:$0xff]   ;;  %v27167_v12 = vld [vmem:[%s36112_s12 + $0x4f0] ss:$76 sps:$4 sm:$0xff]   ;;  %v27170_v34 = vld [vmem:[%s36112_s12 + $0x4f8] ss:$76 sps:$4 sm:$0xff]  }
0x116a   :  { %v20470_v29 = vrot.slane %v20456_v18, %v27873_v49  ;;  %19900 = vmatpush1.bf16.msra.mxu0 %v27101_v63  ;;  %v27172_v63 = vld [vmem:[%s36112_s12 + $0x4fc] ss:$76 sps:$4 sm:$0xff]  }
0x116b   :  { %19982 = vmatpush1.bf16.msra.mxu1 %v27104_v61  ;;  %19901 = vmatprep.subr.bf16.mxu0 %v27109_v42  ;;  %v27175_v61 = vld [vmem:[%s36112_s12 + $0x58c] ss:$76 sps:$4 sm:$0xff]   ;;  %v27178_v42 = vld [vmem:[%s36112_s12 + $0x594] ss:$76 sps:$4 sm:$0xff]  }
0x116c   :  { %v20471_v39 = vcombine.low %v20463_v2, %v20470_v29  ;;  %19983 = vmatprep.subr.bf16.mxu1 %v27112_v21  ;;  %v27173_v18 = vld [vmem:[%s36112_s12 + $0x588] ss:$76 sps:$4 sm:$0xff]   ;;  %v27176_v21 = vld [vmem:[%s36112_s12 + $0x590] ss:$76 sps:$4 sm:$0xff]   ;;  %v27184_v29 = vld [vmem:[%s36112_s12 + $0x62c] ss:$76 sps:$4 sm:$0xff]  }
0x116d   :  { %v27181_v2 = vld [vmem:[%s36112_s12 + $0x624] ss:$76 sps:$4 sm:$0xff]  }
0x116e   :  { %20544 = vst [vmem:[%s36116_s16] sm:$0xff] %v20471_v39  ;;  %19902 = vmatpush1.bf16.msra.mxu0 %v27107_v50  ;;  %v27179_v50 = vld [vmem:[%s36112_s12 + $0x620] ss:$76 sps:$4 sm:$0xff]   ;;  %v27190_v39 = vld [vmem:[%s36112_s12 + $0x6c4] ss:$76 sps:$4 sm:$0xff]  }
0x116f   :  { %19984 = vmatpush1.bf16.msra.mxu1 %v27110_v40  ;;  %19903 = vmatprep.subr.bf16.mxu0 %v27115_v32  ;;  %v27182_v40 = vld [vmem:[%s36112_s12 + $0x628] ss:$76 sps:$4 sm:$0xff]  }
0x1170   :  { %19985 = vmatprep.subr.bf16.mxu1 %v27118_v23  ;;  %v27187_v32 = vld [vmem:[%s36112_s12 + $0x6bc] ss:$76 sps:$4 sm:$0xff]   ;;  %v27185_v23 = vld [vmem:[%s36112_s12 + $0x6b8] ss:$76 sps:$4 sm:$0xff]  }
0x1172   :  { %19904 = vmatpush1.bf16.msra.mxu0 %v27113_v55  ;;  %v27188_v55 = vld [vmem:[%s36112_s12 + $0x6c0] ss:$76 sps:$4 sm:$0xff]  }
0x1173   :  { %19986 = vmatpush1.bf16.msra.mxu1 %v27116_v9  ;;  %19996 = vmatprep.subr.bf16.mxu0 %v27121_v56  ;;  %v27193_v9 = vld [vmem:[%s36112_s12 + $0x754] ss:$76 sps:$4 sm:$0xff]   ;;  %v27196_v56 = vld [vmem:[%s36112_s12 + $0x75c] ss:$76 sps:$4 sm:$0xff]  }
0x1174   :  { %20078 = vmatprep.subr.bf16.mxu1 %v27124_v25  ;;  %v27191_v25 = vld [vmem:[%s36112_s12 + $0x750] ss:$76 sps:$4 sm:$0xff]  }
0x1175   :  { %19906 = vmatmul.mubr.bf16.vlgmr.msra.gmra.mrb[40].mxu0 %v34538_v19 }
0x1176   :  { %19988 = vmatmul.mubr.bf16.vlgmr.msra.gmra.mrb[72].mxu1 %v34538_v19  ;;  %19997 = vmatpush1.bf16.msra.mxu0 %v27119_v41  ;;  %v27194_v41 = vld [vmem:[%s36112_s12 + $0x758] ss:$76 sps:$4 sm:$0xff]  }
0x1177   :  { %20028 = vmatprep.mubr.bf16.mxu0 %v34327_v48  ;;  %20079 = vmatpush1.bf16.msra.mxu1 %v27122_v37  ;;  %v27199_v37 = vld [vmem:[%s36112_s12 + $0x7ec] ss:$76 sps:$4 sm:$0xff]  }
0x1178   :  { %20110 = vmatprep.mubr.bf16.mxu1 %v34327_v48  ;;  %19998 = vmatprep.subr.bf16.mxu0 %v27127_v8  ;;  %v27202_v8 = vld [vmem:[%s36112_s12 + $0x7f4] ss:$76 sps:$4 sm:$0xff]  }
0x1179   :  { %20080 = vmatprep.subr.bf16.mxu1 %v27130_v59  ;;  %v27197_v59 = vld [vmem:[%s36112_s12 + $0x7e8] ss:$76 sps:$4 sm:$0xff]  }
0x117a   :  { %19999 = vmatpush1.bf16.msra.mxu0 %v27125_v26  ;;  %v27200_v26 = vld [vmem:[%s36112_s12 + $0x7f0] ss:$76 sps:$4 sm:$0xff]  }
0x117b   :  { %20081 = vmatpush1.bf16.msra.mxu1 %v27128_v44  ;;  %20000 = vmatprep.subr.bf16.mxu0 %v27133_v45  ;;  %v27205_v44 = vld [vmem:[%s36112_s12 + $0x884] ss:$76 sps:$4 sm:$0xff]   ;;  %v27208_v45 = vld [vmem:[%s36112_s12 + $0x88c] ss:$76 sps:$4 sm:$0xff]  }
0x117c   :  { %20082 = vmatprep.subr.bf16.mxu1 %v27136_v30  ;;  %v27203_v30 = vld [vmem:[%s36112_s12 + $0x880] ss:$76 sps:$4 sm:$0xff]  }
0x117e   :  { %20001 = vmatpush1.bf16.msra.mxu0 %v27131_v11  ;;  %v27206_v11 = vld [vmem:[%s36112_s12 + $0x888] ss:$76 sps:$4 sm:$0xff]  }
0x117f   :  { %20083 = vmatpush1.bf16.msra.mxu1 %v27134_v46  ;;  %20002 = vmatprep.subr.bf16.mxu0 %v27139_v1  ;;  %v27211_v46 = vld [vmem:[%s36112_s12 + $0x91c] ss:$76 sps:$4 sm:$0xff]   ;;  %v27214_v1 = vld [vmem:[%s36112_s12 + $0x924] ss:$76 sps:$4 sm:$0xff]  }
0x1180   :  { %20084 = vmatprep.subr.bf16.mxu1 %v27142_v43  ;;  %v27209_v43 = vld [vmem:[%s36112_s12 + $0x918] ss:$76 sps:$4 sm:$0xff]  }
0x1182   :  { %20003 = vmatpush1.bf16.msra.mxu0 %v27137_v35  ;;  %v27212_v35 = vld [vmem:[%s36112_s12 + $0x920] ss:$76 sps:$4 sm:$0xff]  }
0x1183   :  { %20085 = vmatpush1.bf16.msra.mxu1 %v27140_v51  ;;  %20004 = vmatprep.subr.bf16.mxu0 %v27145_v15  ;;  %v27217_v51 = vld [vmem:[%s36112_s12 + $0x9b4] ss:$76 sps:$4 sm:$0xff]   ;;  %v27220_v15 = vld [vmem:[%s36112_s12 + $0x9bc] ss:$76 sps:$4 sm:$0xff]  }
0x1184   :  { %20086 = vmatprep.subr.bf16.mxu1 %v27148_v62  ;;  %v27215_v62 = vld [vmem:[%s36112_s12 + $0x9b0] ss:$76 sps:$4 sm:$0xff]  }
0x1186   :  { %20005 = vmatpush1.bf16.msra.mxu0 %v27143_v14  ;;  %v27218_v14 = vld [vmem:[%s36112_s12 + $0x9b8] ss:$76 sps:$4 sm:$0xff]  }
0x1187   :  { %20087 = vmatpush1.bf16.msra.mxu1 %v27146_v0  ;;  %20006 = vmatprep.subr.bf16.mxu0 %v27151_v5  ;;  %v27223_v0 = vld [vmem:[%s36112_s12 + $0xa4c] ss:$76 sps:$4 sm:$0xff]   ;;  %v27226_v5 = vld [vmem:[%s36112_s12 + $0xa54] ss:$76 sps:$4 sm:$0xff]  }
0x1188   :  { %20088 = vmatprep.subr.bf16.mxu1 %v27154_v20  ;;  %v27221_v20 = vld [vmem:[%s36112_s12 + $0xa48] ss:$76 sps:$4 sm:$0xff]  }
0x118a   :  { %20007 = vmatpush1.bf16.msra.mxu0 %v27149_v10  ;;  %v27224_v10 = vld [vmem:[%s36112_s12 + $0xa50] ss:$76 sps:$4 sm:$0xff]  }
0x118b   :  { %20089 = vmatpush1.bf16.msra.mxu1 %v27152_v36  ;;  %20008 = vmatprep.subr.bf16.mxu0 %v27157_v16  ;;  %v27229_v36 = vld [vmem:[%s36112_s12 + $0xae4] ss:$76 sps:$4 sm:$0xff]   ;;  %v27232_v16 = vld [vmem:[%s36112_s12 + $0xaec] ss:$76 sps:$4 sm:$0xff]  }
0x118c   :  { %20090 = vmatprep.subr.bf16.mxu1 %v27160_v28  ;;  %v27227_v28 = vld [vmem:[%s36112_s12 + $0xae0] ss:$76 sps:$4 sm:$0xff]  }
0x118e   :  { %20009 = vmatpush1.bf16.msra.mxu0 %v27155_v53  ;;  %v27230_v53 = vld [vmem:[%s36112_s12 + $0xae8] ss:$76 sps:$4 sm:$0xff]  }
0x118f   :  { %20091 = vmatpush1.bf16.msra.mxu1 %v27158_v3  ;;  %20010 = vmatprep.subr.bf16.mxu0 %v27163_v24  ;;  %v27235_v3 = vld [vmem:[%s36112_s12 + $0xb7c] ss:$76 sps:$4 sm:$0xff]   ;;  %v27238_v24 = vld [vmem:[%s36112_s12 + $0xb84] ss:$76 sps:$4 sm:$0xff]  }
0x1190   :  { %20092 = vmatprep.subr.bf16.mxu1 %v27166_v7  ;;  %v27233_v7 = vld [vmem:[%s36112_s12 + $0xb78] ss:$76 sps:$4 sm:$0xff]  }
0x1192   :  { %20011 = vmatpush1.bf16.msra.mxu0 %v27161_v31  ;;  %v27236_v31 = vld [vmem:[%s36112_s12 + $0xb80] ss:$76 sps:$4 sm:$0xff]  }
0x1193   :  { %20093 = vmatpush1.bf16.msra.mxu1 %v27164_v4  ;;  %20012 = vmatprep.subr.bf16.mxu0 %v27169_v6  ;;  %v27241_v4 = vld [vmem:[%s36112_s12 + $0xc14] ss:$76 sps:$4 sm:$0xff]   ;;  %v27244_v6 = vld [vmem:[%s36112_s12 + $0xc1c] ss:$76 sps:$4 sm:$0xff]  }
0x1194   :  { %20094 = vmatprep.subr.bf16.mxu1 %v27172_v63  ;;  %v27239_v63 = vld [vmem:[%s36112_s12 + $0xc10] ss:$76 sps:$4 sm:$0xff]  }
0x1196   :  { %20013 = vmatpush1.bf16.msra.mxu0 %v27167_v12  ;;  %v27242_v12 = vld [vmem:[%s36112_s12 + $0xc18] ss:$76 sps:$4 sm:$0xff]  }
0x1197   :  { %20095 = vmatpush1.bf16.msra.mxu1 %v27170_v34  ;;  %20014 = vmatprep.subr.bf16.mxu0 %v27175_v61  ;;  %v27247_v34 = vld [vmem:[%s36112_s12 + $0xcac] ss:$76 sps:$4 sm:$0xff]   ;;  %v27250_v61 = vld [vmem:[%s36112_s12 + $0xcb4] ss:$76 sps:$4 sm:$0xff]  }
0x1198   :  { %20096 = vmatprep.subr.bf16.mxu1 %v27178_v42  ;;  %v16356_v42 = vrot.slane %v35191_v27, %v31677_v54 }
0x119a   :  { %20015 = vmatpush1.bf16.msra.mxu0 %v27173_v18  ;;  %v16364_v18 = vrot.slane %v35191_v27, %v31683_v57 }
0x119b   :  { %20097 = vmatpush1.bf16.msra.mxu1 %v27176_v21  ;;  %20016 = vmatprep.subr.bf16.mxu0 %v27181_v2  ;;  %v16360_v21 = vrot.slane %v35191_v27, %v31686_v58  ;;  %v27245_v2 = vld [vmem:[%s36112_s12 + $0xca8] ss:$76 sps:$4 sm:$0xff]  }
0x119c   :  { %20098 = vmatprep.subr.bf16.mxu1 %v27184_v29  ;;  %v16368_v29 = vrot.slane %v35191_v27, %v31692_v22  ;;  %v27251_v27 = vld [vmem:[%s36112_s12 + $0xd40] ss:$76 sps:$4 sm:$0xff]  }
0x119e   :  { %20017 = vmatpush1.bf16.msra.mxu0 %v27179_v50  ;;  %v27248_v50 = vld [vmem:[%s36112_s12 + $0xcb0] ss:$76 sps:$4 sm:$0xff]  }
0x119f   :  { %20099 = vmatpush1.bf16.msra.mxu1 %v27182_v40  ;;  %20018 = vmatprep.subr.bf16.mxu0 %v27187_v32  ;;  %v27253_v40 = vld [vmem:[%s36112_s12 + $0xd44] ss:$76 sps:$4 sm:$0xff]  }
0x11a0   :  { %20100 = vmatprep.subr.bf16.mxu1 %v27190_v39  ;;  %v27256_v39 = vld [vmem:[%s36112_s12 + $0xd4c] ss:$76 sps:$4 sm:$0xff]  }
0x11a2   :  { %20019 = vmatpush1.bf16.msra.mxu0 %v27185_v23 }
0x11a3   :  { %20101 = vmatpush1.bf16.msra.mxu1 %v27188_v55  ;;  %20020 = vmatprep.subr.bf16.mxu0 %v27193_v9 }
0x11a4   :  { %20102 = vmatprep.subr.bf16.mxu1 %v27196_v56 }
0x11a6   :  { %20021 = vmatpush1.bf16.msra.mxu0 %v27191_v25 }
0x11a7   :  { %20103 = vmatpush1.bf16.msra.mxu1 %v27194_v41  ;;  %20022 = vmatprep.subr.bf16.mxu0 %v27199_v37 }
0x11a8   :  { %20104 = vmatprep.subr.bf16.mxu1 %v27202_v8  ;;  %v27254_v8 = vld [vmem:[%s36112_s12 + $0xd48] ss:$76 sps:$4 sm:$0xff]  }
0x11aa   :  { %20023 = vmatpush1.bf16.msra.mxu0 %v27197_v59  ;;  %v27259_v59 = vld [vmem:[%s36112_s12 + $0xddc] ss:$76 sps:$4 sm:$0xff]  }
0x11ab   :  { %20105 = vmatpush1.bf16.msra.mxu1 %v27200_v26  ;;  %20024 = vmatprep.subr.bf16.mxu0 %v27205_v44 }
0x11ac   :  { %20106 = vmatprep.subr.bf16.mxu1 %v27208_v45 }
0x11ae   :  { %20025 = vmatpush1.bf16.msra.mxu0 %v27203_v30 }
0x11af   :  { %20107 = vmatpush1.bf16.msra.mxu1 %v27206_v11  ;;  %20026 = vmatprep.subr.bf16.mxu0 %v27211_v46  ;;  %v27262_v11 = vld [vmem:[%s36112_s12 + $0xde4] ss:$76 sps:$4 sm:$0xff]  }
0x11b0   :  { %20108 = vmatprep.subr.bf16.mxu1 %v27214_v1 }
0x11b2   :  { %20027 = vmatpush1.bf16.msra.mxu0 %v27209_v43 }
0x11b3   :  { %20109 = vmatpush1.bf16.msra.mxu1 %v27212_v35  ;;  %20037 = vmatprep.subr.bf16.mxu0 %v27217_v51  ;;  %v27257_v51 = vld [vmem:[%s36112_s12 + $0xdd8] ss:$76 sps:$4 sm:$0xff]  }
0x11b4   :  { %20119 = vmatprep.subr.bf16.mxu1 %v27220_v15  ;;  %v27260_v15 = vld [vmem:[%s36112_s12 + $0xde0] ss:$76 sps:$4 sm:$0xff]  }
0x11b5   :  { %20029 = vmatmul.mubr.bf16.vlgmr.msra.gmra.mrb[44].mxu0 %v34336_v52 }
0x11b6   :  { %20111 = vmatmul.mubr.bf16.vlgmr.msra.gmra.mrb[76].mxu1 %v34336_v52  ;;  %20038 = vmatpush1.bf16.msra.mxu0 %v27215_v62  ;;  %v27265_v62 = vld [vmem:[%s36112_s12 + $0xe74] ss:$76 sps:$4 sm:$0xff]  }
0x11b7   :  { %20069 = vmatprep.mubr.bf16.mxu0 %v34362_v38  ;;  %20120 = vmatpush1.bf16.msra.mxu1 %v27218_v14  ;;  %v27268_v14 = vld [vmem:[%s36112_s12 + $0xe7c] ss:$76 sps:$4 sm:$0xff]  }
0x11b8   :  { %20151 = vmatprep.mubr.bf16.mxu1 %v34362_v38  ;;  %20039 = vmatprep.subr.bf16.mxu0 %v27223_v0  ;;  %v27263_v0 = vld [vmem:[%s36112_s12 + $0xe70] ss:$76 sps:$4 sm:$0xff]  }
0x11b9   :  { %20121 = vmatprep.subr.bf16.mxu1 %v27226_v5  ;;  %v27266_v5 = vld [vmem:[%s36112_s12 + $0xe78] ss:$76 sps:$4 sm:$0xff]  }
0x11ba   :  { %20040 = vmatpush1.bf16.msra.mxu0 %v27221_v20  ;;  %v27271_v20 = vld [vmem:[%s36112_s12 + $0xf0c] ss:$76 sps:$4 sm:$0xff]  }
0x11bb   :  { %20122 = vmatpush1.bf16.msra.mxu1 %v27224_v10  ;;  %20041 = vmatprep.subr.bf16.mxu0 %v27229_v36  ;;  %v27274_v10 = vld [vmem:[%s36112_s12 + $0xf14] ss:$76 sps:$4 sm:$0xff]  }
0x11bc   :  { %20123 = vmatprep.subr.bf16.mxu1 %v27232_v16  ;;  %v27269_v36 = vld [vmem:[%s36112_s12 + $0xf08] ss:$76 sps:$4 sm:$0xff]  }
0x11be   :  { %20042 = vmatpush1.bf16.msra.mxu0 %v27227_v28  ;;  %v27272_v28 = vld [vmem:[%s36112_s12 + $0xf10] ss:$76 sps:$4 sm:$0xff]  }
0x11bf   :  { %20124 = vmatpush1.bf16.msra.mxu1 %v27230_v53  ;;  %20043 = vmatprep.subr.bf16.mxu0 %v27235_v3  ;;  %v27277_v53 = vld [vmem:[%s36112_s12 + $0xfa4] ss:$76 sps:$4 sm:$0xff]  }
0x11c0   :  { %20125 = vmatprep.subr.bf16.mxu1 %v27238_v24 }
0x11c2   :  { %20044 = vmatpush1.bf16.msra.mxu0 %v27233_v7  ;;  %v27280_v7 = vld [vmem:[%s36112_s12 + $0xfac] ss:$76 sps:$4 sm:$0xff]  }
0x11c3   :  { %20126 = vmatpush1.bf16.msra.mxu1 %v27236_v31  ;;  %20045 = vmatprep.subr.bf16.mxu0 %v27241_v4 }
0x11c4   :  { %20127 = vmatprep.subr.bf16.mxu1 %v27244_v6 }
0x11c6   :  { %20046 = vmatpush1.bf16.msra.mxu0 %v27239_v63 }
0x11c7   :  { %20128 = vmatpush1.bf16.msra.mxu1 %v27242_v12  ;;  %20047 = vmatprep.subr.bf16.mxu0 %v27247_v34  ;;  %v27275_v12 = vld [vmem:[%s36112_s12 + $0xfa0] ss:$76 sps:$4 sm:$0xff]  }
0x11c8   :  { %v19743_v32 = vpop.f32.mrb[36].mxu0  ;;  %20129 = vmatprep.subr.bf16.mxu1 %v27250_v61  ;;  %v27278_v61 = vld [vmem:[%s36112_s12 + $0xfa8] ss:$76 sps:$4 sm:$0xff]  }
0x11c9   :  { %v23384_v23 = vadd.f32 %v19743_v32, %v16356_v42  ;;  %v19825_v55 = vpop.f32.mrb[68].mxu1  ;;  %v19745_v9 = vpop.f32.mrb[37].mxu0  ;;  %v27283_v42 = vld [vmem:[%s36112_s12 + $0x103c] ss:$76 sps:$4 sm:$0xff]   ;;  %v27290_v32 = vld [vmem:[%s36112_s12 + $0x10d8] ss:$76 sps:$4 sm:$0xff]  }
0x11ca   :  { %v23386_v56 = vadd.f32 %v19825_v55, %v16364_v18  ;;  %v23385_v25 = vadd.f32 %v19745_v9, %v16360_v21  ;;  %v19827_v41 = vpop.f32.mrb[69].mxu1  ;;  %v19747_v37 = vpop.f32.mrb[38].mxu0  ;;  %20048 = vmatpush1.bf16.msra.mxu0 %v27245_v2  ;;  %v27286_v18 = vld [vmem:[%s36112_s12 + $0x1044] ss:$76 sps:$4 sm:$0xff]   ;;  %v27284_v2 = vld [vmem:[%s36112_s12 + $0x1040] ss:$76 sps:$4 sm:$0xff]  }
0x11cb   :  { %v23183_v26 = vmul.f32 -1.442695, %v23384_v23  ;;  %v23387_v44 = vadd.f32 %v19827_v41, %v16368_v29  ;;  %v19829_v45 = vpop.f32.mrb[70].mxu1  ;;  %20130 = vmatpush1.bf16.msra.mxu1 %v27248_v50  ;;  %v19748_v30 = vpop.f32.mrb[39].mxu0  ;;  %20049 = vmatprep.subr.bf16.mxu0 %v27253_v40  ;;  %v27281_v21 = vld [vmem:[%s36112_s12 + $0x1038] ss:$76 sps:$4 sm:$0xff]  }
0x11cc   :  { %v23185_v46 = vmul.f32 -1.442695, %v23386_v56  ;;  %v23184_v1 = vmul.f32 -1.442695, %v23385_v25  ;;  %v19830_v43 = vpop.f32.mrb[71].mxu1  ;;  %20131 = vmatprep.subr.bf16.mxu1 %v27256_v39 }
0x11cd   :  { %27561 = vpow2.f32 %v23183_v26  ;;  %v23186_v35 = vmul.f32 -1.442695, %v23387_v44  ;;  %v27289_v29 = vld [vmem:[%s36112_s12 + $0x10d4] ss:$76 sps:$4 sm:$0xff]   ;;  %v27292_v50 = vld [vmem:[%s36112_s12 + $0x10dc] ss:$76 sps:$4 sm:$0xff]  }
0x11ce   :  { %27563 = vpow2.f32 %v23185_v46  ;;  %20050 = vmatpush1.bf16.msra.mxu0 %v27251_v27  ;;  %v27287_v40 = vld [vmem:[%s36112_s12 + $0x10d0] ss:$76 sps:$4 sm:$0xff]   ;;  %v27295_v39 = vld [vmem:[%s36112_s12 + $0x116c] ss:$76 sps:$4 sm:$0xff]   ;;  %v27298_v55 = vld [vmem:[%s36112_s12 + $0x1174] ss:$76 sps:$4 sm:$0xff]  }
0x11cf   :  { %27565 = vpow2.f32 %v23184_v1  ;;  %20132 = vmatpush1.bf16.msra.mxu1 %v27254_v8  ;;  %20051 = vmatprep.subr.bf16.mxu0 %v27259_v59  ;;  %v27293_v56 = vld [vmem:[%s36112_s12 + $0x1168] ss:$76 sps:$4 sm:$0xff]   ;;  %v27296_v37 = vld [vmem:[%s36112_s12 + $0x1170] ss:$76 sps:$4 sm:$0xff]   ;;  %v27304_v26 = vld [vmem:[%s36112_s12 + $0x120c] ss:$76 sps:$4 sm:$0xff]  }
0x11d0   :  { %27567 = vpow2.f32 %v23186_v35  ;;  %20133 = vmatprep.subr.bf16.mxu1 %v27262_v11  ;;  %v27301_v8 = vld [vmem:[%s36112_s12 + $0x1204] ss:$76 sps:$4 sm:$0xff]   ;;  %v27299_v30 = vld [vmem:[%s36112_s12 + $0x1200] ss:$76 sps:$4 sm:$0xff]   ;;  %v27302_v11 = vld [vmem:[%s36112_s12 + $0x1208] ss:$76 sps:$4 sm:$0xff]  }
0x11d1   :  { %v27307_v46 = vld [vmem:[%s36112_s12 + $0x129c] ss:$76 sps:$4 sm:$0xff]   ;;  %v27310_v43 = vld [vmem:[%s36112_s12 + $0x12a4] ss:$76 sps:$4 sm:$0xff]  }
0x11d2   :  { %20052 = vmatpush1.bf16.msra.mxu0 %v27257_v51  ;;  %v27305_v35 = vld [vmem:[%s36112_s12 + $0x1298] ss:$76 sps:$4 sm:$0xff]   ;;  %v27308_v51 = vld [vmem:[%s36112_s12 + $0x12a0] ss:$76 sps:$4 sm:$0xff]  }
0x11d3   :  { %20134 = vmatpush1.bf16.msra.mxu1 %v27260_v15  ;;  %20053 = vmatprep.subr.bf16.mxu0 %v27265_v62  ;;  %v27313_v15 = vld [vmem:[%s36112_s12 + $0x44] ss:$76 sps:$4 sm:$0xff]   ;;  %v27314_v62 = vld [vmem:[%s36112_s12 + $0x508] ss:$76 sps:$4 sm:$0xff]  }
0x11d4   :  { %20135 = vmatprep.subr.bf16.mxu1 %v27268_v14  ;;  %v27311_v14 = vld [vmem:[%s36112_s12 + $0x40] ss:$76 sps:$4 sm:$0xff]  }
0x11d6   :  { %20054 = vmatpush1.bf16.msra.mxu0 %v27263_v0  ;;  %v27315_v0 = vld [vmem:[%s36112_s12 + $0x48] ss:$76 sps:$4 sm:$0xff]  }
0x11d7   :  { %v27562_v16 = vpop.eup %27561  ;;  %20136 = vmatpush1.bf16.msra.mxu1 %v27266_v5  ;;  %20055 = vmatprep.subr.bf16.mxu0 %v27271_v20  ;;  %v27318_v5 = vld [vmem:[%s36112_s12 + $0xdc] ss:$76 sps:$4 sm:$0xff]   ;;  %v27319_v20 = vld [vmem:[%s36112_s12 + $0x5a0] ss:$76 sps:$4 sm:$0xff]  }
0x11d8   :  { %v27564_v3 = vpop.eup %27563  ;;  %v20383_v24 = vadd.f32 1.0, %v27562_v16  ;;  %20137 = vmatprep.subr.bf16.mxu1 %v27274_v10  ;;  %v27316_v10 = vld [vmem:[%s36112_s12 + $0xd8] ss:$76 sps:$4 sm:$0xff]   ;;  %v27323_v16 = vld [vmem:[%s36112_s12 + $0x174] ss:$76 sps:$4 sm:$0xff]  }
0x11d9   :  { %v27566_v31 = vpop.eup %27565  ;;  %v20385_v4 = vadd.f32 1.0, %v27564_v3  ;;  %v27325_v3 = vld [vmem:[%s36112_s12 + $0x178] ss:$76 sps:$4 sm:$0xff]  }
0x11da   :  { %v27568_v6 = vpop.eup %27567  ;;  %27569 = vrcp.f32 %v20383_v24  ;;  %v20384_v63 = vadd.f32 1.0, %v27566_v31  ;;  %20056 = vmatpush1.bf16.msra.mxu0 %v27269_v36  ;;  %v27320_v36 = vld [vmem:[%s36112_s12 + $0xe0] ss:$76 sps:$4 sm:$0xff]   ;;  %v27329_v24 = vld [vmem:[%s36112_s12 + $0x6d0] ss:$76 sps:$4 sm:$0xff]  }
0x11db   :  { %27571 = vrcp.f32 %v20385_v4  ;;  %v20386_v34 = vadd.f32 1.0, %v27568_v6  ;;  %20138 = vmatpush1.bf16.msra.mxu1 %v27272_v28  ;;  %20057 = vmatprep.subr.bf16.mxu0 %v27277_v53  ;;  %v27324_v28 = vld [vmem:[%s36112_s12 + $0x638] ss:$76 sps:$4 sm:$0xff]   ;;  %v27321_v53 = vld [vmem:[%s36112_s12 + $0x170] ss:$76 sps:$4 sm:$0xff]  }
0x11dc   :  { %27573 = vrcp.f32 %v20384_v63  ;;  %20139 = vmatprep.subr.bf16.mxu1 %v27280_v7  ;;  %v27326_v7 = vld [vmem:[%s36112_s12 + $0x208] ss:$76 sps:$4 sm:$0xff]   ;;  %v27330_v31 = vld [vmem:[%s36112_s12 + $0x210] ss:$76 sps:$4 sm:$0xff]   ;;  %v27331_v63 = vld [vmem:[%s36112_s12 + $0x2a0] ss:$76 sps:$4 sm:$0xff]  }
0x11dd   :  { %27575 = vrcp.f32 %v20386_v34  ;;  %v27333_v4 = vld [vmem:[%s36112_s12 + $0x2a4] ss:$76 sps:$4 sm:$0xff]   ;;  %v27334_v6 = vld [vmem:[%s36112_s12 + $0x768] ss:$76 sps:$4 sm:$0xff]  }
0x11de   :  { %20058 = vmatpush1.bf16.msra.mxu0 %v27275_v12  ;;  %v27335_v12 = vld [vmem:[%s36112_s12 + $0x2a8] ss:$76 sps:$4 sm:$0xff]  }
0x11df   :  { %20140 = vmatpush1.bf16.msra.mxu1 %v27278_v61  ;;  %20059 = vmatprep.subr.bf16.mxu0 %v27283_v42  ;;  %v27338_v34 = vld [vmem:[%s36112_s12 + $0x33c] ss:$76 sps:$4 sm:$0xff]   ;;  %v27339_v61 = vld [vmem:[%s36112_s12 + $0x800] ss:$76 sps:$4 sm:$0xff]   ;;  %v27336_v42 = vld [vmem:[%s36112_s12 + $0x338] ss:$76 sps:$4 sm:$0xff]  }
0x11e0   :  { %20141 = vmatprep.subr.bf16.mxu1 %v27286_v18  ;;  %v27340_v18 = vld [vmem:[%s36112_s12 + $0x340] ss:$76 sps:$4 sm:$0xff]  }
0x11e2   :  { %20060 = vmatpush1.bf16.msra.mxu0 %v27281_v21  ;;  %v27343_v21 = vld [vmem:[%s36112_s12 + $0x3d4] ss:$76 sps:$4 sm:$0xff]  }
0x11e3   :  { %20142 = vmatpush1.bf16.msra.mxu1 %v27284_v2  ;;  %20061 = vmatprep.subr.bf16.mxu0 %v27289_v29  ;;  %v27344_v2 = vld [vmem:[%s36112_s12 + $0x898] ss:$76 sps:$4 sm:$0xff]   ;;  %v27341_v29 = vld [vmem:[%s36112_s12 + $0x3d0] ss:$76 sps:$4 sm:$0xff]  }
0x11e4   :  { %v27570_v23 = vpop.eup %27569  ;;  %20143 = vmatprep.subr.bf16.mxu1 %v27292_v50  ;;  %v27345_v50 = vld [vmem:[%s36112_s12 + $0x3d8] ss:$76 sps:$4 sm:$0xff]  }
0x11e5   :  { %v27572_v9 = vpop.eup %27571 }
0x11e6   :  { %v27574_v27 = vpop.eup %27573  ;;  %20062 = vmatpush1.bf16.msra.mxu0 %v27287_v40  ;;  %v27348_v40 = vld [vmem:[%s36112_s12 + $0x46c] ss:$76 sps:$4 sm:$0xff]  }
0x11e7   :  { %v27576_v25 = vpop.eup %27575  ;;  %v20472_v41 = vcombine.low %v27570_v23, %v27574_v27  ;;  %20144 = vmatpush1.bf16.msra.mxu1 %v27290_v32  ;;  %20063 = vmatprep.subr.bf16.mxu0 %v27295_v39  ;;  %v27349_v32 = vld [vmem:[%s36112_s12 + $0x930] ss:$76 sps:$4 sm:$0xff]   ;;  %v27346_v39 = vld [vmem:[%s36112_s12 + $0x468] ss:$76 sps:$4 sm:$0xff]   ;;  %v27351_v27 = vld [vmem:[%s36112_s12 + $0x500] ss:$76 sps:$4 sm:$0xff]  }
0x11e8   :  { %v20473_v59 = vcombine.low %v27572_v9, %v27576_v25  ;;  %20145 = vmatprep.subr.bf16.mxu1 %v27298_v55  ;;  %v27350_v23 = vld [vmem:[%s36112_s12 + $0x470] ss:$76 sps:$4 sm:$0xff]   ;;  %v27354_v9 = vld [vmem:[%s36112_s12 + $0xe88] ss:$76 sps:$4 sm:$0xff]  }
0x11e9   :  { %v20480_v44 = vrot.slane %v20472_v41, %v27873_v49  ;;  %v27353_v55 = vld [vmem:[%s36112_s12 + $0x504] ss:$76 sps:$4 sm:$0xff]   ;;  %v27358_v25 = vld [vmem:[%s36112_s12 + $0x59c] ss:$76 sps:$4 sm:$0xff]   ;;  %v27359_v41 = vld [vmem:[%s36112_s12 + $0xf20] ss:$76 sps:$4 sm:$0xff]  }
0x11ea   :  { %v20487_v45 = vrot.slane %v20473_v59, %v27873_v49  ;;  %20064 = vmatpush1.bf16.msra.mxu0 %v27293_v56  ;;  %v27355_v56 = vld [vmem:[%s36112_s12 + $0x9c8] ss:$76 sps:$4 sm:$0xff]  }
0x11eb   :  { %20146 = vmatpush1.bf16.msra.mxu1 %v27296_v37  ;;  %20065 = vmatprep.subr.bf16.mxu0 %v27301_v8  ;;  %v27356_v37 = vld [vmem:[%s36112_s12 + $0x598] ss:$76 sps:$4 sm:$0xff]   ;;  %v27360_v8 = vld [vmem:[%s36112_s12 + $0xa60] ss:$76 sps:$4 sm:$0xff]  }
0x11ec   :  { %v20488_v1 = vcombine.low %v20480_v44, %v20487_v45  ;;  %20147 = vmatprep.subr.bf16.mxu1 %v27304_v26  ;;  %v27363_v59 = vld [vmem:[%s36112_s12 + $0x634] ss:$76 sps:$4 sm:$0xff]   ;;  %v27364_v26 = vld [vmem:[%s36112_s12 + $0xfb8] ss:$76 sps:$4 sm:$0xff]   ;;  %v27361_v44 = vld [vmem:[%s36112_s12 + $0x630] ss:$76 sps:$4 sm:$0xff]  }
0x11ed   :  { %v27365_v45 = vld [vmem:[%s36112_s12 + $0xaf8] ss:$76 sps:$4 sm:$0xff]  }
0x11ee   :  { %20545 = vst [vmem:[%s36116_s16 + $0x8] sm:$0xff] %v20488_v1  ;;  %20066 = vmatpush1.bf16.msra.mxu0 %v27299_v30  ;;  %v27368_v30 = vld [vmem:[%s36112_s12 + $0x6cc] ss:$76 sps:$4 sm:$0xff]   ;;  %v27370_v1 = vld [vmem:[%s36112_s12 + $0xb90] ss:$76 sps:$4 sm:$0xff]  }
0x11ef   :  { %20148 = vmatpush1.bf16.msra.mxu1 %v27302_v11  ;;  %20067 = vmatprep.subr.bf16.mxu0 %v27307_v46  ;;  %v27369_v11 = vld [vmem:[%s36112_s12 + $0x1050] ss:$76 sps:$4 sm:$0xff]   ;;  %v27366_v46 = vld [vmem:[%s36112_s12 + $0x6c8] ss:$76 sps:$4 sm:$0xff]  }
0x11f0   :  { %20149 = vmatprep.subr.bf16.mxu1 %v27310_v43  ;;  %v27373_v43 = vld [vmem:[%s36112_s12 + $0x764] ss:$76 sps:$4 sm:$0xff]  }
0x11f2   :  { %20068 = vmatpush1.bf16.msra.mxu0 %v27305_v35  ;;  %v27374_v35 = vld [vmem:[%s36112_s12 + $0x10e8] ss:$76 sps:$4 sm:$0xff]  }
0x11f3   :  { %20150 = vmatpush1.bf16.msra.mxu1 %v27308_v51  ;;  %20160 = vmatprep.subr.bf16.mxu0 %v27313_v15  ;;  %v27371_v51 = vld [vmem:[%s36112_s12 + $0x760] ss:$76 sps:$4 sm:$0xff]   ;;  %v27375_v15 = vld [vmem:[%s36112_s12 + $0xc28] ss:$76 sps:$4 sm:$0xff]  }
0x11f4   :  { %23308 = vmatprep.subr.bf16.mxu1 %v27314_v62  ;;  %v27378_v62 = vld [vmem:[%s36112_s12 + $0x7fc] ss:$76 sps:$4 sm:$0xff]  }
0x11f5   :  { %20070 = vmatmul.mubr.bf16.vlgmr.msra.gmra.mrb[44].mxu0 %v34538_v19 }
0x11f6   :  { %20152 = vmatmul.mubr.bf16.vlgmr.msra.gmra.mrb[76].mxu1 %v34538_v19  ;;  %20161 = vmatpush1.bf16.msra.mxu0 %v27311_v14  ;;  %v27379_v14 = vld [vmem:[%s36112_s12 + $0x1180] ss:$76 sps:$4 sm:$0xff]  }
0x11f7   :  { %20192 = vmatprep.mubr.bf16.mxu0 %v34327_v48  ;;  %23309 = vmatpush3.bf16.msra.mxu1 %v27315_v0  ;;  %v27376_v0 = vld [vmem:[%s36112_s12 + $0x7f8] ss:$76 sps:$4 sm:$0xff]  }
0x11f8   :  { %20274 = vmatprep.mubr.bf16.mxu1 %v34327_v48  ;;  %20162 = vmatprep.subr.bf16.mxu0 %v27318_v5  ;;  %v27328_v48 = vld [vmem:[%s36112_s12 + $0x20c] ss:$76 sps:$4 sm:$0xff]  }
0x11f9   :  { %23310 = vmatprep.subr.bf16.mxu1 %v27319_v20  ;;  %v27380_v5 = vld [vmem:[%s36112_s12 + $0xcc0] ss:$76 sps:$4 sm:$0xff]  }
0x11fa   :  { %20163 = vmatpush1.bf16.msra.mxu0 %v27316_v10  ;;  %v27383_v20 = vld [vmem:[%s36112_s12 + $0x894] ss:$76 sps:$4 sm:$0xff]   ;;  %v27384_v10 = vld [vmem:[%s36112_s12 + $0x1218] ss:$76 sps:$4 sm:$0xff]  }
0x11fb   :  { %23311 = vmatpush3.bf16.msra.mxu1 %v27320_v36  ;;  %20164 = vmatprep.subr.bf16.mxu0 %v27323_v16  ;;  %v27381_v36 = vld [vmem:[%s36112_s12 + $0x890] ss:$76 sps:$4 sm:$0xff]   ;;  %v27385_v16 = vld [vmem:[%s36112_s12 + $0xd58] ss:$76 sps:$4 sm:$0xff]  }
0x11fc   :  { %23312 = vmatprep.subr.bf16.mxu1 %v27324_v28  ;;  %v27388_v28 = vld [vmem:[%s36112_s12 + $0x92c] ss:$76 sps:$4 sm:$0xff]  }
0x11fe   :  { %20165 = vmatpush1.bf16.msra.mxu0 %v27321_v53  ;;  %v27389_v53 = vld [vmem:[%s36112_s12 + $0x12b0] ss:$76 sps:$4 sm:$0xff]  }
0x11ff   :  { %23313 = vmatpush3.bf16.msra.mxu1 %v27325_v3  ;;  %20166 = vmatprep.subr.bf16.mxu0 %v27328_v48  ;;  %v27386_v3 = vld [vmem:[%s36112_s12 + $0x928] ss:$76 sps:$4 sm:$0xff]   ;;  %v27390_v48 = vld [vmem:[%s36112_s12 + $0xdf0] ss:$76 sps:$4 sm:$0xff]  }
0x1200   :  { %23314 = vmatprep.subr.bf16.mxu1 %v27329_v24  ;;  %v27393_v24 = vld [vmem:[%s36112_s12 + $0x9c4] ss:$76 sps:$4 sm:$0xff]  }
0x1202   :  { %20167 = vmatpush1.bf16.msra.mxu0 %v27326_v7  ;;  %v27391_v7 = vld [vmem:[%s36112_s12 + $0x9c0] ss:$76 sps:$4 sm:$0xff]  }
0x1203   :  { %23315 = vmatpush3.bf16.msra.mxu1 %v27330_v31  ;;  %20168 = vmatprep.subr.bf16.mxu0 %v27333_v4  ;;  %v27396_v31 = vld [vmem:[%s36112_s12 + $0xa5c] ss:$76 sps:$4 sm:$0xff]   ;;  %v27394_v4 = vld [vmem:[%s36112_s12 + $0xa58] ss:$76 sps:$4 sm:$0xff]  }
0x1204   :  { %23316 = vmatprep.subr.bf16.mxu1 %v27334_v6  ;;  %v27399_v6 = vld [vmem:[%s36112_s12 + $0xaf4] ss:$76 sps:$4 sm:$0xff]  }
0x1206   :  { %20169 = vmatpush1.bf16.msra.mxu0 %v27331_v63  ;;  %v27397_v63 = vld [vmem:[%s36112_s12 + $0xaf0] ss:$76 sps:$4 sm:$0xff]  }
0x1207   :  { %23317 = vmatpush3.bf16.msra.mxu1 %v27335_v12  ;;  %20170 = vmatprep.subr.bf16.mxu0 %v27338_v34  ;;  %v27405_v12 = vld [vmem:[%s36112_s12 + $0xc24] ss:$76 sps:$4 sm:$0xff]   ;;  %v27403_v34 = vld [vmem:[%s36112_s12 + $0xc20] ss:$76 sps:$4 sm:$0xff]  }
0x1208   :  { %23318 = vmatprep.subr.bf16.mxu1 %v27339_v61  ;;  %v35980_v61 = vld [vmem:[%s36113_s13 + $0x31] sm:$0xff] }
0x120a   :  { %20171 = vmatpush1.bf16.msra.mxu0 %v27336_v42  ;;  %v27408_v42 = vld [vmem:[%s36112_s12 + $0xcbc] ss:$76 sps:$4 sm:$0xff]  }
0x120b   :  { %23319 = vmatpush3.bf16.msra.mxu1 %v27340_v18  ;;  %20172 = vmatprep.subr.bf16.mxu0 %v27343_v21  ;;  %v16372_v18 = vrot.slane %v35980_v61, %v29821_v47  ;;  %v16380_v21 = vrot.slane %v35980_v61, %v29916_v33 }
0x120c   :  { %23320 = vmatprep.subr.bf16.mxu1 %v27344_v2  ;;  %v16376_v2 = vrot.slane %v35980_v61, %v29824_v13 }
0x120e   :  { %20173 = vmatpush1.bf16.msra.mxu0 %v27341_v29  ;;  %v27406_v29 = vld [vmem:[%s36112_s12 + $0xcb8] ss:$76 sps:$4 sm:$0xff]  }
0x120f   :  { %23321 = vmatpush3.bf16.msra.mxu1 %v27345_v50  ;;  %20174 = vmatprep.subr.bf16.mxu0 %v27348_v40  ;;  %v16384_v50 = vrot.slane %v35980_v61, %v29827_v17  ;;  %v27411_v40 = vld [vmem:[%s36112_s12 + $0xd54] ss:$76 sps:$4 sm:$0xff]  }
0x1210   :  { %23322 = vmatprep.subr.bf16.mxu1 %v27349_v32 }
0x1212   :  { %20175 = vmatpush1.bf16.msra.mxu0 %v27346_v39 }
0x1213   :  { %23323 = vmatpush3.bf16.msra.mxu1 %v27350_v23  ;;  %20176 = vmatprep.subr.bf16.mxu0 %v27353_v55 }
0x1214   :  { %23330 = vmatprep.subr.bf16.mxu1 %v27354_v9 }
0x1216   :  { %20275 = vmatmul.mubr.bf16.vlgmr.msra.gmra.mrb[80].mxu1 %v34336_v52  ;;  %20177 = vmatpush1.bf16.msra.mxu0 %v27351_v27 }
0x1217   :  { %23331 = vmatpush3.bf16.msra.mxu1 %v27355_v56  ;;  %20314 = vmatprep.mubr.bf16.mxu1 %v34362_v38 }
0x1218   :  { %20178 = vmatprep.subr.bf16.mxu0 %v27358_v25  ;;  %23332 = vmatprep.subr.bf16.mxu1 %v27359_v41  ;;  %v27409_v41 = vld [vmem:[%s36112_s12 + $0xd50] ss:$76 sps:$4 sm:$0xff]  }
0x121a   :  { %20179 = vmatpush1.bf16.msra.mxu0 %v27356_v37 }
0x121b   :  { %23333 = vmatpush3.bf16.msra.mxu1 %v27360_v8  ;;  %20180 = vmatprep.subr.bf16.mxu0 %v27363_v59 }
0x121c   :  { %23334 = vmatprep.subr.bf16.mxu1 %v27364_v26  ;;  %v27414_v26 = vld [vmem:[%s36112_s12 + $0xdec] ss:$76 sps:$4 sm:$0xff]  }
0x121e   :  { %20181 = vmatpush1.bf16.msra.mxu0 %v27361_v44 }
0x121f   :  { %23335 = vmatpush3.bf16.msra.mxu1 %v27365_v45  ;;  %20182 = vmatprep.subr.bf16.mxu0 %v27368_v30 }
0x1220   :  { %23336 = vmatprep.subr.bf16.mxu1 %v27369_v11 }
0x1222   :  { %20183 = vmatpush1.bf16.msra.mxu0 %v27366_v46  ;;  %v27412_v46 = vld [vmem:[%s36112_s12 + $0xde8] ss:$76 sps:$4 sm:$0xff]  }
0x1223   :  { %23337 = vmatpush3.bf16.msra.mxu1 %v27370_v1  ;;  %20184 = vmatprep.subr.bf16.mxu0 %v27373_v43  ;;  %v27417_v1 = vld [vmem:[%s36112_s12 + $0xe84] ss:$76 sps:$4 sm:$0xff]   ;;  %v27415_v43 = vld [vmem:[%s36112_s12 + $0xe80] ss:$76 sps:$4 sm:$0xff]  }
0x1224   :  { %23338 = vmatprep.subr.bf16.mxu1 %v27374_v35  ;;  %v27420_v35 = vld [vmem:[%s36112_s12 + $0xf1c] ss:$76 sps:$4 sm:$0xff]  }
0x1226   :  { %20185 = vmatpush1.bf16.msra.mxu0 %v27371_v51  ;;  %v27418_v51 = vld [vmem:[%s36112_s12 + $0xf18] ss:$76 sps:$4 sm:$0xff]  }
0x1227   :  { %23339 = vmatpush3.bf16.msra.mxu1 %v27375_v15  ;;  %20186 = vmatprep.subr.bf16.mxu0 %v27378_v62  ;;  %v27423_v62 = vld [vmem:[%s36112_s12 + $0xfb4] ss:$76 sps:$4 sm:$0xff]  }
0x1228   :  { %23340 = vmatprep.subr.bf16.mxu1 %v27379_v14 }
0x122a   :  { %20187 = vmatpush1.bf16.msra.mxu0 %v27376_v0 }
0x122b   :  { %23341 = vmatpush3.bf16.msra.mxu1 %v27380_v5  ;;  %20188 = vmatprep.subr.bf16.mxu0 %v27383_v20 }
0x122c   :  { %23342 = vmatprep.subr.bf16.mxu1 %v27384_v10 }
0x122e   :  { %20189 = vmatpush1.bf16.msra.mxu0 %v27381_v36 }
0x122f   :  { %23343 = vmatpush3.bf16.msra.mxu1 %v27385_v16  ;;  %20190 = vmatprep.subr.bf16.mxu0 %v27388_v28  ;;  %v27421_v16 = vld [vmem:[%s36112_s12 + $0xfb0] ss:$76 sps:$4 sm:$0xff]  }
0x1230   :  { %23344 = vmatprep.subr.bf16.mxu1 %v27389_v53  ;;  %v27426_v53 = vld [vmem:[%s36112_s12 + $0x104c] ss:$76 sps:$4 sm:$0xff]  }
0x1232   :  { %20191 = vmatpush1.bf16.msra.mxu0 %v27386_v3  ;;  %v27424_v3 = vld [vmem:[%s36112_s12 + $0x1048] ss:$76 sps:$4 sm:$0xff]  }
0x1233   :  { %23345 = vmatpush3.bf16.msra.mxu1 %v27390_v48  ;;  %20201 = vmatprep.subr.bf16.mxu0 %v27393_v24  ;;  %v27429_v48 = vld [vmem:[%s36112_s12 + $0x10e4] ss:$76 sps:$4 sm:$0xff]   ;;  %v27427_v24 = vld [vmem:[%s36112_s12 + $0x10e0] ss:$76 sps:$4 sm:$0xff]  }
0x1235   :  { %20193 = vmatmul.mubr.bf16.vlgmr.msra.gmra.mrb[48].mxu0 %v34336_v52  ;;  %v27402_v52 = vld [vmem:[%s36112_s12 + $0xb8c] ss:$76 sps:$4 sm:$0xff]  }
0x1236   :  { %20315 = vmatmul.mubr.bf16.vlgmr.msra.gmra.mrb[84].mxu1 %v34538_v19  ;;  %20202 = vmatpush1.bf16.msra.mxu0 %v27391_v7  ;;  %v27432_v7 = vld [vmem:[%s36112_s12 + $0x117c] ss:$76 sps:$4 sm:$0xff]  }
0x1237   :  { %20233 = vmatprep.mubr.bf16.mxu0 %v34362_v38  ;;  %20203 = vmatprep.subr.bf16.mxu0 %v27396_v31  ;;  %v27400_v38 = vld [vmem:[%s36112_s12 + $0xb88] ss:$76 sps:$4 sm:$0xff]  }
0x123a   :  { %20204 = vmatpush1.bf16.msra.mxu0 %v27394_v4 }
0x123b   :  { %20205 = vmatprep.subr.bf16.mxu0 %v27399_v6 }
0x123e   :  { %20206 = vmatpush1.bf16.msra.mxu0 %v27397_v63  ;;  %v27430_v63 = vld [vmem:[%s36112_s12 + $0x1178] ss:$76 sps:$4 sm:$0xff]  }
0x123f   :  { %20207 = vmatprep.subr.bf16.mxu0 %v27402_v52 }
0x1242   :  { %20208 = vmatpush1.bf16.msra.mxu0 %v27400_v38 }
0x1243   :  { %20209 = vmatprep.subr.bf16.mxu0 %v27405_v12  ;;  %v27435_v12 = vld [vmem:[%s36112_s12 + $0x1214] ss:$76 sps:$4 sm:$0xff]  }
0x1246   :  { %20210 = vmatpush1.bf16.msra.mxu0 %v27403_v34 }
0x1247   :  { %20211 = vmatprep.subr.bf16.mxu0 %v27408_v42 }
0x1248   :  { %v19907_v32 = vpop.f32.mrb[40].mxu0 }
0x1249   :  { %v23388_v39 = vadd.f32 %v19907_v32, %v16372_v18  ;;  %v19989_v23 = vpop.f32.mrb[72].mxu1  ;;  %v19909_v55 = vpop.f32.mrb[41].mxu0  ;;  %v16396_v32 = vrot.slane %v35980_v61, %v31683_v57 }
0x124a   :  { %v23390_v9 = vadd.f32 %v19989_v23, %v16380_v21  ;;  %v23389_v27 = vadd.f32 %v19909_v55, %v16376_v2  ;;  %v19991_v56 = vpop.f32.mrb[73].mxu1  ;;  %v19911_v25 = vpop.f32.mrb[42].mxu0  ;;  %20212 = vmatpush1.bf16.msra.mxu0 %v27406_v29  ;;  %v27433_v21 = vld [vmem:[%s36112_s12 + $0x1210] ss:$76 sps:$4 sm:$0xff]   ;;  %v27438_v2 = vld [vmem:[%s36112_s12 + $0x12ac] ss:$76 sps:$4 sm:$0xff]   ;;  %v16400_v23 = vrot.slane %v35980_v61, %v31692_v22 }
0x124b   :  { %v23187_v37 = vmul.f32 -1.442695, %v23388_v39  ;;  %v23391_v17 = vadd.f32 %v19991_v56, %v16384_v50  ;;  %v19993_v8 = vpop.f32.mrb[74].mxu1  ;;  %v19912_v59 = vpop.f32.mrb[43].mxu0  ;;  %20213 = vmatprep.subr.bf16.mxu0 %v27411_v40  ;;  %v27436_v50 = vld [vmem:[%s36112_s12 + $0x12a8] ss:$76 sps:$4 sm:$0xff]   ;;  %v16388_v40 = vrot.slane %v35980_v61, %v31677_v54  ;;  %v16392_v39 = vrot.slane %v35980_v61, %v31686_v58 }
0x124c   :  { %v23189_v44 = vmul.f32 -1.442695, %v23390_v9  ;;  %v23188_v45 = vmul.f32 -1.442695, %v23389_v27  ;;  %v19994_v30 = vpop.f32.mrb[75].mxu1  ;;  %s27652_s12 = smov [#allocation2]  }
0x124d   :  { %27577 = vpow2.f32 %v23187_v37  ;;  %v23190_v11 = vmul.f32 -1.442695, %v23391_v17  ;;  %s20555_s9 = sshll.u32 %s27652_s12, 4  ;;  %s20556_s9 = int_to_ptr.vmem [resolvable:$true] %s20555_s9 }
0x124e   :  { %27579 = vpow2.f32 %v23189_v44  ;;  %20214 = vmatpush1.bf16.msra.mxu0 %v27409_v41  ;;  %s27621_s1 = scalar_lea.vmem %s20556_s9, 608  ;;  %p27626_p1 = scmp.lt.s32.totalorder %s20556_s9, %s20556_s9 }
0x124f   :  { %27581 = vpow2.f32 %v23188_v45  ;;  %20215 = vmatprep.subr.bf16.mxu0 %v27414_v26  ;;  %p27622_p0 = scmp.ne.s32.totalorder %s20556_s9, %s27621_s1  ;;  %p27627_p2 = scmp.lt.s32.totalorder %s27621_s1, %s27621_s1 }
0x1250   :  { %27583 = vpow2.f32 %v23190_v11 }
0x1251   :  { %p27628_p3 = por %p27627_p2, %p27626_p1 }
0x1252   :  { %20216 = vmatpush1.bf16.msra.mxu0 %v27412_v46 }
0x1253   :  { %20217 = vmatprep.subr.bf16.mxu0 %v27417_v1  ;;  %p27629_p4 = pnand %p27628_p3, %p27622_p0 }
0x1256   :  { %20218 = vmatpush1.bf16.msra.mxu0 %v27415_v43 }
0x1257   :  { %v27578_v15 = vpop.eup %27577  ;;  %20219 = vmatprep.subr.bf16.mxu0 %v27420_v35 }
0x1258   :  { %v27580_v14 = vpop.eup %27579  ;;  %v20387_v0 = vadd.f32 1.0, %v27578_v15 }
0x1259   :  { %v27582_v5 = vpop.eup %27581  ;;  %v20389_v20 = vadd.f32 1.0, %v27580_v14 }
0x125a   :  { %v27584_v10 = vpop.eup %27583  ;;  %27585 = vrcp.f32 %v20387_v0  ;;  %v20388_v36 = vadd.f32 1.0, %v27582_v5  ;;  %20220 = vmatpush1.bf16.msra.mxu0 %v27418_v51 }
0x125b   :  { %27587 = vrcp.f32 %v20389_v20  ;;  %v20390_v28 = vadd.f32 1.0, %v27584_v10  ;;  %20221 = vmatprep.subr.bf16.mxu0 %v27423_v62 }
0x125c   :  { %27589 = vrcp.f32 %v20388_v36 }
0x125d   :  { %27591 = vrcp.f32 %v20390_v28 }
0x125e   :  { %20222 = vmatpush1.bf16.msra.mxu0 %v27421_v16 }
0x125f   :  { %20223 = vmatprep.subr.bf16.mxu0 %v27426_v53 }
0x1262   :  { %20224 = vmatpush1.bf16.msra.mxu0 %v27424_v3 }
0x1263   :  { %20225 = vmatprep.subr.bf16.mxu0 %v27429_v48 }
0x1264   :  { %v27586_v31 = vpop.eup %27585 }
0x1265   :  { %v27588_v4 = vpop.eup %27587 }
0x1266   :  { %v27590_v6 = vpop.eup %27589  ;;  %20226 = vmatpush1.bf16.msra.mxu0 %v27427_v24 }
0x1267   :  { %v27592_v52 = vpop.eup %27591  ;;  %v20489_v38 = vcombine.low %v27586_v31, %v27590_v6  ;;  %20227 = vmatprep.subr.bf16.mxu0 %v27432_v7 }
0x1268   :  { %v20490_v34 = vcombine.low %v27588_v4, %v27592_v52 }
0x1269   :  { %v20497_v42 = vrot.slane %v20489_v38, %v27873_v49 }
0x126a   :  { %v20504_v18 = vrot.slane %v20490_v34, %v27873_v49  ;;  %20228 = vmatpush1.bf16.msra.mxu0 %v27430_v63 }
0x126b   :  { %20229 = vmatprep.subr.bf16.mxu0 %v27435_v12 }
0x126c   :  { %v20505_v29 = vcombine.low %v20497_v42, %v20504_v18 }
0x126e   :  { %20546 = vst [vmem:[%s36116_s16 + $0x10] sm:$0xff] %v20505_v29  ;;  %20230 = vmatpush1.bf16.msra.mxu0 %v27433_v21 }
0x126f   :  { %20231 = vmatprep.subr.bf16.mxu0 %v27438_v2 }
0x1272   :  { %20232 = vmatpush1.bf16.msra.mxu0 %v27436_v50 }
0x1275   :  { %20234 = vmatmul.mubr.bf16.vlgmr.msra.gmra.mrb[48].mxu0 %v34538_v19 }
0x12c8   :  { %v20071_v55 = vpop.f32.mrb[44].mxu0 }
0x12c9   :  { %v23392_v9 = vadd.f32 %v20071_v55, %v16388_v40  ;;  %v20153_v27 = vpop.f32.mrb[76].mxu1  ;;  %v20073_v56 = vpop.f32.mrb[45].mxu0 }
0x12ca   :  { %v23394_v25 = vadd.f32 %v20153_v27, %v16396_v32  ;;  %v23393_v41 = vadd.f32 %v20073_v56, %v16392_v39  ;;  %v20155_v37 = vpop.f32.mrb[77].mxu1  ;;  %v20075_v19 = vpop.f32.mrb[46].mxu0 }
0x12cb   :  { %v23191_v17 = vmul.f32 -1.442695, %v23392_v9  ;;  %v23395_v8 = vadd.f32 %v20155_v37, %v16400_v23  ;;  %v20157_v54 = vpop.f32.mrb[78].mxu1  ;;  %v20076_v59 = vpop.f32.mrb[47].mxu0 }
0x12cc   :  { %v23193_v26 = vmul.f32 -1.442695, %v23394_v25  ;;  %v23192_v57 = vmul.f32 -1.442695, %v23393_v41  ;;  %v20158_v44 = vpop.f32.mrb[79].mxu1 }
0x12cd   :  { %27593 = vpow2.f32 %v23191_v17  ;;  %v23194_v58 = vmul.f32 -1.442695, %v23395_v8 }
0x12ce   :  { %27595 = vpow2.f32 %v23193_v26 }
0x12cf   :  { %27597 = vpow2.f32 %v23192_v57 }
0x12d0   :  { %27599 = vpow2.f32 %v23194_v58 }
0x12d7   :  { %v27594_v22 = vpop.eup %27593 }
0x12d8   :  { %v27596_v61 = vpop.eup %27595  ;;  %v20391_v45 = vadd.f32 1.0, %v27594_v22 }
0x12d9   :  { %v27598_v30 = vpop.eup %27597  ;;  %v20393_v11 = vadd.f32 1.0, %v27596_v61 }
0x12da   :  { %v27600_v46 = vpop.eup %27599  ;;  %27601 = vrcp.f32 %v20391_v45  ;;  %v20392_v1 = vadd.f32 1.0, %v27598_v30 }
0x12db   :  { %27603 = vrcp.f32 %v20393_v11  ;;  %v20394_v43 = vadd.f32 1.0, %v27600_v46 }
0x12dc   :  { %27605 = vrcp.f32 %v20392_v1 }
0x12dd   :  { %27607 = vrcp.f32 %v20394_v43 }
0x12e4   :  { %v27602_v35 = vpop.eup %27601 }
0x12e5   :  { %v27604_v51 = vpop.eup %27603 }
0x12e6   :  { %v27606_v15 = vpop.eup %27605 }
0x12e7   :  { %v27608_v62 = vpop.eup %27607  ;;  %v20506_v14 = vcombine.low %v27602_v35, %v27606_v15 }
0x12e8   :  { %v20507_v0 = vcombine.low %v27604_v51, %v27608_v62 }
0x12e9   :  { %v20514_v5 = vrot.slane %v20506_v14, %v27873_v49  ;;  %v23324_v20 = vpop.f32.mrb[80].mxu1 }
0x12ea   :  { %v20521_v10 = vrot.slane %v20507_v0, %v27873_v49  ;;  %v23325_v36 = vpop.f32.mrb[81].mxu1 }
0x12eb   :  { %v23326_v16 = vadd.f32 %v23325_v36, %v23324_v20  ;;  %v23327_v28 = vpop.f32.mrb[82].mxu1 }
0x12ec   :  { %v20522_v53 = vcombine.low %v20514_v5, %v20521_v10  ;;  %v23328_v3 = vpop.f32.mrb[83].mxu1 }
0x12ee   :  { %20547 = vst [vmem:[%s36116_s16 + $0x18] sm:$0xff] %v20522_v53 }
0x12ef   :  { %27632 = shalt.err (!%p27629_p4)
}
0x12f0   :  { %s27633_s6 = scalar_lea.hbm %s36114_s14, 608 }
0x12f1   :  { %p27634_p5 = scmp.ne.s32.totalorder %s36114_s14, %s27633_s6  ;;  %p27637_p6 = scmp.lt.u32.totalorder %s27633_s6, %s36114_s14 }
0x12f3   :  { %p27639_p7 = pnand %p27637_p6, %p27634_p5 }
0x12f5   :  { %27642 = shalt.err (!%p27639_p7)
}
0x12f6   :  { %20558 = dma.vmem_to_hbm [thread:$0]  %s20556_s9, 608, %s36114_s14, [#allocation3]   ;;  %v16333_v48 = vld [vmem:[%s36113_s13 + $0x39] sm:$0x7] }
0x12f7   :  { %v16412_v24 = vrot.slane %v16333_v48, %v29916_v33  ;;  %v16404_v34 = vrot.slane %v16333_v48, %v29821_v47  ;;  %v16408_v42 = vrot.slane %v16333_v48, %v29824_v13 }
0x12f9   :  { %v20277_v4 = vadd.f32 %v23326_v16, %v16412_v24 }
0x1309   :  { %v23346_v7 = vpop.f32.mrb[84].mxu1 }
0x130a   :  { %v23347_v31 = vpop.f32.mrb[85].mxu1 }
0x130b   :  { %v23348_v6 = vadd.f32 %v23347_v31, %v23346_v7  ;;  %v23349_v63 = vpop.f32.mrb[86].mxu1 }
0x130c   :  { %v23350_v52 = vpop.f32.mrb[87].mxu1 }
0x130d   :  { %v20317_v38 = vadd.f32 %v23348_v6, %v20277_v4 }
0x130f   :  { %v23197_v12 = vmul.f32 -1.442695, %v20317_v38 }
0x1311   :  { %27609 = vpow2.f32 %v23197_v12 }
0x131b   :  { %v27610_v39 = vpop.eup %27609 }
0x131c   :  { %v20397_v23 = vadd.f32 1.0, %v27610_v39 }
0x1348   :  { %v20235_v18 = vpop.f32.mrb[48].mxu0 }
0x1349   :  { %v23396_v21 = vadd.f32 %v20235_v18, %v16404_v34  ;;  %v20237_v2 = vpop.f32.mrb[49].mxu0 }
0x134a   :  { %v23397_v29 = vadd.f32 %v20237_v2, %v16408_v42  ;;  %v20239_v50 = vpop.f32.mrb[50].mxu0 }
0x134b   :  { %v23195_v40 = vmul.f32 -1.442695, %v23396_v21  ;;  %v20240_v33 = vpop.f32.mrb[51].mxu0 }
0x134c   :  { %v23196_v32 = vmul.f32 -1.442695, %v23397_v29 }
0x134d   :  { %27611 = vpow2.f32 %v23195_v40 }
0x134e   :  { %27613 = vpow2.f32 %v23196_v32 }
0x134f   :  { %27615 = vrcp.f32 %v20397_v23 }
0x1357   :  { %v27612_v55 = vpop.eup %27611 }
0x1358   :  { %v27614_v9 = vpop.eup %27613  ;;  %v20395_v27 = vadd.f32 1.0, %v27612_v55 }
0x1359   :  { %v20396_v47 = vadd.f32 1.0, %v27614_v9  ;;  %v27616_v13 = vpop.eup %27615 }
0x135a   :  { %27617 = vrcp.f32 %v20395_v27  ;;  %v20537_v19 = vrot.slane %v27616_v13, %v27873_v49 }
0x135b   :  { %27619 = vrcp.f32 %v20396_v47 }
0x1364   :  { %v27618_v56 = vpop.eup %27617 }
0x1365   :  { %v27620_v25 = vpop.eup %27619 }
0x1366   :  { %v20523_v41 = vcombine.low %v27618_v56, %v27620_v25 }
0x1368   :  { %v20530_v37 = vrot.slane %v20523_v41, %v27873_v49 }
0x136a   :  { %v20538_v17 = vcombine.low %v20530_v37, %v20537_v19 }
0x136c   :  { %20548 = vst.msk [vmem:[%s36116_s16 + $0x20] sm:$0x3f] %vm33040_vm12, %v20538_v17 }
0x136d   :  { %27643 = dma.done.wait [#allocation3], 608  }
0x136e   :  { %27644 = vsyncadd [#allocation3], 4294966688 }
0x136f   :  { %20570 = vsyncpa [#allocation3], 1 }

</bundles_post_ra>
